<compile_context>
chip_gen: v7x
topology: tpu7x:2x2x1
jax: 0.10.0
libtpu: 0.0.40
codegen_flags: <defaults>
</compile_context>

<pallas_src>
import functools
import math

import jax
import jax.numpy as jnp
from jax import lax
from jax.experimental import pallas as pl
from jax.experimental.pallas import tpu as pltpu

_VMEM_LIMIT = 48 * 1024 * 1024   # explicit scoped-VMEM budget (headroom on v7x 64 MiB)


def _cparams(sem):
    return pltpu.CompilerParams(dimension_semantics=sem, vmem_limit_bytes=_VMEM_LIMIT)


def _pick_tile(n, pref, align):
    """Largest tile <= pref that divides n and is a multiple of align, else n."""
    if n <= pref or n % align != 0:
        return n
    t = (min(pref, n) // align) * align
    while t >= align:
        if n % t == 0:
            return t
        t -= align
    return n


# ---------------------------------------------------------------------------
# Pallas kernels
# ---------------------------------------------------------------------------

def _conv_max_kernel(w_ref, x_ref, b_ref, *out_refs, k_nn, emit_full):
    # 1x1 Conv2d (eval-mode BatchNorm folded into weights/bias) + ReLU with the
    # DGCNN max-over-neighbours fused into the epilogue.  K is the leading block
    # dim so every matmul / store keeps N in the lane dim (pure VPU fmax).
    if emit_full:
        full_ref, max_ref = out_refs
    else:
        (max_ref,) = out_refs
    w = w_ref[...]                                     # (C_out, C_in) bf16
    bias = b_ref[...]                                  # (C_out, 1)    f32
    m = None
    for k in range(k_nn):                              # static unroll, K is small
        xk = x_ref[k].astype(jnp.bfloat16)             # (C_in, TILE_N)
        y = jnp.dot(w, xk, preferred_element_type=jnp.float32)
        y = jnp.maximum(y + bias, 0.0)                 # (C_out, TILE_N)
        if emit_full:
            full_ref[k] = y.astype(full_ref.dtype)
        m = y if m is None else jnp.maximum(m, y)
    max_ref[...] = m.astype(max_ref.dtype)


def conv_bn_relu_max(x, w, b, emit_full=True):
    # x: (B, K, C_in, N) bf16, w: (C_out, C_in) bf16, b: (C_out, 1) f32
    B, K, C_in, N = x.shape
    C_out = w.shape[0]
    tn = _pick_tile(N, 512, 128)
    grid = (B, N // tn)
    max_spec = pl.BlockSpec((None, C_out, tn), lambda bi, ni: (bi, 0, ni))
    if emit_full:
        out_shape = (jax.ShapeDtypeStruct((B, K, C_out, N), jnp.bfloat16),
                     jax.ShapeDtypeStruct((B, C_out, N), jnp.bfloat16))
        out_specs = (pl.BlockSpec((None, K, C_out, tn), lambda bi, ni: (bi, 0, 0, ni)),
                     max_spec)
    else:
        out_shape = jax.ShapeDtypeStruct((B, C_out, N), jnp.bfloat16)
        out_specs = max_spec
    return pl.pallas_call(
        functools.partial(_conv_max_kernel, k_nn=K, emit_full=emit_full),
        out_shape=out_shape,
        grid=grid,
        in_specs=[pl.BlockSpec((C_out, C_in), lambda bi, ni: (0, 0)),
                  pl.BlockSpec((None, K, C_in, tn), lambda bi, ni: (bi, 0, 0, ni)),
                  pl.BlockSpec((C_out, 1), lambda bi, ni: (0, 0))],
        out_specs=out_specs,
        compiler_params=_cparams(("parallel", "parallel")),
    )(w, x, b)


def _conv_kernel(w_ref, x_ref, b_ref, o_ref):
    y = jnp.dot(w_ref[...], x_ref[...].astype(jnp.bfloat16),
                preferred_element_type=jnp.float32)
    o_ref[...] = jnp.maximum(y + b_ref[...], 0.0)


def conv_bn_relu(x, w, b):
    # x: (B, C_in, N), w: (C_out, C_in) bf16, b: (C_out, 1) -> (B, C_out, N) f32
    B, C_in, N = x.shape
    C_out = w.shape[0]
    tn = _pick_tile(N, 512, 128)
    return pl.pallas_call(
        _conv_kernel,
        out_shape=jax.ShapeDtypeStruct((B, C_out, N), jnp.float32),
        grid=(B, N // tn),
        in_specs=[pl.BlockSpec((C_out, C_in), lambda bi, ni: (0, 0)),
                  pl.BlockSpec((None, C_in, tn), lambda bi, ni: (bi, 0, ni)),
                  pl.BlockSpec((C_out, 1), lambda bi, ni: (0, 0))],
        out_specs=pl.BlockSpec((None, C_out, tn), lambda bi, ni: (bi, 0, ni)),
        compiler_params=_cparams(("parallel", "parallel")),
    )(w, x, b)


def _linear_kernel(*refs, relu, has_res):
    if has_res:
        x_ref, res_ref, wT_ref, b_ref, o_ref = refs
    else:
        x_ref, wT_ref, b_ref, o_ref = refs
    x = x_ref[...].astype(jnp.bfloat16)
    y = jnp.dot(x, wT_ref[...], preferred_element_type=jnp.float32) + b_ref[...]
    if relu:
        y = jnp.maximum(y, 0.0)
    if has_res:
        y = y + res_ref[...]                     # residual fused into the epilogue
    o_ref[...] = y


def linear2d(x2d, wT, b, relu=False, residual=None):
    # x2d: (M, d_in) f32, wT: (d_in, d_out) bf16 (pre-transposed at init),
    # b: (1, d_out) f32, residual: optional (M, d_out) f32.
    M, d_in = x2d.shape
    d_out = wT.shape[1]
    tm = _pick_tile(M, 256, 8)
    in_specs = [pl.BlockSpec((tm, d_in), lambda i: (i, 0))]
    args = [x2d]
    if residual is not None:
        in_specs.append(pl.BlockSpec((tm, d_out), lambda i: (i, 0)))
        args.append(residual)
    in_specs += [pl.BlockSpec((d_in, d_out), lambda i: (0, 0)),
                 pl.BlockSpec((1, d_out), lambda i: (0, 0))]
    args += [wT, b]
    return pl.pallas_call(
        functools.partial(_linear_kernel, relu=relu, has_res=residual is not None),
        out_shape=jax.ShapeDtypeStruct((M, d_out), jnp.float32),
        grid=(M // tm,),
        in_specs=in_specs,
        out_specs=pl.BlockSpec((tm, d_out), lambda i: (i, 0)),
        compiler_params=_cparams(("parallel",)),
    )(*args)


def _layernorm_kernel(x_ref, a_ref, b_ref, o_ref, *, eps, d):
    # DCP's custom LayerNorm: unbiased std, eps added to std (not variance).
    x = x_ref[...]
    mean = jnp.mean(x, axis=-1, keepdims=True)
    xc = x - mean
    var = jnp.sum(xc * xc, axis=-1, keepdims=True) / (d - 1.0)
    o_ref[...] = a_ref[...] * xc / (jnp.sqrt(var) + eps) + b_ref[...]


def layer_norm(x, p, eps=1e-6):
    # x: (B, N, d)
    B, N, d = x.shape
    M = B * N
    tm = _pick_tile(M, 256, 8)
    out = pl.pallas_call(
        functools.partial(_layernorm_kernel, eps=eps, d=float(d)),
        out_shape=jax.ShapeDtypeStruct((M, d), jnp.float32),
        grid=(M // tm,),
        in_specs=[pl.BlockSpec((tm, d), lambda i: (i, 0)),
                  pl.BlockSpec((1, d), lambda i: (0, 0)),
                  pl.BlockSpec((1, d), lambda i: (0, 0))],
        out_specs=pl.BlockSpec((tm, d), lambda i: (i, 0)),
        compiler_params=_cparams(("parallel",)),
    )(x.reshape(M, d), p['a'], p['b'])
    return out.reshape(B, N, d)


def _attention_kernel(q_ref, k_ref, v_ref, o_ref, *, scale):
    # softmax(q @ k^T * scale) @ v  — bf16 MXU inputs, f32 accumulation.
    q = q_ref[...].astype(jnp.bfloat16)
    k = k_ref[...].astype(jnp.bfloat16)
    s = lax.dot_general(q, k, (((1,), (1,)), ((), ())),
                        preferred_element_type=jnp.float32) * scale
    s = s - jnp.max(s, axis=-1, keepdims=True)
    e = jnp.exp(s)
    p = e * pl.reciprocal(jnp.sum(e, axis=-1, keepdims=True), approx=True)
    o_ref[...] = jnp.dot(p.astype(jnp.bfloat16), v_ref[...].astype(jnp.bfloat16),
                         preferred_element_type=jnp.float32)


def attention_batched(q, k, v, scale):
    # q: (G, Nq, dk), k: (G, Nk, dk), v: (G, Nk, dv) -> (G, Nq, dv)
    G, Nq, dk = q.shape
    Nk = k.shape[1]
    dv = v.shape[2]
    return pl.pallas_call(
        functools.partial(_attention_kernel, scale=scale),
        out_shape=jax.ShapeDtypeStruct((G, Nq, dv), jnp.float32),
        grid=(G,),
        in_specs=[pl.BlockSpec((None, Nq, dk), lambda g: (g, 0, 0)),
                  pl.BlockSpec((None, Nk, dk), lambda g: (g, 0, 0)),
                  pl.BlockSpec((None, Nk, dv), lambda g: (g, 0, 0))],
        out_specs=pl.BlockSpec((None, Nq, dv), lambda g: (g, 0, 0)),
        compiler_params=_cparams(("parallel",)),
    )(q, k, v)


def _svd_corr_kernel(qe_ref, ke_ref, v_ref, o_ref, *, scale):
    # scores = softmax(src_emb^T tgt_emb / sqrt(d)); src_corr = tgt @ scores^T.
    # Consumes channel-major (d, N) embeddings directly and emits (3, N) so the
    # output store is lane-dense (no masked 3-lane stores, no wrapper transposes).
    qe = qe_ref[...].astype(jnp.bfloat16)              # (d, Nq)
    ke = ke_ref[...].astype(jnp.bfloat16)              # (d, Nk)
    s = lax.dot_general(qe, ke, (((0,), (0,)), ((), ())),
                        preferred_element_type=jnp.float32) * scale      # (Nq, Nk)
    s = s - jnp.max(s, axis=-1, keepdims=True)
    e = jnp.exp(s)
    p = e * pl.reciprocal(jnp.sum(e, axis=-1, keepdims=True), approx=True)
    o_ref[...] = lax.dot_general(v_ref[...], p, (((1,), (1,)), ((), ())),
                                 preferred_element_type=jnp.float32)     # (3, Nq)


def svd_corr(src_emb, tgt_emb, tgt):
    B, d, N = src_emb.shape
    return pl.pallas_call(
        functools.partial(_svd_corr_kernel, scale=1.0 / math.sqrt(d)),
        out_shape=jax.ShapeDtypeStruct((B, 3, N), jnp.float32),
        grid=(B,),
        in_specs=[pl.BlockSpec((None, d, N), lambda b: (b, 0, 0)),
                  pl.BlockSpec((None, d, N), lambda b: (b, 0, 0)),
                  pl.BlockSpec((None, 3, N), lambda b: (b, 0, 0))],
        out_specs=pl.BlockSpec((None, 3, N), lambda b: (b, 0, 0)),
        compiler_params=_cparams(("parallel",)),
    )(src_emb, tgt_emb, tgt)


def _neg_pdist_kernel(x_ref, o_ref):
    # out[i, j] = -||x_i - x_j||^2 = 2 x_i.x_j - ||x_i||^2 - ||x_j||^2
    x = x_ref[...]                                                       # (C, N)
    inner = lax.dot_general(x, x, (((0,), (0,)), ((), ())),
                            preferred_element_type=jnp.float32)          # (N, N)
    xx = x * x
    sq_row = jnp.sum(xx, axis=0, keepdims=True)                          # (1, N)
    ones = jnp.ones((x.shape[0], 1), jnp.float32)
    sq_col = lax.dot_general(xx, ones, (((0,), (0,)), ((), ())),
                             preferred_element_type=jnp.float32)         # (N, 1)
    o_ref[...] = 2.0 * inner - sq_col - sq_row


def neg_pairwise_dist(x):
    # x: (B, C, N) -> (B, N, N)
    B, C, N = x.shape
    return pl.pallas_call(
        _neg_pdist_kernel,
        out_shape=jax.ShapeDtypeStruct((B, N, N), jnp.float32),
        grid=(B,),
        in_specs=[pl.BlockSpec((None, C, N), lambda b: (b, 0, 0))],
        out_specs=pl.BlockSpec((None, N, N), lambda b: (b, 0, 0)),
        compiler_params=_cparams(("parallel",)),
    )(x)


# ---------------------------------------------------------------------------
# Model pieces (JAX glue calling the Pallas kernels)
# ---------------------------------------------------------------------------

def knn_indices(x, k_nn):
    neg_dist = neg_pairwise_dist(x)              # (B, N, N)
    _, idx = lax.top_k(neg_dist, k_nn)           # k nearest (largest neg dist)
    return idx                                   # (B, N, k)


def get_graph_feature(x, k_nn):
    # x: (B, C, N) -> (B, K, 2C (padded to 8), N) bf16; K-major layout so the
    # max-over-neighbours is a lane-dense elementwise reduce inside the conv.
    B, C, N = x.shape
    idx = knn_indices(x, k_nn)
    x_t = jnp.transpose(x, (0, 2, 1))                                # (B, N, C)
    nbr = jax.vmap(lambda pts, ids: pts[ids])(x_t, idx)              # (B, N, K, C)
    ctr = jnp.broadcast_to(x_t[:, :, None, :], (B, N, k_nn, C))      # (B, N, K, C)
    feat = jnp.concatenate([nbr, ctr], axis=-1)                      # (B, N, K, 2C)
    feat = jnp.transpose(feat, (0, 2, 3, 1))                         # (B, K, 2C, N)
    pad = (-feat.shape[2]) % 8
    if pad:                                                          # pad C_in 6 -> 8
        feat = jnp.pad(feat, ((0, 0), (0, 0), (0, pad), (0, 0)))
    return feat.astype(jnp.bfloat16)


def dgcnn(x, params, k_nn):
    h = get_graph_feature(x, k_nn)                                   # (B, K, 8, N)
    maxed = []
    for i in range(4):
        p = params[i]
        if i < 3:
            h, m = conv_bn_relu_max(h, p['w'], p['b'], emit_full=True)
        else:
            m = conv_bn_relu_max(h, p['w'], p['b'], emit_full=False)  # conv4: max only
        maxed.append(m)
    cat = jnp.concatenate(maxed, axis=1)                             # (B, 512, N) bf16
    p = params[4]
    return conv_bn_relu(cat, p['w'], p['b'])                         # (B, emb, N) f32


def multi_head_attention(q_in, kv_in, p, n_heads, residual, self_attention):
    B, Nq, d = q_in.shape
    Nk = kv_in.shape[1]
    dk = d // n_heads

    if self_attention:
        qkv = linear2d(q_in.reshape(B * Nq, d), p['wqkvT'], p['bqkv'])   # fused QKV matmul
        q, k, v = qkv[:, :d], qkv[:, d:2 * d], qkv[:, 2 * d:]
    else:
        q = linear2d(q_in.reshape(B * Nq, d), p['wqkvT'][:, :d], p['bqkv'][:, :d])
        kv = linear2d(kv_in.reshape(B * Nk, d), p['wqkvT'][:, d:], p['bqkv'][:, d:])
        k, v = kv[:, :d], kv[:, d:]

    def split_heads(t, n):
        return t.reshape(B, n, n_heads, dk).transpose(0, 2, 1, 3).reshape(B * n_heads, n, dk)

    oh = attention_batched(split_heads(q, Nq), split_heads(k, Nk), split_heads(v, Nk),
                           1.0 / math.sqrt(dk))
    o = oh.reshape(B, n_heads, Nq, dk).transpose(0, 2, 1, 3).reshape(B * Nq, d)
    out = linear2d(o, p['woT'], p['bo'], residual=residual.reshape(B * Nq, d))
    return out.reshape(B, Nq, d)


def feed_forward(x, p, residual):
    B, N, d = x.shape
    h = linear2d(x.reshape(B * N, d), p['w1T'], p['b1'], relu=True)
    out = linear2d(h, p['w2T'], p['b2'], residual=residual.reshape(B * N, d))
    return out.reshape(B, N, d)


def encode(x, p, n_heads):
    for lp in p['enc_layers']:
        y = layer_norm(x, lp['norm0'])
        x = multi_head_attention(y, y, lp['self_attn'], n_heads,
                                 residual=x, self_attention=True)
        y = layer_norm(x, lp['norm1'])
        x = feed_forward(y, lp['ff'], residual=x)
    return layer_norm(x, p['enc_norm'])


def decode(x, memory, p, n_heads):
    for lp in p['dec_layers']:
        y = layer_norm(x, lp['norm0'])
        x = multi_head_attention(y, y, lp['self_attn'], n_heads,
                                 residual=x, self_attention=True)
        y = layer_norm(x, lp['norm1'])
        x = multi_head_attention(y, memory, lp['src_attn'], n_heads,
                                 residual=x, self_attention=False)
        y = layer_norm(x, lp['norm2'])
        x = feed_forward(y, lp['ff'], residual=x)
    return layer_norm(x, p['dec_norm'])


def transformer_pointer(src_emb, tgt_emb, p, n_heads):
    # matches DCP Transformer.forward (inputs/outputs are (B, emb, N))
    src_t = jnp.transpose(src_emb, (0, 2, 1))
    tgt_t = jnp.transpose(tgt_emb, (0, 2, 1))

    def model(s, t):
        return decode(t, encode(s, p, n_heads), p, n_heads)

    tgt_p = jnp.transpose(model(src_t, tgt_t), (0, 2, 1))
    src_p = jnp.transpose(model(tgt_t, src_t), (0, 2, 1))
    return src_p, tgt_p


def svd_head(src_emb, tgt_emb, src, tgt):
    B, d, N = src_emb.shape
    src_corr = svd_corr(src_emb, tgt_emb, tgt)                       # (B, 3, N)

    src_mean = jnp.mean(src, axis=2, keepdims=True)
    corr_mean = jnp.mean(src_corr, axis=2, keepdims=True)
    src_c = src - src_mean
    corr_c = src_corr - corr_mean
    H = jnp.einsum('bin,bjn->bij', src_c, corr_c)                    # (B, 3, 3) tiny
    # TODO(synk): torch.svd/torch.det have no Pallas equivalent; solved with jnp.linalg (XLA).
    u, _, vh = jnp.linalg.svd(H)
    v3 = jnp.swapaxes(vh, -1, -2)
    ut = jnp.swapaxes(u, -1, -2)
    r = v3 @ ut
    det = jnp.linalg.det(r)
    reflect = jnp.diag(jnp.array([1.0, 1.0, -1.0], jnp.float32))
    r_fix = (v3 @ reflect) @ ut
    R = jnp.where(det[:, None, None] < 0, r_fix, r)
    t = jnp.matmul(-R, src_mean) + corr_mean                         # (B, 3, 1)
    return R, t.reshape(B, 3)


@functools.partial(jax.jit, static_argnames=('n_heads', 'k_nn', 'mutual'))
def dcp_forward(input_data, params, n_heads, k_nn, mutual=False):
    src = input_data[:, 0, :, :]                 # (B, 3, N)
    tgt = input_data[:, 1, :, :]
    src_emb = dgcnn(src, params['dgcnn'], k_nn)
    tgt_emb = dgcnn(tgt, params['dgcnn'], k_nn)
    src_p, tgt_p = transformer_pointer(src_emb, tgt_emb, params['transformer'], n_heads)
    src_emb = src_emb + src_p
    tgt_emb = tgt_emb + tgt_p
    R_ab, t_ab = svd_head(src_emb, tgt_emb, src, tgt)
    if mutual:
        R_ba, t_ba = svd_head(tgt_emb, src_emb, tgt, src)
    else:
        R_ba = jnp.swapaxes(R_ab, 1, 2)
        t_ba = -jnp.matmul(R_ba, t_ab[:, :, None])[:, :, 0]
    return R_ab, t_ab, R_ba, t_ba


# ---------------------------------------------------------------------------
# Deterministic parameter initialization (synthetic — no checkpoint loading)
# ---------------------------------------------------------------------------

def _init_linear_T(key, d_in, d_out):
    k1, k2 = jax.random.split(key)
    wT = (jax.random.normal(k1, (d_in, d_out), jnp.float32) / jnp.sqrt(d_in)).astype(jnp.bfloat16)
    b = 0.01 * jax.random.normal(k2, (1, d_out), jnp.float32)
    return wT, b


def _init_attn(key, d):
    kq, kk, kv, ko = jax.random.split(key, 4)
    wqT, bq = _init_linear_T(kq, d, d)
    wkT, bk = _init_linear_T(kk, d, d)
    wvT, bv = _init_linear_T(kv, d, d)
    woT, bo = _init_linear_T(ko, d, d)
    return {'wqkvT': jnp.concatenate([wqT, wkT, wvT], axis=1),    # (d, 3d) fused QKV
            'bqkv': jnp.concatenate([bq, bk, bv], axis=1),        # (1, 3d)
            'woT': woT, 'bo': bo}


def _init_ff(key, d, ff):
    k1, k2 = jax.random.split(key)
    w1T, b1 = _init_linear_T(k1, d, ff)
    w2T, b2 = _init_linear_T(k2, ff, d)
    return {'w1T': w1T, 'b1': b1, 'w2T': w2T, 'b2': b2}


def _init_ln(d):
    return {'a': jnp.ones((1, d), jnp.float32), 'b': jnp.zeros((1, d), jnp.float32)}


def _init_dgcnn(key, emb_dims):
    dims = [(64, 6), (64, 64), (128, 64), (256, 128), (emb_dims, 512)]
    params = []
    for li, (co, ci) in enumerate(dims):
        key, k1, k2, k3, k4, k5 = jax.random.split(key, 6)
        w = jax.random.normal(k1, (co, ci), jnp.float32) * jnp.sqrt(2.0 / ci)
        gamma = 1.0 + 0.1 * jax.random.normal(k2, (co, 1), jnp.float32)
        beta = 0.1 * jax.random.normal(k3, (co, 1), jnp.float32)
        mean = 0.1 * jax.random.normal(k4, (co, 1), jnp.float32)
        var = 1.0 + 0.1 * jnp.abs(jax.random.normal(k5, (co, 1), jnp.float32))
        scale = gamma / jnp.sqrt(var + 1e-5)          # fold BatchNorm (eval mode)
        shift = beta - mean * scale
        wf = w * scale                                # scale folded into the weight
        if li == 0:
            wf = jnp.pad(wf, ((0, 0), (0, 2)))        # pad C_in 6 -> 8 (inputs zero-padded too)
        params.append({'w': wf.astype(jnp.bfloat16), 'b': shift})
    return params


def _init_transformer(key, d, ff, n_blocks):
    enc_layers, dec_layers = [], []
    for _ in range(n_blocks):
        key, ka, kf = jax.random.split(key, 3)
        enc_layers.append({'self_attn': _init_attn(ka, d), 'ff': _init_ff(kf, d, ff),
                           'norm0': _init_ln(d), 'norm1': _init_ln(d)})
    for _ in range(n_blocks):
        key, ka, kb, kf = jax.random.split(key, 4)
        dec_layers.append({'self_attn': _init_attn(ka, d), 'src_attn': _init_attn(kb, d),
                           'ff': _init_ff(kf, d, ff),
                           'norm0': _init_ln(d), 'norm1': _init_ln(d), 'norm2': _init_ln(d)})
    return {'enc_layers': enc_layers, 'enc_norm': _init_ln(d),
            'dec_layers': dec_layers, 'dec_norm': _init_ln(d)}


def init_params(key, emb_dims, ff_dims, n_blocks):
    kd, kt = jax.random.split(key)
    return {'dgcnn': _init_dgcnn(kd, emb_dims),
            'transformer': _init_transformer(kt, emb_dims, ff_dims, n_blocks)}


# ---------------------------------------------------------------------------

if __name__ == "__main__":
    B, N, K_NN = 2, 16, 4
    EMB_DIMS, N_HEADS, FF_DIMS, N_BLOCKS = 64, 4, 128, 1

    key = jax.random.PRNGKey(0)
    key, k_in, k_par = jax.random.split(key, 3)
    input_data = jax.random.normal(k_in, (B, 2, 3, N), jnp.float32)
    params = init_params(k_par, EMB_DIMS, FF_DIMS, N_BLOCKS)

    R_ab, t_ab, R_ba, t_ba = jax.block_until_ready(
        dcp_forward(input_data, params, n_heads=N_HEADS, k_nn=K_NN, mutual=False))

    assert R_ab.shape == (B, 3, 3) and t_ab.shape == (B, 3)
    assert R_ba.shape == (B, 3, 3) and t_ba.shape == (B, 3)
    assert bool(jnp.all(jnp.isfinite(R_ab))) and bool(jnp.all(jnp.isfinite(t_ab)))
    assert bool(jnp.all(jnp.isfinite(R_ba))) and bool(jnp.all(jnp.isfinite(t_ba)))
    print("KERNEL_OK")
</pallas_src>

<mosaic_0001>
module attributes {stable_mosaic.version = 11 : i64} {
  func.func @_neg_pdist_kernel(%arg0: i32, %arg1: memref<1x3x16xf32, #tpu.memory_space<vmem>>, %arg2: memref<1x16x16xf32, #tpu.memory_space<vmem>>) attributes {dimension_semantics = [#tpu.dimension_semantics<parallel>], iteration_bounds = array<i64: 2>, scalar_prefetch = 0 : i64, scratch_operands = 0 : i64, tpu.core_type = #tpu.core_type<tc>, window_params = [{transform_indices = @transform_0, window_bounds = array<i64: 1, 3, 16>}, {transform_indices = @transform_1, window_bounds = array<i64: 1, 16, 16>}]} {
    %c0 = arith.constant 0 : index
    %c0_0 = arith.constant 0 : index
    %c0_1 = arith.constant 0 : index
    %0 = vector.load %arg1[%c0, %c0_0, %c0_1] : memref<1x3x16xf32, #tpu.memory_space<vmem>>, vector<1x3x16xf32>
    %1 = vector.shape_cast %0 : vector<1x3x16xf32> to vector<3x16xf32>
    %cst = arith.constant dense<0.000000e+00> : vector<16x16xf32>
    %2 = tpu.matmul %1, %1, %cst {dimension_numbers = #tpu.dot_dimension_numbers<[0], [0], [1], [1], [0, 1, 1, 1], [], []>} : vector<3x16xf32>, vector<3x16xf32>, vector<16x16xf32> -> vector<16x16xf32>
    %3 = arith.mulf %1, %1 : vector<3x16xf32>
    %cst_2 = arith.constant dense<0.000000e+00> : vector<16xf32>
    %4 = vector.multi_reduction <add>, %3, %cst_2 [0] : vector<3x16xf32> to vector<16xf32>
    %5 = vector.shape_cast %4 : vector<16xf32> to vector<1x16xf32>
    %cst_3 = arith.constant 1.000000e+00 : f32
    %6 = vector.broadcast %cst_3 : f32 to vector<3x1xf32>
    %cst_4 = arith.constant dense<0.000000e+00> : vector<16x1xf32>
    %7 = tpu.matmul %3, %6, %cst_4 {dimension_numbers = #tpu.dot_dimension_numbers<[0], [0], [1], [1], [0, 1, 1, 1], [], []>} : vector<3x16xf32>, vector<3x1xf32>, vector<16x1xf32> -> vector<16x1xf32>
    %cst_5 = arith.constant 2.000000e+00 : f32
    %8 = vector.broadcast %cst_5 : f32 to vector<16x16xf32>
    %9 = arith.mulf %8, %2 : vector<16x16xf32>
    %10 = vector.broadcast %7 : vector<16x1xf32> to vector<16x16xf32>
    %11 = arith.subf %9, %10 : vector<16x16xf32>
    %12 = vector.broadcast %5 : vector<1x16xf32> to vector<16x16xf32>
    %13 = arith.subf %11, %12 : vector<16x16xf32>
    %c0_6 = arith.constant 0 : index
    %c0_7 = arith.constant 0 : index
    %c0_8 = arith.constant 0 : index
    %14 = vector.load %arg2[%c0_6, %c0_7, %c0_8] : memref<1x16x16xf32, #tpu.memory_space<vmem>>, vector<1x16x16xf32>
    %15 = vector.shape_cast %14 : vector<1x16x16xf32> to vector<16x16xf32>
    %16 = vector.shape_cast %13 : vector<16x16xf32> to vector<1x16x16xf32>
    tpu.vector_store %arg2[%c0_6, %c0_7, %c0_8], %16 {strides = array<i32>} : memref<1x16x16xf32, #tpu.memory_space<vmem>>, vector<1x16x16xf32>,
    return
  }
  func.func @transform_0(%arg0: i32) -> (i32, i32, i32) {
    %c0_i32 = arith.constant 0 : i32
    %c0_i32_0 = arith.constant 0 : i32
    %c0_i32_1 = arith.constant 0 : i32
    return %arg0, %c0_i32, %c0_i32_0 : i32, i32, i32
  }
  func.func @transform_1(%arg0: i32) -> (i32, i32, i32) {
    %c0_i32 = arith.constant 0 : i32
    %c0_i32_0 = arith.constant 0 : i32
    %c0_i32_1 = arith.constant 0 : i32
    return %arg0, %c0_i32, %c0_i32_0 : i32, i32, i32
  }
}

module attributes {stable_mosaic.version = 11 : i64} {
  func.func @_conv_max_kernel(%arg0: i32, %arg1: i32, %arg2: memref<64x8xbf16, #tpu.memory_space<vmem>>, %arg3: memref<1x4x8x16xbf16, #tpu.memory_space<vmem>>, %arg4: memref<64x1xf32, #tpu.memory_space<vmem>>, %arg5: memref<1x4x64x16xbf16, #tpu.memory_space<vmem>>, %arg6: memref<1x64x16xbf16, #tpu.memory_space<vmem>>) attributes {dimension_semantics = [#tpu.dimension_semantics<parallel>, #tpu.dimension_semantics<parallel>], iteration_bounds = array<i64: 2, 1>, scalar_prefetch = 0 : i64, scratch_operands = 0 : i64, tpu.core_type = #tpu.core_type<tc>, window_params = [{pipeline_mode = #tpu.pipeline_mode<synchronous>, transform_indices = @transform_0, window_bounds = array<i64: 64, 8>}, {transform_indices = @transform_1, window_bounds = array<i64: 1, 4, 8, 16>}, {pipeline_mode = #tpu.pipeline_mode<synchronous>, transform_indices = @transform_2, window_bounds = array<i64: 64, 1>}, {transform_indices = @transform_3, window_bounds = array<i64: 1, 4, 64, 16>}, {transform_indices = @transform_4, window_bounds = array<i64: 1, 64, 16>}]} {
    %c0 = arith.constant 0 : index
    %c0_0 = arith.constant 0 : index
    %0 = vector.load %arg2[%c0, %c0_0] : memref<64x8xbf16, #tpu.memory_space<vmem>>, vector<64x8xbf16>
    %c0_1 = arith.constant 0 : index
    %c0_2 = arith.constant 0 : index
    %1 = vector.load %arg4[%c0_1, %c0_2] : memref<64x1xf32, #tpu.memory_space<vmem>>, vector<64x1xf32>
    %c0_3 = arith.constant 0 : index
    %c0_4 = arith.constant 0 : index
    %c0_5 = arith.constant 0 : index
    %c0_6 = arith.constant 0 : index
    %2 = vector.load %arg3[%c0_3, %c0_4, %c0_5, %c0_6] : memref<1x4x8x16xbf16, #tpu.memory_space<vmem>>, vector<1x1x8x16xbf16>
    %3 = vector.shape_cast %2 : vector<1x1x8x16xbf16> to vector<8x16xbf16>
    %cst = arith.constant dense<0.000000e+00> : vector<64x16xf32>
    %4 = tpu.matmul %0, %3, %cst {dimension_numbers = #tpu.dot_dimension_numbers<[1], [0], [0], [1], [0, 0, 1, 1], [], []>} : vector<64x8xbf16>, vector<8x16xbf16>, vector<64x16xf32> -> vector<64x16xf32>
    %5 = vector.broadcast %1 : vector<64x1xf32> to vector<64x16xf32>
    %6 = arith.addf %4, %5 : vector<64x16xf32>
    %cst_7 = arith.constant 0.000000e+00 : f32
    %7 = vector.broadcast %cst_7 : f32 to vector<64x16xf32>
    %8 = arith.maximumf %6, %7 : vector<64x16xf32>
    %9 = arith.truncf %8 : vector<64x16xf32> to vector<64x16xbf16>
    %c0_8 = arith.constant 0 : index
    %c0_9 = arith.constant 0 : index
    %c0_10 = arith.constant 0 : index
    %c0_11 = arith.constant 0 : index
    %10 = vector.load %arg5[%c0_8, %c0_9, %c0_10, %c0_11] : memref<1x4x64x16xbf16, #tpu.memory_space<vmem>>, vector<1x1x64x16xbf16>
    %11 = vector.shape_cast %10 : vector<1x1x64x16xbf16> to vector<64x16xbf16>
    %12 = vector.shape_cast %9 : vector<64x16xbf16> to vector<1x1x64x16xbf16>
    tpu.vector_store %arg5[%c0_8, %c0_9, %c0_10, %c0_11], %12 {strides = array<i32>} : memref<1x4x64x16xbf16, #tpu.memory_space<vmem>>, vector<1x1x64x16xbf16>,
    %c0_12 = arith.constant 0 : index
    %c1 = arith.constant 1 : index
    %c0_13 = arith.constant 0 : index
    %c0_14 = arith.constant 0 : index
    %13 = vector.load %arg3[%c0_12, %c1, %c0_13, %c0_14] : memref<1x4x8x16xbf16, #tpu.memory_space<vmem>>, vector<1x1x8x16xbf16>
    %14 = vector.shape_cast %13 : vector<1x1x8x16xbf16> to vector<8x16xbf16>
    %cst_15 = arith.constant dense<0.000000e+00> : vector<64x16xf32>
    %15 = tpu.matmul %0, %14, %cst_15 {dimension_numbers = #tpu.dot_dimension_numbers<[1], [0], [0], [1], [0, 0, 1, 1], [], []>} : vector<64x8xbf16>, vector<8x16xbf16>, vector<64x16xf32> -> vector<64x16xf32>
    %16 = vector.broadcast %1 : vector<64x1xf32> to vector<64x16xf32>
    %17 = arith.addf %15, %16 : vector<64x16xf32>
    %cst_16 = arith.constant 0.000000e+00 : f32
    %18 = vector.broadcast %cst_16 : f32 to vector<64x16xf32>
    %19 = arith.maximumf %17, %18 : vector<64x16xf32>
    %20 = arith.truncf %19 : vector<64x16xf32> to vector<64x16xbf16>
    %c0_17 = arith.constant 0 : index
    %c1_18 = arith.constant 1 : index
    %c0_19 = arith.constant 0 : index
    %c0_20 = arith.constant 0 : index
    %21 = vector.load %arg5[%c0_17, %c1_18, %c0_19, %c0_20] : memref<1x4x64x16xbf16, #tpu.memory_space<vmem>>, vector<1x1x64x16xbf16>
    %22 = vector.shape_cast %21 : vector<1x1x64x16xbf16> to vector<64x16xbf16>
    %23 = vector.shape_cast %20 : vector<64x16xbf16> to vector<1x1x64x16xbf16>
    tpu.vector_store %arg5[%c0_17, %c1_18, %c0_19, %c0_20], %23 {strides = array<i32>} : memref<1x4x64x16xbf16, #tpu.memory_space<vmem>>, vector<1x1x64x16xbf16>,
    %24 = arith.maximumf %8, %19 : vector<64x16xf32>
    %c0_21 = arith.constant 0 : index
    %c2 = arith.constant 2 : index
    %c0_22 = arith.constant 0 : index
    %c0_23 = arith.constant 0 : index
    %25 = vector.load %arg3[%c0_21, %c2, %c0_22, %c0_23] : memref<1x4x8x16xbf16, #tpu.memory_space<vmem>>, vector<1x1x8x16xbf16>
    %26 = vector.shape_cast %25 : vector<1x1x8x16xbf16> to vector<8x16xbf16>
    %cst_24 = arith.constant dense<0.000000e+00> : vector<64x16xf32>
    %27 = tpu.matmul %0, %26, %cst_24 {dimension_numbers = #tpu.dot_dimension_numbers<[1], [0], [0], [1], [0, 0, 1, 1], [], []>} : vector<64x8xbf16>, vector<8x16xbf16>, vector<64x16xf32> -> vector<64x16xf32>
    %28 = vector.broadcast %1 : vector<64x1xf32> to vector<64x16xf32>
    %29 = arith.addf %27, %28 : vector<64x16xf32>
    %cst_25 = arith.constant 0.000000e+00 : f32
    %30 = vector.broadcast %cst_25 : f32 to vector<64x16xf32>
    %31 = arith.maximumf %29, %30 : vector<64x16xf32>
    %32 = arith.truncf %31 : vector<64x16xf32> to vector<64x16xbf16>
    %c0_26 = arith.constant 0 : index
    %c2_27 = arith.constant 2 : index
    %c0_28 = arith.constant 0 : index
    %c0_29 = arith.constant 0 : index
    %33 = vector.load %arg5[%c0_26, %c2_27, %c0_28, %c0_29] : memref<1x4x64x16xbf16, #tpu.memory_space<vmem>>, vector<1x1x64x16xbf16>
    %34 = vector.shape_cast %33 : vector<1x1x64x16xbf16> to vector<64x16xbf16>
    %35 = vector.shape_cast %32 : vector<64x16xbf16> to vector<1x1x64x16xbf16>
    tpu.vector_store %arg5[%c0_26, %c2_27, %c0_28, %c0_29], %35 {strides = array<i32>} : memref<1x4x64x16xbf16, #tpu.memory_space<vmem>>, vector<1x1x64x16xbf16>,
    %36 = arith.maximumf %24, %31 : vector<64x16xf32>
    %c0_30 = arith.constant 0 : index
    %c3 = arith.constant 3 : index
    %c0_31 = arith.constant 0 : index
    %c0_32 = arith.constant 0 : index
    %37 = vector.load %arg3[%c0_30, %c3, %c0_31, %c0_32] : memref<1x4x8x16xbf16, #tpu.memory_space<vmem>>, vector<1x1x8x16xbf16>
    %38 = vector.shape_cast %37 : vector<1x1x8x16xbf16> to vector<8x16xbf16>
    %cst_33 = arith.constant dense<0.000000e+00> : vector<64x16xf32>
    %39 = tpu.matmul %0, %38, %cst_33 {dimension_numbers = #tpu.dot_dimension_numbers<[1], [0], [0], [1], [0, 0, 1, 1], [], []>} : vector<64x8xbf16>, vector<8x16xbf16>, vector<64x16xf32> -> vector<64x16xf32>
    %40 = vector.broadcast %1 : vector<64x1xf32> to vector<64x16xf32>
    %41 = arith.addf %39, %40 : vector<64x16xf32>
    %cst_34 = arith.constant 0.000000e+00 : f32
    %42 = vector.broadcast %cst_34 : f32 to vector<64x16xf32>
    %43 = arith.maximumf %41, %42 : vector<64x16xf32>
    %44 = arith.truncf %43 : vector<64x16xf32> to vector<64x16xbf16>
    %c0_35 = arith.constant 0 : index
    %c3_36 = arith.constant 3 : index
    %c0_37 = arith.constant 0 : index
    %c0_38 = arith.constant 0 : index
    %45 = vector.load %arg5[%c0_35, %c3_36, %c0_37, %c0_38] : memref<1x4x64x16xbf16, #tpu.memory_space<vmem>>, vector<1x1x64x16xbf16>
    %46 = vector.shape_cast %45 : vector<1x1x64x16xbf16> to vector<64x16xbf16>
    %47 = vector.shape_cast %44 : vector<64x16xbf16> to vector<1x1x64x16xbf16>
    tpu.vector_store %arg5[%c0_35, %c3_36, %c0_37, %c0_38], %47 {strides = array<i32>} : memref<1x4x64x16xbf16, #tpu.memory_space<vmem>>, vector<1x1x64x16xbf16>,
    %48 = arith.maximumf %36, %43 : vector<64x16xf32>
    %49 = arith.truncf %48 : vector<64x16xf32> to vector<64x16xbf16>
    %c0_39 = arith.constant 0 : index
    %c0_40 = arith.constant 0 : index
    %c0_41 = arith.constant 0 : index
    %50 = vector.load %arg6[%c0_39, %c0_40, %c0_41] : memref<1x64x16xbf16, #tpu.memory_space<vmem>>, vector<1x64x16xbf16>
    %51 = vector.shape_cast %50 : vector<1x64x16xbf16> to vector<64x16xbf16>
    %52 = vector.shape_cast %49 : vector<64x16xbf16> to vector<1x64x16xbf16>
    tpu.vector_store %arg6[%c0_39, %c0_40, %c0_41], %52 {strides = array<i32>} : memref<1x64x16xbf16, #tpu.memory_space<vmem>>, vector<1x64x16xbf16>,
    return
  }
  func.func @transform_0(%arg0: i32, %arg1: i32) -> (i32, i32) {
    %c0_i32 = arith.constant 0 : i32
    %c0_i32_0 = arith.constant 0 : i32
    %c0_i32_1 = arith.constant 0 : i32
    return %c0_i32, %c0_i32_0 : i32, i32
  }
  func.func @transform_1(%arg0: i32, %arg1: i32) -> (i32, i32, i32, i32) {
    %c0_i32 = arith.constant 0 : i32
    %c0_i32_0 = arith.constant 0 : i32
    %c0_i32_1 = arith.constant 0 : i32
    return %arg0, %c0_i32, %c0_i32_0, %arg1 : i32, i32, i32, i32
  }
  func.func @transform_2(%arg0: i32, %arg1: i32) -> (i32, i32) {
    %c0_i32 = arith.constant 0 : i32
    %c0_i32_0 = arith.constant 0 : i32
    %c0_i32_1 = arith.constant 0 : i32
    return %c0_i32, %c0_i32_0 : i32, i32
  }
  func.func @transform_3(%arg0: i32, %arg1: i32) -> (i32, i32, i32, i32) {
    %c0_i32 = arith.constant 0 : i32
    %c0_i32_0 = arith.constant 0 : i32
    %c0_i32_1 = arith.constant 0 : i32
    return %arg0, %c0_i32, %c0_i32_0, %arg1 : i32, i32, i32, i32
  }
  func.func @transform_4(%arg0: i32, %arg1: i32) -> (i32, i32, i32) {
    %c0_i32 = arith.constant 0 : i32
    %c0_i32_0 = arith.constant 0 : i32
    return %arg0, %c0_i32, %arg1 : i32, i32, i32
  }
}

module attributes {stable_mosaic.version = 11 : i64} {
  func.func @_conv_max_kernel(%arg0: i32, %arg1: i32, %arg2: memref<64x64xbf16, #tpu.memory_space<vmem>>, %arg3: memref<1x4x64x16xbf16, #tpu.memory_space<vmem>>, %arg4: memref<64x1xf32, #tpu.memory_space<vmem>>, %arg5: memref<1x4x64x16xbf16, #tpu.memory_space<vmem>>, %arg6: memref<1x64x16xbf16, #tpu.memory_space<vmem>>) attributes {dimension_semantics = [#tpu.dimension_semantics<parallel>, #tpu.dimension_semantics<parallel>], iteration_bounds = array<i64: 2, 1>, scalar_prefetch = 0 : i64, scratch_operands = 0 : i64, tpu.core_type = #tpu.core_type<tc>, window_params = [{pipeline_mode = #tpu.pipeline_mode<synchronous>, transform_indices = @transform_0, window_bounds = array<i64: 64, 64>}, {transform_indices = @transform_1, window_bounds = array<i64: 1, 4, 64, 16>}, {pipeline_mode = #tpu.pipeline_mode<synchronous>, transform_indices = @transform_2, window_bounds = array<i64: 64, 1>}, {transform_indices = @transform_3, window_bounds = array<i64: 1, 4, 64, 16>}, {transform_indices = @transform_4, window_bounds = array<i64: 1, 64, 16>}]} {
    %c0 = arith.constant 0 : index
    %c0_0 = arith.constant 0 : index
    %0 = vector.load %arg2[%c0, %c0_0] : memref<64x64xbf16, #tpu.memory_space<vmem>>, vector<64x64xbf16>
    %c0_1 = arith.constant 0 : index
    %c0_2 = arith.constant 0 : index
    %1 = vector.load %arg4[%c0_1, %c0_2] : memref<64x1xf32, #tpu.memory_space<vmem>>, vector<64x1xf32>
    %c0_3 = arith.constant 0 : index
    %c0_4 = arith.constant 0 : index
    %c0_5 = arith.constant 0 : index
    %c0_6 = arith.constant 0 : index
    %2 = vector.load %arg3[%c0_3, %c0_4, %c0_5, %c0_6] : memref<1x4x64x16xbf16, #tpu.memory_space<vmem>>, vector<1x1x64x16xbf16>
    %3 = vector.shape_cast %2 : vector<1x1x64x16xbf16> to vector<64x16xbf16>
    %cst = arith.constant dense<0.000000e+00> : vector<64x16xf32>
    %4 = tpu.matmul %0, %3, %cst {dimension_numbers = #tpu.dot_dimension_numbers<[1], [0], [0], [1], [0, 0, 1, 1], [], []>} : vector<64x64xbf16>, vector<64x16xbf16>, vector<64x16xf32> -> vector<64x16xf32>
    %5 = vector.broadcast %1 : vector<64x1xf32> to vector<64x16xf32>
    %6 = arith.addf %4, %5 : vector<64x16xf32>
    %cst_7 = arith.constant 0.000000e+00 : f32
    %7 = vector.broadcast %cst_7 : f32 to vector<64x16xf32>
    %8 = arith.maximumf %6, %7 : vector<64x16xf32>
    %9 = arith.truncf %8 : vector<64x16xf32> to vector<64x16xbf16>
    %c0_8 = arith.constant 0 : index
    %c0_9 = arith.constant 0 : index
    %c0_10 = arith.constant 0 : index
    %c0_11 = arith.constant 0 : index
    %10 = vector.load %arg5[%c0_8, %c0_9, %c0_10, %c0_11] : memref<1x4x64x16xbf16, #tpu.memory_space<vmem>>, vector<1x1x64x16xbf16>
    %11 = vector.shape_cast %10 : vector<1x1x64x16xbf16> to vector<64x16xbf16>
    %12 = vector.shape_cast %9 : vector<64x16xbf16> to vector<1x1x64x16xbf16>
    tpu.vector_store %arg5[%c0_8, %c0_9, %c0_10, %c0_11], %12 {strides = array<i32>} : memref<1x4x64x16xbf16, #tpu.memory_space<vmem>>, vector<1x1x64x16xbf16>,
    %c0_12 = arith.constant 0 : index
    %c1 = arith.constant 1 : index
    %c0_13 = arith.constant 0 : index
    %c0_14 = arith.constant 0 : index
    %13 = vector.load %arg3[%c0_12, %c1, %c0_13, %c0_14] : memref<1x4x64x16xbf16, #tpu.memory_space<vmem>>, vector<1x1x64x16xbf16>
    %14 = vector.shape_cast %13 : vector<1x1x64x16xbf16> to vector<64x16xbf16>
    %cst_15 = arith.constant dense<0.000000e+00> : vector<64x16xf32>
    %15 = tpu.matmul %0, %14, %cst_15 {dimension_numbers = #tpu.dot_dimension_numbers<[1], [0], [0], [1], [0, 0, 1, 1], [], []>} : vector<64x64xbf16>, vector<64x16xbf16>, vector<64x16xf32> -> vector<64x16xf32>
    %16 = vector.broadcast %1 : vector<64x1xf32> to vector<64x16xf32>
    %17 = arith.addf %15, %16 : vector<64x16xf32>
    %cst_16 = arith.constant 0.000000e+00 : f32
    %18 = vector.broadcast %cst_16 : f32 to vector<64x16xf32>
    %19 = arith.maximumf %17, %18 : vector<64x16xf32>
    %20 = arith.truncf %19 : vector<64x16xf32> to vector<64x16xbf16>
    %c0_17 = arith.constant 0 : index
    %c1_18 = arith.constant 1 : index
    %c0_19 = arith.constant 0 : index
    %c0_20 = arith.constant 0 : index
    %21 = vector.load %arg5[%c0_17, %c1_18, %c0_19, %c0_20] : memref<1x4x64x16xbf16, #tpu.memory_space<vmem>>, vector<1x1x64x16xbf16>
    %22 = vector.shape_cast %21 : vector<1x1x64x16xbf16> to vector<64x16xbf16>
    %23 = vector.shape_cast %20 : vector<64x16xbf16> to vector<1x1x64x16xbf16>
    tpu.vector_store %arg5[%c0_17, %c1_18, %c0_19, %c0_20], %23 {strides = array<i32>} : memref<1x4x64x16xbf16, #tpu.memory_space<vmem>>, vector<1x1x64x16xbf16>,
    %24 = arith.maximumf %8, %19 : vector<64x16xf32>
    %c0_21 = arith.constant 0 : index
    %c2 = arith.constant 2 : index
    %c0_22 = arith.constant 0 : index
    %c0_23 = arith.constant 0 : index
    %25 = vector.load %arg3[%c0_21, %c2, %c0_22, %c0_23] : memref<1x4x64x16xbf16, #tpu.memory_space<vmem>>, vector<1x1x64x16xbf16>
    %26 = vector.shape_cast %25 : vector<1x1x64x16xbf16> to vector<64x16xbf16>
    %cst_24 = arith.constant dense<0.000000e+00> : vector<64x16xf32>
    %27 = tpu.matmul %0, %26, %cst_24 {dimension_numbers = #tpu.dot_dimension_numbers<[1], [0], [0], [1], [0, 0, 1, 1], [], []>} : vector<64x64xbf16>, vector<64x16xbf16>, vector<64x16xf32> -> vector<64x16xf32>
    %28 = vector.broadcast %1 : vector<64x1xf32> to vector<64x16xf32>
    %29 = arith.addf %27, %28 : vector<64x16xf32>
    %cst_25 = arith.constant 0.000000e+00 : f32
    %30 = vector.broadcast %cst_25 : f32 to vector<64x16xf32>
    %31 = arith.maximumf %29, %30 : vector<64x16xf32>
    %32 = arith.truncf %31 : vector<64x16xf32> to vector<64x16xbf16>
    %c0_26 = arith.constant 0 : index
    %c2_27 = arith.constant 2 : index
    %c0_28 = arith.constant 0 : index
    %c0_29 = arith.constant 0 : index
    %33 = vector.load %arg5[%c0_26, %c2_27, %c0_28, %c0_29] : memref<1x4x64x16xbf16, #tpu.memory_space<vmem>>, vector<1x1x64x16xbf16>
    %34 = vector.shape_cast %33 : vector<1x1x64x16xbf16> to vector<64x16xbf16>
    %35 = vector.shape_cast %32 : vector<64x16xbf16> to vector<1x1x64x16xbf16>
    tpu.vector_store %arg5[%c0_26, %c2_27, %c0_28, %c0_29], %35 {strides = array<i32>} : memref<1x4x64x16xbf16, #tpu.memory_space<vmem>>, vector<1x1x64x16xbf16>,
    %36 = arith.maximumf %24, %31 : vector<64x16xf32>
    %c0_30 = arith.constant 0 : index
    %c3 = arith.constant 3 : index
    %c0_31 = arith.constant 0 : index
    %c0_32 = arith.constant 0 : index
    %37 = vector.load %arg3[%c0_30, %c3, %c0_31, %c0_32] : memref<1x4x64x16xbf16, #tpu.memory_space<vmem>>, vector<1x1x64x16xbf16>
    %38 = vector.shape_cast %37 : vector<1x1x64x16xbf16> to vector<64x16xbf16>
    %cst_33 = arith.constant dense<0.000000e+00> : vector<64x16xf32>
    %39 = tpu.matmul %0, %38, %cst_33 {dimension_numbers = #tpu.dot_dimension_numbers<[1], [0], [0], [1], [0, 0, 1, 1], [], []>} : vector<64x64xbf16>, vector<64x16xbf16>, vector<64x16xf32> -> vector<64x16xf32>
    %40 = vector.broadcast %1 : vector<64x1xf32> to vector<64x16xf32>
    %41 = arith.addf %39, %40 : vector<64x16xf32>
    %cst_34 = arith.constant 0.000000e+00 : f32
    %42 = vector.broadcast %cst_34 : f32 to vector<64x16xf32>
    %43 = arith.maximumf %41, %42 : vector<64x16xf32>
    %44 = arith.truncf %43 : vector<64x16xf32> to vector<64x16xbf16>
    %c0_35 = arith.constant 0 : index
    %c3_36 = arith.constant 3 : index
    %c0_37 = arith.constant 0 : index
    %c0_38 = arith.constant 0 : index
    %45 = vector.load %arg5[%c0_35, %c3_36, %c0_37, %c0_38] : memref<1x4x64x16xbf16, #tpu.memory_space<vmem>>, vector<1x1x64x16xbf16>
    %46 = vector.shape_cast %45 : vector<1x1x64x16xbf16> to vector<64x16xbf16>
    %47 = vector.shape_cast %44 : vector<64x16xbf16> to vector<1x1x64x16xbf16>
    tpu.vector_store %arg5[%c0_35, %c3_36, %c0_37, %c0_38], %47 {strides = array<i32>} : memref<1x4x64x16xbf16, #tpu.memory_space<vmem>>, vector<1x1x64x16xbf16>,
    %48 = arith.maximumf %36, %43 : vector<64x16xf32>
    %49 = arith.truncf %48 : vector<64x16xf32> to vector<64x16xbf16>
    %c0_39 = arith.constant 0 : index
    %c0_40 = arith.constant 0 : index
    %c0_41 = arith.constant 0 : index
    %50 = vector.load %arg6[%c0_39, %c0_40, %c0_41] : memref<1x64x16xbf16, #tpu.memory_space<vmem>>, vector<1x64x16xbf16>
    %51 = vector.shape_cast %50 : vector<1x64x16xbf16> to vector<64x16xbf16>
    %52 = vector.shape_cast %49 : vector<64x16xbf16> to vector<1x64x16xbf16>
    tpu.vector_store %arg6[%c0_39, %c0_40, %c0_41], %52 {strides = array<i32>} : memref<1x64x16xbf16, #tpu.memory_space<vmem>>, vector<1x64x16xbf16>,
    return
  }
  func.func @transform_0(%arg0: i32, %arg1: i32) -> (i32, i32) {
    %c0_i32 = arith.constant 0 : i32
    %c0_i32_0 = arith.constant 0 : i32
    %c0_i32_1 = arith.constant 0 : i32
    return %c0_i32, %c0_i32_0 : i32, i32
  }
  func.func @transform_1(%arg0: i32, %arg1: i32) -> (i32, i32, i32, i32) {
    %c0_i32 = arith.constant 0 : i32
    %c0_i32_0 = arith.constant 0 : i32
    %c0_i32_1 = arith.constant 0 : i32
    return %arg0, %c0_i32, %c0_i32_0, %arg1 : i32, i32, i32, i32
  }
  func.func @transform_2(%arg0: i32, %arg1: i32) -> (i32, i32) {
    %c0_i32 = arith.constant 0 : i32
    %c0_i32_0 = arith.constant 0 : i32
    %c0_i32_1 = arith.constant 0 : i32
    return %c0_i32, %c0_i32_0 : i32, i32
  }
  func.func @transform_3(%arg0: i32, %arg1: i32) -> (i32, i32, i32, i32) {
    %c0_i32 = arith.constant 0 : i32
    %c0_i32_0 = arith.constant 0 : i32
    %c0_i32_1 = arith.constant 0 : i32
    return %arg0, %c0_i32, %c0_i32_0, %arg1 : i32, i32, i32, i32
  }
  func.func @transform_4(%arg0: i32, %arg1: i32) -> (i32, i32, i32) {
    %c0_i32 = arith.constant 0 : i32
    %c0_i32_0 = arith.constant 0 : i32
    return %arg0, %c0_i32, %arg1 : i32, i32, i32
  }
}

module attributes {stable_mosaic.version = 11 : i64} {
  func.func @_conv_max_kernel(%arg0: i32, %arg1: i32, %arg2: memref<128x64xbf16, #tpu.memory_space<vmem>>, %arg3: memref<1x4x64x16xbf16, #tpu.memory_space<vmem>>, %arg4: memref<128x1xf32, #tpu.memory_space<vmem>>, %arg5: memref<1x4x128x16xbf16, #tpu.memory_space<vmem>>, %arg6: memref<1x128x16xbf16, #tpu.memory_space<vmem>>) attributes {dimension_semantics = [#tpu.dimension_semantics<parallel>, #tpu.dimension_semantics<parallel>], iteration_bounds = array<i64: 2, 1>, scalar_prefetch = 0 : i64, scratch_operands = 0 : i64, tpu.core_type = #tpu.core_type<tc>, window_params = [{pipeline_mode = #tpu.pipeline_mode<synchronous>, transform_indices = @transform_0, window_bounds = array<i64: 128, 64>}, {transform_indices = @transform_1, window_bounds = array<i64: 1, 4, 64, 16>}, {pipeline_mode = #tpu.pipeline_mode<synchronous>, transform_indices = @transform_2, window_bounds = array<i64: 128, 1>}, {transform_indices = @transform_3, window_bounds = array<i64: 1, 4, 128, 16>}, {transform_indices = @transform_4, window_bounds = array<i64: 1, 128, 16>}]} {
    %c0 = arith.constant 0 : index
    %c0_0 = arith.constant 0 : index
    %0 = vector.load %arg2[%c0, %c0_0] : memref<128x64xbf16, #tpu.memory_space<vmem>>, vector<128x64xbf16>
    %c0_1 = arith.constant 0 : index
    %c0_2 = arith.constant 0 : index
    %1 = vector.load %arg4[%c0_1, %c0_2] : memref<128x1xf32, #tpu.memory_space<vmem>>, vector<128x1xf32>
    %c0_3 = arith.constant 0 : index
    %c0_4 = arith.constant 0 : index
    %c0_5 = arith.constant 0 : index
    %c0_6 = arith.constant 0 : index
    %2 = vector.load %arg3[%c0_3, %c0_4, %c0_5, %c0_6] : memref<1x4x64x16xbf16, #tpu.memory_space<vmem>>, vector<1x1x64x16xbf16>
    %3 = vector.shape_cast %2 : vector<1x1x64x16xbf16> to vector<64x16xbf16>
    %cst = arith.constant dense<0.000000e+00> : vector<128x16xf32>
    %4 = tpu.matmul %0, %3, %cst {dimension_numbers = #tpu.dot_dimension_numbers<[1], [0], [0], [1], [0, 0, 1, 1], [], []>} : vector<128x64xbf16>, vector<64x16xbf16>, vector<128x16xf32> -> vector<128x16xf32>
    %5 = vector.broadcast %1 : vector<128x1xf32> to vector<128x16xf32>
    %6 = arith.addf %4, %5 : vector<128x16xf32>
    %cst_7 = arith.constant 0.000000e+00 : f32
    %7 = vector.broadcast %cst_7 : f32 to vector<128x16xf32>
    %8 = arith.maximumf %6, %7 : vector<128x16xf32>
    %9 = arith.truncf %8 : vector<128x16xf32> to vector<128x16xbf16>
    %c0_8 = arith.constant 0 : index
    %c0_9 = arith.constant 0 : index
    %c0_10 = arith.constant 0 : index
    %c0_11 = arith.constant 0 : index
    %10 = vector.load %arg5[%c0_8, %c0_9, %c0_10, %c0_11] : memref<1x4x128x16xbf16, #tpu.memory_space<vmem>>, vector<1x1x128x16xbf16>
    %11 = vector.shape_cast %10 : vector<1x1x128x16xbf16> to vector<128x16xbf16>
    %12 = vector.shape_cast %9 : vector<128x16xbf16> to vector<1x1x128x16xbf16>
    tpu.vector_store %arg5[%c0_8, %c0_9, %c0_10, %c0_11], %12 {strides = array<i32>} : memref<1x4x128x16xbf16, #tpu.memory_space<vmem>>, vector<1x1x128x16xbf16>,
    %c0_12 = arith.constant 0 : index
    %c1 = arith.constant 1 : index
    %c0_13 = arith.constant 0 : index
    %c0_14 = arith.constant 0 : index
    %13 = vector.load %arg3[%c0_12, %c1, %c0_13, %c0_14] : memref<1x4x64x16xbf16, #tpu.memory_space<vmem>>, vector<1x1x64x16xbf16>
    %14 = vector.shape_cast %13 : vector<1x1x64x16xbf16> to vector<64x16xbf16>
    %cst_15 = arith.constant dense<0.000000e+00> : vector<128x16xf32>
    %15 = tpu.matmul %0, %14, %cst_15 {dimension_numbers = #tpu.dot_dimension_numbers<[1], [0], [0], [1], [0, 0, 1, 1], [], []>} : vector<128x64xbf16>, vector<64x16xbf16>, vector<128x16xf32> -> vector<128x16xf32>
    %16 = vector.broadcast %1 : vector<128x1xf32> to vector<128x16xf32>
    %17 = arith.addf %15, %16 : vector<128x16xf32>
    %cst_16 = arith.constant 0.000000e+00 : f32
    %18 = vector.broadcast %cst_16 : f32 to vector<128x16xf32>
    %19 = arith.maximumf %17, %18 : vector<128x16xf32>
    %20 = arith.truncf %19 : vector<128x16xf32> to vector<128x16xbf16>
    %c0_17 = arith.constant 0 : index
    %c1_18 = arith.constant 1 : index
    %c0_19 = arith.constant 0 : index
    %c0_20 = arith.constant 0 : index
    %21 = vector.load %arg5[%c0_17, %c1_18, %c0_19, %c0_20] : memref<1x4x128x16xbf16, #tpu.memory_space<vmem>>, vector<1x1x128x16xbf16>
    %22 = vector.shape_cast %21 : vector<1x1x128x16xbf16> to vector<128x16xbf16>
    %23 = vector.shape_cast %20 : vector<128x16xbf16> to vector<1x1x128x16xbf16>
    tpu.vector_store %arg5[%c0_17, %c1_18, %c0_19, %c0_20], %23 {strides = array<i32>} : memref<1x4x128x16xbf16, #tpu.memory_space<vmem>>, vector<1x1x128x16xbf16>,
    %24 = arith.maximumf %8, %19 : vector<128x16xf32>
    %c0_21 = arith.constant 0 : index
    %c2 = arith.constant 2 : index
    %c0_22 = arith.constant 0 : index
    %c0_23 = arith.constant 0 : index
    %25 = vector.load %arg3[%c0_21, %c2, %c0_22, %c0_23] : memref<1x4x64x16xbf16, #tpu.memory_space<vmem>>, vector<1x1x64x16xbf16>
    %26 = vector.shape_cast %25 : vector<1x1x64x16xbf16> to vector<64x16xbf16>
    %cst_24 = arith.constant dense<0.000000e+00> : vector<128x16xf32>
    %27 = tpu.matmul %0, %26, %cst_24 {dimension_numbers = #tpu.dot_dimension_numbers<[1], [0], [0], [1], [0, 0, 1, 1], [], []>} : vector<128x64xbf16>, vector<64x16xbf16>, vector<128x16xf32> -> vector<128x16xf32>
    %28 = vector.broadcast %1 : vector<128x1xf32> to vector<128x16xf32>
    %29 = arith.addf %27, %28 : vector<128x16xf32>
    %cst_25 = arith.constant 0.000000e+00 : f32
    %30 = vector.broadcast %cst_25 : f32 to vector<128x16xf32>
    %31 = arith.maximumf %29, %30 : vector<128x16xf32>
    %32 = arith.truncf %31 : vector<128x16xf32> to vector<128x16xbf16>
    %c0_26 = arith.constant 0 : index
    %c2_27 = arith.constant 2 : index
    %c0_28 = arith.constant 0 : index
    %c0_29 = arith.constant 0 : index
    %33 = vector.load %arg5[%c0_26, %c2_27, %c0_28, %c0_29] : memref<1x4x128x16xbf16, #tpu.memory_space<vmem>>, vector<1x1x128x16xbf16>
    %34 = vector.shape_cast %33 : vector<1x1x128x16xbf16> to vector<128x16xbf16>
    %35 = vector.shape_cast %32 : vector<128x16xbf16> to vector<1x1x128x16xbf16>
    tpu.vector_store %arg5[%c0_26, %c2_27, %c0_28, %c0_29], %35 {strides = array<i32>} : memref<1x4x128x16xbf16, #tpu.memory_space<vmem>>, vector<1x1x128x16xbf16>,
    %36 = arith.maximumf %24, %31 : vector<128x16xf32>
    %c0_30 = arith.constant 0 : index
    %c3 = arith.constant 3 : index
    %c0_31 = arith.constant 0 : index
    %c0_32 = arith.constant 0 : index
    %37 = vector.load %arg3[%c0_30, %c3, %c0_31, %c0_32] : memref<1x4x64x16xbf16, #tpu.memory_space<vmem>>, vector<1x1x64x16xbf16>
    %38 = vector.shape_cast %37 : vector<1x1x64x16xbf16> to vector<64x16xbf16>
    %cst_33 = arith.constant dense<0.000000e+00> : vector<128x16xf32>
    %39 = tpu.matmul %0, %38, %cst_33 {dimension_numbers = #tpu.dot_dimension_numbers<[1], [0], [0], [1], [0, 0, 1, 1], [], []>} : vector<128x64xbf16>, vector<64x16xbf16>, vector<128x16xf32> -> vector<128x16xf32>
    %40 = vector.broadcast %1 : vector<128x1xf32> to vector<128x16xf32>
    %41 = arith.addf %39, %40 : vector<128x16xf32>
    %cst_34 = arith.constant 0.000000e+00 : f32
    %42 = vector.broadcast %cst_34 : f32 to vector<128x16xf32>
    %43 = arith.maximumf %41, %42 : vector<128x16xf32>
    %44 = arith.truncf %43 : vector<128x16xf32> to vector<128x16xbf16>
    %c0_35 = arith.constant 0 : index
    %c3_36 = arith.constant 3 : index
    %c0_37 = arith.constant 0 : index
    %c0_38 = arith.constant 0 : index
    %45 = vector.load %arg5[%c0_35, %c3_36, %c0_37, %c0_38] : memref<1x4x128x16xbf16, #tpu.memory_space<vmem>>, vector<1x1x128x16xbf16>
    %46 = vector.shape_cast %45 : vector<1x1x128x16xbf16> to vector<128x16xbf16>
    %47 = vector.shape_cast %44 : vector<128x16xbf16> to vector<1x1x128x16xbf16>
    tpu.vector_store %arg5[%c0_35, %c3_36, %c0_37, %c0_38], %47 {strides = array<i32>} : memref<1x4x128x16xbf16, #tpu.memory_space<vmem>>, vector<1x1x128x16xbf16>,
    %48 = arith.maximumf %36, %43 : vector<128x16xf32>
    %49 = arith.truncf %48 : vector<128x16xf32> to vector<128x16xbf16>
    %c0_39 = arith.constant 0 : index
    %c0_40 = arith.constant 0 : index
    %c0_41 = arith.constant 0 : index
    %50 = vector.load %arg6[%c0_39, %c0_40, %c0_41] : memref<1x128x16xbf16, #tpu.memory_space<vmem>>, vector<1x128x16xbf16>
    %51 = vector.shape_cast %50 : vector<1x128x16xbf16> to vector<128x16xbf16>
    %52 = vector.shape_cast %49 : vector<128x16xbf16> to vector<1x128x16xbf16>
    tpu.vector_store %arg6[%c0_39, %c0_40, %c0_41], %52 {strides = array<i32>} : memref<1x128x16xbf16, #tpu.memory_space<vmem>>, vector<1x128x16xbf16>,
    return
  }
  func.func @transform_0(%arg0: i32, %arg1: i32) -> (i32, i32) {
    %c0_i32 = arith.constant 0 : i32
    %c0_i32_0 = arith.constant 0 : i32
    %c0_i32_1 = arith.constant 0 : i32
    return %c0_i32, %c0_i32_0 : i32, i32
  }
  func.func @transform_1(%arg0: i32, %arg1: i32) -> (i32, i32, i32, i32) {
    %c0_i32 = arith.constant 0 : i32
    %c0_i32_0 = arith.constant 0 : i32
    %c0_i32_1 = arith.constant 0 : i32
    return %arg0, %c0_i32, %c0_i32_0, %arg1 : i32, i32, i32, i32
  }
  func.func @transform_2(%arg0: i32, %arg1: i32) -> (i32, i32) {
    %c0_i32 = arith.constant 0 : i32
    %c0_i32_0 = arith.constant 0 : i32
    %c0_i32_1 = arith.constant 0 : i32
    return %c0_i32, %c0_i32_0 : i32, i32
  }
  func.func @transform_3(%arg0: i32, %arg1: i32) -> (i32, i32, i32, i32) {
    %c0_i32 = arith.constant 0 : i32
    %c0_i32_0 = arith.constant 0 : i32
    %c0_i32_1 = arith.constant 0 : i32
    return %arg0, %c0_i32, %c0_i32_0, %arg1 : i32, i32, i32, i32
  }
  func.func @transform_4(%arg0: i32, %arg1: i32) -> (i32, i32, i32) {
    %c0_i32 = arith.constant 0 : i32
    %c0_i32_0 = arith.constant 0 : i32
    return %arg0, %c0_i32, %arg1 : i32, i32, i32
  }
}

module attributes {stable_mosaic.version = 11 : i64} {
  func.func @_conv_max_kernel(%arg0: i32, %arg1: i32, %arg2: memref<256x128xbf16, #tpu.memory_space<vmem>>, %arg3: memref<1x4x128x16xbf16, #tpu.memory_space<vmem>>, %arg4: memref<256x1xf32, #tpu.memory_space<vmem>>, %arg5: memref<1x256x16xbf16, #tpu.memory_space<vmem>>) attributes {dimension_semantics = [#tpu.dimension_semantics<parallel>, #tpu.dimension_semantics<parallel>], iteration_bounds = array<i64: 2, 1>, scalar_prefetch = 0 : i64, scratch_operands = 0 : i64, tpu.core_type = #tpu.core_type<tc>, window_params = [{pipeline_mode = #tpu.pipeline_mode<synchronous>, transform_indices = @transform_0, window_bounds = array<i64: 256, 128>}, {transform_indices = @transform_1, window_bounds = array<i64: 1, 4, 128, 16>}, {pipeline_mode = #tpu.pipeline_mode<synchronous>, transform_indices = @transform_2, window_bounds = array<i64: 256, 1>}, {transform_indices = @transform_3, window_bounds = array<i64: 1, 256, 16>}]} {
    %c0 = arith.constant 0 : index
    %c0_0 = arith.constant 0 : index
    %0 = vector.load %arg2[%c0, %c0_0] : memref<256x128xbf16, #tpu.memory_space<vmem>>, vector<256x128xbf16>
    %c0_1 = arith.constant 0 : index
    %c0_2 = arith.constant 0 : index
    %1 = vector.load %arg4[%c0_1, %c0_2] : memref<256x1xf32, #tpu.memory_space<vmem>>, vector<256x1xf32>
    %c0_3 = arith.constant 0 : index
    %c0_4 = arith.constant 0 : index
    %c0_5 = arith.constant 0 : index
    %c0_6 = arith.constant 0 : index
    %2 = vector.load %arg3[%c0_3, %c0_4, %c0_5, %c0_6] : memref<1x4x128x16xbf16, #tpu.memory_space<vmem>>, vector<1x1x128x16xbf16>
    %3 = vector.shape_cast %2 : vector<1x1x128x16xbf16> to vector<128x16xbf16>
    %cst = arith.constant dense<0.000000e+00> : vector<256x16xf32>
    %4 = tpu.matmul %0, %3, %cst {dimension_numbers = #tpu.dot_dimension_numbers<[1], [0], [0], [1], [0, 0, 1, 1], [], []>} : vector<256x128xbf16>, vector<128x16xbf16>, vector<256x16xf32> -> vector<256x16xf32>
    %5 = vector.broadcast %1 : vector<256x1xf32> to vector<256x16xf32>
    %6 = arith.addf %4, %5 : vector<256x16xf32>
    %cst_7 = arith.constant 0.000000e+00 : f32
    %7 = vector.broadcast %cst_7 : f32 to vector<256x16xf32>
    %8 = arith.maximumf %6, %7 : vector<256x16xf32>
    %c0_8 = arith.constant 0 : index
    %c1 = arith.constant 1 : index
    %c0_9 = arith.constant 0 : index
    %c0_10 = arith.constant 0 : index
    %9 = vector.load %arg3[%c0_8, %c1, %c0_9, %c0_10] : memref<1x4x128x16xbf16, #tpu.memory_space<vmem>>, vector<1x1x128x16xbf16>
    %10 = vector.shape_cast %9 : vector<1x1x128x16xbf16> to vector<128x16xbf16>
    %cst_11 = arith.constant dense<0.000000e+00> : vector<256x16xf32>
    %11 = tpu.matmul %0, %10, %cst_11 {dimension_numbers = #tpu.dot_dimension_numbers<[1], [0], [0], [1], [0, 0, 1, 1], [], []>} : vector<256x128xbf16>, vector<128x16xbf16>, vector<256x16xf32> -> vector<256x16xf32>
    %12 = vector.broadcast %1 : vector<256x1xf32> to vector<256x16xf32>
    %13 = arith.addf %11, %12 : vector<256x16xf32>
    %cst_12 = arith.constant 0.000000e+00 : f32
    %14 = vector.broadcast %cst_12 : f32 to vector<256x16xf32>
    %15 = arith.maximumf %13, %14 : vector<256x16xf32>
    %16 = arith.maximumf %8, %15 : vector<256x16xf32>
    %c0_13 = arith.constant 0 : index
    %c2 = arith.constant 2 : index
    %c0_14 = arith.constant 0 : index
    %c0_15 = arith.constant 0 : index
    %17 = vector.load %arg3[%c0_13, %c2, %c0_14, %c0_15] : memref<1x4x128x16xbf16, #tpu.memory_space<vmem>>, vector<1x1x128x16xbf16>
    %18 = vector.shape_cast %17 : vector<1x1x128x16xbf16> to vector<128x16xbf16>
    %cst_16 = arith.constant dense<0.000000e+00> : vector<256x16xf32>
    %19 = tpu.matmul %0, %18, %cst_16 {dimension_numbers = #tpu.dot_dimension_numbers<[1], [0], [0], [1], [0, 0, 1, 1], [], []>} : vector<256x128xbf16>, vector<128x16xbf16>, vector<256x16xf32> -> vector<256x16xf32>
    %20 = vector.broadcast %1 : vector<256x1xf32> to vector<256x16xf32>
    %21 = arith.addf %19, %20 : vector<256x16xf32>
    %cst_17 = arith.constant 0.000000e+00 : f32
    %22 = vector.broadcast %cst_17 : f32 to vector<256x16xf32>
    %23 = arith.maximumf %21, %22 : vector<256x16xf32>
    %24 = arith.maximumf %16, %23 : vector<256x16xf32>
    %c0_18 = arith.constant 0 : index
    %c3 = arith.constant 3 : index
    %c0_19 = arith.constant 0 : index
    %c0_20 = arith.constant 0 : index
    %25 = vector.load %arg3[%c0_18, %c3, %c0_19, %c0_20] : memref<1x4x128x16xbf16, #tpu.memory_space<vmem>>, vector<1x1x128x16xbf16>
    %26 = vector.shape_cast %25 : vector<1x1x128x16xbf16> to vector<128x16xbf16>
    %cst_21 = arith.constant dense<0.000000e+00> : vector<256x16xf32>
    %27 = tpu.matmul %0, %26, %cst_21 {dimension_numbers = #tpu.dot_dimension_numbers<[1], [0], [0], [1], [0, 0, 1, 1], [], []>} : vector<256x128xbf16>, vector<128x16xbf16>, vector<256x16xf32> -> vector<256x16xf32>
    %28 = vector.broadcast %1 : vector<256x1xf32> to vector<256x16xf32>
    %29 = arith.addf %27, %28 : vector<256x16xf32>
    %cst_22 = arith.constant 0.000000e+00 : f32
    %30 = vector.broadcast %cst_22 : f32 to vector<256x16xf32>
    %31 = arith.maximumf %29, %30 : vector<256x16xf32>
    %32 = arith.maximumf %24, %31 : vector<256x16xf32>
    %33 = arith.truncf %32 : vector<256x16xf32> to vector<256x16xbf16>
    %c0_23 = arith.constant 0 : index
    %c0_24 = arith.constant 0 : index
    %c0_25 = arith.constant 0 : index
    %34 = vector.load %arg5[%c0_23, %c0_24, %c0_25] : memref<1x256x16xbf16, #tpu.memory_space<vmem>>, vector<1x256x16xbf16>
    %35 = vector.shape_cast %34 : vector<1x256x16xbf16> to vector<256x16xbf16>
    %36 = vector.shape_cast %33 : vector<256x16xbf16> to vector<1x256x16xbf16>
    tpu.vector_store %arg5[%c0_23, %c0_24, %c0_25], %36 {strides = array<i32>} : memref<1x256x16xbf16, #tpu.memory_space<vmem>>, vector<1x256x16xbf16>,
    return
  }
  func.func @transform_0(%arg0: i32, %arg1: i32) -> (i32, i32) {
    %c0_i32 = arith.constant 0 : i32
    %c0_i32_0 = arith.constant 0 : i32
    %c0_i32_1 = arith.constant 0 : i32
    return %c0_i32, %c0_i32_0 : i32, i32
  }
  func.func @transform_1(%arg0: i32, %arg1: i32) -> (i32, i32, i32, i32) {
    %c0_i32 = arith.constant 0 : i32
    %c0_i32_0 = arith.constant 0 : i32
    %c0_i32_1 = arith.constant 0 : i32
    return %arg0, %c0_i32, %c0_i32_0, %arg1 : i32, i32, i32, i32
  }
  func.func @transform_2(%arg0: i32, %arg1: i32) -> (i32, i32) {
    %c0_i32 = arith.constant 0 : i32
    %c0_i32_0 = arith.constant 0 : i32
    %c0_i32_1 = arith.constant 0 : i32
    return %c0_i32, %c0_i32_0 : i32, i32
  }
  func.func @transform_3(%arg0: i32, %arg1: i32) -> (i32, i32, i32) {
    %c0_i32 = arith.constant 0 : i32
    %c0_i32_0 = arith.constant 0 : i32
    return %arg0, %c0_i32, %arg1 : i32, i32, i32
  }
}

module attributes {stable_mosaic.version = 11 : i64} {
  func.func @_conv_kernel(%arg0: i32, %arg1: i32, %arg2: memref<64x512xbf16, #tpu.memory_space<vmem>>, %arg3: memref<1x512x16xbf16, #tpu.memory_space<vmem>>, %arg4: memref<64x1xf32, #tpu.memory_space<vmem>>, %arg5: memref<1x64x16xf32, #tpu.memory_space<vmem>>) attributes {dimension_semantics = [#tpu.dimension_semantics<parallel>, #tpu.dimension_semantics<parallel>], iteration_bounds = array<i64: 2, 1>, scalar_prefetch = 0 : i64, scratch_operands = 0 : i64, tpu.core_type = #tpu.core_type<tc>, window_params = [{pipeline_mode = #tpu.pipeline_mode<synchronous>, transform_indices = @transform_0, window_bounds = array<i64: 64, 512>}, {transform_indices = @transform_1, window_bounds = array<i64: 1, 512, 16>}, {pipeline_mode = #tpu.pipeline_mode<synchronous>, transform_indices = @transform_2, window_bounds = array<i64: 64, 1>}, {transform_indices = @transform_3, window_bounds = array<i64: 1, 64, 16>}]} {
    %c0 = arith.constant 0 : index
    %c0_0 = arith.constant 0 : index
    %0 = vector.load %arg2[%c0, %c0_0] : memref<64x512xbf16, #tpu.memory_space<vmem>>, vector<64x512xbf16>
    %c0_1 = arith.constant 0 : index
    %c0_2 = arith.constant 0 : index
    %c0_3 = arith.constant 0 : index
    %1 = vector.load %arg3[%c0_1, %c0_2, %c0_3] : memref<1x512x16xbf16, #tpu.memory_space<vmem>>, vector<1x512x16xbf16>
    %2 = vector.shape_cast %1 : vector<1x512x16xbf16> to vector<512x16xbf16>
    %cst = arith.constant dense<0.000000e+00> : vector<64x16xf32>
    %3 = tpu.matmul %0, %2, %cst {dimension_numbers = #tpu.dot_dimension_numbers<[1], [0], [0], [1], [0, 0, 1, 1], [], []>} : vector<64x512xbf16>, vector<512x16xbf16>, vector<64x16xf32> -> vector<64x16xf32>
    %c0_4 = arith.constant 0 : index
    %c0_5 = arith.constant 0 : index
    %4 = vector.load %arg4[%c0_4, %c0_5] : memref<64x1xf32, #tpu.memory_space<vmem>>, vector<64x1xf32>
    %5 = vector.broadcast %4 : vector<64x1xf32> to vector<64x16xf32>
    %6 = arith.addf %3, %5 : vector<64x16xf32>
    %cst_6 = arith.constant 0.000000e+00 : f32
    %7 = vector.broadcast %cst_6 : f32 to vector<64x16xf32>
    %8 = arith.maximumf %6, %7 : vector<64x16xf32>
    %c0_7 = arith.constant 0 : index
    %c0_8 = arith.constant 0 : index
    %c0_9 = arith.constant 0 : index
    %9 = vector.load %arg5[%c0_7, %c0_8, %c0_9] : memref<1x64x16xf32, #tpu.memory_space<vmem>>, vector<1x64x16xf32>
    %10 = vector.shape_cast %9 : vector<1x64x16xf32> to vector<64x16xf32>
    %11 = vector.shape_cast %8 : vector<64x16xf32> to vector<1x64x16xf32>
    tpu.vector_store %arg5[%c0_7, %c0_8, %c0_9], %11 {strides = array<i32>} : memref<1x64x16xf32, #tpu.memory_space<vmem>>, vector<1x64x16xf32>,
    return
  }
  func.func @transform_0(%arg0: i32, %arg1: i32) -> (i32, i32) {
    %c0_i32 = arith.constant 0 : i32
    %c0_i32_0 = arith.constant 0 : i32
    %c0_i32_1 = arith.constant 0 : i32
    return %c0_i32, %c0_i32_0 : i32, i32
  }
  func.func @transform_1(%arg0: i32, %arg1: i32) -> (i32, i32, i32) {
    %c0_i32 = arith.constant 0 : i32
    %c0_i32_0 = arith.constant 0 : i32
    return %arg0, %c0_i32, %arg1 : i32, i32, i32
  }
  func.func @transform_2(%arg0: i32, %arg1: i32) -> (i32, i32) {
    %c0_i32 = arith.constant 0 : i32
    %c0_i32_0 = arith.constant 0 : i32
    %c0_i32_1 = arith.constant 0 : i32
    return %c0_i32, %c0_i32_0 : i32, i32
  }
  func.func @transform_3(%arg0: i32, %arg1: i32) -> (i32, i32, i32) {
    %c0_i32 = arith.constant 0 : i32
    %c0_i32_0 = arith.constant 0 : i32
    return %arg0, %c0_i32, %arg1 : i32, i32, i32
  }
}

module attributes {stable_mosaic.version = 11 : i64} {
  func.func @_layernorm_kernel(%arg0: i32, %arg1: memref<32x64xf32, #tpu.memory_space<vmem>>, %arg2: memref<1x64xf32, #tpu.memory_space<vmem>>, %arg3: memref<1x64xf32, #tpu.memory_space<vmem>>, %arg4: memref<32x64xf32, #tpu.memory_space<vmem>>) attributes {dimension_semantics = [#tpu.dimension_semantics<parallel>], iteration_bounds = array<i64: 1>, scalar_prefetch = 0 : i64, scratch_operands = 0 : i64, tpu.core_type = #tpu.core_type<tc>, window_params = [{transform_indices = @transform_0, window_bounds = array<i64: 32, 64>}, {pipeline_mode = #tpu.pipeline_mode<synchronous>, transform_indices = @transform_1, window_bounds = array<i64: 1, 64>}, {pipeline_mode = #tpu.pipeline_mode<synchronous>, transform_indices = @transform_2, window_bounds = array<i64: 1, 64>}, {transform_indices = @transform_3, window_bounds = array<i64: 32, 64>}]} {
    %c0 = arith.constant 0 : index
    %c0_0 = arith.constant 0 : index
    %0 = vector.load %arg1[%c0, %c0_0] : memref<32x64xf32, #tpu.memory_space<vmem>>, vector<32x64xf32>
    %cst = arith.constant dense<0.000000e+00> : vector<32xf32>
    %1 = vector.multi_reduction <add>, %0, %cst [1] : vector<32x64xf32> to vector<32xf32>
    %2 = vector.shape_cast %1 : vector<32xf32> to vector<32x1xf32>
    %cst_1 = arith.constant 6.400000e+01 : f32
    %3 = vector.broadcast %cst_1 : f32 to vector<32x1xf32>
    %4 = arith.divf %2, %3 : vector<32x1xf32>
    %5 = vector.broadcast %4 : vector<32x1xf32> to vector<32x64xf32>
    %6 = arith.subf %0, %5 : vector<32x64xf32>
    %7 = arith.mulf %6, %6 : vector<32x64xf32>
    %cst_2 = arith.constant dense<0.000000e+00> : vector<32xf32>
    %8 = vector.multi_reduction <add>, %7, %cst_2 [1] : vector<32x64xf32> to vector<32xf32>
    %9 = vector.shape_cast %8 : vector<32xf32> to vector<32x1xf32>
    %cst_3 = arith.constant 6.300000e+01 : f32
    %10 = vector.broadcast %cst_3 : f32 to vector<32x1xf32>
    %11 = arith.divf %9, %10 : vector<32x1xf32>
    %c0_4 = arith.constant 0 : index
    %c0_5 = arith.constant 0 : index
    %12 = vector.load %arg2[%c0_4, %c0_5] : memref<1x64xf32, #tpu.memory_space<vmem>>, vector<1x64xf32>
    %13 = vector.broadcast %12 : vector<1x64xf32> to vector<32x64xf32>
    %14 = arith.mulf %13, %6 : vector<32x64xf32>
    %15 = math.sqrt %11 : vector<32x1xf32>
    %cst_6 = arith.constant 9.99999997E-7 : f32
    %16 = vector.broadcast %cst_6 : f32 to vector<32x1xf32>
    %17 = arith.addf %15, %16 : vector<32x1xf32>
    %18 = vector.broadcast %17 : vector<32x1xf32> to vector<32x64xf32>
    %19 = arith.divf %14, %18 : vector<32x64xf32>
    %c0_7 = arith.constant 0 : index
    %c0_8 = arith.constant 0 : index
    %20 = vector.load %arg3[%c0_7, %c0_8] : memref<1x64xf32, #tpu.memory_space<vmem>>, vector<1x64xf32>
    %21 = vector.broadcast %20 : vector<1x64xf32> to vector<32x64xf32>
    %22 = arith.addf %19, %21 : vector<32x64xf32>
    %c0_9 = arith.constant 0 : index
    %c0_10 = arith.constant 0 : index
    %23 = vector.load %arg4[%c0_9, %c0_10] : memref<32x64xf32, #tpu.memory_space<vmem>>, vector<32x64xf32>
    tpu.vector_store %arg4[%c0_9, %c0_10], %22 {strides = array<i32>} : memref<32x64xf32, #tpu.memory_space<vmem>>, vector<32x64xf32>,
    return
  }
  func.func @transform_0(%arg0: i32) -> (i32, i32) {
    %c0_i32 = arith.constant 0 : i32
    %c0_i32_0 = arith.constant 0 : i32
    return %arg0, %c0_i32 : i32, i32
  }
  func.func @transform_1(%arg0: i32) -> (i32, i32) {
    %c0_i32 = arith.constant 0 : i32
    %c0_i32_0 = arith.constant 0 : i32
    %c0_i32_1 = arith.constant 0 : i32
    return %c0_i32, %c0_i32_0 : i32, i32
  }
  func.func @transform_2(%arg0: i32) -> (i32, i32) {
    %c0_i32 = arith.constant 0 : i32
    %c0_i32_0 = arith.constant 0 : i32
    %c0_i32_1 = arith.constant 0 : i32
    return %c0_i32, %c0_i32_0 : i32, i32
  }
  func.func @transform_3(%arg0: i32) -> (i32, i32) {
    %c0_i32 = arith.constant 0 : i32
    %c0_i32_0 = arith.constant 0 : i32
    return %arg0, %c0_i32 : i32, i32
  }
}

module attributes {stable_mosaic.version = 11 : i64} {
  func.func @_linear_kernel(%arg0: i32, %arg1: memref<32x64xf32, #tpu.memory_space<vmem>>, %arg2: memref<64x192xbf16, #tpu.memory_space<vmem>>, %arg3: memref<1x192xf32, #tpu.memory_space<vmem>>, %arg4: memref<32x192xf32, #tpu.memory_space<vmem>>) attributes {dimension_semantics = [#tpu.dimension_semantics<parallel>], iteration_bounds = array<i64: 1>, scalar_prefetch = 0 : i64, scratch_operands = 0 : i64, tpu.core_type = #tpu.core_type<tc>, window_params = [{transform_indices = @transform_0, window_bounds = array<i64: 32, 64>}, {pipeline_mode = #tpu.pipeline_mode<synchronous>, transform_indices = @transform_1, window_bounds = array<i64: 64, 192>}, {pipeline_mode = #tpu.pipeline_mode<synchronous>, transform_indices = @transform_2, window_bounds = array<i64: 1, 192>}, {transform_indices = @transform_3, window_bounds = array<i64: 32, 192>}]} {
    %c0 = arith.constant 0 : index
    %c0_0 = arith.constant 0 : index
    %0 = vector.load %arg1[%c0, %c0_0] : memref<32x64xf32, #tpu.memory_space<vmem>>, vector<32x64xf32>
    %1 = arith.truncf %0 : vector<32x64xf32> to vector<32x64xbf16>
    %c0_1 = arith.constant 0 : index
    %c0_2 = arith.constant 0 : index
    %2 = vector.load %arg2[%c0_1, %c0_2] : memref<64x192xbf16, #tpu.memory_space<vmem>>, vector<64x192xbf16>
    %cst = arith.constant dense<0.000000e+00> : vector<32x192xf32>
    %3 = tpu.matmul %1, %2, %cst {dimension_numbers = #tpu.dot_dimension_numbers<[1], [0], [0], [1], [0, 0, 1, 1], [], []>} : vector<32x64xbf16>, vector<64x192xbf16>, vector<32x192xf32> -> vector<32x192xf32>
    %c0_3 = arith.constant 0 : index
    %c0_4 = arith.constant 0 : index
    %4 = vector.load %arg3[%c0_3, %c0_4] : memref<1x192xf32, #tpu.memory_space<vmem>>, vector<1x192xf32>
    %5 = vector.broadcast %4 : vector<1x192xf32> to vector<32x192xf32>
    %6 = arith.addf %3, %5 : vector<32x192xf32>
    %c0_5 = arith.constant 0 : index
    %c0_6 = arith.constant 0 : index
    %7 = vector.load %arg4[%c0_5, %c0_6] : memref<32x192xf32, #tpu.memory_space<vmem>>, vector<32x192xf32>
    tpu.vector_store %arg4[%c0_5, %c0_6], %6 {strides = array<i32>} : memref<32x192xf32, #tpu.memory_space<vmem>>, vector<32x192xf32>,
    return
  }
  func.func @transform_0(%arg0: i32) -> (i32, i32) {
    %c0_i32 = arith.constant 0 : i32
    %c0_i32_0 = arith.constant 0 : i32
    return %arg0, %c0_i32 : i32, i32
  }
  func.func @transform_1(%arg0: i32) -> (i32, i32) {
    %c0_i32 = arith.constant 0 : i32
    %c0_i32_0 = arith.constant 0 : i32
    %c0_i32_1 = arith.constant 0 : i32
    return %c0_i32, %c0_i32_0 : i32, i32
  }
  func.func @transform_2(%arg0: i32) -> (i32, i32) {
    %c0_i32 = arith.constant 0 : i32
    %c0_i32_0 = arith.constant 0 : i32
    %c0_i32_1 = arith.constant 0 : i32
    return %c0_i32, %c0_i32_0 : i32, i32
  }
  func.func @transform_3(%arg0: i32) -> (i32, i32) {
    %c0_i32 = arith.constant 0 : i32
    %c0_i32_0 = arith.constant 0 : i32
    return %arg0, %c0_i32 : i32, i32
  }
}

module attributes {stable_mosaic.version = 11 : i64} {
  func.func @_attention_kernel(%arg0: i32, %arg1: memref<1x16x16xf32, #tpu.memory_space<vmem>>, %arg2: memref<1x16x16xf32, #tpu.memory_space<vmem>>, %arg3: memref<1x16x16xf32, #tpu.memory_space<vmem>>, %arg4: memref<1x16x16xf32, #tpu.memory_space<vmem>>) attributes {dimension_semantics = [#tpu.dimension_semantics<parallel>], iteration_bounds = array<i64: 8>, scalar_prefetch = 0 : i64, scratch_operands = 0 : i64, tpu.core_type = #tpu.core_type<tc>, window_params = [{transform_indices = @transform_0, window_bounds = array<i64: 1, 16, 16>}, {transform_indices = @transform_1, window_bounds = array<i64: 1, 16, 16>}, {transform_indices = @transform_2, window_bounds = array<i64: 1, 16, 16>}, {transform_indices = @transform_3, window_bounds = array<i64: 1, 16, 16>}]} {
    %c0 = arith.constant 0 : index
    %c0_0 = arith.constant 0 : index
    %c0_1 = arith.constant 0 : index
    %0 = vector.load %arg1[%c0, %c0_0, %c0_1] : memref<1x16x16xf32, #tpu.memory_space<vmem>>, vector<1x16x16xf32>
    %1 = vector.shape_cast %0 : vector<1x16x16xf32> to vector<16x16xf32>
    %2 = arith.truncf %1 : vector<16x16xf32> to vector<16x16xbf16>
    %c0_2 = arith.constant 0 : index
    %c0_3 = arith.constant 0 : index
    %c0_4 = arith.constant 0 : index
    %3 = vector.load %arg2[%c0_2, %c0_3, %c0_4] : memref<1x16x16xf32, #tpu.memory_space<vmem>>, vector<1x16x16xf32>
    %4 = vector.shape_cast %3 : vector<1x16x16xf32> to vector<16x16xf32>
    %5 = arith.truncf %4 : vector<16x16xf32> to vector<16x16xbf16>
    %cst = arith.constant dense<0.000000e+00> : vector<16x16xf32>
    %6 = tpu.matmul %2, %5, %cst {dimension_numbers = #tpu.dot_dimension_numbers<[1], [1], [0], [0], [0, 0, 1, 0], [], []>} : vector<16x16xbf16>, vector<16x16xbf16>, vector<16x16xf32> -> vector<16x16xf32>
    %cst_5 = arith.constant 2.500000e-01 : f32
    %7 = vector.broadcast %cst_5 : f32 to vector<16x16xf32>
    %8 = arith.mulf %6, %7 : vector<16x16xf32>
    %cst_6 = arith.constant dense<0xFF800000> : vector<16xf32>
    %9 = vector.multi_reduction <maximumf>, %8, %cst_6 [1] : vector<16x16xf32> to vector<16xf32>
    %10 = vector.shape_cast %9 : vector<16xf32> to vector<16x1xf32>
    %11 = vector.broadcast %10 : vector<16x1xf32> to vector<16x16xf32>
    %12 = arith.subf %8, %11 : vector<16x16xf32>
    %13 = math.exp %12 : vector<16x16xf32>
    %cst_7 = arith.constant dense<0.000000e+00> : vector<16xf32>
    %14 = vector.multi_reduction <add>, %13, %cst_7 [1] : vector<16x16xf32> to vector<16xf32>
    %15 = vector.shape_cast %14 : vector<16xf32> to vector<16x1xf32>
    %16 = tpu.reciprocal %15 {approx = true} : vector<16x1xf32> -> vector<16x1xf32>
    %17 = vector.broadcast %16 : vector<16x1xf32> to vector<16x16xf32>
    %18 = arith.mulf %13, %17 : vector<16x16xf32>
    %19 = arith.truncf %18 : vector<16x16xf32> to vector<16x16xbf16>
    %c0_8 = arith.constant 0 : index
    %c0_9 = arith.constant 0 : index
    %c0_10 = arith.constant 0 : index
    %20 = vector.load %arg3[%c0_8, %c0_9, %c0_10] : memref<1x16x16xf32, #tpu.memory_space<vmem>>, vector<1x16x16xf32>
    %21 = vector.shape_cast %20 : vector<1x16x16xf32> to vector<16x16xf32>
    %22 = arith.truncf %21 : vector<16x16xf32> to vector<16x16xbf16>
    %cst_11 = arith.constant dense<0.000000e+00> : vector<16x16xf32>
    %23 = tpu.matmul %19, %22, %cst_11 {dimension_numbers = #tpu.dot_dimension_numbers<[1], [0], [0], [1], [0, 0, 1, 1], [], []>} : vector<16x16xbf16>, vector<16x16xbf16>, vector<16x16xf32> -> vector<16x16xf32>
    %c0_12 = arith.constant 0 : index
    %c0_13 = arith.constant 0 : index
    %c0_14 = arith.constant 0 : index
    %24 = vector.load %arg4[%c0_12, %c0_13, %c0_14] : memref<1x16x16xf32, #tpu.memory_space<vmem>>, vector<1x16x16xf32>
    %25 = vector.shape_cast %24 : vector<1x16x16xf32> to vector<16x16xf32>
    %26 = vector.shape_cast %23 : vector<16x16xf32> to vector<1x16x16xf32>
    tpu.vector_store %arg4[%c0_12, %c0_13, %c0_14], %26 {strides = array<i32>} : memref<1x16x16xf32, #tpu.memory_space<vmem>>, vector<1x16x16xf32>,
    return
  }
  func.func @transform_0(%arg0: i32) -> (i32, i32, i32) {
    %c0_i32 = arith.constant 0 : i32
    %c0_i32_0 = arith.constant 0 : i32
    %c0_i32_1 = arith.constant 0 : i32
    return %arg0, %c0_i32, %c0_i32_0 : i32, i32, i32
  }
  func.func @transform_1(%arg0: i32) -> (i32, i32, i32) {
    %c0_i32 = arith.constant 0 : i32
    %c0_i32_0 = arith.constant 0 : i32
    %c0_i32_1 = arith.constant 0 : i32
    return %arg0, %c0_i32, %c0_i32_0 : i32, i32, i32
  }
  func.func @transform_2(%arg0: i32) -> (i32, i32, i32) {
    %c0_i32 = arith.constant 0 : i32
    %c0_i32_0 = arith.constant 0 : i32
    %c0_i32_1 = arith.constant 0 : i32
    return %arg0, %c0_i32, %c0_i32_0 : i32, i32, i32
  }
  func.func @transform_3(%arg0: i32) -> (i32, i32, i32) {
    %c0_i32 = arith.constant 0 : i32
    %c0_i32_0 = arith.constant 0 : i32
    %c0_i32_1 = arith.constant 0 : i32
    return %arg0, %c0_i32, %c0_i32_0 : i32, i32, i32
  }
}

module attributes {stable_mosaic.version = 11 : i64} {
  func.func @_linear_kernel(%arg0: i32, %arg1: memref<32x64xf32, #tpu.memory_space<vmem>>, %arg2: memref<32x64xf32, #tpu.memory_space<vmem>>, %arg3: memref<64x64xbf16, #tpu.memory_space<vmem>>, %arg4: memref<1x64xf32, #tpu.memory_space<vmem>>, %arg5: memref<32x64xf32, #tpu.memory_space<vmem>>) attributes {dimension_semantics = [#tpu.dimension_semantics<parallel>], iteration_bounds = array<i64: 1>, scalar_prefetch = 0 : i64, scratch_operands = 0 : i64, tpu.core_type = #tpu.core_type<tc>, window_params = [{transform_indices = @transform_0, window_bounds = array<i64: 32, 64>}, {transform_indices = @transform_1, window_bounds = array<i64: 32, 64>}, {pipeline_mode = #tpu.pipeline_mode<synchronous>, transform_indices = @transform_2, window_bounds = array<i64: 64, 64>}, {pipeline_mode = #tpu.pipeline_mode<synchronous>, transform_indices = @transform_3, window_bounds = array<i64: 1, 64>}, {transform_indices = @transform_4, window_bounds = array<i64: 32, 64>}]} {
    %c0 = arith.constant 0 : index
    %c0_0 = arith.constant 0 : index
    %0 = vector.load %arg1[%c0, %c0_0] : memref<32x64xf32, #tpu.memory_space<vmem>>, vector<32x64xf32>
    %1 = arith.truncf %0 : vector<32x64xf32> to vector<32x64xbf16>
    %c0_1 = arith.constant 0 : index
    %c0_2 = arith.constant 0 : index
    %2 = vector.load %arg3[%c0_1, %c0_2] : memref<64x64xbf16, #tpu.memory_space<vmem>>, vector<64x64xbf16>
    %cst = arith.constant dense<0.000000e+00> : vector<32x64xf32>
    %3 = tpu.matmul %1, %2, %cst {dimension_numbers = #tpu.dot_dimension_numbers<[1], [0], [0], [1], [0, 0, 1, 1], [], []>} : vector<32x64xbf16>, vector<64x64xbf16>, vector<32x64xf32> -> vector<32x64xf32>
    %c0_3 = arith.constant 0 : index
    %c0_4 = arith.constant 0 : index
    %4 = vector.load %arg4[%c0_3, %c0_4] : memref<1x64xf32, #tpu.memory_space<vmem>>, vector<1x64xf32>
    %5 = vector.broadcast %4 : vector<1x64xf32> to vector<32x64xf32>
    %6 = arith.addf %3, %5 : vector<32x64xf32>
    %c0_5 = arith.constant 0 : index
    %c0_6 = arith.constant 0 : index
    %7 = vector.load %arg2[%c0_5, %c0_6] : memref<32x64xf32, #tpu.memory_space<vmem>>, vector<32x64xf32>
    %8 = arith.addf %6, %7 : vector<32x64xf32>
    %c0_7 = arith.constant 0 : index
    %c0_8 = arith.constant 0 : index
    %9 = vector.load %arg5[%c0_7, %c0_8] : memref<32x64xf32, #tpu.memory_space<vmem>>, vector<32x64xf32>
    tpu.vector_store %arg5[%c0_7, %c0_8], %8 {strides = array<i32>} : memref<32x64xf32, #tpu.memory_space<vmem>>, vector<32x64xf32>,
    return
  }
  func.func @transform_0(%arg0: i32) -> (i32, i32) {
    %c0_i32 = arith.constant 0 : i32
    %c0_i32_0 = arith.constant 0 : i32
    return %arg0, %c0_i32 : i32, i32
  }
  func.func @transform_1(%arg0: i32) -> (i32, i32) {
    %c0_i32 = arith.constant 0 : i32
    %c0_i32_0 = arith.constant 0 : i32
    return %arg0, %c0_i32 : i32, i32
  }
  func.func @transform_2(%arg0: i32) -> (i32, i32) {
    %c0_i32 = arith.constant 0 : i32
    %c0_i32_0 = arith.constant 0 : i32
    %c0_i32_1 = arith.constant 0 : i32
    return %c0_i32, %c0_i32_0 : i32, i32
  }
  func.func @transform_3(%arg0: i32) -> (i32, i32) {
    %c0_i32 = arith.constant 0 : i32
    %c0_i32_0 = arith.constant 0 : i32
    %c0_i32_1 = arith.constant 0 : i32
    return %c0_i32, %c0_i32_0 : i32, i32
  }
  func.func @transform_4(%arg0: i32) -> (i32, i32) {
    %c0_i32 = arith.constant 0 : i32
    %c0_i32_0 = arith.constant 0 : i32
    return %arg0, %c0_i32 : i32, i32
  }
}

module attributes {stable_mosaic.version = 11 : i64} {
  func.func @_linear_kernel(%arg0: i32, %arg1: memref<32x64xf32, #tpu.memory_space<vmem>>, %arg2: memref<64x64xbf16, #tpu.memory_space<vmem>>, %arg3: memref<1x64xf32, #tpu.memory_space<vmem>>, %arg4: memref<32x64xf32, #tpu.memory_space<vmem>>) attributes {dimension_semantics = [#tpu.dimension_semantics<parallel>], iteration_bounds = array<i64: 1>, scalar_prefetch = 0 : i64, scratch_operands = 0 : i64, tpu.core_type = #tpu.core_type<tc>, window_params = [{transform_indices = @transform_0, window_bounds = array<i64: 32, 64>}, {pipeline_mode = #tpu.pipeline_mode<synchronous>, transform_indices = @transform_1, window_bounds = array<i64: 64, 64>}, {pipeline_mode = #tpu.pipeline_mode<synchronous>, transform_indices = @transform_2, window_bounds = array<i64: 1, 64>}, {transform_indices = @transform_3, window_bounds = array<i64: 32, 64>}]} {
    %c0 = arith.constant 0 : index
    %c0_0 = arith.constant 0 : index
    %0 = vector.load %arg1[%c0, %c0_0] : memref<32x64xf32, #tpu.memory_space<vmem>>, vector<32x64xf32>
    %1 = arith.truncf %0 : vector<32x64xf32> to vector<32x64xbf16>
    %c0_1 = arith.constant 0 : index
    %c0_2 = arith.constant 0 : index
    %2 = vector.load %arg2[%c0_1, %c0_2] : memref<64x64xbf16, #tpu.memory_space<vmem>>, vector<64x64xbf16>
    %cst = arith.constant dense<0.000000e+00> : vector<32x64xf32>
    %3 = tpu.matmul %1, %2, %cst {dimension_numbers = #tpu.dot_dimension_numbers<[1], [0], [0], [1], [0, 0, 1, 1], [], []>} : vector<32x64xbf16>, vector<64x64xbf16>, vector<32x64xf32> -> vector<32x64xf32>
    %c0_3 = arith.constant 0 : index
    %c0_4 = arith.constant 0 : index
    %4 = vector.load %arg3[%c0_3, %c0_4] : memref<1x64xf32, #tpu.memory_space<vmem>>, vector<1x64xf32>
    %5 = vector.broadcast %4 : vector<1x64xf32> to vector<32x64xf32>
    %6 = arith.addf %3, %5 : vector<32x64xf32>
    %c0_5 = arith.constant 0 : index
    %c0_6 = arith.constant 0 : index
    %7 = vector.load %arg4[%c0_5, %c0_6] : memref<32x64xf32, #tpu.memory_space<vmem>>, vector<32x64xf32>
    tpu.vector_store %arg4[%c0_5, %c0_6], %6 {strides = array<i32>} : memref<32x64xf32, #tpu.memory_space<vmem>>, vector<32x64xf32>,
    return
  }
  func.func @transform_0(%arg0: i32) -> (i32, i32) {
    %c0_i32 = arith.constant 0 : i32
    %c0_i32_0 = arith.constant 0 : i32
    return %arg0, %c0_i32 : i32, i32
  }
  func.func @transform_1(%arg0: i32) -> (i32, i32) {
    %c0_i32 = arith.constant 0 : i32
    %c0_i32_0 = arith.constant 0 : i32
    %c0_i32_1 = arith.constant 0 : i32
    return %c0_i32, %c0_i32_0 : i32, i32
  }
  func.func @transform_2(%arg0: i32) -> (i32, i32) {
    %c0_i32 = arith.constant 0 : i32
    %c0_i32_0 = arith.constant 0 : i32
    %c0_i32_1 = arith.constant 0 : i32
    return %c0_i32, %c0_i32_0 : i32, i32
  }
  func.func @transform_3(%arg0: i32) -> (i32, i32) {
    %c0_i32 = arith.constant 0 : i32
    %c0_i32_0 = arith.constant 0 : i32
    return %arg0, %c0_i32 : i32, i32
  }
}

module attributes {stable_mosaic.version = 11 : i64} {
  func.func @_linear_kernel(%arg0: i32, %arg1: memref<32x64xf32, #tpu.memory_space<vmem>>, %arg2: memref<64x128xbf16, #tpu.memory_space<vmem>>, %arg3: memref<1x128xf32, #tpu.memory_space<vmem>>, %arg4: memref<32x128xf32, #tpu.memory_space<vmem>>) attributes {dimension_semantics = [#tpu.dimension_semantics<parallel>], iteration_bounds = array<i64: 1>, scalar_prefetch = 0 : i64, scratch_operands = 0 : i64, tpu.core_type = #tpu.core_type<tc>, window_params = [{transform_indices = @transform_0, window_bounds = array<i64: 32, 64>}, {pipeline_mode = #tpu.pipeline_mode<synchronous>, transform_indices = @transform_1, window_bounds = array<i64: 64, 128>}, {pipeline_mode = #tpu.pipeline_mode<synchronous>, transform_indices = @transform_2, window_bounds = array<i64: 1, 128>}, {transform_indices = @transform_3, window_bounds = array<i64: 32, 128>}]} {
    %c0 = arith.constant 0 : index
    %c0_0 = arith.constant 0 : index
    %0 = vector.load %arg1[%c0, %c0_0] : memref<32x64xf32, #tpu.memory_space<vmem>>, vector<32x64xf32>
    %1 = arith.truncf %0 : vector<32x64xf32> to vector<32x64xbf16>
    %c0_1 = arith.constant 0 : index
    %c0_2 = arith.constant 0 : index
    %2 = vector.load %arg2[%c0_1, %c0_2] : memref<64x128xbf16, #tpu.memory_space<vmem>>, vector<64x128xbf16>
    %cst = arith.constant dense<0.000000e+00> : vector<32x128xf32>
    %3 = tpu.matmul %1, %2, %cst {dimension_numbers = #tpu.dot_dimension_numbers<[1], [0], [0], [1], [0, 0, 1, 1], [], []>} : vector<32x64xbf16>, vector<64x128xbf16>, vector<32x128xf32> -> vector<32x128xf32>
    %c0_3 = arith.constant 0 : index
    %c0_4 = arith.constant 0 : index
    %4 = vector.load %arg3[%c0_3, %c0_4] : memref<1x128xf32, #tpu.memory_space<vmem>>, vector<1x128xf32>
    %5 = vector.broadcast %4 : vector<1x128xf32> to vector<32x128xf32>
    %6 = arith.addf %3, %5 : vector<32x128xf32>
    %cst_5 = arith.constant 0.000000e+00 : f32
    %7 = vector.broadcast %cst_5 : f32 to vector<32x128xf32>
    %8 = arith.maximumf %6, %7 : vector<32x128xf32>
    %c0_6 = arith.constant 0 : index
    %c0_7 = arith.constant 0 : index
    %9 = vector.load %arg4[%c0_6, %c0_7] : memref<32x128xf32, #tpu.memory_space<vmem>>, vector<32x128xf32>
    tpu.vector_store %arg4[%c0_6, %c0_7], %8 {strides = array<i32>} : memref<32x128xf32, #tpu.memory_space<vmem>>, vector<32x128xf32>,
    return
  }
  func.func @transform_0(%arg0: i32) -> (i32, i32) {
    %c0_i32 = arith.constant 0 : i32
    %c0_i32_0 = arith.constant 0 : i32
    return %arg0, %c0_i32 : i32, i32
  }
  func.func @transform_1(%arg0: i32) -> (i32, i32) {
    %c0_i32 = arith.constant 0 : i32
    %c0_i32_0 = arith.constant 0 : i32
    %c0_i32_1 = arith.constant 0 : i32
    return %c0_i32, %c0_i32_0 : i32, i32
  }
  func.func @transform_2(%arg0: i32) -> (i32, i32) {
    %c0_i32 = arith.constant 0 : i32
    %c0_i32_0 = arith.constant 0 : i32
    %c0_i32_1 = arith.constant 0 : i32
    return %c0_i32, %c0_i32_0 : i32, i32
  }
  func.func @transform_3(%arg0: i32) -> (i32, i32) {
    %c0_i32 = arith.constant 0 : i32
    %c0_i32_0 = arith.constant 0 : i32
    return %arg0, %c0_i32 : i32, i32
  }
}

module attributes {stable_mosaic.version = 11 : i64} {
  func.func @_linear_kernel(%arg0: i32, %arg1: memref<32x128xf32, #tpu.memory_space<vmem>>, %arg2: memref<32x64xf32, #tpu.memory_space<vmem>>, %arg3: memref<128x64xbf16, #tpu.memory_space<vmem>>, %arg4: memref<1x64xf32, #tpu.memory_space<vmem>>, %arg5: memref<32x64xf32, #tpu.memory_space<vmem>>) attributes {dimension_semantics = [#tpu.dimension_semantics<parallel>], iteration_bounds = array<i64: 1>, scalar_prefetch = 0 : i64, scratch_operands = 0 : i64, tpu.core_type = #tpu.core_type<tc>, window_params = [{transform_indices = @transform_0, window_bounds = array<i64: 32, 128>}, {transform_indices = @transform_1, window_bounds = array<i64: 32, 64>}, {pipeline_mode = #tpu.pipeline_mode<synchronous>, transform_indices = @transform_2, window_bounds = array<i64: 128, 64>}, {pipeline_mode = #tpu.pipeline_mode<synchronous>, transform_indices = @transform_3, window_bounds = array<i64: 1, 64>}, {transform_indices = @transform_4, window_bounds = array<i64: 32, 64>}]} {
    %c0 = arith.constant 0 : index
    %c0_0 = arith.constant 0 : index
    %0 = vector.load %arg1[%c0, %c0_0] : memref<32x128xf32, #tpu.memory_space<vmem>>, vector<32x128xf32>
    %1 = arith.truncf %0 : vector<32x128xf32> to vector<32x128xbf16>
    %c0_1 = arith.constant 0 : index
    %c0_2 = arith.constant 0 : index
    %2 = vector.load %arg3[%c0_1, %c0_2] : memref<128x64xbf16, #tpu.memory_space<vmem>>, vector<128x64xbf16>
    %cst = arith.constant dense<0.000000e+00> : vector<32x64xf32>
    %3 = tpu.matmul %1, %2, %cst {dimension_numbers = #tpu.dot_dimension_numbers<[1], [0], [0], [1], [0, 0, 1, 1], [], []>} : vector<32x128xbf16>, vector<128x64xbf16>, vector<32x64xf32> -> vector<32x64xf32>
    %c0_3 = arith.constant 0 : index
    %c0_4 = arith.constant 0 : index
    %4 = vector.load %arg4[%c0_3, %c0_4] : memref<1x64xf32, #tpu.memory_space<vmem>>, vector<1x64xf32>
    %5 = vector.broadcast %4 : vector<1x64xf32> to vector<32x64xf32>
    %6 = arith.addf %3, %5 : vector<32x64xf32>
    %c0_5 = arith.constant 0 : index
    %c0_6 = arith.constant 0 : index
    %7 = vector.load %arg2[%c0_5, %c0_6] : memref<32x64xf32, #tpu.memory_space<vmem>>, vector<32x64xf32>
    %8 = arith.addf %6, %7 : vector<32x64xf32>
    %c0_7 = arith.constant 0 : index
    %c0_8 = arith.constant 0 : index
    %9 = vector.load %arg5[%c0_7, %c0_8] : memref<32x64xf32, #tpu.memory_space<vmem>>, vector<32x64xf32>
    tpu.vector_store %arg5[%c0_7, %c0_8], %8 {strides = array<i32>} : memref<32x64xf32, #tpu.memory_space<vmem>>, vector<32x64xf32>,
    return
  }
  func.func @transform_0(%arg0: i32) -> (i32, i32) {
    %c0_i32 = arith.constant 0 : i32
    %c0_i32_0 = arith.constant 0 : i32
    return %arg0, %c0_i32 : i32, i32
  }
  func.func @transform_1(%arg0: i32) -> (i32, i32) {
    %c0_i32 = arith.constant 0 : i32
    %c0_i32_0 = arith.constant 0 : i32
    return %arg0, %c0_i32 : i32, i32
  }
  func.func @transform_2(%arg0: i32) -> (i32, i32) {
    %c0_i32 = arith.constant 0 : i32
    %c0_i32_0 = arith.constant 0 : i32
    %c0_i32_1 = arith.constant 0 : i32
    return %c0_i32, %c0_i32_0 : i32, i32
  }
  func.func @transform_3(%arg0: i32) -> (i32, i32) {
    %c0_i32 = arith.constant 0 : i32
    %c0_i32_0 = arith.constant 0 : i32
    %c0_i32_1 = arith.constant 0 : i32
    return %c0_i32, %c0_i32_0 : i32, i32
  }
  func.func @transform_4(%arg0: i32) -> (i32, i32) {
    %c0_i32 = arith.constant 0 : i32
    %c0_i32_0 = arith.constant 0 : i32
    return %arg0, %c0_i32 : i32, i32
  }
}

module attributes {stable_mosaic.version = 11 : i64} {
  func.func @_linear_kernel(%arg0: i32, %arg1: memref<32x64xf32, #tpu.memory_space<vmem>>, %arg2: memref<64x128xbf16, #tpu.memory_space<vmem>>, %arg3: memref<1x128xf32, #tpu.memory_space<vmem>>, %arg4: memref<32x128xf32, #tpu.memory_space<vmem>>) attributes {dimension_semantics = [#tpu.dimension_semantics<parallel>], iteration_bounds = array<i64: 1>, scalar_prefetch = 0 : i64, scratch_operands = 0 : i64, tpu.core_type = #tpu.core_type<tc>, window_params = [{transform_indices = @transform_0, window_bounds = array<i64: 32, 64>}, {pipeline_mode = #tpu.pipeline_mode<synchronous>, transform_indices = @transform_1, window_bounds = array<i64: 64, 128>}, {pipeline_mode = #tpu.pipeline_mode<synchronous>, transform_indices = @transform_2, window_bounds = array<i64: 1, 128>}, {transform_indices = @transform_3, window_bounds = array<i64: 32, 128>}]} {
    %c0 = arith.constant 0 : index
    %c0_0 = arith.constant 0 : index
    %0 = vector.load %arg1[%c0, %c0_0] : memref<32x64xf32, #tpu.memory_space<vmem>>, vector<32x64xf32>
    %1 = arith.truncf %0 : vector<32x64xf32> to vector<32x64xbf16>
    %c0_1 = arith.constant 0 : index
    %c0_2 = arith.constant 0 : index
    %2 = vector.load %arg2[%c0_1, %c0_2] : memref<64x128xbf16, #tpu.memory_space<vmem>>, vector<64x128xbf16>
    %cst = arith.constant dense<0.000000e+00> : vector<32x128xf32>
    %3 = tpu.matmul %1, %2, %cst {dimension_numbers = #tpu.dot_dimension_numbers<[1], [0], [0], [1], [0, 0, 1, 1], [], []>} : vector<32x64xbf16>, vector<64x128xbf16>, vector<32x128xf32> -> vector<32x128xf32>
    %c0_3 = arith.constant 0 : index
    %c0_4 = arith.constant 0 : index
    %4 = vector.load %arg3[%c0_3, %c0_4] : memref<1x128xf32, #tpu.memory_space<vmem>>, vector<1x128xf32>
    %5 = vector.broadcast %4 : vector<1x128xf32> to vector<32x128xf32>
    %6 = arith.addf %3, %5 : vector<32x128xf32>
    %c0_5 = arith.constant 0 : index
    %c0_6 = arith.constant 0 : index
    %7 = vector.load %arg4[%c0_5, %c0_6] : memref<32x128xf32, #tpu.memory_space<vmem>>, vector<32x128xf32>
    tpu.vector_store %arg4[%c0_5, %c0_6], %6 {strides = array<i32>} : memref<32x128xf32, #tpu.memory_space<vmem>>, vector<32x128xf32>,
    return
  }
  func.func @transform_0(%arg0: i32) -> (i32, i32) {
    %c0_i32 = arith.constant 0 : i32
    %c0_i32_0 = arith.constant 0 : i32
    return %arg0, %c0_i32 : i32, i32
  }
  func.func @transform_1(%arg0: i32) -> (i32, i32) {
    %c0_i32 = arith.constant 0 : i32
    %c0_i32_0 = arith.constant 0 : i32
    %c0_i32_1 = arith.constant 0 : i32
    return %c0_i32, %c0_i32_0 : i32, i32
  }
  func.func @transform_2(%arg0: i32) -> (i32, i32) {
    %c0_i32 = arith.constant 0 : i32
    %c0_i32_0 = arith.constant 0 : i32
    %c0_i32_1 = arith.constant 0 : i32
    return %c0_i32, %c0_i32_0 : i32, i32
  }
  func.func @transform_3(%arg0: i32) -> (i32, i32) {
    %c0_i32 = arith.constant 0 : i32
    %c0_i32_0 = arith.constant 0 : i32
    return %arg0, %c0_i32 : i32, i32
  }
}

module attributes {stable_mosaic.version = 11 : i64} {
  func.func @_svd_corr_kernel(%arg0: i32, %arg1: memref<1x64x16xf32, #tpu.memory_space<vmem>>, %arg2: memref<1x64x16xf32, #tpu.memory_space<vmem>>, %arg3: memref<1x3x16xf32, #tpu.memory_space<vmem>>, %arg4: memref<1x3x16xf32, #tpu.memory_space<vmem>>) attributes {dimension_semantics = [#tpu.dimension_semantics<parallel>], iteration_bounds = array<i64: 2>, scalar_prefetch = 0 : i64, scratch_operands = 0 : i64, tpu.core_type = #tpu.core_type<tc>, window_params = [{transform_indices = @transform_0, window_bounds = array<i64: 1, 64, 16>}, {transform_indices = @transform_1, window_bounds = array<i64: 1, 64, 16>}, {transform_indices = @transform_2, window_bounds = array<i64: 1, 3, 16>}, {transform_indices = @transform_3, window_bounds = array<i64: 1, 3, 16>}]} {
    %c0 = arith.constant 0 : index
    %c0_0 = arith.constant 0 : index
    %c0_1 = arith.constant 0 : index
    %0 = vector.load %arg1[%c0, %c0_0, %c0_1] : memref<1x64x16xf32, #tpu.memory_space<vmem>>, vector<1x64x16xf32>
    %1 = vector.shape_cast %0 : vector<1x64x16xf32> to vector<64x16xf32>
    %2 = arith.truncf %1 : vector<64x16xf32> to vector<64x16xbf16>
    %c0_2 = arith.constant 0 : index
    %c0_3 = arith.constant 0 : index
    %c0_4 = arith.constant 0 : index
    %3 = vector.load %arg2[%c0_2, %c0_3, %c0_4] : memref<1x64x16xf32, #tpu.memory_space<vmem>>, vector<1x64x16xf32>
    %4 = vector.shape_cast %3 : vector<1x64x16xf32> to vector<64x16xf32>
    %5 = arith.truncf %4 : vector<64x16xf32> to vector<64x16xbf16>
    %cst = arith.constant dense<0.000000e+00> : vector<16x16xf32>
    %6 = tpu.matmul %2, %5, %cst {dimension_numbers = #tpu.dot_dimension_numbers<[0], [0], [1], [1], [0, 1, 1, 1], [], []>} : vector<64x16xbf16>, vector<64x16xbf16>, vector<16x16xf32> -> vector<16x16xf32>
    %cst_5 = arith.constant 1.250000e-01 : f32
    %7 = vector.broadcast %cst_5 : f32 to vector<16x16xf32>
    %8 = arith.mulf %6, %7 : vector<16x16xf32>
    %cst_6 = arith.constant dense<0xFF800000> : vector<16xf32>
    %9 = vector.multi_reduction <maximumf>, %8, %cst_6 [1] : vector<16x16xf32> to vector<16xf32>
    %10 = vector.shape_cast %9 : vector<16xf32> to vector<16x1xf32>
    %11 = vector.broadcast %10 : vector<16x1xf32> to vector<16x16xf32>
    %12 = arith.subf %8, %11 : vector<16x16xf32>
    %13 = math.exp %12 : vector<16x16xf32>
    %cst_7 = arith.constant dense<0.000000e+00> : vector<16xf32>
    %14 = vector.multi_reduction <add>, %13, %cst_7 [1] : vector<16x16xf32> to vector<16xf32>
    %15 = vector.shape_cast %14 : vector<16xf32> to vector<16x1xf32>
    %16 = tpu.reciprocal %15 {approx = true} : vector<16x1xf32> -> vector<16x1xf32>
    %17 = vector.broadcast %16 : vector<16x1xf32> to vector<16x16xf32>
    %18 = arith.mulf %13, %17 : vector<16x16xf32>
    %c0_8 = arith.constant 0 : index
    %c0_9 = arith.constant 0 : index
    %c0_10 = arith.constant 0 : index
    %19 = vector.load %arg3[%c0_8, %c0_9, %c0_10] : memref<1x3x16xf32, #tpu.memory_space<vmem>>, vector<1x3x16xf32>
    %20 = vector.shape_cast %19 : vector<1x3x16xf32> to vector<3x16xf32>
    %cst_11 = arith.constant dense<0.000000e+00> : vector<3x16xf32>
    %21 = tpu.matmul %20, %18, %cst_11 {dimension_numbers = #tpu.dot_dimension_numbers<[1], [1], [0], [0], [0, 0, 1, 0], [], []>} : vector<3x16xf32>, vector<16x16xf32>, vector<3x16xf32> -> vector<3x16xf32>
    %c0_12 = arith.constant 0 : index
    %c0_13 = arith.constant 0 : index
    %c0_14 = arith.constant 0 : index
    %22 = vector.load %arg4[%c0_12, %c0_13, %c0_14] : memref<1x3x16xf32, #tpu.memory_space<vmem>>, vector<1x3x16xf32>
    %23 = vector.shape_cast %22 : vector<1x3x16xf32> to vector<3x16xf32>
    %24 = vector.shape_cast %21 : vector<3x16xf32> to vector<1x3x16xf32>
    tpu.vector_store %arg4[%c0_12, %c0_13, %c0_14], %24 {strides = array<i32>} : memref<1x3x16xf32, #tpu.memory_space<vmem>>, vector<1x3x16xf32>,
    return
  }
  func.func @transform_0(%arg0: i32) -> (i32, i32, i32) {
    %c0_i32 = arith.constant 0 : i32
    %c0_i32_0 = arith.constant 0 : i32
    %c0_i32_1 = arith.constant 0 : i32
    return %arg0, %c0_i32, %c0_i32_0 : i32, i32, i32
  }
  func.func @transform_1(%arg0: i32) -> (i32, i32, i32) {
    %c0_i32 = arith.constant 0 : i32
    %c0_i32_0 = arith.constant 0 : i32
    %c0_i32_1 = arith.constant 0 : i32
    return %arg0, %c0_i32, %c0_i32_0 : i32, i32, i32
  }
  func.func @transform_2(%arg0: i32) -> (i32, i32, i32) {
    %c0_i32 = arith.constant 0 : i32
    %c0_i32_0 = arith.constant 0 : i32
    %c0_i32_1 = arith.constant 0 : i32
    return %arg0, %c0_i32, %c0_i32_0 : i32, i32, i32
  }
  func.func @transform_3(%arg0: i32) -> (i32, i32, i32) {
    %c0_i32 = arith.constant 0 : i32
    %c0_i32_0 = arith.constant 0 : i32
    %c0_i32_1 = arith.constant 0 : i32
    return %arg0, %c0_i32, %c0_i32_0 : i32, i32, i32
  }
}

</mosaic_0001>

<bundles_post_ra>
// kernel: dcp_forward.55
= control target key start
LH: loop header
LB: loop body
LE: loop exit
PB: predicated region body
PF: predicated region fallthrough
CT: control target
= control target key end

     0   :  { %s498_s6 = smov 0   ;;  %s519_s0 = inlined_call_operand.vmem [shape: f32[2,3,16], index: 0, kind: input, shape index: {}]   ;;  %s520_s1 = inlined_call_operand.vmem [shape: f32[2,16,16], index: 1, kind: output, shape index: {}]  }
   0x1 LB: > { %s432_s7 = sadd.s32 4294967295, %s484_s6   ;;  %p436_p0 = scmp.ge.s32.totalorder %s484_s6, 1  ;;  %s484_s6 = sphi %s498_s6, %s11_s6  }
   0x2   : > { %p86_p1 = scmp.lt.s32.totalorder %s484_s6, 3 }
   0x4   : > { %p87_p2 = pnand %p436_p0, %p86_p1 }
   0x5   : > { %p105_p3 = scmp.lt.s32.totalorder (!%p87_p2), %s432_s7, 1  ;;  %vm154_vm0 = vcmask (!%p87_p2), 1042432   ;;  %v486_v2 = vmov (!%p87_p2), 1.0   ;;  %vm147_vm1 = vcmask (!%p87_p2), 23552   ;;  %v487_v7 = vmov (!%p87_p2), 0  }
   0x6   : > { %90 = sbr.rel (%p87_p2) target bundleno = 502 (0x1f6), region = 24  ;;  %460 = vmatprep.subr.msk.mxu1 (!%p87_p2), %vm154_vm0, %v486_v2  ;;  %476 = vset.pattern.permute.xlu1 (!%p87_p2), %v487_v7  ;;  %vm234_vm2 = vcmask (!%p87_p2), 124928   ;;  %vm374_vm3 = vcmask (!%p87_p2), 130048  }
   0x7   : > { %461 = vmatpush3.msk.msra.mxu1 (!%p87_p2), %vm154_vm0, %v486_v2 }
   0xd   : > { %s522_s7 = smov (!%p105_p3, %s432_s7), 1 }
   0xe   : > { %s437_s8 = sshll.u32 %s522_s7, 2  ;;  %s448_s12 = sshll.u32 %s522_s7, 4 }
   0xf   : > { %s108_s11 = scalar_lea.vmem %s519_s0, %s437_s8  ;;  %s113_s15 = scalar_lea.vmem %s520_s1, %s448_s12 }
  0x10   : > { %v114_v0 = vld [vmem:[%s108_s11] sm:$0x7] }
  0x11   : > { %v233_v1 = vmul.f32 %v114_v0, %v114_v0  ;;  %455 = vmatprep.subr.msk.mxu0 %vm154_vm0, %v114_v0 }
  0x12   : > { %456 = vmatpush3.msk.msra.mxu0 %vm154_vm0, %v114_v0 }
  0x13   : > { %242 = vxpose.xlu0.b32.start.end [1/1] (short) (narrow) %v233_v1, 16  ;;  %v235_v12 = vsel %vm234_vm2, %v233_v1, 0.0 }
  0x14   : > { %v236_v13 = vrot.slane %v235_v12, 4 }
  0x16   : > { %v237_v14 = vadd.f32 %v236_v13, %v235_v12 }
  0x18   : > { %115 = vxpose.xlu0.b32.start.end [1/1] (short) (narrow) %v114_v0, 16  ;;  %v238_v15 = vrot.slane %v237_v14, 2 }
  0x1a   : > { %v239_v16 = vadd.f32 %v238_v15, %v237_v14 }
  0x1c   : > { %v240_v17 = vrot.slane %v239_v16, 1 }
  0x1e   : > { %v241_v19 = vadd.f32 %v240_v17, %v239_v16 }
  0x41   : > { %477 = vset.pattern.permute.xlu0 %v487_v7 }
  0x93   : > { %v258_v3 = vpop.trf.xlu0 }
  0x94   : > { %462 = vmatprep.mubr.msk.f32.mxu1 %vm147_vm1, %v258_v3 }
  0x97   : > { %v259_v4 = vpop.trf.xlu0 }
  0x98   : > { %463 = vmatmul.mubr.msk.f32.vlgmr.msra.gmra.mrb[0].mxu1 %vm147_vm1, %v259_v4 }
  0x9b   : > { %v131_v5 = vpop.trf.xlu0 }
  0x9c   : > { %457 = vmatprep.mubr.msk.f32.mxu0 %vm147_vm1, %v131_v5 }
  0x9f   : > { %v132_v6 = vpop.trf.xlu0 }
  0xa0   : > { %458 = vmatmul.mubr.msk.f32.vlgmr.msra.gmra.mrb[0].mxu0 %vm147_vm1, %v132_v6 }
 0x16b   : > { %v464_v8 = vpop.f32.mrb[0].mxu1 }
 0x16c   : > { %v349_v9 = vpop.f32.mrb[1].mxu1 }
 0x16d   : > { %362 = vperm.xlu1 %476, %v349_v9  }
 0x171   : > { %367 = vperm.xlu1 %476, %v464_v8  }
 0x173   : > { %v459_v10 = vpop.f32.mrb[0].mxu0 }
 0x174   : > { %v224_v11 = vpop.f32.mrb[1].mxu0  ;;  %v359_v21 = vmul.f32 2.0, %v459_v10 }
 0x175   : > { %v358_v18 = vmul.f32 2.0, %v224_v11 }
 0x1ec   : > { %v363_v20 = vpop.permute.xlu1 %362 }
 0x1ed   : > { %v370_v22 = vsub.f32 %v358_v18, %v363_v20 }
 0x1ef   : > { %v372_v23 = vsub.f32 %v370_v22, %v241_v19 }
 0x1f0   : > { %v368_v24 = vpop.permute.xlu1 %367 }
 0x1f1   : > { %375 = vst.msk [vmem:[%s113_s15] sm:$0xff] %vm374_vm3, %v372_v23  ;;  %v371_v25 = vsub.f32 %v359_v21, %v368_v24 }
 0x1f3   : > { %v373_v26 = vsub.f32 %v371_v25, %v241_v19 }
 0x1f5   : > { %376 = vst.msk [vmem:[%s113_s15 + $0x8] sm:$0xff] %vm374_vm3, %v373_v26 }
 0x1f6 PF: > { %s11_s6 = sadd.s32 1, %s484_s6  }
 0x1f7   : > { %p8_p4 = scmp.ge.s32.totalorder %s11_s6, 4  }
 0x1f9   :  { %10 = sbr.rel (!%p8_p4) target bundleno = 1 (0x1), region = 54 }

// kernel: dcp_forward.56
= control target key start
LH: loop header
LB: loop body
LE: loop exit
PB: predicated region body
PF: predicated region fallthrough
CT: control target
= control target key end

     0   :  { %s1298_s15 = smov 0   ;;  %s1300_s16 = smov 0   ;;  %s1635_s0 = inlined_call_operand.vmem [shape: bf16[64,8], index: 0, kind: input, shape index: {}]   ;;  %s1636_s1 = inlined_call_operand.vmem [shape: bf16[2,4,8,16], index: 1, kind: input, shape index: {}]   ;;  %s1637_s2 = inlined_call_operand.vmem [shape: f32[64,1], index: 2, kind: input, shape index: {}]   ;;  %s1638_s3 = inlined_call_operand.vmem [shape: bf16[2,4,64,16], index: 3, kind: output, shape index: {0}]   ;;  %s1639_s4 = inlined_call_operand.vmem [shape: bf16[2,64,16], index: 4, kind: output, shape index: {1}]  }
   0x1   :  { %s1302_s17 = smov 0  }
   0x2 LB: > { %s27_s18 = sadd.s32 1, %s1266_s16  ;;  %p1014_p0 = scmp.ge.s32.totalorder %s1270_s17, 1  ;;  %s1270_s17 = sphi %s1302_s17, %s15_s17   ;;  %s1266_s16 = sphi %s1300_s16, %s1641_s16   ;;  %s1262_s15 = sphi %s1298_s15, %s1640_s15  }
   0x3   : > { %p29_p1 = scmp.ge.s32.totalorder %s27_s18, 2  ;;  %p186_p2 = scmp.lt.s32.totalorder %s1270_s17, 3 }
   0x5   : > { %s1643_s18 = smov (%p29_p1, %s27_s18), 0  ;;  %p187_p3 = pnand %p1014_p0, %p186_p2 }
   0x6   : > { %p226_p4 = scmp.lt.s32.totalorder (!%p187_p3), %s1262_s15, 1  ;;  %v1244_v0 = vld [vmem:[%s1635_s0] sm:$0xff] (!%p187_p3)   ;;  %vm328_vm0 = vcmask (!%p187_p3), 64512   ;;  %vm341_vm1 = vcmask (!%p187_p3), 1043456   ;;  %v1272_v1 = vmov (!%p187_p3), 0   ;;  %v261_v3 = vld [vmem:[%s1637_s2 + $0x10] sm:$0xff] (!%p187_p3) }
   0x7   : > { %190 = sbr.rel (%p187_p3) target bundleno = 276 (0x114), region = 32  ;;  %1175 = vmatprep.mubr.msk.bf16.mxu0 (!%p187_p3), %vm328_vm0, %v1244_v0  ;;  %1185 = vmatprep.mubr.msk.bf16.mxu1 (!%p187_p3), %vm328_vm0, %v1244_v0  ;;  %v259_v2 = vld [vmem:[%s1637_s2] sm:$0xff] (!%p187_p3)  ;;  %v1245_v4 = vld [vmem:[%s1635_s0 + $0x8] sm:$0xff] (!%p187_p3)   ;;  %v262_v8 = vld [vmem:[%s1637_s2 + $0x18] sm:$0xff] (!%p187_p3)  ;;  %vm450_vm2 = vcmask (!%p187_p3), 125952  }
   0x8   : > { %1242 = vset.pattern.permute.xlu0 (!%p187_p3), %v1272_v1  ;;  %1243 = vset.pattern.permute.xlu1 (!%p187_p3), %v1272_v1  ;;  %v260_v5 = vld [vmem:[%s1637_s2 + $0x8] sm:$0xff] (!%p187_p3)  ;;  %v1246_v15 = vld [vmem:[%s1635_s0 + $0x10] sm:$0xff] (!%p187_p3)   ;;  %v263_v16 = vld [vmem:[%s1637_s2 + $0x20] sm:$0xff] (!%p187_p3) }
   0x9   : > { %270 = vperm.xlu0 (!%p187_p3), %1242, %v259_v2   ;;  %280 = vperm.xlu1 (!%p187_p3), %1243, %v261_v3   ;;  %v264_v17 = vld [vmem:[%s1637_s2 + $0x28] sm:$0xff] (!%p187_p3)  ;;  %v1247_v18 = vld [vmem:[%s1635_s0 + $0x18] sm:$0xff] (!%p187_p3)   ;;  %v265_v19 = vld [vmem:[%s1637_s2 + $0x30] sm:$0xff] (!%p187_p3) }
   0xa   : > { %v266_v20 = vld [vmem:[%s1637_s2 + $0x38] sm:$0xff] (!%p187_p3) }
   0xd   : > { %275 = vperm.xlu0 (!%p187_p3), %1242, %v260_v5   ;;  %285 = vperm.xlu1 (!%p187_p3), %1243, %v262_v8  }
   0xe   : > { %s1645_s15 = smov (!%p226_p4, %s1262_s15), 1 }
   0xf   : > { %s1110_s21 = sshll.u32 %s1645_s15, 4  ;;  %s1111_s25 = sshll.u32 %s1645_s15, 7 }
  0x10   : > { %s233_s28 = scalar_lea.vmem %s1636_s1, %s1110_s21  ;;  %s1112_s29 = sshll.u32 %s1645_s15, 5 }
  0x11   : > { %v267_v6 = vld [vmem:[%s233_s28] sm:$0xf]  ;;  %v1037_v7 = vld [vmem:[%s233_s28 + $0x4] sm:$0xf]  ;;  %v1058_v11 = vld [vmem:[%s233_s28 + $0x8] sm:$0xf]  ;;  %290 = vperm.xlu0 %1242, %v263_v16   ;;  %295 = vperm.xlu1 %1243, %v264_v17   ;;  %s1557_s5 = scalar_lea.vmem %s1639_s4, %s1112_s29 }
  0x12   : > { %1213 = vmatprep.subr.msk.bf16.mxu0 %vm341_vm1, %v267_v6  ;;  %1214 = vmatprep.subr.msk.bf16.mxu1 %vm341_vm1, %v1037_v7  ;;  %v343_v9 = vsel %vm341_vm1, %v267_v6, 0  ;;  %v462_v10 = vsel %vm341_vm1, %v1037_v7, 0  ;;  %v1079_v12 = vld [vmem:[%s233_s28 + $0xc] sm:$0xf]  ;;  %v589_v13 = vsel %vm341_vm1, %v1058_v11, 0  ;;  %s1408_s28 = scalar_lea.vmem %s1638_s3, %s1111_s25 }
  0x13   : > { %1174 = vmatpush3.bf16.msra.mxu0 %v343_v9  ;;  %1184 = vmatpush3.bf16.msra.mxu1 %v462_v10  ;;  %v716_v14 = vsel %vm341_vm1, %v1079_v12, 0 }
  0x14   : > { %1215 = vmatprep.subr.msk.bf16.mxu0 %vm341_vm1, %v1058_v11  ;;  %1216 = vmatprep.subr.msk.bf16.mxu1 %vm341_vm1, %v1079_v12 }
  0x15   : > { %300 = vperm.xlu0 %1242, %v265_v19   ;;  %305 = vperm.xlu1 %1243, %v266_v20  }
  0x16   : > { %1176 = vmatmul.mubr.msk.bf16.vlgmr.msra.gmra.mrb[0].mxu0 %vm328_vm0, %v1245_v4  ;;  %1186 = vmatmul.mubr.msk.bf16.vlgmr.msra.gmra.mrb[0].mxu1 %vm328_vm0, %v1245_v4 }
  0x17   : > { %1194 = vmatpush3.bf16.msra.mxu0 %v589_v13  ;;  %1204 = vmatpush3.bf16.msra.mxu1 %v716_v14 }
  0x18   : > { %1179 = vmatprep.mubr.msk.bf16.mxu0 %vm328_vm0, %v1246_v15  ;;  %1189 = vmatprep.mubr.msk.bf16.mxu1 %vm328_vm0, %v1246_v15 }
  0x1e   : > { %1180 = vmatmul.mubr.msk.bf16.gmra.mrb[4].mxu0 %vm328_vm0, %v1247_v18  ;;  %1190 = vmatmul.mubr.msk.bf16.gmra.mrb[4].mxu1 %vm328_vm0, %v1247_v18 }
  0x1f   : > { %1195 = vmatprep.mubr.msk.bf16.mxu0 %vm328_vm0, %v1244_v0  ;;  %1205 = vmatprep.mubr.msk.bf16.mxu1 %vm328_vm0, %v1244_v0 }
  0x26   : > { %1196 = vmatmul.mubr.msk.bf16.vlgmr.msra.gmra.mrb[8].mxu0 %vm328_vm0, %v1245_v4  ;;  %1206 = vmatmul.mubr.msk.bf16.vlgmr.msra.gmra.mrb[8].mxu1 %vm328_vm0, %v1245_v4 }
  0x27   : > { %1199 = vmatprep.mubr.msk.bf16.mxu0 %vm328_vm0, %v1246_v15  ;;  %1209 = vmatprep.mubr.msk.bf16.mxu1 %vm328_vm0, %v1246_v15 }
  0x2e   : > { %1200 = vmatmul.mubr.msk.bf16.gmra.mrb[12].mxu0 %vm328_vm0, %v1247_v18  ;;  %1210 = vmatmul.mubr.msk.bf16.gmra.mrb[12].mxu1 %vm328_vm0, %v1247_v18 }
  0x88   : > { %v1382_v21 = vpop.permute.xlu0 %270  ;;  %v1384_v22 = vpop.permute.xlu1 %280 }
  0x8c   : > { %v1386_v23 = vpop.permute.xlu0 %275  ;;  %v1388_v24 = vpop.permute.xlu1 %285 }
  0x90   : > { %v1390_v25 = vpop.permute.xlu0 %290  ;;  %v1392_v26 = vpop.permute.xlu1 %295 }
  0x94   : > { %v1432_v55 = vpop.permute.xlu0 %300  ;;  %v1444_v59 = vpop.permute.xlu1 %305 }
  0xe9   : > { %v1177_v27 = vpop.f32.mrb[0].mxu0  ;;  %v1187_v28 = vpop.f32.mrb[0].mxu1 }
  0xea   : > { %v388_v29 = vadd.f32 %v1177_v27, %v1384_v22  ;;  %v507_v30 = vadd.f32 %v1187_v28, %v1384_v22  ;;  %v379_v31 = vpop.f32.mrb[1].mxu0  ;;  %v498_v32 = vpop.f32.mrb[1].mxu1 }
  0xeb   : > { %v380_v33 = vadd.f32 %v379_v31, %v1382_v21  ;;  %v499_v34 = vadd.f32 %v498_v32, %v1382_v21  ;;  %v1178_v35 = vpop.f32.mrb[2].mxu0  ;;  %v1188_v36 = vpop.f32.mrb[2].mxu1 }
  0xec   : > { %v1399_v37 = vmax.f32 %v388_v29, 0.0  ;;  %v1401_v38 = vmax.f32 %v507_v30, 0.0  ;;  %v391_v39 = vadd.f32 %v1178_v35, %v1388_v24  ;;  %v510_v40 = vadd.f32 %v1188_v36, %v1388_v24  ;;  %v382_v41 = vpop.f32.mrb[3].mxu0  ;;  %v501_v42 = vpop.f32.mrb[3].mxu1 }
  0xed   : > { %v1410_v43 = vmax.f32 %v380_v33, 0.0  ;;  %v1412_v44 = vmax.f32 %v499_v34, 0.0  ;;  %v383_v45 = vadd.f32 %v382_v41, %v1386_v23  ;;  %v502_v46 = vadd.f32 %v501_v42, %v1386_v23 }
  0xee   : > { %v1115_v47 = vpack.c.bf16 %v1399_v37, %v1399_v37  ;;  %v1123_v48 = vpack.c.bf16 %v1401_v38, %v1401_v38  ;;  %v580_v49 = vmax.f32 %v1399_v37, %v1401_v38  ;;  %v1422_v50 = vmax.f32 %v391_v39, 0.0 }
  0xef   : > { %v1113_v51 = vpack.c.bf16 %v1410_v43, %v1410_v43  ;;  %v1121_v52 = vpack.c.bf16 %v1412_v44, %v1412_v44  ;;  %v578_v53 = vmax.f32 %v1410_v43, %v1412_v44  ;;  %v1430_v54 = vmax.f32 %v510_v40, 0.0 }
  0xf0   : > { %453 = vst.msk [vmem:[%s1408_s28 + $0x8] sm:$0xf] %vm450_vm2, %v1115_v47  ;;  %1052 = vst.msk [vmem:[%s1408_s28 + $0x28] sm:$0xf] %vm450_vm2, %v1123_v48  ;;  %v1116_v56 = vpack.c.bf16 %v1422_v50, %v1422_v50  ;;  %v1440_v57 = vmax.f32 %v383_v45, 0.0  ;;  %v1442_v58 = vmax.f32 %v502_v46, 0.0 }
  0xf1   : > { %451 = vst.msk [vmem:[%s1408_s28] sm:$0xf] %vm450_vm2, %v1113_v51  ;;  %1050 = vst.msk [vmem:[%s1408_s28 + $0x20] sm:$0xf] %vm450_vm2, %v1121_v52  ;;  %v1124_v60 = vpack.c.bf16 %v1430_v54, %v1430_v54  ;;  %v581_v61 = vmax.f32 %v1422_v50, %v1430_v54  ;;  %v1181_v62 = vpop.f32.mrb[4].mxu0  ;;  %v1191_v63 = vpop.f32.mrb[4].mxu1 }
  0xf2   : > { %454 = vst.msk [vmem:[%s1408_s28 + $0xc] sm:$0xf] %vm450_vm2, %v1116_v56  ;;  %v1114_v0 = vpack.c.bf16 %v1440_v57, %v1440_v57  ;;  %v1122_v1 = vpack.c.bf16 %v1442_v58, %v1442_v58  ;;  %v579_v2 = vmax.f32 %v1440_v57, %v1442_v58  ;;  %v404_v3 = vadd.f32 %v1181_v62, %v1432_v55  ;;  %v395_v4 = vpop.f32.mrb[5].mxu0  ;;  %v514_v5 = vpop.f32.mrb[5].mxu1 }
  0xf3   : > { %1053 = vst.msk [vmem:[%s1408_s28 + $0x2c] sm:$0xf] %vm450_vm2, %v1124_v60  ;;  %v523_v6 = vadd.f32 %v1191_v63, %v1432_v55  ;;  %v396_v7 = vadd.f32 %v395_v4, %v1390_v25  ;;  %v515_v8 = vadd.f32 %v514_v5, %v1390_v25  ;;  %v1182_v9 = vpop.f32.mrb[6].mxu0  ;;  %v1192_v10 = vpop.f32.mrb[6].mxu1 }
  0xf4   : > { %452 = vst.msk [vmem:[%s1408_s28 + $0x4] sm:$0xf] %vm450_vm2, %v1114_v0  ;;  %1051 = vst.msk [vmem:[%s1408_s28 + $0x24] sm:$0xf] %vm450_vm2, %v1122_v1  ;;  %v1472_v11 = vmax.f32 %v404_v3, 0.0  ;;  %v407_v12 = vadd.f32 %v1182_v9, %v1444_v59  ;;  %v526_v13 = vadd.f32 %v1192_v10, %v1444_v59  ;;  %v398_v14 = vpop.f32.mrb[7].mxu0 }
  0xf5   : > { %v517_v15 = vpop.f32.mrb[7].mxu1  ;;  %v1476_v16 = vmax.f32 %v523_v6, 0.0  ;;  %v1478_v17 = vmax.f32 %v396_v7, 0.0  ;;  %v1480_v18 = vmax.f32 %v515_v8, 0.0  ;;  %v399_v19 = vadd.f32 %v398_v14, %v1392_v26 }
  0xf6   : > { %v1119_v20 = vpack.c.bf16 %v1472_v11, %v1472_v11  ;;  %v1485_v27 = vmax.f32 %v407_v12, 0.0  ;;  %v1487_v28 = vmax.f32 %v526_v13, 0.0  ;;  %v518_v29 = vadd.f32 %v517_v15, %v1392_v26 }
  0xf7   : > { %v1127_v30 = vpack.c.bf16 %v1476_v16, %v1476_v16  ;;  %v1117_v31 = vpack.c.bf16 %v1478_v17, %v1478_v17  ;;  %v1125_v32 = vpack.c.bf16 %v1480_v18, %v1480_v18  ;;  %v582_v33 = vmax.f32 %v1478_v17, %v1480_v18 }
  0xf8   : > { %457 = vst.msk [vmem:[%s1408_s28 + $0x18] sm:$0xf] %vm450_vm2, %v1119_v20  ;;  %v1120_v34 = vpack.c.bf16 %v1485_v27, %v1485_v27  ;;  %v1128_v35 = vpack.c.bf16 %v1487_v28, %v1487_v28  ;;  %v585_v36 = vmax.f32 %v1485_v27, %v1487_v28  ;;  %v1506_v39 = vmax.f32 %v399_v19, 0.0 }
  0xf9   : > { %1056 = vst.msk [vmem:[%s1408_s28 + $0x38] sm:$0xf] %vm450_vm2, %v1127_v30  ;;  %455 = vst.msk [vmem:[%s1408_s28 + $0x10] sm:$0xf] %vm450_vm2, %v1117_v31  ;;  %v1514_v40 = vmax.f32 %v518_v29, 0.0  ;;  %v1197_v41 = vpop.f32.mrb[8].mxu0  ;;  %v584_v45 = vmax.f32 %v1472_v11, %v1476_v16 }
  0xfa   : > { %1054 = vst.msk [vmem:[%s1408_s28 + $0x30] sm:$0xf] %vm450_vm2, %v1125_v32  ;;  %v1207_v42 = vpop.f32.mrb[8].mxu1  ;;  %458 = vst.msk [vmem:[%s1408_s28 + $0x1c] sm:$0xf] %vm450_vm2, %v1120_v34  ;;  %v1118_v46 = vpack.c.bf16 %v1506_v39, %v1506_v39  ;;  %v634_v47 = vadd.f32 %v1197_v41, %v1384_v22  ;;  %v625_v51 = vpop.f32.mrb[9].mxu0 }
  0xfb   : > { %1057 = vst.msk [vmem:[%s1408_s28 + $0x3c] sm:$0xf] %vm450_vm2, %v1128_v35  ;;  %v761_v48 = vadd.f32 %v1207_v42, %v1384_v22  ;;  %v752_v52 = vpop.f32.mrb[9].mxu1  ;;  %v1126_v56 = vpack.c.bf16 %v1514_v40, %v1514_v40  ;;  %v583_v60 = vmax.f32 %v1506_v39, %v1514_v40  ;;  %v626_v62 = vadd.f32 %v625_v51, %v1382_v21  ;;  %v1198_v0 = vpop.f32.mrb[10].mxu0 }
  0xfc   : > { %v753_v63 = vadd.f32 %v752_v52, %v1382_v21  ;;  %v1208_v1 = vpop.f32.mrb[10].mxu1  ;;  %456 = vst.msk [vmem:[%s1408_s28 + $0x14] sm:$0xf] %vm450_vm2, %v1118_v46  ;;  %v658_v3 = vmax.f32 %v634_v47, 0.0  ;;  %v637_v4 = vadd.f32 %v1198_v0, %v1388_v24  ;;  %v628_v6 = vpop.f32.mrb[11].mxu0 }
  0xfd   : > { %v785_v22 = vmax.f32 %v761_v48, 0.0  ;;  %v764_v5 = vadd.f32 %v1208_v1, %v1388_v24  ;;  %v755_v7 = vpop.f32.mrb[11].mxu1  ;;  %1055 = vst.msk [vmem:[%s1408_s28 + $0x34] sm:$0xf] %vm450_vm2, %v1126_v56  ;;  %v656_v8 = vmax.f32 %v626_v62, 0.0  ;;  %v629_v21 = vadd.f32 %v628_v6, %v1386_v23 }
  0xfe   : > { %v783_v9 = vmax.f32 %v753_v63, 0.0  ;;  %v756_v10 = vadd.f32 %v755_v7, %v1386_v23  ;;  %v1131_v12 = vpack.c.bf16 %v658_v3, %v658_v3  ;;  %v707_v24 = vmax.f32 %v580_v49, %v658_v3 }
  0xff   : > { %v1139_v13 = vpack.c.bf16 %v785_v22, %v785_v22  ;;  %v659_v14 = vmax.f32 %v637_v4, 0.0  ;;  %v1129_v15 = vpack.c.bf16 %v656_v8, %v656_v8  ;;  %v705_v19 = vmax.f32 %v578_v53, %v656_v8 }
 0x100   : > { %v1137_v20 = vpack.c.bf16 %v783_v9, %v783_v9  ;;  %v786_v29 = vmax.f32 %v764_v5, 0.0  ;;  %1073 = vst.msk [vmem:[%s1408_s28 + $0x48] sm:$0xf] %vm450_vm2, %v1131_v12  ;;  %v834_v23 = vmax.f32 %v707_v24, %v785_v22  ;;  %v657_v38 = vmax.f32 %v629_v21, 0.0 }
 0x101   : > { %1094 = vst.msk [vmem:[%s1408_s28 + $0x68] sm:$0xf] %vm450_vm2, %v1139_v13  ;;  %v1132_v30 = vpack.c.bf16 %v659_v14, %v659_v14  ;;  %v708_v37 = vmax.f32 %v581_v61, %v659_v14  ;;  %1071 = vst.msk [vmem:[%s1408_s28 + $0x40] sm:$0xf] %vm450_vm2, %v1129_v15  ;;  %v832_v43 = vmax.f32 %v705_v19, %v783_v9  ;;  %v784_v49 = vmax.f32 %v756_v10, 0.0  ;;  %v1201_v53 = vpop.f32.mrb[12].mxu0 }
 0x102   : > { %1092 = vst.msk [vmem:[%s1408_s28 + $0x60] sm:$0xf] %vm450_vm2, %v1137_v20  ;;  %v1140_v44 = vpack.c.bf16 %v786_v29, %v786_v29  ;;  %v1211_v31 = vpop.f32.mrb[12].mxu1  ;;  %v1147_v32 = vpack.c.bf16 %v834_v23, %v834_v23  ;;  %v1130_v54 = vpack.c.bf16 %v657_v38, %v657_v38  ;;  %v706_v61 = vmax.f32 %v579_v2, %v657_v38  ;;  %v641_v34 = vpop.f32.mrb[13].mxu0 }
 0x103   : > { %1074 = vst.msk [vmem:[%s1408_s28 + $0x4c] sm:$0xf] %vm450_vm2, %v1132_v30  ;;  %v835_v50 = vmax.f32 %v708_v37, %v786_v29  ;;  %v768_v35 = vpop.f32.mrb[13].mxu1  ;;  %v1145_v41 = vpack.c.bf16 %v832_v43, %v832_v43  ;;  %v1138_v42 = vpack.c.bf16 %v784_v49, %v784_v49  ;;  %v650_v46 = vadd.f32 %v1201_v53, %v1432_v55  ;;  %v1202_v48 = vpop.f32.mrb[14].mxu0 }
 0x104   : > { %1095 = vst.msk [vmem:[%s1408_s28 + $0x6c] sm:$0xf] %vm450_vm2, %v1140_v44  ;;  %v777_v47 = vadd.f32 %v1211_v31, %v1432_v55  ;;  %v1212_v51 = vpop.f32.mrb[14].mxu1  ;;  %874 = vst.msk [vmem:[%s1557_s5 + $0x8] sm:$0xf] %vm450_vm2, %v1147_v32  ;;  %v833_v57 = vmax.f32 %v706_v61, %v784_v49  ;;  %v642_v58 = vadd.f32 %v641_v34, %v1390_v25  ;;  %v644_v56 = vpop.f32.mrb[15].mxu0 }
 0x105   : > { %v1148_v52 = vpack.c.bf16 %v835_v50, %v835_v50  ;;  %1072 = vst.msk [vmem:[%s1408_s28 + $0x44] sm:$0xf] %vm450_vm2, %v1130_v54  ;;  %v769_v2 = vadd.f32 %v768_v35, %v1390_v25  ;;  %v771_v62 = vpop.f32.mrb[15].mxu1  ;;  %872 = vst.msk [vmem:[%s1557_s5] sm:$0xf] %vm450_vm2, %v1145_v41  ;;  %v662_v55 = vmax.f32 %v650_v46, 0.0  ;;  %v653_v0 = vadd.f32 %v1202_v48, %v1444_v59 }
 0x106   : > { %1093 = vst.msk [vmem:[%s1408_s28 + $0x64] sm:$0xf] %vm450_vm2, %v1138_v42  ;;  %v789_v63 = vmax.f32 %v777_v47, 0.0  ;;  %v780_v1 = vadd.f32 %v1212_v51, %v1444_v59  ;;  %v1146_v3 = vpack.c.bf16 %v833_v57, %v833_v57  ;;  %v660_v22 = vmax.f32 %v642_v58, 0.0 }
 0x107   : > { %875 = vst.msk [vmem:[%s1557_s5 + $0xc] sm:$0xf] %vm450_vm2, %v1148_v52  ;;  %v787_v25 = vmax.f32 %v769_v2, 0.0  ;;  %v645_v4 = vadd.f32 %v644_v56, %v1392_v26  ;;  %v1135_v5 = vpack.c.bf16 %v662_v55, %v662_v55  ;;  %v711_v6 = vmax.f32 %v584_v45, %v662_v55 }
 0x108   : > { %v1143_v7 = vpack.c.bf16 %v789_v63, %v789_v63  ;;  %v663_v8 = vmax.f32 %v653_v0, 0.0  ;;  %873 = vst.msk [vmem:[%s1557_s5 + $0x4] sm:$0xf] %vm450_vm2, %v1146_v3  ;;  %v1133_v59 = vpack.c.bf16 %v660_v22, %v660_v22  ;;  %v709_v9 = vmax.f32 %v582_v33, %v660_v22 }
 0x109   : > { %v1141_v21 = vpack.c.bf16 %v787_v25, %v787_v25  ;;  %v790_v10 = vmax.f32 %v780_v1, 0.0  ;;  %1077 = vst.msk [vmem:[%s1408_s28 + $0x58] sm:$0xf] %vm450_vm2, %v1135_v5  ;;  %v838_v11 = vmax.f32 %v711_v6, %v789_v63  ;;  %v661_v12 = vmax.f32 %v645_v4, 0.0 }
 0x10a   : > { %1098 = vst.msk [vmem:[%s1408_s28 + $0x78] sm:$0xf] %vm450_vm2, %v1143_v7  ;;  %v1136_v16 = vpack.c.bf16 %v663_v8, %v663_v8  ;;  %v712_v45 = vmax.f32 %v585_v36, %v663_v8  ;;  %1075 = vst.msk [vmem:[%s1408_s28 + $0x50] sm:$0xf] %vm450_vm2, %v1133_v59  ;;  %v836_v17 = vmax.f32 %v709_v9, %v787_v25 }
 0x10b   : > { %1096 = vst.msk [vmem:[%s1408_s28 + $0x70] sm:$0xf] %vm450_vm2, %v1141_v21  ;;  %v1144_v18 = vpack.c.bf16 %v790_v10, %v790_v10  ;;  %v772_v33 = vadd.f32 %v771_v62, %v1392_v26  ;;  %v1151_v24 = vpack.c.bf16 %v838_v11, %v838_v11  ;;  %v1134_v28 = vpack.c.bf16 %v661_v12, %v661_v12 }
 0x10c   : > { %1078 = vst.msk [vmem:[%s1408_s28 + $0x5c] sm:$0xf] %vm450_vm2, %v1136_v16  ;;  %v839_v27 = vmax.f32 %v712_v45, %v790_v10  ;;  %v710_v36 = vmax.f32 %v583_v60, %v661_v12  ;;  %v1149_v13 = vpack.c.bf16 %v836_v17, %v836_v17 }
 0x10d   : > { %1099 = vst.msk [vmem:[%s1408_s28 + $0x7c] sm:$0xf] %vm450_vm2, %v1144_v18  ;;  %v788_v14 = vmax.f32 %v772_v33, 0.0  ;;  %878 = vst.msk [vmem:[%s1557_s5 + $0x18] sm:$0xf] %vm450_vm2, %v1151_v24 }
 0x10e   : > { %v1152_v15 = vpack.c.bf16 %v839_v27, %v839_v27  ;;  %1076 = vst.msk [vmem:[%s1408_s28 + $0x54] sm:$0xf] %vm450_vm2, %v1134_v28  ;;  %876 = vst.msk [vmem:[%s1557_s5 + $0x10] sm:$0xf] %vm450_vm2, %v1149_v13 }
 0x10f   : > { %v1142_v26 = vpack.c.bf16 %v788_v14, %v788_v14  ;;  %v837_v19 = vmax.f32 %v710_v36, %v788_v14 }
 0x110   : > { %879 = vst.msk [vmem:[%s1557_s5 + $0x1c] sm:$0xf] %vm450_vm2, %v1152_v15 }
 0x111   : > { %1097 = vst.msk [vmem:[%s1408_s28 + $0x74] sm:$0xf] %vm450_vm2, %v1142_v26  ;;  %v1150_v20 = vpack.c.bf16 %v837_v19, %v837_v19 }
 0x113   : > { %877 = vst.msk [vmem:[%s1557_s5 + $0x14] sm:$0xf] %vm450_vm2, %v1150_v20 }
 0x114 PF: > { %s15_s17 = sadd.s32 1, %s1270_s17   ;;  %s1640_s15 = smov %s1266_s16 }
 0x115   : > { %p12_p5 = scmp.ge.s32.totalorder %s15_s17, 4   ;;  %s1641_s16 = smov %s1643_s18 }
 0x117   :  { %14 = sbr.rel (!%p12_p5) target bundleno = 2 (0x2), region = 80 }

// kernel: dcp_forward.57
= control target key start
LH: loop header
LB: loop body
LE: loop exit
PB: predicated region body
PF: predicated region fallthrough
CT: control target
= control target key end

     0   :  { %s1494_s15 = smov 0   ;;  %s1496_s16 = smov 0   ;;  %s1850_s0 = inlined_call_operand.vmem [shape: bf16[64,64], index: 0, kind: input, shape index: {}]   ;;  %s1851_s1 = inlined_call_operand.vmem [shape: bf16[2,4,64,16], index: 1, kind: input, shape index: {}]   ;;  %s1852_s2 = inlined_call_operand.vmem [shape: f32[64,1], index: 2, kind: input, shape index: {}]   ;;  %s1853_s3 = inlined_call_operand.vmem [shape: bf16[2,4,64,16], index: 3, kind: output, shape index: {0}]   ;;  %s1854_s4 = inlined_call_operand.vmem [shape: bf16[2,64,16], index: 4, kind: output, shape index: {1}]  }
   0x1   :  { %s1498_s17 = smov 0  }
   0x2 LB: > { %s27_s18 = sadd.s32 1, %s1462_s16  ;;  %p1125_p0 = scmp.ge.s32.totalorder %s1466_s17, 1  ;;  %s1466_s17 = sphi %s1498_s17, %s15_s17   ;;  %s1462_s16 = sphi %s1496_s16, %s1856_s16   ;;  %s1458_s15 = sphi %s1494_s15, %s1855_s15  }
   0x3   : > { %p29_p1 = scmp.ge.s32.totalorder %s27_s18, 2  ;;  %p186_p2 = scmp.lt.s32.totalorder %s1466_s17, 3 }
   0x5   : > { %s1858_s18 = smov (%p29_p1, %s27_s18), 0  ;;  %p187_p3 = pnand %p1125_p0, %p186_p2 }
   0x6   : > { %p226_p4 = scmp.lt.s32.totalorder (!%p187_p3), %s1458_s15, 1  ;;  %v1515_v0 = vld [vmem:[%s1850_s0] sm:$0xff] (!%p187_p3)   ;;  %vm359_vm0 = vcmask (!%p187_p3), 523264   ;;  %v1468_v1 = vmov (!%p187_p3), 0   ;;  %v261_v3 = vld [vmem:[%s1852_s2 + $0x10] sm:$0xff] (!%p187_p3)  ;;  %v260_v5 = vld [vmem:[%s1852_s2 + $0x8] sm:$0xff] (!%p187_p3) }
   0x7   : > { %190 = sbr.rel (%p187_p3) target bundleno = 288 (0x120), region = 32  ;;  %1341 = vmatprep.mubr.msk.bf16.mxu0 (!%p187_p3), %vm359_vm0, %v1515_v0  ;;  %1357 = vmatprep.mubr.msk.bf16.mxu1 (!%p187_p3), %vm359_vm0, %v1515_v0  ;;  %v259_v2 = vld [vmem:[%s1852_s2] sm:$0xff] (!%p187_p3)  ;;  %v262_v7 = vld [vmem:[%s1852_s2 + $0x18] sm:$0xff] (!%p187_p3)  ;;  %v264_v13 = vld [vmem:[%s1852_s2 + $0x28] sm:$0xff] (!%p187_p3)  ;;  %vm477_vm1 = vcmask (!%p187_p3), 125952  }
   0x8   : > { %1422 = vset.pattern.permute.xlu0 (!%p187_p3), %v1468_v1  ;;  %1423 = vset.pattern.permute.xlu1 (!%p187_p3), %v1468_v1  ;;  %v263_v12 = vld [vmem:[%s1852_s2 + $0x20] sm:$0xff] (!%p187_p3)  ;;  %v1433_v18 = vld [vmem:[%s1850_s0 + $0x8] sm:$0xff] (!%p187_p3)   ;;  %v265_v20 = vld [vmem:[%s1852_s2 + $0x30] sm:$0xff] (!%p187_p3) }
   0x9   : > { %277 = vperm.xlu0 (!%p187_p3), %1422, %v259_v2   ;;  %287 = vperm.xlu1 (!%p187_p3), %1423, %v261_v3   ;;  %v266_v21 = vld [vmem:[%s1852_s2 + $0x38] sm:$0xff] (!%p187_p3)  ;;  %v1438_v23 = vld [vmem:[%s1850_s0 + $0x10] sm:$0xff] (!%p187_p3)  }
   0xa   : > { %v1439_v26 = vld [vmem:[%s1850_s0 + $0x18] sm:$0xff] (!%p187_p3)  }
   0xd   : > { %282 = vperm.xlu0 (!%p187_p3), %1422, %v260_v5   ;;  %292 = vperm.xlu1 (!%p187_p3), %1423, %v262_v7  }
   0xe   : > { %s1860_s15 = smov (!%p226_p4, %s1458_s15), 1 }
   0xf   : > { %s1258_s21 = sshll.u32 %s1860_s15, 7 }
  0x10   : > { %s1535_s28 = scalar_lea.vmem %s1851_s1, %s1258_s21 }
  0x11   : > { %v1424_v4 = vld [vmem:[%s1535_s28] sm:$0xff]   ;;  %v1426_v8 = vld [vmem:[%s1535_s28 + $0x8] sm:$0xff]   ;;  %v1428_v10 = vld [vmem:[%s1535_s28 + $0x10] sm:$0xff]   ;;  %297 = vperm.xlu0 %1422, %v263_v12   ;;  %302 = vperm.xlu1 %1423, %v264_v13  }
  0x12   : > { %v1425_v6 = vld [vmem:[%s1535_s28 + $0x20] sm:$0xff]   ;;  %1333 = vmatprep.subr.bf16.mxu0 %v1424_v4  ;;  %v1427_v9 = vld [vmem:[%s1535_s28 + $0x28] sm:$0xff]   ;;  %v1429_v11 = vld [vmem:[%s1535_s28 + $0x30] sm:$0xff]  }
  0x13   : > { %1349 = vmatprep.subr.bf16.mxu1 %v1425_v6  ;;  %1334 = vmatpush3.bf16.msra.mxu0 %v1424_v4  ;;  %v1430_v14 = vld [vmem:[%s1535_s28 + $0x18] sm:$0xff]   ;;  %v1434_v16 = vld [vmem:[%s1535_s28 + $0x40] sm:$0xff]   ;;  %v1436_v19 = vld [vmem:[%s1535_s28 + $0x48] sm:$0xff]  }
  0x14   : > { %1350 = vmatpush3.bf16.msra.mxu1 %v1425_v6  ;;  %1335 = vmatprep.subr.bf16.mxu0 %v1426_v8  ;;  %v1431_v15 = vld [vmem:[%s1535_s28 + $0x38] sm:$0xff]   ;;  %v1435_v17 = vld [vmem:[%s1535_s28 + $0x60] sm:$0xff]   ;;  %v1437_v22 = vld [vmem:[%s1535_s28 + $0x68] sm:$0xff]  }
  0x15   : > { %1351 = vmatprep.subr.bf16.mxu1 %v1427_v9  ;;  %307 = vperm.xlu0 %1422, %v265_v20   ;;  %v1440_v24 = vld [vmem:[%s1535_s28 + $0x50] sm:$0xff]   ;;  %v1442_v27 = vld [vmem:[%s1535_s28 + $0x58] sm:$0xff]  }
  0x16   : > { %312 = vperm.xlu1 %1423, %v266_v21   ;;  %v1441_v25 = vld [vmem:[%s1535_s28 + $0x70] sm:$0xff]   ;;  %v1443_v28 = vld [vmem:[%s1535_s28 + $0x78] sm:$0xff]   ;;  %s1620_s28 = scalar_lea.vmem %s1853_s3, %s1258_s21  ;;  %s1260_s21 = sshll.u32 %s1860_s15, 5 }
  0x17   : > { %1336 = vmatpush3.bf16.msra.mxu0 %v1426_v8  ;;  %s1769_s30 = scalar_lea.vmem %s1854_s4, %s1260_s21 }
  0x18   : > { %1352 = vmatpush3.bf16.msra.mxu1 %v1427_v9  ;;  %1337 = vmatprep.subr.bf16.mxu0 %v1428_v10 }
  0x19   : > { %1353 = vmatprep.subr.bf16.mxu1 %v1429_v11 }
  0x1b   : > { %1338 = vmatpush3.bf16.msra.mxu0 %v1428_v10 }
  0x1c   : > { %1354 = vmatpush3.bf16.msra.mxu1 %v1429_v11  ;;  %1339 = vmatprep.subr.bf16.mxu0 %v1430_v14 }
  0x1d   : > { %1355 = vmatprep.subr.bf16.mxu1 %v1431_v15 }
  0x1f   : > { %1340 = vmatpush3.bf16.msra.mxu0 %v1430_v14 }
  0x20   : > { %1356 = vmatpush3.bf16.msra.mxu1 %v1431_v15  ;;  %1365 = vmatprep.subr.bf16.mxu0 %v1434_v16 }
  0x21   : > { %1381 = vmatprep.subr.bf16.mxu1 %v1435_v17 }
  0x22   : > { %1342 = vmatmul.mubr.msk.bf16.vlgmr.msra.gmra.mrb[0].mxu0 %vm359_vm0, %v1433_v18 }
  0x23   : > { %1358 = vmatmul.mubr.msk.bf16.vlgmr.msra.gmra.mrb[0].mxu1 %vm359_vm0, %v1433_v18  ;;  %1366 = vmatpush3.bf16.msra.mxu0 %v1434_v16 }
  0x24   : > { %1382 = vmatpush3.bf16.msra.mxu1 %v1435_v17  ;;  %1367 = vmatprep.subr.bf16.mxu0 %v1436_v19 }
  0x25   : > { %1383 = vmatprep.subr.bf16.mxu1 %v1437_v22  ;;  %1345 = vmatprep.mubr.msk.bf16.mxu0 %vm359_vm0, %v1438_v23 }
  0x26   : > { %1361 = vmatprep.mubr.msk.bf16.mxu1 %vm359_vm0, %v1438_v23 }
  0x27   : > { %1368 = vmatpush3.bf16.msra.mxu0 %v1436_v19 }
  0x28   : > { %1384 = vmatpush3.bf16.msra.mxu1 %v1437_v22  ;;  %1369 = vmatprep.subr.bf16.mxu0 %v1440_v24 }
  0x29   : > { %1385 = vmatprep.subr.bf16.mxu1 %v1441_v25 }
  0x2a   : > { %1346 = vmatmul.mubr.msk.bf16.gmra.mrb[4].mxu0 %vm359_vm0, %v1439_v26 }
  0x2b   : > { %1362 = vmatmul.mubr.msk.bf16.gmra.mrb[4].mxu1 %vm359_vm0, %v1439_v26  ;;  %1370 = vmatpush3.bf16.msra.mxu0 %v1440_v24 }
  0x2c   : > { %1386 = vmatpush3.bf16.msra.mxu1 %v1441_v25  ;;  %1371 = vmatprep.subr.bf16.mxu0 %v1442_v27 }
  0x2d   : > { %1387 = vmatprep.subr.bf16.mxu1 %v1443_v28  ;;  %1373 = vmatprep.mubr.msk.bf16.mxu0 %vm359_vm0, %v1515_v0 }
  0x2e   : > { %1389 = vmatprep.mubr.msk.bf16.mxu1 %vm359_vm0, %v1515_v0 }
  0x2f   : > { %1372 = vmatpush3.bf16.msra.mxu0 %v1442_v27 }
  0x30   : > { %1388 = vmatpush3.bf16.msra.mxu1 %v1443_v28 }
  0x32   : > { %1374 = vmatmul.mubr.msk.bf16.vlgmr.msra.gmra.mrb[8].mxu0 %vm359_vm0, %v1433_v18 }
  0x33   : > { %1390 = vmatmul.mubr.msk.bf16.vlgmr.msra.gmra.mrb[8].mxu1 %vm359_vm0, %v1433_v18  ;;  %1377 = vmatprep.mubr.msk.bf16.mxu0 %vm359_vm0, %v1438_v23 }
  0x34   : > { %1393 = vmatprep.mubr.msk.bf16.mxu1 %vm359_vm0, %v1438_v23 }
  0x3a   : > { %1378 = vmatmul.mubr.msk.bf16.gmra.mrb[12].mxu0 %vm359_vm0, %v1439_v26 }
  0x3b   : > { %1394 = vmatmul.mubr.msk.bf16.gmra.mrb[12].mxu1 %vm359_vm0, %v1439_v26 }
  0x88   : > { %v1596_v29 = vpop.permute.xlu0 %277  ;;  %v1598_v30 = vpop.permute.xlu1 %287 }
  0x8c   : > { %v1600_v31 = vpop.permute.xlu0 %282  ;;  %v1602_v32 = vpop.permute.xlu1 %292 }
  0x90   : > { %v1604_v33 = vpop.permute.xlu0 %297  ;;  %v1606_v35 = vpop.permute.xlu1 %302 }
  0x94   : > { %v1643_v61 = vpop.permute.xlu0 %307 }
  0x95   : > { %v1665_v6 = vpop.permute.xlu1 %312 }
  0xf5   : > { %v1343_v34 = vpop.f32.mrb[0].mxu0 }
  0xf6   : > { %v415_v36 = vadd.f32 %v1343_v34, %v1598_v30  ;;  %v1359_v37 = vpop.f32.mrb[0].mxu1  ;;  %v406_v38 = vpop.f32.mrb[1].mxu0 }
  0xf7   : > { %v562_v39 = vadd.f32 %v1359_v37, %v1598_v30  ;;  %v407_v40 = vadd.f32 %v406_v38, %v1596_v29  ;;  %v553_v41 = vpop.f32.mrb[1].mxu1  ;;  %v1344_v42 = vpop.f32.mrb[2].mxu0 }
  0xf8   : > { %v1611_v43 = vmax.f32 %v415_v36, 0.0  ;;  %v554_v44 = vadd.f32 %v553_v41, %v1596_v29  ;;  %v418_v45 = vadd.f32 %v1344_v42, %v1602_v32  ;;  %v1360_v46 = vpop.f32.mrb[2].mxu1  ;;  %v409_v47 = vpop.f32.mrb[3].mxu0 }
  0xf9   : > { %v1622_v48 = vmax.f32 %v562_v39, 0.0  ;;  %v1624_v49 = vmax.f32 %v407_v40, 0.0  ;;  %v565_v50 = vadd.f32 %v1360_v46, %v1602_v32  ;;  %v410_v51 = vadd.f32 %v409_v47, %v1600_v31  ;;  %v556_v52 = vpop.f32.mrb[3].mxu1 }
  0xfa   : > { %v1263_v53 = vpack.c.bf16 %v1611_v43, %v1611_v43  ;;  %v1630_v54 = vmax.f32 %v554_v44, 0.0  ;;  %v1632_v55 = vmax.f32 %v418_v45, 0.0  ;;  %v557_v56 = vadd.f32 %v556_v52, %v1600_v31 }
  0xfb   : > { %v1271_v57 = vpack.c.bf16 %v1622_v48, %v1622_v48  ;;  %v635_v58 = vmax.f32 %v1611_v43, %v1622_v48  ;;  %v1261_v59 = vpack.c.bf16 %v1624_v49, %v1624_v49  ;;  %v1641_v60 = vmax.f32 %v565_v50, 0.0 }
  0xfc   : > { %480 = vst.msk [vmem:[%s1620_s28 + $0x8] sm:$0xf] %vm477_vm1, %v1263_v53  ;;  %v1269_v62 = vpack.c.bf16 %v1630_v54, %v1630_v54  ;;  %v633_v63 = vmax.f32 %v1624_v49, %v1630_v54  ;;  %v1264_v0 = vpack.c.bf16 %v1632_v55, %v1632_v55  ;;  %v1653_v1 = vmax.f32 %v410_v51, 0.0 }
  0xfd   : > { %1178 = vst.msk [vmem:[%s1620_s28 + $0x28] sm:$0xf] %vm477_vm1, %v1271_v57  ;;  %478 = vst.msk [vmem:[%s1620_s28] sm:$0xf] %vm477_vm1, %v1261_v59  ;;  %v1272_v2 = vpack.c.bf16 %v1641_v60, %v1641_v60  ;;  %v636_v3 = vmax.f32 %v1632_v55, %v1641_v60  ;;  %v1663_v4 = vmax.f32 %v557_v56, 0.0  ;;  %v1347_v5 = vpop.f32.mrb[4].mxu0 }
  0xfe   : > { %1176 = vst.msk [vmem:[%s1620_s28 + $0x20] sm:$0xf] %vm477_vm1, %v1269_v62  ;;  %481 = vst.msk [vmem:[%s1620_s28 + $0xc] sm:$0xf] %vm477_vm1, %v1264_v0  ;;  %v1262_v7 = vpack.c.bf16 %v1653_v1, %v1653_v1  ;;  %v1363_v8 = vpop.f32.mrb[4].mxu1  ;;  %v431_v9 = vadd.f32 %v1347_v5, %v1643_v61  ;;  %v422_v10 = vpop.f32.mrb[5].mxu0 }
  0xff   : > { %1179 = vst.msk [vmem:[%s1620_s28 + $0x2c] sm:$0xf] %vm477_vm1, %v1272_v2  ;;  %v1270_v11 = vpack.c.bf16 %v1663_v4, %v1663_v4  ;;  %v634_v12 = vmax.f32 %v1653_v1, %v1663_v4  ;;  %v578_v13 = vadd.f32 %v1363_v8, %v1643_v61  ;;  %v423_v14 = vadd.f32 %v422_v10, %v1604_v33  ;;  %v569_v15 = vpop.f32.mrb[5].mxu1  ;;  %v1348_v16 = vpop.f32.mrb[6].mxu0 }
 0x100   : > { %479 = vst.msk [vmem:[%s1620_s28 + $0x4] sm:$0xf] %vm477_vm1, %v1262_v7  ;;  %v1684_v17 = vmax.f32 %v431_v9, 0.0  ;;  %v570_v18 = vadd.f32 %v569_v15, %v1604_v33  ;;  %v434_v19 = vadd.f32 %v1348_v16, %v1665_v6  ;;  %v1364_v20 = vpop.f32.mrb[6].mxu1  ;;  %v425_v21 = vpop.f32.mrb[7].mxu0 }
 0x101   : > { %1177 = vst.msk [vmem:[%s1620_s28 + $0x24] sm:$0xf] %vm477_vm1, %v1270_v11  ;;  %v1690_v22 = vmax.f32 %v578_v13, 0.0  ;;  %v1692_v23 = vmax.f32 %v423_v14, 0.0  ;;  %v581_v24 = vadd.f32 %v1364_v20, %v1665_v6  ;;  %v426_v25 = vadd.f32 %v425_v21, %v1606_v35  ;;  %v572_v26 = vpop.f32.mrb[7].mxu1 }
 0x102   : > { %v1267_v27 = vpack.c.bf16 %v1684_v17, %v1684_v17  ;;  %v1698_v28 = vmax.f32 %v570_v18, 0.0  ;;  %v1700_v34 = vmax.f32 %v434_v19, 0.0  ;;  %v573_v36 = vadd.f32 %v572_v26, %v1606_v35 }
 0x103   : > { %v1275_v37 = vpack.c.bf16 %v1690_v22, %v1690_v22  ;;  %v1265_v38 = vpack.c.bf16 %v1692_v23, %v1692_v23  ;;  %v1707_v39 = vmax.f32 %v581_v24, 0.0  ;;  %v1709_v40 = vmax.f32 %v426_v25, 0.0 }
 0x104   : > { %484 = vst.msk [vmem:[%s1620_s28 + $0x18] sm:$0xf] %vm477_vm1, %v1267_v27  ;;  %v1273_v41 = vpack.c.bf16 %v1698_v28, %v1698_v28  ;;  %v637_v42 = vmax.f32 %v1692_v23, %v1698_v28  ;;  %v1268_v44 = vpack.c.bf16 %v1700_v34, %v1700_v34  ;;  %v1719_v45 = vmax.f32 %v573_v36, 0.0 }
 0x105   : > { %1182 = vst.msk [vmem:[%s1620_s28 + $0x38] sm:$0xf] %vm477_vm1, %v1275_v37  ;;  %482 = vst.msk [vmem:[%s1620_s28 + $0x10] sm:$0xf] %vm477_vm1, %v1265_v38  ;;  %v1276_v46 = vpack.c.bf16 %v1707_v39, %v1707_v39  ;;  %v640_v47 = vmax.f32 %v1700_v34, %v1707_v39  ;;  %v1266_v50 = vpack.c.bf16 %v1709_v40, %v1709_v40  ;;  %v1375_v51 = vpop.f32.mrb[8].mxu0 }
 0x106   : > { %v639_v52 = vmax.f32 %v1684_v17, %v1690_v22  ;;  %1180 = vst.msk [vmem:[%s1620_s28 + $0x30] sm:$0xf] %vm477_vm1, %v1273_v41  ;;  %485 = vst.msk [vmem:[%s1620_s28 + $0x1c] sm:$0xf] %vm477_vm1, %v1268_v44  ;;  %v1274_v53 = vpack.c.bf16 %v1719_v45, %v1719_v45  ;;  %v638_v56 = vmax.f32 %v1709_v40, %v1719_v45  ;;  %v1391_v59 = vpop.f32.mrb[8].mxu1  ;;  %v708_v62 = vpop.f32.mrb[9].mxu0 }
 0x107   : > { %v717_v57 = vadd.f32 %v1375_v51, %v1598_v30  ;;  %1183 = vst.msk [vmem:[%s1620_s28 + $0x3c] sm:$0xf] %vm477_vm1, %v1276_v46  ;;  %483 = vst.msk [vmem:[%s1620_s28 + $0x14] sm:$0xf] %vm477_vm1, %v1266_v50  ;;  %v872_v0 = vadd.f32 %v1391_v59, %v1598_v30  ;;  %v709_v2 = vadd.f32 %v708_v62, %v1596_v29  ;;  %v863_v5 = vpop.f32.mrb[9].mxu1  ;;  %v1376_v7 = vpop.f32.mrb[10].mxu0 }
 0x108   : > { %1181 = vst.msk [vmem:[%s1620_s28 + $0x34] sm:$0xf] %vm477_vm1, %v1274_v53  ;;  %v864_v9 = vadd.f32 %v863_v5, %v1596_v29  ;;  %v720_v10 = vadd.f32 %v1376_v7, %v1602_v32  ;;  %v1392_v11 = vpop.f32.mrb[10].mxu1  ;;  %v711_v13 = vpop.f32.mrb[11].mxu0 }
 0x109   : > { %v741_v8 = vmax.f32 %v717_v57, 0.0  ;;  %v896_v14 = vmax.f32 %v872_v0, 0.0  ;;  %v739_v15 = vmax.f32 %v709_v2, 0.0  ;;  %v875_v16 = vadd.f32 %v1392_v11, %v1602_v32  ;;  %v866_v18 = vpop.f32.mrb[11].mxu1 }
 0x10a   : > { %v712_v30 = vadd.f32 %v711_v13, %v1600_v31  ;;  %v894_v29 = vmax.f32 %v864_v9, 0.0  ;;  %v742_v21 = vmax.f32 %v720_v10, 0.0 }
 0x10b   : > { %v1279_v19 = vpack.c.bf16 %v741_v8, %v741_v8  ;;  %v790_v20 = vmax.f32 %v635_v58, %v741_v8  ;;  %v1287_v24 = vpack.c.bf16 %v896_v14, %v896_v14  ;;  %v1277_v25 = vpack.c.bf16 %v739_v15, %v739_v15 }
 0x10c   : > { %v788_v26 = vmax.f32 %v633_v63, %v739_v15  ;;  %v897_v32 = vmax.f32 %v875_v16, 0.0  ;;  %v1285_v36 = vpack.c.bf16 %v894_v29, %v894_v29  ;;  %v1280_v37 = vpack.c.bf16 %v742_v21, %v742_v21 }
 0x10d   : > { %1210 = vst.msk [vmem:[%s1620_s28 + $0x48] sm:$0xf] %vm477_vm1, %v1279_v19  ;;  %v945_v27 = vmax.f32 %v790_v20, %v896_v14  ;;  %v791_v43 = vmax.f32 %v636_v3, %v742_v21  ;;  %1242 = vst.msk [vmem:[%s1620_s28 + $0x68] sm:$0xf] %vm477_vm1, %v1287_v24  ;;  %v740_v54 = vmax.f32 %v712_v30, 0.0  ;;  %v867_v58 = vadd.f32 %v866_v18, %v1600_v31  ;;  %v1379_v63 = vpop.f32.mrb[12].mxu0 }
 0x10e   : > { %1208 = vst.msk [vmem:[%s1620_s28 + $0x40] sm:$0xf] %vm477_vm1, %v1277_v25  ;;  %v943_v48 = vmax.f32 %v788_v26, %v894_v29  ;;  %v1288_v49 = vpack.c.bf16 %v897_v32, %v897_v32  ;;  %1240 = vst.msk [vmem:[%s1620_s28 + $0x60] sm:$0xf] %vm477_vm1, %v1285_v36  ;;  %v733_v60 = vadd.f32 %v1379_v63, %v1643_v61  ;;  %v1395_v3 = vpop.f32.mrb[12].mxu1  ;;  %v724_v41 = vpop.f32.mrb[13].mxu0 }
 0x10f   : > { %v1295_v38 = vpack.c.bf16 %v945_v27, %v945_v27  ;;  %1211 = vst.msk [vmem:[%s1620_s28 + $0x4c] sm:$0xf] %vm477_vm1, %v1280_v37  ;;  %v946_v55 = vmax.f32 %v791_v43, %v897_v32  ;;  %v1278_v46 = vpack.c.bf16 %v740_v54, %v740_v54  ;;  %v789_v31 = vmax.f32 %v634_v12, %v740_v54  ;;  %v879_v51 = vpop.f32.mrb[13].mxu1  ;;  %v1380_v53 = vpop.f32.mrb[14].mxu0 }
 0x110   : > { %v1293_v44 = vpack.c.bf16 %v943_v48, %v943_v48  ;;  %1243 = vst.msk [vmem:[%s1620_s28 + $0x6c] sm:$0xf] %vm477_vm1, %v1288_v49  ;;  %v895_v50 = vmax.f32 %v867_v58, 0.0  ;;  %v745_v59 = vmax.f32 %v733_v60, 0.0  ;;  %v888_v62 = vadd.f32 %v1395_v3, %v1643_v61  ;;  %v1396_v2 = vpop.f32.mrb[14].mxu1  ;;  %v727_v5 = vpop.f32.mrb[15].mxu0 }
 0x111   : > { %985 = vst.msk [vmem:[%s1769_s30 + $0x8] sm:$0xf] %vm477_vm1, %v1295_v38  ;;  %v1296_v57 = vpack.c.bf16 %v946_v55, %v946_v55  ;;  %v725_v0 = vadd.f32 %v724_v41, %v1604_v33  ;;  %1209 = vst.msk [vmem:[%s1620_s28 + $0x44] sm:$0xf] %vm477_vm1, %v1278_v46  ;;  %v880_v12 = vadd.f32 %v879_v51, %v1604_v33  ;;  %v882_v8 = vpop.f32.mrb[15].mxu1 }
 0x112   : > { %983 = vst.msk [vmem:[%s1769_s30] sm:$0xf] %vm477_vm1, %v1293_v44  ;;  %v1286_v1 = vpack.c.bf16 %v895_v50, %v895_v50  ;;  %v944_v4 = vmax.f32 %v789_v31, %v895_v50  ;;  %v736_v7 = vadd.f32 %v1380_v53, %v1665_v6  ;;  %v1283_v61 = vpack.c.bf16 %v745_v59, %v745_v59 }
 0x113   : > { %986 = vst.msk [vmem:[%s1769_s30 + $0xc] sm:$0xf] %vm477_vm1, %v1296_v57  ;;  %v794_v9 = vmax.f32 %v639_v52, %v745_v59  ;;  %v900_v10 = vmax.f32 %v888_v62, 0.0  ;;  %v743_v11 = vmax.f32 %v725_v0, 0.0  ;;  %v898_v14 = vmax.f32 %v880_v12, 0.0 }
 0x114   : > { %1241 = vst.msk [vmem:[%s1620_s28 + $0x64] sm:$0xf] %vm477_vm1, %v1286_v1  ;;  %v1294_v13 = vpack.c.bf16 %v944_v4, %v944_v4  ;;  %v746_v33 = vmax.f32 %v736_v7, 0.0  ;;  %v891_v15 = vadd.f32 %v1396_v2, %v1665_v6  ;;  %1214 = vst.msk [vmem:[%s1620_s28 + $0x58] sm:$0xf] %vm477_vm1, %v1283_v61  ;;  %v728_v23 = vadd.f32 %v727_v5, %v1606_v35 }
 0x115   : > { %v1291_v16 = vpack.c.bf16 %v900_v10, %v900_v10  ;;  %v949_v30 = vmax.f32 %v794_v9, %v900_v10  ;;  %v1281_v18 = vpack.c.bf16 %v743_v11, %v743_v11  ;;  %v792_v17 = vmax.f32 %v637_v42, %v743_v11 }
 0x116   : > { %984 = vst.msk [vmem:[%s1769_s30 + $0x4] sm:$0xf] %vm477_vm1, %v1294_v13  ;;  %v1289_v22 = vpack.c.bf16 %v898_v14, %v898_v14  ;;  %v1284_v52 = vpack.c.bf16 %v746_v33, %v746_v33  ;;  %v795_v6 = vmax.f32 %v640_v47, %v746_v33  ;;  %v901_v19 = vmax.f32 %v891_v15, 0.0 }
 0x117   : > { %1246 = vst.msk [vmem:[%s1620_s28 + $0x78] sm:$0xf] %vm477_vm1, %v1291_v16  ;;  %v1299_v20 = vpack.c.bf16 %v949_v30, %v949_v30  ;;  %1212 = vst.msk [vmem:[%s1620_s28 + $0x50] sm:$0xf] %vm477_vm1, %v1281_v18  ;;  %v947_v29 = vmax.f32 %v792_v17, %v898_v14  ;;  %v883_v28 = vadd.f32 %v882_v8, %v1606_v35  ;;  %v744_v47 = vmax.f32 %v728_v23, 0.0 }
 0x118   : > { %1244 = vst.msk [vmem:[%s1620_s28 + $0x70] sm:$0xf] %vm477_vm1, %v1289_v22  ;;  %1215 = vst.msk [vmem:[%s1620_s28 + $0x5c] sm:$0xf] %vm477_vm1, %v1284_v52  ;;  %v1292_v34 = vpack.c.bf16 %v901_v19, %v901_v19  ;;  %v950_v39 = vmax.f32 %v795_v6, %v901_v19 }
 0x119   : > { %989 = vst.msk [vmem:[%s1769_s30 + $0x18] sm:$0xf] %vm477_vm1, %v1299_v20  ;;  %v1297_v42 = vpack.c.bf16 %v947_v29, %v947_v29  ;;  %v899_v21 = vmax.f32 %v883_v28, 0.0  ;;  %v1282_v35 = vpack.c.bf16 %v744_v47, %v744_v47  ;;  %v793_v25 = vmax.f32 %v638_v56, %v744_v47 }
 0x11a   : > { %1247 = vst.msk [vmem:[%s1620_s28 + $0x7c] sm:$0xf] %vm477_vm1, %v1292_v34  ;;  %v1300_v24 = vpack.c.bf16 %v950_v39, %v950_v39 }
 0x11b   : > { %987 = vst.msk [vmem:[%s1769_s30 + $0x10] sm:$0xf] %vm477_vm1, %v1297_v42  ;;  %v1290_v26 = vpack.c.bf16 %v899_v21, %v899_v21  ;;  %1213 = vst.msk [vmem:[%s1620_s28 + $0x54] sm:$0xf] %vm477_vm1, %v1282_v35  ;;  %v948_v32 = vmax.f32 %v793_v25, %v899_v21 }
 0x11c   : > { %990 = vst.msk [vmem:[%s1769_s30 + $0x1c] sm:$0xf] %vm477_vm1, %v1300_v24 }
 0x11d   : > { %1245 = vst.msk [vmem:[%s1620_s28 + $0x74] sm:$0xf] %vm477_vm1, %v1290_v26  ;;  %v1298_v27 = vpack.c.bf16 %v948_v32, %v948_v32 }
 0x11f   : > { %988 = vst.msk [vmem:[%s1769_s30 + $0x14] sm:$0xf] %vm477_vm1, %v1298_v27 }
 0x120 PF: > { %s15_s17 = sadd.s32 1, %s1466_s17   ;;  %s1855_s15 = smov %s1462_s16 }
 0x121   : > { %p12_p5 = scmp.ge.s32.totalorder %s15_s17, 4   ;;  %s1856_s16 = smov %s1858_s18 }
 0x123   :  { %14 = sbr.rel (!%p12_p5) target bundleno = 2 (0x2), region = 80 }

// kernel: dcp_forward.58
= control target key start
LH: loop header
LB: loop body
LE: loop exit
PB: predicated region body
PF: predicated region fallthrough
CT: control target
= control target key end

     0   :  { %s2142_s15 = smov 0   ;;  %s2144_s16 = smov 0   ;;  %s2803_s0 = inlined_call_operand.vmem [shape: bf16[128,64], index: 0, kind: input, shape index: {}]   ;;  %s2804_s1 = inlined_call_operand.vmem [shape: bf16[2,4,64,16], index: 1, kind: input, shape index: {}]   ;;  %s2805_s2 = inlined_call_operand.vmem [shape: f32[128,1], index: 2, kind: input, shape index: {}]   ;;  %s2806_s3 = inlined_call_operand.vmem [shape: bf16[2,4,128,16], index: 3, kind: output, shape index: {0}]   ;;  %s2807_s4 = inlined_call_operand.vmem [shape: bf16[2,128,16], index: 4, kind: output, shape index: {1}]  }
   0x1   :  { %s2146_s17 = smov 0  }
   0x2 LB: > { %s27_s18 = sadd.s32 1, %s2110_s16  ;;  %p1597_p0 = scmp.ge.s32.totalorder %s2114_s17, 1  ;;  %s2114_s17 = sphi %s2146_s17, %s15_s17   ;;  %s2110_s16 = sphi %s2144_s16, %s2831_s16   ;;  %s2106_s15 = sphi %s2142_s15, %s2830_s15  }
   0x3   : > { %p29_p1 = scmp.ge.s32.totalorder %s27_s18, 2  ;;  %p186_p2 = scmp.lt.s32.totalorder %s2114_s17, 3 }
   0x5   : > { %s2833_s18 = smov (%p29_p1, %s27_s18), 0  ;;  %p187_p3 = pnand %p1597_p0, %p186_p2 }
   0x7   : > { %190 = sbr.rel (%p187_p3) target bundleno = 329 (0x149), region = 32 }
   0xe   : > { %p226_p4 = scmp.lt.s32.totalorder %s2106_s15, 1  ;;  %v2163_v0 = vld [vmem:[%s2803_s0] sm:$0xff]   ;;  %vm435_vm0 = vcmask 523264   ;;  %v2116_v1 = vmov 0   ;;  %v2190_v12 = vld [vmem:[%s2803_s0 + $0x8] sm:$0xff]   ;;  %v2195_v13 = vld [vmem:[%s2803_s0 + $0x10] sm:$0xff]  }
   0xf   : > { %1953 = vmatprep.mubr.msk.bf16.mxu0 %vm435_vm0, %v2163_v0  ;;  %1977 = vmatprep.mubr.msk.bf16.mxu1 %vm435_vm0, %v2163_v0  ;;  %v267_v16 = vld [vmem:[%s2805_s2] sm:$0xff]  ;;  %v269_v18 = vld [vmem:[%s2805_s2 + $0x10] sm:$0xff]  ;;  %v2218_v20 = vld [vmem:[%s2803_s0 + $0x18] sm:$0xff]   ;;  %vm637_vm1 = vcmask 125952  }
  0x10   : > { %s2835_s15 = smov (!%p226_p4, %s2106_s15), 1  ;;  %2066 = vset.pattern.permute.xlu0 %v2116_v1  ;;  %2067 = vset.pattern.permute.xlu1 %v2116_v1  ;;  %v2223_v21 = vld [vmem:[%s2803_s0 + $0x20] sm:$0xff]   ;;  %v268_v22 = vld [vmem:[%s2805_s2 + $0x8] sm:$0xff]  ;;  %v270_v25 = vld [vmem:[%s2805_s2 + $0x18] sm:$0xff] }
  0x11   : > { %s1814_s21 = sshll.u32 %s2835_s15, 7  ;;  %293 = vperm.xlu0 %2066, %v267_v16   ;;  %303 = vperm.xlu1 %2067, %v269_v18   ;;  %v271_v26 = vld [vmem:[%s2805_s2 + $0x20] sm:$0xff]  ;;  %v2085_v27 = vld [vmem:[%s2803_s0 + $0x28] sm:$0xff]   ;;  %v2088_v28 = vld [vmem:[%s2803_s0 + $0x30] sm:$0xff]   ;;  %s1815_s27 = sshll.u32 %s2835_s15, 8 }
  0x12   : > { %s2175_s24 = scalar_lea.vmem %s2804_s1, %s1814_s21  ;;  %v272_v29 = vld [vmem:[%s2805_s2 + $0x28] sm:$0xff]  ;;  %v273_v30 = vld [vmem:[%s2805_s2 + $0x30] sm:$0xff]  ;;  %v274_v31 = vld [vmem:[%s2805_s2 + $0x38] sm:$0xff]  ;;  %s2349_s30 = scalar_lea.vmem %s2806_s3, %s1815_s27 }
  0x13   : > { %v2068_v2 = vld [vmem:[%s2175_s24] sm:$0xff]   ;;  %v2070_v4 = vld [vmem:[%s2175_s24 + $0x8] sm:$0xff]   ;;  %v2072_v6 = vld [vmem:[%s2175_s24 + $0x10] sm:$0xff]   ;;  %s1816_s5 = sshll.u32 %s2835_s15, 6 }
  0x14   : > { %v2069_v3 = vld [vmem:[%s2175_s24 + $0x20] sm:$0xff]   ;;  %1945 = vmatprep.subr.bf16.mxu0 %v2068_v2  ;;  %v2071_v5 = vld [vmem:[%s2175_s24 + $0x28] sm:$0xff]   ;;  %v2073_v7 = vld [vmem:[%s2175_s24 + $0x30] sm:$0xff]   ;;  %s2634_s7 = scalar_lea.vmem %s2807_s4, %s1816_s5 }
  0x15   : > { %1969 = vmatprep.subr.bf16.mxu1 %v2069_v3  ;;  %1946 = vmatpush3.bf16.msra.mxu0 %v2068_v2  ;;  %v2074_v8 = vld [vmem:[%s2175_s24 + $0x18] sm:$0xff]   ;;  %v2078_v10 = vld [vmem:[%s2175_s24 + $0x40] sm:$0xff]   ;;  %v2082_v14 = vld [vmem:[%s2175_s24 + $0x48] sm:$0xff]  }
  0x16   : > { %1970 = vmatpush3.bf16.msra.mxu1 %v2069_v3  ;;  %1947 = vmatprep.subr.bf16.mxu0 %v2070_v4  ;;  %v2075_v9 = vld [vmem:[%s2175_s24 + $0x38] sm:$0xff]   ;;  %v2079_v11 = vld [vmem:[%s2175_s24 + $0x60] sm:$0xff]   ;;  %v2083_v15 = vld [vmem:[%s2175_s24 + $0x68] sm:$0xff]  }
  0x17   : > { %1971 = vmatprep.subr.bf16.mxu1 %v2071_v5  ;;  %v2086_v17 = vld [vmem:[%s2175_s24 + $0x50] sm:$0xff]   ;;  %v2090_v23 = vld [vmem:[%s2175_s24 + $0x58] sm:$0xff]   ;;  %298 = vperm.xlu0 %2066, %v268_v22   ;;  %v275_v32 = vld [vmem:[%s2805_s2 + $0x40] sm:$0xff] }
  0x18   : > { %v2087_v19 = vld [vmem:[%s2175_s24 + $0x70] sm:$0xff]   ;;  %v2091_v24 = vld [vmem:[%s2175_s24 + $0x78] sm:$0xff]   ;;  %308 = vperm.xlu1 %2067, %v270_v25   ;;  %v276_v34 = vld [vmem:[%s2805_s2 + $0x48] sm:$0xff] }
  0x19   : > { %1948 = vmatpush3.bf16.msra.mxu0 %v2070_v4  ;;  %v2089_v33 = vld [vmem:[%s2803_s0 + $0x38] sm:$0xff]   ;;  %v277_v35 = vld [vmem:[%s2805_s2 + $0x50] sm:$0xff]  ;;  %v279_v37 = vld [vmem:[%s2805_s2 + $0x60] sm:$0xff] }
  0x1a   : > { %1972 = vmatpush3.bf16.msra.mxu1 %v2071_v5  ;;  %1949 = vmatprep.subr.bf16.mxu0 %v2072_v6  ;;  %v278_v36 = vld [vmem:[%s2805_s2 + $0x58] sm:$0xff]  ;;  %v280_v38 = vld [vmem:[%s2805_s2 + $0x68] sm:$0xff]  ;;  %v281_v39 = vld [vmem:[%s2805_s2 + $0x70] sm:$0xff] }
  0x1b   : > { %1973 = vmatprep.subr.bf16.mxu1 %v2073_v7  ;;  %313 = vperm.xlu0 %2066, %v271_v26   ;;  %v282_v40 = vld [vmem:[%s2805_s2 + $0x78] sm:$0xff] }
  0x1c   : > { %318 = vperm.xlu1 %2067, %v272_v29  }
  0x1d   : > { %1950 = vmatpush3.bf16.msra.mxu0 %v2072_v6 }
  0x1e   : > { %1974 = vmatpush3.bf16.msra.mxu1 %v2073_v7  ;;  %1951 = vmatprep.subr.bf16.mxu0 %v2074_v8 }
  0x1f   : > { %1975 = vmatprep.subr.bf16.mxu1 %v2075_v9  ;;  %323 = vperm.xlu0 %2066, %v273_v30  }
  0x20   : > { %328 = vperm.xlu1 %2067, %v274_v31  }
  0x21   : > { %1952 = vmatpush3.bf16.msra.mxu0 %v2074_v8 }
  0x22   : > { %1976 = vmatpush3.bf16.msra.mxu1 %v2075_v9  ;;  %1993 = vmatprep.subr.bf16.mxu0 %v2078_v10 }
  0x23   : > { %2017 = vmatprep.subr.bf16.mxu1 %v2079_v11  ;;  %333 = vperm.xlu0 %2066, %v275_v32  }
  0x24   : > { %1954 = vmatmul.mubr.msk.bf16.vlgmr.msra.gmra.mrb[0].mxu0 %vm435_vm0, %v2190_v12  ;;  %338 = vperm.xlu1 %2067, %v276_v34  }
  0x25   : > { %1978 = vmatmul.mubr.msk.bf16.vlgmr.msra.gmra.mrb[0].mxu1 %vm435_vm0, %v2190_v12  ;;  %1994 = vmatpush3.bf16.msra.mxu0 %v2078_v10 }
  0x26   : > { %2018 = vmatpush3.bf16.msra.mxu1 %v2079_v11  ;;  %1957 = vmatprep.mubr.msk.bf16.mxu0 %vm435_vm0, %v2195_v13 }
  0x27   : > { %1981 = vmatprep.mubr.msk.bf16.mxu1 %vm435_vm0, %v2195_v13  ;;  %1995 = vmatprep.subr.bf16.mxu0 %v2082_v14 }
  0x28   : > { %2019 = vmatprep.subr.bf16.mxu1 %v2083_v15  ;;  %343 = vperm.xlu0 %2066, %v277_v35  }
  0x29   : > { %1996 = vmatpush3.bf16.msra.mxu0 %v2082_v14  ;;  %348 = vperm.xlu1 %2067, %v278_v36  }
  0x2a   : > { %2020 = vmatpush3.bf16.msra.mxu1 %v2083_v15  ;;  %1997 = vmatprep.subr.bf16.mxu0 %v2086_v17 }
  0x2b   : > { %2021 = vmatprep.subr.bf16.mxu1 %v2087_v19 }
  0x2c   : > { %1958 = vmatmul.mubr.msk.bf16.gmra.mrb[4].mxu0 %vm435_vm0, %v2218_v20  ;;  %353 = vperm.xlu0 %2066, %v279_v37  }
  0x2d   : > { %1982 = vmatmul.mubr.msk.bf16.gmra.mrb[4].mxu1 %vm435_vm0, %v2218_v20  ;;  %1961 = vmatprep.mubr.msk.bf16.mxu0 %vm435_vm0, %v2223_v21 }
  0x2e   : > { %1985 = vmatprep.mubr.msk.bf16.mxu1 %vm435_vm0, %v2223_v21  ;;  %1998 = vmatpush3.bf16.msra.mxu0 %v2086_v17 }
  0x2f   : > { %2022 = vmatpush3.bf16.msra.mxu1 %v2087_v19  ;;  %1999 = vmatprep.subr.bf16.mxu0 %v2090_v23 }
  0x30   : > { %2023 = vmatprep.subr.bf16.mxu1 %v2091_v24  ;;  %358 = vperm.xlu1 %2067, %v280_v38  }
  0x31   : > { %363 = vperm.xlu0 %2066, %v281_v39  }
  0x32   : > { %2000 = vmatpush3.bf16.msra.mxu0 %v2090_v23 }
  0x33   : > { %2024 = vmatpush3.bf16.msra.mxu1 %v2091_v24 }
  0x34   : > { %1962 = vmatmul.mubr.msk.bf16.gmra.mrb[8].mxu0 %vm435_vm0, %v2085_v27  ;;  %368 = vperm.xlu1 %2067, %v282_v40  }
  0x35   : > { %1986 = vmatmul.mubr.msk.bf16.gmra.mrb[8].mxu1 %vm435_vm0, %v2085_v27  ;;  %1965 = vmatprep.mubr.msk.bf16.mxu0 %vm435_vm0, %v2088_v28 }
  0x36   : > { %1989 = vmatprep.mubr.msk.bf16.mxu1 %vm435_vm0, %v2088_v28 }
  0x3c   : > { %1966 = vmatmul.mubr.msk.bf16.gmra.mrb[12].mxu0 %vm435_vm0, %v2089_v33 }
  0x3d   : > { %1990 = vmatmul.mubr.msk.bf16.gmra.mrb[12].mxu1 %vm435_vm0, %v2089_v33  ;;  %2001 = vmatprep.mubr.msk.bf16.mxu0 %vm435_vm0, %v2163_v0 }
  0x3e   : > { %2025 = vmatprep.mubr.msk.bf16.mxu1 %vm435_vm0, %v2163_v0 }
  0x44   : > { %2002 = vmatmul.mubr.msk.bf16.vlgmr.msra.gmra.mrb[16].mxu0 %vm435_vm0, %v2190_v12 }
  0x45   : > { %2026 = vmatmul.mubr.msk.bf16.vlgmr.msra.gmra.mrb[16].mxu1 %vm435_vm0, %v2190_v12  ;;  %2005 = vmatprep.mubr.msk.bf16.mxu0 %vm435_vm0, %v2195_v13 }
  0x46   : > { %2029 = vmatprep.mubr.msk.bf16.mxu1 %vm435_vm0, %v2195_v13 }
  0x4c   : > { %2006 = vmatmul.mubr.msk.bf16.gmra.mrb[20].mxu0 %vm435_vm0, %v2218_v20 }
  0x4d   : > { %2030 = vmatmul.mubr.msk.bf16.gmra.mrb[20].mxu1 %vm435_vm0, %v2218_v20  ;;  %2009 = vmatprep.mubr.msk.bf16.mxu0 %vm435_vm0, %v2223_v21 }
  0x4e   : > { %2033 = vmatprep.mubr.msk.bf16.mxu1 %vm435_vm0, %v2223_v21 }
  0x54   : > { %2010 = vmatmul.mubr.msk.bf16.gmra.mrb[24].mxu0 %vm435_vm0, %v2085_v27 }
  0x55   : > { %2034 = vmatmul.mubr.msk.bf16.gmra.mrb[24].mxu1 %vm435_vm0, %v2085_v27  ;;  %2013 = vmatprep.mubr.msk.bf16.mxu0 %vm435_vm0, %v2088_v28 }
  0x56   : > { %2037 = vmatprep.mubr.msk.bf16.mxu1 %vm435_vm0, %v2088_v28 }
  0x5c   : > { %2014 = vmatmul.mubr.msk.bf16.gmra.mrb[28].mxu0 %vm435_vm0, %v2089_v33 }
  0x5d   : > { %2038 = vmatmul.mubr.msk.bf16.gmra.mrb[28].mxu1 %vm435_vm0, %v2089_v33 }
  0x90   : > { %v2318_v41 = vpop.permute.xlu0 %293  ;;  %v2320_v42 = vpop.permute.xlu1 %303 }
  0x96   : > { %v2322_v43 = vpop.permute.xlu0 %298 }
  0x97   : > { %v2324_v44 = vpop.permute.xlu1 %308 }
  0x9a   : > { %v2326_v45 = vpop.permute.xlu0 %313 }
  0x9b   : > { %v2328_v46 = vpop.permute.xlu1 %318 }
  0x9e   : > { %v2330_v47 = vpop.permute.xlu0 %323 }
  0x9f   : > { %v2332_v48 = vpop.permute.xlu1 %328 }
  0xa2   : > { %v2334_v49 = vpop.permute.xlu0 %333 }
  0xa3   : > { %v2336_v51 = vpop.permute.xlu1 %338 }
  0xa7   : > { %v2382_v17 = vpop.permute.xlu0 %343 }
  0xa8   : > { %v2394_v22 = vpop.permute.xlu1 %348 }
  0xf7   : > { %v1955_v50 = vpop.f32.mrb[0].mxu0 }
  0xf8   : > { %v503_v52 = vadd.f32 %v1955_v50, %v2320_v42  ;;  %v1979_v53 = vpop.f32.mrb[0].mxu1  ;;  %v494_v54 = vpop.f32.mrb[1].mxu0 }
  0xf9   : > { %v730_v55 = vadd.f32 %v1979_v53, %v2320_v42  ;;  %v495_v56 = vadd.f32 %v494_v54, %v2318_v41  ;;  %v721_v57 = vpop.f32.mrb[1].mxu1  ;;  %v1956_v58 = vpop.f32.mrb[2].mxu0 }
  0xfa   : > { %v2342_v59 = vmax.f32 %v503_v52, 0.0  ;;  %v722_v60 = vadd.f32 %v721_v57, %v2318_v41  ;;  %v506_v61 = vadd.f32 %v1956_v58, %v2324_v44  ;;  %v1980_v62 = vpop.f32.mrb[2].mxu1  ;;  %v497_v63 = vpop.f32.mrb[3].mxu0 }
  0xfb   : > { %v2351_v0 = vmax.f32 %v730_v55, 0.0  ;;  %v2353_v1 = vmax.f32 %v495_v56, 0.0  ;;  %v733_v2 = vadd.f32 %v1980_v62, %v2324_v44  ;;  %v498_v3 = vadd.f32 %v497_v63, %v2322_v43  ;;  %v724_v4 = vpop.f32.mrb[3].mxu1 }
  0xfc   : > { %v1819_v5 = vpack.c.bf16 %v2342_v59, %v2342_v59  ;;  %v2359_v6 = vmax.f32 %v722_v60, 0.0  ;;  %v2361_v7 = vmax.f32 %v506_v61, 0.0  ;;  %v725_v8 = vadd.f32 %v724_v4, %v2322_v43  ;;  %v2450_v4 = vpop.permute.xlu0 %353 }
  0xfd   : > { %v1835_v9 = vpack.c.bf16 %v2351_v0, %v2351_v0  ;;  %v1817_v11 = vpack.c.bf16 %v2353_v1, %v2353_v1  ;;  %v2370_v12 = vmax.f32 %v733_v2, 0.0  ;;  %v2380_v16 = vmax.f32 %v498_v3, 0.0 }
  0xfe   : > { %640 = vst.msk [vmem:[%s2349_s30 + $0x8] sm:$0xf] %vm637_vm1, %v1819_v5  ;;  %v1833_v13 = vpack.c.bf16 %v2359_v6, %v2359_v6  ;;  %v1820_v15 = vpack.c.bf16 %v2361_v7, %v2361_v7  ;;  %v2392_v20 = vmax.f32 %v725_v8, 0.0 }
  0xff   : > { %1678 = vst.msk [vmem:[%s2349_s30 + $0x48] sm:$0xf] %vm637_vm1, %v1835_v9  ;;  %638 = vst.msk [vmem:[%s2349_s30] sm:$0xf] %vm637_vm1, %v1817_v11  ;;  %v1836_v18 = vpack.c.bf16 %v2370_v12, %v2370_v12  ;;  %v1959_v21 = vpop.f32.mrb[4].mxu0  ;;  %v1818_v23 = vpack.c.bf16 %v2380_v16, %v2380_v16 }
 0x100   : > { %1676 = vst.msk [vmem:[%s2349_s30 + $0x40] sm:$0xf] %vm637_vm1, %v1833_v13  ;;  %641 = vst.msk [vmem:[%s2349_s30 + $0xc] sm:$0xf] %vm637_vm1, %v1820_v15  ;;  %v1983_v24 = vpop.f32.mrb[4].mxu1  ;;  %v519_v25 = vadd.f32 %v1959_v21, %v2330_v47  ;;  %v510_v26 = vpop.f32.mrb[5].mxu0  ;;  %v1834_v27 = vpack.c.bf16 %v2392_v20, %v2392_v20 }
 0x101   : > { %1679 = vst.msk [vmem:[%s2349_s30 + $0x4c] sm:$0xf] %vm637_vm1, %v1836_v18  ;;  %v746_v29 = vadd.f32 %v1983_v24, %v2330_v47  ;;  %v511_v30 = vadd.f32 %v510_v26, %v2326_v45  ;;  %v737_v31 = vpop.f32.mrb[5].mxu1  ;;  %v1960_v32 = vpop.f32.mrb[6].mxu0  ;;  %639 = vst.msk [vmem:[%s2349_s30 + $0x4] sm:$0xf] %vm637_vm1, %v1818_v23 }
 0x102   : > { %v2413_v33 = vmax.f32 %v519_v25, 0.0  ;;  %v738_v34 = vadd.f32 %v737_v31, %v2326_v45  ;;  %v522_v35 = vadd.f32 %v1960_v32, %v2332_v48  ;;  %v1984_v36 = vpop.f32.mrb[6].mxu1  ;;  %v513_v37 = vpop.f32.mrb[7].mxu0  ;;  %1677 = vst.msk [vmem:[%s2349_s30 + $0x44] sm:$0xf] %vm637_vm1, %v1834_v27 }
 0x103   : > { %v2419_v38 = vmax.f32 %v746_v29, 0.0  ;;  %v2421_v39 = vmax.f32 %v511_v30, 0.0  ;;  %v749_v40 = vadd.f32 %v1984_v36, %v2332_v48  ;;  %v514_v50 = vadd.f32 %v513_v37, %v2328_v46  ;;  %v740_v52 = vpop.f32.mrb[7].mxu1  ;;  %v2462_v13 = vpop.permute.xlu1 %358 }
 0x104   : > { %v1823_v53 = vpack.c.bf16 %v2413_v33, %v2413_v33  ;;  %v2427_v54 = vmax.f32 %v738_v34, 0.0  ;;  %v2429_v55 = vmax.f32 %v522_v35, 0.0  ;;  %v741_v56 = vadd.f32 %v740_v52, %v2328_v46 }
 0x105   : > { %v1839_v57 = vpack.c.bf16 %v2419_v38, %v2419_v38  ;;  %v1821_v58 = vpack.c.bf16 %v2421_v39, %v2421_v39  ;;  %v2436_v60 = vmax.f32 %v749_v40, 0.0  ;;  %v2438_v61 = vmax.f32 %v514_v50, 0.0 }
 0x106   : > { %644 = vst.msk [vmem:[%s2349_s30 + $0x18] sm:$0xf] %vm637_vm1, %v1823_v53  ;;  %v1837_v62 = vpack.c.bf16 %v2427_v54, %v2427_v54  ;;  %v1824_v2 = vpack.c.bf16 %v2429_v55, %v2429_v55  ;;  %v2448_v3 = vmax.f32 %v741_v56, 0.0 }
 0x107   : > { %1682 = vst.msk [vmem:[%s2349_s30 + $0x58] sm:$0xf] %vm637_vm1, %v1839_v57  ;;  %642 = vst.msk [vmem:[%s2349_s30 + $0x10] sm:$0xf] %vm637_vm1, %v1821_v58  ;;  %v1840_v5 = vpack.c.bf16 %v2436_v60, %v2436_v60  ;;  %v1822_v9 = vpack.c.bf16 %v2438_v61, %v2438_v61  ;;  %v1963_v11 = vpop.f32.mrb[8].mxu0 }
 0x108   : > { %1680 = vst.msk [vmem:[%s2349_s30 + $0x50] sm:$0xf] %vm637_vm1, %v1837_v62  ;;  %645 = vst.msk [vmem:[%s2349_s30 + $0x1c] sm:$0xf] %vm637_vm1, %v1824_v2  ;;  %v1838_v18 = vpack.c.bf16 %v2448_v3, %v2448_v3  ;;  %v1987_v23 = vpop.f32.mrb[8].mxu1  ;;  %v535_v24 = vadd.f32 %v1963_v11, %v2382_v17  ;;  %v526_v25 = vpop.f32.mrb[9].mxu0 }
 0x109   : > { %1683 = vst.msk [vmem:[%s2349_s30 + $0x5c] sm:$0xf] %vm637_vm1, %v1840_v5  ;;  %643 = vst.msk [vmem:[%s2349_s30 + $0x14] sm:$0xf] %vm637_vm1, %v1822_v9  ;;  %v762_v26 = vadd.f32 %v1987_v23, %v2382_v17  ;;  %v527_v27 = vadd.f32 %v526_v25, %v2334_v49  ;;  %v753_v29 = vpop.f32.mrb[9].mxu1  ;;  %v1964_v30 = vpop.f32.mrb[10].mxu0 }
 0x10a   : > { %1681 = vst.msk [vmem:[%s2349_s30 + $0x54] sm:$0xf] %vm637_vm1, %v1838_v18  ;;  %v2483_v31 = vmax.f32 %v535_v24, 0.0  ;;  %v754_v32 = vadd.f32 %v753_v29, %v2334_v49  ;;  %v538_v34 = vadd.f32 %v1964_v30, %v2394_v22  ;;  %v1988_v35 = vpop.f32.mrb[10].mxu1  ;;  %v529_v36 = vpop.f32.mrb[11].mxu0 }
 0x10b   : > { %v2487_v37 = vmax.f32 %v762_v26, 0.0  ;;  %v2489_v40 = vmax.f32 %v527_v27, 0.0  ;;  %v765_v50 = vadd.f32 %v1988_v35, %v2394_v22  ;;  %v530_v52 = vadd.f32 %v529_v36, %v2336_v51  ;;  %v756_v53 = vpop.f32.mrb[11].mxu1  ;;  %v2508_v18 = vpop.permute.xlu0 %363 }
 0x10c   : > { %v1827_v56 = vpack.c.bf16 %v2483_v31, %v2483_v31  ;;  %v2495_v57 = vmax.f32 %v754_v32, 0.0  ;;  %v2497_v58 = vmax.f32 %v538_v34, 0.0  ;;  %v757_v62 = vadd.f32 %v756_v53, %v2336_v51  ;;  %v2530_v34 = vpop.permute.xlu1 %368 }
 0x10d   : > { %v1843_v2 = vpack.c.bf16 %v2487_v37, %v2487_v37  ;;  %v1825_v5 = vpack.c.bf16 %v2489_v40, %v2489_v40  ;;  %v2504_v9 = vmax.f32 %v765_v50, 0.0  ;;  %v2506_v11 = vmax.f32 %v530_v52, 0.0 }
 0x10e   : > { %648 = vst.msk [vmem:[%s2349_s30 + $0x28] sm:$0xf] %vm637_vm1, %v1827_v56  ;;  %v1841_v23 = vpack.c.bf16 %v2495_v57, %v2495_v57  ;;  %v1828_v25 = vpack.c.bf16 %v2497_v58, %v2497_v58  ;;  %v2518_v26 = vmax.f32 %v757_v62, 0.0 }
 0x10f   : > { %1686 = vst.msk [vmem:[%s2349_s30 + $0x68] sm:$0xf] %vm637_vm1, %v1843_v2  ;;  %646 = vst.msk [vmem:[%s2349_s30 + $0x20] sm:$0xf] %vm637_vm1, %v1825_v5  ;;  %v1844_v27 = vpack.c.bf16 %v2504_v9, %v2504_v9  ;;  %v1826_v30 = vpack.c.bf16 %v2506_v11, %v2506_v11  ;;  %v1967_v32 = vpop.f32.mrb[12].mxu0 }
 0x110   : > { %1684 = vst.msk [vmem:[%s2349_s30 + $0x60] sm:$0xf] %vm637_vm1, %v1841_v23  ;;  %649 = vst.msk [vmem:[%s2349_s30 + $0x2c] sm:$0xf] %vm637_vm1, %v1828_v25  ;;  %v1842_v36 = vpack.c.bf16 %v2518_v26, %v2518_v26  ;;  %v1991_v52 = vpop.f32.mrb[12].mxu1  ;;  %v551_v53 = vadd.f32 %v1967_v32, %v2508_v18  ;;  %v542_v56 = vpop.f32.mrb[13].mxu0 }
 0x111   : > { %1687 = vst.msk [vmem:[%s2349_s30 + $0x6c] sm:$0xf] %vm637_vm1, %v1844_v27  ;;  %647 = vst.msk [vmem:[%s2349_s30 + $0x24] sm:$0xf] %vm637_vm1, %v1826_v30  ;;  %v778_v62 = vadd.f32 %v1991_v52, %v2508_v18  ;;  %v543_v2 = vadd.f32 %v542_v56, %v2450_v4  ;;  %v769_v5 = vpop.f32.mrb[13].mxu1  ;;  %v1968_v23 = vpop.f32.mrb[14].mxu0 }
 0x112   : > { %1685 = vst.msk [vmem:[%s2349_s30 + $0x64] sm:$0xf] %vm637_vm1, %v1842_v36  ;;  %v2551_v25 = vmax.f32 %v551_v53, 0.0  ;;  %v770_v50 = vadd.f32 %v769_v5, %v2450_v4  ;;  %v554_v29 = vadd.f32 %v1968_v23, %v2530_v34  ;;  %v1992_v32 = vpop.f32.mrb[14].mxu1  ;;  %v545_v24 = vpop.f32.mrb[15].mxu0 }
 0x113   : > { %v2555_v27 = vmax.f32 %v778_v62, 0.0  ;;  %v2557_v30 = vmax.f32 %v543_v2, 0.0  ;;  %v781_v52 = vadd.f32 %v1992_v32, %v2530_v34  ;;  %v546_v56 = vadd.f32 %v545_v24, %v2462_v13  ;;  %v772_v36 = vpop.f32.mrb[15].mxu1 }
 0x114   : > { %v1831_v53 = vpack.c.bf16 %v2551_v25, %v2551_v25  ;;  %v2563_v5 = vmax.f32 %v770_v50, 0.0  ;;  %v2565_v23 = vmax.f32 %v554_v29, 0.0  ;;  %v773_v35 = vadd.f32 %v772_v36, %v2462_v13 }
 0x115   : > { %v1847_v62 = vpack.c.bf16 %v2555_v27, %v2555_v27  ;;  %v1829_v2 = vpack.c.bf16 %v2557_v30, %v2557_v30  ;;  %v2572_v24 = vmax.f32 %v781_v52, 0.0  ;;  %v2574_v32 = vmax.f32 %v546_v56, 0.0 }
 0x116   : > { %652 = vst.msk [vmem:[%s2349_s30 + $0x38] sm:$0xf] %vm637_vm1, %v1831_v53  ;;  %v1845_v29 = vpack.c.bf16 %v2563_v5, %v2563_v5  ;;  %v1832_v36 = vpack.c.bf16 %v2565_v23, %v2565_v23  ;;  %v2584_v21 = vmax.f32 %v773_v35, 0.0 }
 0x117   : > { %2810 = vst [vmem:[#allocation2_spill] sm:$0xff] %v2574_v32  ;;  %1690 = vst.msk [vmem:[%s2349_s30 + $0x78] sm:$0xf] %vm637_vm1, %v1847_v62  ;;  %v1848_v52 = vpack.c.bf16 %v2572_v24, %v2572_v24  ;;  %v1830_v53 = vpack.c.bf16 %v2574_v32, %v2574_v32  ;;  %v2003_v50 = vpop.f32.mrb[16].mxu0 }
 0x118   : > { %2811 = vst [vmem:[#allocation3_spill] sm:$0xff] %v2584_v21  ;;  %650 = vst.msk [vmem:[%s2349_s30 + $0x30] sm:$0xf] %vm637_vm1, %v1829_v2  ;;  %v1846_v62 = vpack.c.bf16 %v2584_v21, %v2584_v21  ;;  %v973_v56 = vadd.f32 %v2003_v50, %v2320_v42  ;;  %v2027_v8 = vpop.f32.mrb[16].mxu1  ;;  %v964_v63 = vpop.f32.mrb[17].mxu0 }
 0x119   : > { %1688 = vst.msk [vmem:[%s2349_s30 + $0x70] sm:$0xf] %vm637_vm1, %v1845_v29  ;;  %653 = vst.msk [vmem:[%s2349_s30 + $0x3c] sm:$0xf] %vm637_vm1, %v1832_v36  ;;  %v1216_v35 = vadd.f32 %v2027_v8, %v2320_v42  ;;  %v965_v29 = vadd.f32 %v964_v63, %v2318_v41  ;;  %v1207_v36 = vpop.f32.mrb[17].mxu1  ;;  %v2004_v15 = vpop.f32.mrb[18].mxu0 }
 0x11a   : > { %1691 = vst.msk [vmem:[%s2349_s30 + $0x7c] sm:$0xf] %vm637_vm1, %v1848_v52  ;;  %651 = vst.msk [vmem:[%s2349_s30 + $0x34] sm:$0xf] %vm637_vm1, %v1830_v53  ;;  %v1029_v28 = vmax.f32 %v973_v56, 0.0  ;;  %v1208_v2 = vadd.f32 %v1207_v36, %v2318_v41  ;;  %v976_v50 = vadd.f32 %v2004_v15, %v2324_v44  ;;  %v2028_v19 = vpop.f32.mrb[18].mxu1 }
 0x11b   : > { %1689 = vst.msk [vmem:[%s2349_s30 + $0x74] sm:$0xf] %vm637_vm1, %v1846_v62  ;;  %v967_v14 = vpop.f32.mrb[19].mxu0  ;;  %v1272_v52 = vmax.f32 %v1216_v35, 0.0  ;;  %v1027_v10 = vmax.f32 %v965_v29, 0.0  ;;  %v1219_v53 = vadd.f32 %v2028_v19, %v2324_v44  ;;  %v1210_v63 = vpop.f32.mrb[19].mxu1  ;;  %v2812_v62 = vmax.f32 %v2342_v59, %v2351_v0 }
 0x11c   : > { %v968_v42 = vadd.f32 %v967_v14, %v2322_v43  ;;  %v1851_v8 = vpack.c.bf16 %v1029_v28, %v1029_v28  ;;  %v1270_v41 = vmax.f32 %v1208_v2, 0.0  ;;  %v1030_v15 = vmax.f32 %v976_v50, 0.0 }
 0x11d   : > { %v1126_v56 = vmax.f32 %v2812_v62, %v1029_v28  ;;  %v1867_v36 = vpack.c.bf16 %v1272_v52, %v1272_v52  ;;  %v1849_v21 = vpack.c.bf16 %v1027_v10, %v1027_v10  ;;  %v2813_v35 = vmax.f32 %v2353_v1, %v2359_v6 }
 0x11e   : > { %v1273_v44 = vmax.f32 %v1219_v53, 0.0  ;;  %1730 = vst.msk [vmem:[%s2349_s30 + $0x88] sm:$0xf] %vm637_vm1, %v1851_v8  ;;  %v1865_v19 = vpack.c.bf16 %v1270_v41, %v1270_v41  ;;  %v1852_v32 = vpack.c.bf16 %v1030_v15, %v1030_v15  ;;  %v2814_v59 = vmax.f32 %v2361_v7, %v2370_v12 }
 0x11f   : > { %v1124_v29 = vmax.f32 %v2813_v35, %v1027_v10  ;;  %v1369_v14 = vmax.f32 %v1126_v56, %v1272_v52  ;;  %1782 = vst.msk [vmem:[%s2349_s30 + $0xc8] sm:$0xf] %vm637_vm1, %v1867_v36  ;;  %1728 = vst.msk [vmem:[%s2349_s30 + $0x80] sm:$0xf] %vm637_vm1, %v1849_v21  ;;  %v1028_v10 = vmax.f32 %v968_v42, 0.0  ;;  %v1211_v28 = vadd.f32 %v1210_v63, %v2322_v43  ;;  %v2007_v2 = vpop.f32.mrb[20].mxu0 }
 0x120   : > { %v1127_v0 = vmax.f32 %v2814_v59, %v1030_v15  ;;  %v1868_v6 = vpack.c.bf16 %v1273_v44, %v1273_v44  ;;  %1780 = vst.msk [vmem:[%s2349_s30 + $0xc0] sm:$0xf] %vm637_vm1, %v1865_v19  ;;  %1731 = vst.msk [vmem:[%s2349_s30 + $0x8c] sm:$0xf] %vm637_vm1, %v1852_v32  ;;  %v989_v12 = vadd.f32 %v2007_v2, %v2330_v47  ;;  %v2031_v52 = vpop.f32.mrb[20].mxu1  ;;  %v980_v53 = vpop.f32.mrb[21].mxu0 }
 0x121   : > { %v1367_v1 = vmax.f32 %v1124_v29, %v1270_v41  ;;  %v1883_v50 = vpack.c.bf16 %v1369_v14, %v1369_v14  ;;  %v1850_v42 = vpack.c.bf16 %v1028_v10, %v1028_v10  ;;  %v2815_v43 = vmax.f32 %v2380_v16, %v2392_v20  ;;  %v1223_v62 = vpop.f32.mrb[21].mxu1  ;;  %v2008_v56 = vpop.f32.mrb[22].mxu0 }
 0x122   : > { %v1370_v7 = vmax.f32 %v1127_v0, %v1273_v44  ;;  %1783 = vst.msk [vmem:[%s2349_s30 + $0xcc] sm:$0xf] %vm637_vm1, %v1868_v6  ;;  %v1271_v8 = vmax.f32 %v1211_v28, 0.0  ;;  %v1033_v41 = vmax.f32 %v989_v12, 0.0  ;;  %v1232_v15 = vadd.f32 %v2031_v52, %v2330_v47  ;;  %v2032_v35 = vpop.f32.mrb[22].mxu1  ;;  %v983_v29 = vpop.f32.mrb[23].mxu0 }
 0x123   : > { %v1881_v21 = vpack.c.bf16 %v1367_v1, %v1367_v1  ;;  %v1125_v63 = vmax.f32 %v2815_v43, %v1028_v10  ;;  %1449 = vst.msk [vmem:[%s2634_s7 + $0x8] sm:$0xf] %vm637_vm1, %v1883_v50  ;;  %v981_v36 = vadd.f32 %v980_v53, %v2326_v45  ;;  %1729 = vst.msk [vmem:[%s2349_s30 + $0x84] sm:$0xf] %vm637_vm1, %v1850_v42  ;;  %v1226_v19 = vpop.f32.mrb[23].mxu1 }
 0x124   : > { %v1884_v32 = vpack.c.bf16 %v1370_v7, %v1370_v7  ;;  %v1866_v16 = vpack.c.bf16 %v1271_v8, %v1271_v8  ;;  %v1224_v44 = vadd.f32 %v1223_v62, %v2326_v45  ;;  %v992_v14 = vadd.f32 %v2008_v56, %v2332_v48 }
 0x125   : > { %1447 = vst.msk [vmem:[%s2634_s7] sm:$0xf] %vm637_vm1, %v1881_v21  ;;  %v1368_v20 = vmax.f32 %v1125_v63, %v1271_v8  ;;  %v1855_v47 = vpack.c.bf16 %v1033_v41, %v1033_v41  ;;  %v2816_v59 = vmax.f32 %v2413_v33, %v2419_v38  ;;  %v1276_v1 = vmax.f32 %v1232_v15, 0.0 }
 0x126   : > { %1450 = vst.msk [vmem:[%s2634_s7 + $0xc] sm:$0xf] %vm637_vm1, %v1884_v32  ;;  %v1031_v6 = vmax.f32 %v981_v36, 0.0  ;;  %1781 = vst.msk [vmem:[%s2349_s30 + $0xc4] sm:$0xf] %vm637_vm1, %v1866_v16  ;;  %v1274_v28 = vmax.f32 %v1224_v44, 0.0  ;;  %v1235_v2 = vadd.f32 %v2032_v35, %v2332_v48  ;;  %v2817_v33 = vmax.f32 %v2421_v39, %v2427_v54 }
 0x127   : > { %v1130_v0 = vmax.f32 %v2816_v59, %v1033_v41  ;;  %v1882_v10 = vpack.c.bf16 %v1368_v20, %v1368_v20  ;;  %v1034_v45 = vmax.f32 %v992_v14, 0.0  ;;  %1734 = vst.msk [vmem:[%s2349_s30 + $0x98] sm:$0xf] %vm637_vm1, %v1855_v47  ;;  %v1871_v50 = vpack.c.bf16 %v1276_v1, %v1276_v1  ;;  %v2011_v43 = vpop.f32.mrb[24].mxu0 }
 0x128   : > { %v1853_v12 = vpack.c.bf16 %v1031_v6, %v1031_v6  ;;  %v1128_v38 = vmax.f32 %v2817_v33, %v1031_v6  ;;  %v1869_v52 = vpack.c.bf16 %v1274_v28, %v1274_v28  ;;  %v2818_v21 = vmax.f32 %v2429_v55, %v2436_v60  ;;  %v2035_v62 = vpop.f32.mrb[24].mxu1  ;;  %v996_v56 = vpop.f32.mrb[25].mxu0 }
 0x129   : > { %v1373_v7 = vmax.f32 %v1130_v0, %v1276_v1  ;;  %1448 = vst.msk [vmem:[%s2634_s7 + $0x4] sm:$0xf] %vm637_vm1, %v1882_v10  ;;  %v1856_v53 = vpack.c.bf16 %v1034_v45, %v1034_v45  ;;  %v1277_v48 = vmax.f32 %v1235_v2, 0.0  ;;  %1786 = vst.msk [vmem:[%s2349_s30 + $0xd8] sm:$0xf] %vm637_vm1, %v1871_v50  ;;  %v984_v54 = vadd.f32 %v983_v29, %v2328_v46  ;;  %v1239_v15 = vpop.f32.mrb[25].mxu1 }
 0x12a   : > { %v1131_v42 = vmax.f32 %v2818_v21, %v1034_v45  ;;  %1732 = vst.msk [vmem:[%s2349_s30 + $0x90] sm:$0xf] %vm637_vm1, %v1853_v12  ;;  %v1371_v39 = vmax.f32 %v1128_v38, %v1274_v28  ;;  %v1227_v8 = vadd.f32 %v1226_v19, %v2328_v46  ;;  %1784 = vst.msk [vmem:[%s2349_s30 + $0xd0] sm:$0xf] %vm637_vm1, %v1869_v52  ;;  %v2012_v36 = vpop.f32.mrb[26].mxu0  ;;  %v2036_v20 = vpop.f32.mrb[26].mxu1 }
 0x12b   : > { %v1887_v63 = vpack.c.bf16 %v1373_v7, %v1373_v7  ;;  %1735 = vst.msk [vmem:[%s2349_s30 + $0x9c] sm:$0xf] %vm637_vm1, %v1856_v53  ;;  %v1872_v55 = vpack.c.bf16 %v1277_v48, %v1277_v48  ;;  %v1005_v32 = vadd.f32 %v2011_v43, %v2382_v17  ;;  %v1248_v41 = vadd.f32 %v2035_v62, %v2382_v17  ;;  %v999_v44 = vpop.f32.mrb[27].mxu0  ;;  %v1242_v59 = vpop.f32.mrb[27].mxu1 }
 0x12c   : > { %v1374_v60 = vmax.f32 %v1131_v42, %v1277_v48  ;;  %v1885_v35 = vpack.c.bf16 %v1371_v39, %v1371_v39  ;;  %v1032_v46 = vmax.f32 %v984_v54, 0.0  ;;  %v1275_v29 = vmax.f32 %v1227_v8, 0.0 }
 0x12d   : > { %1453 = vst.msk [vmem:[%s2634_s7 + $0x18] sm:$0xf] %vm637_vm1, %v1887_v63  ;;  %v997_v16 = vadd.f32 %v996_v56, %v2334_v49  ;;  %1787 = vst.msk [vmem:[%s2349_s30 + $0xdc] sm:$0xf] %vm637_vm1, %v1872_v55  ;;  %v1037_v19 = vmax.f32 %v1005_v32, 0.0  ;;  %v1280_v17 = vmax.f32 %v1248_v41, 0.0  ;;  %v1240_v47 = vadd.f32 %v1239_v15, %v2334_v49 }
 0x12e   : > { %v1888_v14 = vpack.c.bf16 %v1374_v60, %v1374_v60  ;;  %1451 = vst.msk [vmem:[%s2634_s7 + $0x10] sm:$0xf] %vm637_vm1, %v1885_v35  ;;  %v1854_v0 = vpack.c.bf16 %v1032_v46, %v1032_v46  ;;  %v2819_v1 = vmax.f32 %v2438_v61, %v2448_v3  ;;  %v1870_v10 = vpack.c.bf16 %v1275_v29, %v1275_v29 }
 0x12f   : > { %v1035_v28 = vmax.f32 %v997_v16, 0.0  ;;  %v1859_v45 = vpack.c.bf16 %v1037_v19, %v1037_v19  ;;  %v2820_v2 = vmax.f32 %v2483_v31, %v2487_v37  ;;  %v1875_v49 = vpack.c.bf16 %v1280_v17, %v1280_v17  ;;  %v2015_v21 = vpop.f32.mrb[28].mxu0 }
 0x130   : > { %v1129_v6 = vmax.f32 %v2819_v1, %v1032_v46  ;;  %1454 = vst.msk [vmem:[%s2634_s7 + $0x1c] sm:$0xf] %vm637_vm1, %v1888_v14  ;;  %v1278_v7 = vmax.f32 %v1240_v47, 0.0  ;;  %1733 = vst.msk [vmem:[%s2349_s30 + $0x94] sm:$0xf] %vm637_vm1, %v1854_v0  ;;  %v2821_v3 = vmax.f32 %v2489_v40, %v2495_v57  ;;  %v1008_v38 = vadd.f32 %v2012_v36, %v2394_v22  ;;  %v2039_v43 = vpop.f32.mrb[28].mxu1 }
 0x131   : > { %v1134_v50 = vmax.f32 %v2820_v2, %v1037_v19  ;;  %1785 = vst.msk [vmem:[%s2349_s30 + $0xd4] sm:$0xf] %vm637_vm1, %v1870_v10  ;;  %v1857_v61 = vpack.c.bf16 %v1035_v28, %v1035_v28  ;;  %1738 = vst.msk [vmem:[%s2349_s30 + $0xa8] sm:$0xf] %vm637_vm1, %v1859_v45  ;;  %v1251_v52 = vadd.f32 %v2036_v20, %v2394_v22  ;;  %v1012_v63 = vpop.f32.mrb[29].mxu0  ;;  %v1255_v62 = vpop.f32.mrb[29].mxu1 }
 0x132   : > { %v1372_v12 = vmax.f32 %v1129_v6, %v1275_v29  ;;  %v1132_v33 = vmax.f32 %v2821_v3, %v1035_v28  ;;  %1790 = vst.msk [vmem:[%s2349_s30 + $0xe8] sm:$0xf] %vm637_vm1, %v1875_v49  ;;  %v1873_v37 = vpack.c.bf16 %v1278_v7, %v1278_v7  ;;  %v1000_v53 = vadd.f32 %v999_v44, %v2336_v51  ;;  %v2016_v56 = vpop.f32.mrb[30].mxu0  ;;  %v2040_v15 = vpop.f32.mrb[30].mxu1 }
 0x133   : > { %v1377_v31 = vmax.f32 %v1134_v50, %v1280_v17  ;;  %1736 = vst.msk [vmem:[%s2349_s30 + $0xa0] sm:$0xf] %vm637_vm1, %v1857_v61  ;;  %v1038_v57 = vmax.f32 %v1008_v38, 0.0  ;;  %v1243_v48 = vadd.f32 %v1242_v59, %v2336_v51  ;;  %v1281_v54 = vmax.f32 %v1251_v52, 0.0  ;;  %v1015_v36 = vpop.f32.mrb[31].mxu0  ;;  %v1258_v44 = vpop.f32.mrb[31].mxu1 }
 0x134   : > { %v1886_v42 = vpack.c.bf16 %v1372_v12, %v1372_v12  ;;  %v1375_v40 = vmax.f32 %v1132_v33, %v1278_v7  ;;  %1788 = vst.msk [vmem:[%s2349_s30 + $0xe0] sm:$0xf] %vm637_vm1, %v1873_v37  ;;  %v1036_v8 = vmax.f32 %v1000_v53, 0.0  ;;  %v1021_v22 = vadd.f32 %v2015_v21, %v2508_v18  ;;  %v2827_v21 = vld [vmem:[#allocation2_spill] sm:$0xff] }
 0x135   : > { %v1891_v39 = vpack.c.bf16 %v1377_v31, %v1377_v31  ;;  %v1860_v60 = vpack.c.bf16 %v1038_v57, %v1038_v57  ;;  %v2822_v51 = vmax.f32 %v2497_v58, %v2504_v9  ;;  %v1279_v41 = vmax.f32 %v1243_v48, 0.0 }
 0x136   : > { %1452 = vst.msk [vmem:[%s2634_s7 + $0x14] sm:$0xf] %vm637_vm1, %v1886_v42  ;;  %v1889_v55 = vpack.c.bf16 %v1375_v40, %v1375_v40  ;;  %v1876_v35 = vpack.c.bf16 %v1281_v54, %v1281_v54  ;;  %v1858_v46 = vpack.c.bf16 %v1036_v8, %v1036_v8  ;;  %v2823_v29 = vmax.f32 %v2506_v11, %v2518_v26  ;;  %v2828_v42 = vld [vmem:[#allocation3_spill] sm:$0xff] }
 0x137   : > { %v1135_v32 = vmax.f32 %v2822_v51, %v1038_v57  ;;  %1457 = vst.msk [vmem:[%s2634_s7 + $0x28] sm:$0xf] %vm637_vm1, %v1891_v39  ;;  %v1041_v20 = vmax.f32 %v1021_v22, 0.0  ;;  %1739 = vst.msk [vmem:[%s2349_s30 + $0xac] sm:$0xf] %vm637_vm1, %v1860_v60  ;;  %v1874_v9 = vpack.c.bf16 %v1279_v41, %v1279_v41  ;;  %v1264_v14 = vadd.f32 %v2039_v43, %v2508_v18 }
 0x138   : > { %v1133_v16 = vmax.f32 %v2823_v29, %v1036_v8  ;;  %1455 = vst.msk [vmem:[%s2634_s7 + $0x20] sm:$0xf] %vm637_vm1, %v1889_v55  ;;  %v1013_v19 = vadd.f32 %v1012_v63, %v2450_v4  ;;  %1791 = vst.msk [vmem:[%s2349_s30 + $0xec] sm:$0xf] %vm637_vm1, %v1876_v35  ;;  %v2824_v17 = vmax.f32 %v2551_v25, %v2555_v27 }
 0x139   : > { %v1378_v58 = vmax.f32 %v1135_v32, %v1281_v54  ;;  %1737 = vst.msk [vmem:[%s2349_s30 + $0xa4] sm:$0xf] %vm637_vm1, %v1858_v46  ;;  %v1863_v26 = vpack.c.bf16 %v1041_v20, %v1041_v20  ;;  %v1256_v59 = vadd.f32 %v1255_v62, %v2450_v4  ;;  %1789 = vst.msk [vmem:[%s2349_s30 + $0xe4] sm:$0xf] %vm637_vm1, %v1874_v9  ;;  %v1284_v18 = vmax.f32 %v1264_v14, 0.0 }
 0x13a   : > { %v1376_v11 = vmax.f32 %v1133_v16, %v1279_v41  ;;  %v1138_v47 = vmax.f32 %v2824_v17, %v1041_v20  ;;  %v1039_v1 = vmax.f32 %v1013_v19, 0.0  ;;  %v1024_v6 = vadd.f32 %v2016_v56, %v2530_v34 }
 0x13b   : > { %v1892_v0 = vpack.c.bf16 %v1378_v58, %v1378_v58  ;;  %1742 = vst.msk [vmem:[%s2349_s30 + $0xb8] sm:$0xf] %vm637_vm1, %v1863_v26  ;;  %v1282_v28 = vmax.f32 %v1256_v59, 0.0  ;;  %v1267_v45 = vadd.f32 %v2040_v15, %v2530_v34  ;;  %v1016_v25 = vadd.f32 %v1015_v36, %v2462_v13 }
 0x13c   : > { %v1890_v10 = vpack.c.bf16 %v1376_v11, %v1376_v11  ;;  %v1879_v4 = vpack.c.bf16 %v1284_v18, %v1284_v18  ;;  %v1381_v27 = vmax.f32 %v1138_v47, %v1284_v18  ;;  %v1861_v2 = vpack.c.bf16 %v1039_v1, %v1039_v1 }
 0x13d   : > { %1458 = vst.msk [vmem:[%s2634_s7 + $0x2c] sm:$0xf] %vm637_vm1, %v1892_v0  ;;  %v2825_v50 = vmax.f32 %v2557_v30, %v2563_v5  ;;  %v1877_v7 = vpack.c.bf16 %v1282_v28, %v1282_v28  ;;  %v1042_v12 = vmax.f32 %v1024_v6, 0.0  ;;  %v1285_v61 = vmax.f32 %v1267_v45, 0.0 }
 0x13e   : > { %1456 = vst.msk [vmem:[%s2634_s7 + $0x24] sm:$0xf] %vm637_vm1, %v1890_v10  ;;  %v1040_v34 = vmax.f32 %v1016_v25, 0.0  ;;  %1794 = vst.msk [vmem:[%s2349_s30 + $0xf8] sm:$0xf] %vm637_vm1, %v1879_v4  ;;  %v1895_v3 = vpack.c.bf16 %v1381_v27, %v1381_v27  ;;  %v1259_v30 = vadd.f32 %v1258_v44, %v2462_v13  ;;  %v2826_v38 = vmax.f32 %v2565_v23, %v2572_v24 }
 0x13f   : > { %v1136_v49 = vmax.f32 %v2825_v50, %v1039_v1  ;;  %1740 = vst.msk [vmem:[%s2349_s30 + $0xb0] sm:$0xf] %vm637_vm1, %v1861_v2  ;;  %1792 = vst.msk [vmem:[%s2349_s30 + $0xf0] sm:$0xf] %vm637_vm1, %v1877_v7  ;;  %v1864_v5 = vpack.c.bf16 %v1042_v12, %v1042_v12  ;;  %v1880_v37 = vpack.c.bf16 %v1285_v61, %v1285_v61 }
 0x140   : > { %v1139_v31 = vmax.f32 %v2826_v38, %v1042_v12  ;;  %v1862_v52 = vpack.c.bf16 %v1040_v34, %v1040_v34  ;;  %1461 = vst.msk [vmem:[%s2634_s7 + $0x38] sm:$0xf] %vm637_vm1, %v1895_v3  ;;  %v2829_v40 = vmax.f32 %v2827_v21, %v2828_v42  ;;  %v1283_v13 = vmax.f32 %v1259_v30, 0.0 }
 0x141   : > { %v1379_v33 = vmax.f32 %v1136_v49, %v1282_v28  ;;  %1743 = vst.msk [vmem:[%s2349_s30 + $0xbc] sm:$0xf] %vm637_vm1, %v1864_v5  ;;  %1795 = vst.msk [vmem:[%s2349_s30 + $0xfc] sm:$0xf] %vm637_vm1, %v1880_v37 }
 0x142   : > { %v1137_v57 = vmax.f32 %v2829_v40, %v1040_v34  ;;  %v1382_v48 = vmax.f32 %v1139_v31, %v1285_v61  ;;  %1741 = vst.msk [vmem:[%s2349_s30 + $0xb4] sm:$0xf] %vm637_vm1, %v1862_v52  ;;  %v1878_v23 = vpack.c.bf16 %v1283_v13, %v1283_v13 }
 0x143   : > { %v1893_v53 = vpack.c.bf16 %v1379_v33, %v1379_v33 }
 0x144   : > { %v1380_v24 = vmax.f32 %v1137_v57, %v1283_v13  ;;  %v1896_v43 = vpack.c.bf16 %v1382_v48, %v1382_v48  ;;  %1793 = vst.msk [vmem:[%s2349_s30 + $0xf4] sm:$0xf] %vm637_vm1, %v1878_v23 }
 0x145   : > { %1459 = vst.msk [vmem:[%s2634_s7 + $0x30] sm:$0xf] %vm637_vm1, %v1893_v53 }
 0x146   : > { %v1894_v63 = vpack.c.bf16 %v1380_v24, %v1380_v24  ;;  %1462 = vst.msk [vmem:[%s2634_s7 + $0x3c] sm:$0xf] %vm637_vm1, %v1896_v43 }
 0x148   : > { %1460 = vst.msk [vmem:[%s2634_s7 + $0x34] sm:$0xf] %vm637_vm1, %v1894_v63 }
 0x149 PF: > { %s15_s17 = sadd.s32 1, %s2114_s17   ;;  %s2830_s15 = smov %s2110_s16 }
 0x14a   : > { %p12_p5 = scmp.ge.s32.totalorder %s15_s17, 4   ;;  %s2831_s16 = smov %s2833_s18 }
 0x14c   :  { %14 = sbr.rel (!%p12_p5) target bundleno = 2 (0x2), region = 80 }

// kernel: dcp_forward.96
= control target key start
LH: loop header
LB: loop body
LE: loop exit
PB: predicated region body
PF: predicated region fallthrough
CT: control target
= control target key end

     0   :  { %vm18_vm0 = vcmask 523264   ;;  %s231_s0 = inlined_call_operand.vmem [shape: f32[32,64], index: 0, kind: input, shape index: {}]   ;;  %s232_s1 = inlined_call_operand.vmem [shape: f32[1,64], index: 1, kind: input, shape index: {}]   ;;  %s233_s2 = inlined_call_operand.vmem [shape: f32[1,64], index: 2, kind: input, shape index: {}]   ;;  %s234_s3 = inlined_call_operand.vmem [shape: f32[32,64], index: 3, kind: output, shape index: {}]  }
   0x1   :  { %v14_v0 = vld [vmem:[%s231_s0] sm:$0xff]  ;;  %v16_v1 = vld [vmem:[%s231_s0 + $0x10] sm:$0xff]  ;;  %v15_v2 = vld [vmem:[%s231_s0 + $0x8] sm:$0xff] }
   0x2   :  { %v19_v3 = vsel %vm18_vm0, %v14_v0, 0.0  ;;  %v25_v4 = vsel %vm18_vm0, %v16_v1, 0.0  ;;  %v17_v5 = vld [vmem:[%s231_s0 + $0x18] sm:$0xff]  ;;  %v22_v6 = vsel %vm18_vm0, %v15_v2, 0.0  ;;  %v131_v60 = vld [vmem:[%s232_s1] ss:$0 sm:$0xff] }
   0x3   :  { %20 = vadd.xlane.f32.xlu0 %v19_v3  ;;  %26 = vadd.xlane.f32.xlu1 %v25_v4  ;;  %v28_v7 = vsel %vm18_vm0, %v17_v5, 0.0  ;;  %v132_v63 = vld [vmem:[%s233_s2] ss:$0 sm:$0xff] }
   0x7   :  { %23 = vadd.xlane.f32.xlu0 %v22_v6  ;;  %29 = vadd.xlane.f32.xlu1 %v28_v7 }
  0x90   :  { %v21_v8 = vpop.xlane.xlu0 %20  ;;  %v27_v9 = vpop.xlane.xlu1 %26 }
  0x91   :  { %v32_v10 = vmul.f32 0.015625, %v21_v8  ;;  %v34_v11 = vmul.f32 0.015625, %v27_v9 }
  0x93   :  { %v185_v12 = vsub.f32 %v14_v0, %v32_v10  ;;  %v187_v13 = vsub.f32 %v16_v1, %v34_v11 }
  0x94   :  { %v24_v14 = vpop.xlane.xlu0 %23  ;;  %v30_v15 = vpop.xlane.xlu1 %29 }
  0x95   :  { %v33_v16 = vmul.f32 0.015625, %v24_v14  ;;  %v35_v17 = vmul.f32 0.015625, %v30_v15  ;;  %v40_v18 = vmul.f32 %v185_v12, %v185_v12  ;;  %v42_v19 = vmul.f32 %v187_v13, %v187_v13 }
  0x96   :  { %v68_v61 = vmul.f32 %v131_v60, %v185_v12  ;;  %v70_v3 = vmul.f32 %v131_v60, %v187_v13 }
  0x97   :  { %v193_v20 = vsub.f32 %v15_v2, %v33_v16  ;;  %v195_v21 = vsub.f32 %v17_v5, %v35_v17  ;;  %v44_v22 = vsel %vm18_vm0, %v40_v18, 0.0  ;;  %v50_v25 = vsel %vm18_vm0, %v42_v19, 0.0 }
  0x98   :  { %45 = vadd.xlane.f32.xlu0 %v44_v22 }
  0x99   :  { %v41_v23 = vmul.f32 %v193_v20, %v193_v20  ;;  %v43_v24 = vmul.f32 %v195_v21, %v195_v21  ;;  %v69_v1 = vmul.f32 %v131_v60, %v193_v20  ;;  %v71_v8 = vmul.f32 %v131_v60, %v195_v21 }
  0x9b   :  { %v47_v26 = vsel %vm18_vm0, %v41_v23, 0.0  ;;  %v53_v27 = vsel %vm18_vm0, %v43_v24, 0.0 }
  0x9c   :  { %48 = vadd.xlane.f32.xlu1 %v47_v26  ;;  %51 = vadd.xlane.f32.xlu0 %v50_v25 }
  0xa0   :  { %54 = vadd.xlane.f32.xlu1 %v53_v27 }
 0x125   :  { %v46_v28 = vpop.xlane.xlu0 %45 }
 0x126   :  { %v57_v29 = vmul.f32 0.015873017, %v46_v28 }
 0x128   :  { %133 = vrsqrt.f32 %v57_v29  ;;  %vm74_vm1 = vcmp.eq.f32.partialorder %v57_v29, inf  ;;  %v77_v38 = vand.u32 2147483648, %v57_v29  ;;  %vm76_vm2 = vcmp.eq.f32.partialorder %v57_v29, 0.0 }
 0x129   :  { %v49_v30 = vpop.xlane.xlu1 %48  ;;  %v52_v32 = vpop.xlane.xlu0 %51 }
 0x12a   :  { %v58_v31 = vmul.f32 0.015873017, %v49_v30  ;;  %v59_v33 = vmul.f32 0.015873017, %v52_v32 }
 0x12c   :  { %135 = vrsqrt.f32 %v58_v31  ;;  %vm81_vm3 = vcmp.eq.f32.partialorder %v58_v31, inf  ;;  %v84_v45 = vand.u32 2147483648, %v58_v31  ;;  %vm83_vm4 = vcmp.eq.f32.partialorder %v58_v31, 0.0 }
 0x12d   :  { %137 = vrsqrt.f32 %v59_v33  ;;  %v55_v34 = vpop.xlane.xlu1 %54  ;;  %vm88_vm5 = vcmp.eq.f32.partialorder %v59_v33, inf  ;;  %v91_v48 = vand.u32 2147483648, %v59_v33  ;;  %vm90_vm6 = vcmp.eq.f32.partialorder %v59_v33, 0.0 }
 0x12e   :  { %v60_v35 = vmul.f32 0.015873017, %v55_v34 }
 0x130   :  { %139 = vrsqrt.f32 %v60_v35  ;;  %vm95_vm7 = vcmp.eq.f32.partialorder %v60_v35, inf  ;;  %v98_v56 = vand.u32 2147483648, %v60_v35  ;;  %vm97_vm8 = vcmp.eq.f32.partialorder %v60_v35, 0.0 }
 0x132   :  { %v134_v36 = vpop.eup %133 }
 0x133   :  { %v73_v37 = vmul.f32 %v134_v36, %v57_v29 }
 0x135   :  { %v75_v40 = vsel %vm74_vm1, %v57_v29, %v73_v37 }
 0x136   :  { %v136_v39 = vpop.eup %135  ;;  %v78_v42 = vsel %vm76_vm2, %v77_v38, %v75_v40 }
 0x137   :  { %v138_v41 = vpop.eup %137  ;;  %v80_v43 = vmul.f32 %v136_v39, %v58_v31  ;;  %v100_v44 = vadd.f32 1e-06, %v78_v42 }
 0x138   :  { %v87_v46 = vmul.f32 %v138_v41, %v59_v33 }
 0x139   :  { %v82_v47 = vsel %vm81_vm3, %v58_v31, %v80_v43  ;;  %141 = vrcp.f32 %v100_v44 }
 0x13a   :  { %v140_v49 = vpop.eup %139  ;;  %v85_v50 = vsel %vm83_vm4, %v84_v45, %v82_v47  ;;  %v89_v51 = vsel %vm88_vm5, %v59_v33, %v87_v46 }
 0x13b   :  { %v101_v52 = vadd.f32 1e-06, %v85_v50  ;;  %v92_v53 = vsel %vm90_vm6, %v91_v48, %v89_v51  ;;  %v94_v54 = vmul.f32 %v140_v49, %v60_v35 }
 0x13c   :  { %v102_v55 = vadd.f32 1e-06, %v92_v53 }
 0x13d   :  { %143 = vrcp.f32 %v101_v52  ;;  %v96_v57 = vsel %vm95_vm7, %v60_v35, %v94_v54 }
 0x13e   :  { %145 = vrcp.f32 %v102_v55  ;;  %v99_v58 = vsel %vm97_vm8, %v98_v56, %v96_v57 }
 0x13f   :  { %v103_v59 = vadd.f32 1e-06, %v99_v58 }
 0x141   :  { %147 = vrcp.f32 %v103_v59 }
 0x143   :  { %v142_v62 = vpop.eup %141 }
 0x144   :  { %v105_v0 = vmul.f32 %v142_v62, %v68_v61 }
 0x146   :  { %v119_v4 = vadd.f32 %v132_v63, %v105_v0 }
 0x147   :  { %v144_v2 = vpop.eup %143 }
 0x148   :  { %v146_v5 = vpop.eup %145  ;;  %v107_v6 = vmul.f32 %v144_v2, %v69_v1  ;;  %123 = vst.msk [vmem:[%s234_s3] sm:$0xff] %vm18_vm0, %v119_v4 }
 0x149   :  { %v109_v7 = vmul.f32 %v146_v5, %v70_v3 }
 0x14a   :  { %v120_v9 = vadd.f32 %v132_v63, %v107_v6 }
 0x14b   :  { %v148_v10 = vpop.eup %147  ;;  %v121_v11 = vadd.f32 %v132_v63, %v109_v7 }
 0x14c   :  { %124 = vst.msk [vmem:[%s234_s3 + $0x8] sm:$0xff] %vm18_vm0, %v120_v9  ;;  %v111_v12 = vmul.f32 %v148_v10, %v71_v8 }
 0x14d   :  { %125 = vst.msk [vmem:[%s234_s3 + $0x10] sm:$0xff] %vm18_vm0, %v121_v11 }
 0x14e   :  { %v122_v13 = vadd.f32 %v132_v63, %v111_v12 }
 0x150   :  { %126 = vst.msk [vmem:[%s234_s3 + $0x18] sm:$0xff] %vm18_vm0, %v122_v13 }

// kernel: dcp_forward.60
= control target key start
LH: loop header
LB: loop body
LE: loop exit
PB: predicated region body
PF: predicated region fallthrough
CT: control target
= control target key end

     0   :  { %s1102_s12 = smov 0   ;;  %s1104_s13 = smov 0   ;;  %s1263_s0 = inlined_call_operand.vmem [shape: bf16[64,512], index: 0, kind: input, shape index: {}]   ;;  %s1264_s1 = inlined_call_operand.vmem [shape: bf16[2,512,16], index: 1, kind: input, shape index: {}]   ;;  %s1265_s2 = inlined_call_operand.vmem [shape: f32[64,1], index: 2, kind: input, shape index: {}]   ;;  %s1266_s3 = inlined_call_operand.vmem [shape: f32[2,64,16], index: 3, kind: output, shape index: {}]  }
   0x1   :  { %s1106_s14 = smov 0  }
   0x2 LB: > { %s25_s15 = sadd.s32 1, %s1075_s13  ;;  %p837_p0 = scmp.ge.s32.totalorder %s1079_s14, 1  ;;  %s1079_s14 = sphi %s1106_s14, %s13_s14   ;;  %s1075_s13 = sphi %s1104_s13, %s1268_s13   ;;  %s1071_s12 = sphi %s1102_s12, %s1267_s12  }
   0x3   : > { %p27_p1 = scmp.ge.s32.totalorder %s25_s15, 2  ;;  %p156_p2 = scmp.lt.s32.totalorder %s1079_s14, 3 }
   0x5   : > { %s1270_s15 = smov (%p27_p1, %s25_s15), 0  ;;  %p157_p3 = pnand %p837_p0, %p156_p2 }
   0x6   : > { %p186_p4 = scmp.lt.s32.totalorder (!%p157_p3), %s1071_s12, 1  ;;  %v1035_v0 = vld [vmem:[%s1263_s0 + $0x4] ss:$16 sps:$4 sm:$0xff] (!%p157_p3)   ;;  %v1081_v1 = vmov (!%p157_p3), 0   ;;  %v1038_v2 = vld [vmem:[%s1263_s0 + $0xc] ss:$16 sps:$4 sm:$0xff] (!%p157_p3)  }
   0x7   : > { %160 = sbr.rel (%p157_p3) target bundleno = 299 (0x12b), region = 32  ;;  %999 = vset.pattern.permute.xlu0 (!%p157_p3), %v1081_v1  ;;  %1000 = vset.pattern.permute.xlu1 (!%p157_p3), %v1081_v1  ;;  %v1033_v33 = vld [vmem:[%s1263_s0] ss:$16 sps:$4 sm:$0xff] (!%p157_p3)   ;;  %v1036_v35 = vld [vmem:[%s1263_s0 + $0x8] ss:$16 sps:$4 sm:$0xff] (!%p157_p3)   ;;  %vm741_vm0 = vcmask (!%p157_p3), 130048  }
   0x8   : > { %635 = vmatprep.mubr.bf16.mxu0 (!%p157_p3), %v1035_v0  ;;  %700 = vmatprep.mubr.bf16.mxu1 (!%p157_p3), %v1038_v2  ;;  %v1039_v37 = vld [vmem:[%s1263_s0 + $0x24] ss:$16 sps:$4 sm:$0xff] (!%p157_p3)   ;;  %v1041_v38 = vld [vmem:[%s1263_s0 + $0x2c] ss:$16 sps:$4 sm:$0xff] (!%p157_p3)   ;;  %v1043_v42 = vld [vmem:[%s1263_s0 + $0x20] ss:$16 sps:$4 sm:$0xff] (!%p157_p3)  }
   0x9   : > { %v283_v39 = vld [vmem:[%s1265_s2] sm:$0xff] (!%p157_p3)  ;;  %v285_v40 = vld [vmem:[%s1265_s2 + $0x10] sm:$0xff] (!%p157_p3)  ;;  %v284_v41 = vld [vmem:[%s1265_s2 + $0x8] sm:$0xff] (!%p157_p3) }
   0xa   : > { %293 = vperm.xlu0 (!%p157_p3), %999, %v283_v39   ;;  %303 = vperm.xlu1 (!%p157_p3), %1000, %v285_v40   ;;  %v286_v43 = vld [vmem:[%s1265_s2 + $0x18] sm:$0xff] (!%p157_p3)  ;;  %v1045_v45 = vld [vmem:[%s1263_s0 + $0x44] ss:$16 sps:$4 sm:$0xff] (!%p157_p3)   ;;  %v288_v48 = vld [vmem:[%s1265_s2 + $0x28] sm:$0xff] (!%p157_p3) }
   0xb   : > { %v1044_v44 = vld [vmem:[%s1263_s0 + $0x28] ss:$16 sps:$4 sm:$0xff] (!%p157_p3)   ;;  %v1047_v46 = vld [vmem:[%s1263_s0 + $0x4c] ss:$16 sps:$4 sm:$0xff] (!%p157_p3)   ;;  %v287_v47 = vld [vmem:[%s1265_s2 + $0x20] sm:$0xff] (!%p157_p3) }
   0xc   : > { %v289_v49 = vld [vmem:[%s1265_s2 + $0x30] sm:$0xff] (!%p157_p3)  ;;  %v290_v51 = vld [vmem:[%s1265_s2 + $0x38] sm:$0xff] (!%p157_p3) }
   0xd   : > { %v1049_v50 = vld [vmem:[%s1263_s0 + $0x40] ss:$16 sps:$4 sm:$0xff] (!%p157_p3)   ;;  %v1050_v52 = vld [vmem:[%s1263_s0 + $0x48] ss:$16 sps:$4 sm:$0xff] (!%p157_p3)   ;;  %v1051_v53 = vld [vmem:[%s1263_s0 + $0x64] ss:$16 sps:$4 sm:$0xff] (!%p157_p3)  }
   0xe   : > { %s1272_s12 = smov (!%p186_p4, %s1071_s12), 1  ;;  %298 = vperm.xlu0 %999, %v284_v41   ;;  %308 = vperm.xlu1 %1000, %v286_v43   ;;  %v1053_v54 = vld [vmem:[%s1263_s0 + $0x6c] ss:$16 sps:$4 sm:$0xff]   ;;  %v1055_v55 = vld [vmem:[%s1263_s0 + $0x60] ss:$16 sps:$4 sm:$0xff]  }
   0xf   : > { %s892_s20 = sshll.u32 %s1272_s12, 8  ;;  %v1056_v56 = vld [vmem:[%s1263_s0 + $0x68] ss:$16 sps:$4 sm:$0xff]   ;;  %s893_s22 = sshll.u32 %s1272_s12, 6 }
  0x10   : > { %s1132_s23 = scalar_lea.vmem %s1264_s1, %s892_s20  ;;  %s1236_s25 = scalar_lea.vmem %s1266_s3, %s893_s22 }
  0x11   : > { %v1001_v3 = vld [vmem:[%s1132_s23 + $0x40] sm:$0xff]   ;;  %v1005_v7 = vld [vmem:[%s1132_s23 + $0x48] sm:$0xff]   ;;  %v1009_v11 = vld [vmem:[%s1132_s23 + $0x50] sm:$0xff]  }
  0x12   : > { %v1002_v4 = vld [vmem:[%s1132_s23 + $0xc0] sm:$0xff]   ;;  %894 = vmatprep.subr.bf16.mxu0 %v1001_v3  ;;  %v1006_v8 = vld [vmem:[%s1132_s23 + $0xc8] sm:$0xff]   ;;  %v1010_v12 = vld [vmem:[%s1132_s23 + $0xd0] sm:$0xff]   ;;  %313 = vperm.xlu0 %999, %v287_v47  }
  0x13   : > { %v1003_v5 = vld [vmem:[%s1132_s23] sm:$0xff]   ;;  %934 = vmatprep.subr.bf16.mxu1 %v1002_v4  ;;  %v1007_v9 = vld [vmem:[%s1132_s23 + $0x8] sm:$0xff]   ;;  %v1011_v13 = vld [vmem:[%s1132_s23 + $0x10] sm:$0xff]   ;;  %318 = vperm.xlu1 %1000, %v288_v48  }
  0x14   : > { %v1004_v6 = vld [vmem:[%s1132_s23 + $0x80] sm:$0xff]   ;;  %895 = vmatpush3.bf16.msra.mxu0 %v1003_v5  ;;  %v1008_v10 = vld [vmem:[%s1132_s23 + $0x88] sm:$0xff]   ;;  %v1012_v14 = vld [vmem:[%s1132_s23 + $0x90] sm:$0xff]  }
  0x15   : > { %935 = vmatpush3.bf16.msra.mxu1 %v1004_v6  ;;  %896 = vmatprep.subr.bf16.mxu0 %v1005_v7  ;;  %v1013_v15 = vld [vmem:[%s1132_s23 + $0x58] sm:$0xff]   ;;  %v1017_v19 = vld [vmem:[%s1132_s23 + $0x60] sm:$0xff]   ;;  %v1021_v23 = vld [vmem:[%s1132_s23 + $0x68] sm:$0xff]  }
  0x16   : > { %936 = vmatprep.subr.bf16.mxu1 %v1006_v8  ;;  %v1014_v16 = vld [vmem:[%s1132_s23 + $0xd8] sm:$0xff]   ;;  %v1018_v20 = vld [vmem:[%s1132_s23 + $0xe0] sm:$0xff]   ;;  %v1022_v24 = vld [vmem:[%s1132_s23 + $0xe8] sm:$0xff]   ;;  %323 = vperm.xlu0 %999, %v289_v49  }
  0x17   : > { %v1015_v17 = vld [vmem:[%s1132_s23 + $0x18] sm:$0xff]   ;;  %v1019_v21 = vld [vmem:[%s1132_s23 + $0x20] sm:$0xff]   ;;  %v1023_v25 = vld [vmem:[%s1132_s23 + $0x28] sm:$0xff]   ;;  %328 = vperm.xlu1 %1000, %v290_v51  }
  0x18   : > { %897 = vmatpush3.bf16.msra.mxu0 %v1007_v9  ;;  %v1016_v18 = vld [vmem:[%s1132_s23 + $0x98] sm:$0xff]   ;;  %v1020_v22 = vld [vmem:[%s1132_s23 + $0xa0] sm:$0xff]   ;;  %v1024_v26 = vld [vmem:[%s1132_s23 + $0xa8] sm:$0xff]  }
  0x19   : > { %937 = vmatpush3.bf16.msra.mxu1 %v1008_v10  ;;  %898 = vmatprep.subr.bf16.mxu0 %v1009_v11  ;;  %v1025_v27 = vld [vmem:[%s1132_s23 + $0x70] sm:$0xff]   ;;  %v1029_v31 = vld [vmem:[%s1132_s23 + $0x78] sm:$0xff]  }
  0x1a   : > { %938 = vmatprep.subr.bf16.mxu1 %v1010_v12  ;;  %v1026_v28 = vld [vmem:[%s1132_s23 + $0xf0] sm:$0xff]   ;;  %v1030_v32 = vld [vmem:[%s1132_s23 + $0xf8] sm:$0xff]  }
  0x1b   : > { %v1027_v29 = vld [vmem:[%s1132_s23 + $0x30] sm:$0xff]   ;;  %v1031_v34 = vld [vmem:[%s1132_s23 + $0x38] sm:$0xff]  }
  0x1c   : > { %899 = vmatpush3.bf16.msra.mxu0 %v1011_v13  ;;  %v1028_v30 = vld [vmem:[%s1132_s23 + $0xb0] sm:$0xff]   ;;  %v1032_v36 = vld [vmem:[%s1132_s23 + $0xb8] sm:$0xff]  }
  0x1d   : > { %939 = vmatpush3.bf16.msra.mxu1 %v1012_v14  ;;  %900 = vmatprep.subr.bf16.mxu0 %v1013_v15 }
  0x1e   : > { %940 = vmatprep.subr.bf16.mxu1 %v1014_v16 }
  0x20   : > { %901 = vmatpush3.bf16.msra.mxu0 %v1015_v17 }
  0x21   : > { %941 = vmatpush3.bf16.msra.mxu1 %v1016_v18  ;;  %902 = vmatprep.subr.bf16.mxu0 %v1017_v19 }
  0x22   : > { %942 = vmatprep.subr.bf16.mxu1 %v1018_v20 }
  0x24   : > { %903 = vmatpush3.bf16.msra.mxu0 %v1019_v21 }
  0x25   : > { %943 = vmatpush3.bf16.msra.mxu1 %v1020_v22  ;;  %904 = vmatprep.subr.bf16.mxu0 %v1021_v23 }
  0x26   : > { %944 = vmatprep.subr.bf16.mxu1 %v1022_v24 }
  0x28   : > { %905 = vmatpush3.bf16.msra.mxu0 %v1023_v25 }
  0x29   : > { %945 = vmatpush3.bf16.msra.mxu1 %v1024_v26  ;;  %906 = vmatprep.subr.bf16.mxu0 %v1025_v27 }
  0x2a   : > { %946 = vmatprep.subr.bf16.mxu1 %v1026_v28 }
  0x2c   : > { %907 = vmatpush3.bf16.msra.mxu0 %v1027_v29 }
  0x2d   : > { %947 = vmatpush3.bf16.msra.mxu1 %v1028_v30  ;;  %908 = vmatprep.subr.bf16.mxu0 %v1029_v31 }
  0x2e   : > { %948 = vmatprep.subr.bf16.mxu1 %v1030_v32 }
  0x30   : > { %909 = vmatpush3.bf16.msra.mxu0 %v1031_v34 }
  0x31   : > { %949 = vmatpush3.bf16.msra.mxu1 %v1032_v36 }
  0x33   : > { %636 = vmatmul.mubr.bf16.vlgmr.msra.gmra.mrb[0].mxu0 %v1033_v33 }
  0x34   : > { %701 = vmatmul.mubr.bf16.vlgmr.msra.gmra.mrb[0].mxu1 %v1036_v35  ;;  %643 = vmatprep.mubr.bf16.mxu0 %v1039_v37 }
  0x35   : > { %708 = vmatprep.mubr.bf16.mxu1 %v1041_v38 }
  0x3b   : > { %644 = vmatmul.mubr.bf16.gmra.mrb[4].mxu0 %v1043_v42 }
  0x3c   : > { %709 = vmatmul.mubr.bf16.gmra.mrb[4].mxu1 %v1044_v44  ;;  %651 = vmatprep.mubr.bf16.mxu0 %v1045_v45 }
  0x3d   : > { %716 = vmatprep.mubr.bf16.mxu1 %v1047_v46 }
  0x43   : > { %652 = vmatmul.mubr.bf16.gmra.mrb[8].mxu0 %v1049_v50 }
  0x44   : > { %717 = vmatmul.mubr.bf16.gmra.mrb[8].mxu1 %v1050_v52  ;;  %659 = vmatprep.mubr.bf16.mxu0 %v1051_v53 }
  0x45   : > { %724 = vmatprep.mubr.bf16.mxu1 %v1053_v54 }
  0x4b   : > { %660 = vmatmul.mubr.bf16.gmra.mrb[12].mxu0 %v1055_v55 }
  0x4c   : > { %725 = vmatmul.mubr.bf16.gmra.mrb[12].mxu1 %v1056_v56 }
  0x89   : > { %v294_v57 = vpop.permute.xlu0 %293  ;;  %v304_v10 = vpop.permute.xlu1 %303 }
  0x8d   : > { %v299_v59 = vpop.permute.xlu0 %298  ;;  %v309_v26 = vpop.permute.xlu1 %308 }
  0x91   : > { %v314_v32 = vpop.permute.xlu0 %313 }
  0x92   : > { %v319_v46 = vpop.permute.xlu1 %318 }
  0x95   : > { %v324_v50 = vpop.permute.xlu0 %323 }
 0x106   : > { %v910_v58 = vpop.f32.mrb[0].mxu0 }
 0x107   : > { %v950_v60 = vpop.f32.mrb[0].mxu1  ;;  %v911_v61 = vpop.f32.mrb[1].mxu0 }
 0x108   : > { %v912_v62 = vadd.f32 %v911_v61, %v910_v58  ;;  %v951_v63 = vpop.f32.mrb[1].mxu1  ;;  %v913_v0 = vpop.f32.mrb[2].mxu0 }
 0x109   : > { %v952_v1 = vadd.f32 %v951_v63, %v950_v60  ;;  %v953_v2 = vpop.f32.mrb[2].mxu1  ;;  %v914_v3 = vpop.f32.mrb[3].mxu0 }
 0x10a   : > { %v638_v4 = vadd.f32 %v912_v62, %v294_v57  ;;  %v915_v5 = vadd.f32 %v914_v3, %v913_v0  ;;  %v954_v6 = vpop.f32.mrb[3].mxu1 }
 0x10b   : > { %v955_v7 = vadd.f32 %v954_v6, %v953_v2  ;;  %v329_v2 = vpop.permute.xlu1 %328 }
 0x10c   : > { %v703_v8 = vadd.f32 %v952_v1, %v638_v4  ;;  %v641_v9 = vadd.f32 %v915_v5, %v299_v59 }
 0x10e   : > { %v733_v11 = vmax.f32 %v703_v8, 0.0  ;;  %v706_v12 = vadd.f32 %v955_v7, %v641_v9  ;;  %v916_v13 = vpop.f32.mrb[4].mxu0 }
 0x10f   : > { %v956_v14 = vpop.f32.mrb[4].mxu1  ;;  %v917_v15 = vpop.f32.mrb[5].mxu0 }
 0x110   : > { %742 = vst.msk [vmem:[%s1236_s25] sm:$0xff] %vm741_vm0, %v733_v11  ;;  %v734_v16 = vmax.f32 %v706_v12, 0.0  ;;  %v918_v17 = vadd.f32 %v917_v15, %v916_v13  ;;  %v957_v18 = vpop.f32.mrb[5].mxu1  ;;  %v919_v19 = vpop.f32.mrb[6].mxu0 }
 0x111   : > { %v958_v20 = vadd.f32 %v957_v18, %v956_v14  ;;  %v959_v21 = vpop.f32.mrb[6].mxu1  ;;  %v920_v22 = vpop.f32.mrb[7].mxu0 }
 0x112   : > { %743 = vst.msk [vmem:[%s1236_s25 + $0x8] sm:$0xff] %vm741_vm0, %v734_v16  ;;  %v646_v23 = vadd.f32 %v918_v17, %v304_v10  ;;  %v921_v24 = vadd.f32 %v920_v22, %v919_v19  ;;  %v960_v25 = vpop.f32.mrb[7].mxu1 }
 0x113   : > { %v961_v27 = vadd.f32 %v960_v25, %v959_v21 }
 0x114   : > { %v711_v28 = vadd.f32 %v958_v20, %v646_v23  ;;  %v649_v29 = vadd.f32 %v921_v24, %v309_v26 }
 0x116   : > { %v735_v30 = vmax.f32 %v711_v28, 0.0  ;;  %v714_v31 = vadd.f32 %v961_v27, %v649_v29  ;;  %v922_v33 = vpop.f32.mrb[8].mxu0 }
 0x117   : > { %v962_v34 = vpop.f32.mrb[8].mxu1  ;;  %v923_v35 = vpop.f32.mrb[9].mxu0 }
 0x118   : > { %744 = vst.msk [vmem:[%s1236_s25 + $0x10] sm:$0xff] %vm741_vm0, %v735_v30  ;;  %v736_v36 = vmax.f32 %v714_v31, 0.0  ;;  %v924_v37 = vadd.f32 %v923_v35, %v922_v33  ;;  %v963_v38 = vpop.f32.mrb[9].mxu1  ;;  %v925_v39 = vpop.f32.mrb[10].mxu0 }
 0x119   : > { %v964_v40 = vadd.f32 %v963_v38, %v962_v34  ;;  %v965_v41 = vpop.f32.mrb[10].mxu1  ;;  %v926_v42 = vpop.f32.mrb[11].mxu0 }
 0x11a   : > { %745 = vst.msk [vmem:[%s1236_s25 + $0x18] sm:$0xff] %vm741_vm0, %v736_v36  ;;  %v654_v43 = vadd.f32 %v924_v37, %v314_v32  ;;  %v927_v44 = vadd.f32 %v926_v42, %v925_v39  ;;  %v966_v45 = vpop.f32.mrb[11].mxu1 }
 0x11b   : > { %v967_v47 = vadd.f32 %v966_v45, %v965_v41 }
 0x11c   : > { %v719_v48 = vadd.f32 %v964_v40, %v654_v43  ;;  %v657_v49 = vadd.f32 %v927_v44, %v319_v46 }
 0x11e   : > { %v737_v51 = vmax.f32 %v719_v48, 0.0  ;;  %v722_v52 = vadd.f32 %v967_v47, %v657_v49  ;;  %v928_v53 = vpop.f32.mrb[12].mxu0 }
 0x11f   : > { %v968_v54 = vpop.f32.mrb[12].mxu1  ;;  %v929_v55 = vpop.f32.mrb[13].mxu0 }
 0x120   : > { %746 = vst.msk [vmem:[%s1236_s25 + $0x20] sm:$0xff] %vm741_vm0, %v737_v51  ;;  %v738_v56 = vmax.f32 %v722_v52, 0.0  ;;  %v930_v57 = vadd.f32 %v929_v55, %v928_v53  ;;  %v969_v58 = vpop.f32.mrb[13].mxu1  ;;  %v931_v59 = vpop.f32.mrb[14].mxu0 }
 0x121   : > { %v970_v60 = vadd.f32 %v969_v58, %v968_v54  ;;  %v971_v61 = vpop.f32.mrb[14].mxu1  ;;  %v932_v62 = vpop.f32.mrb[15].mxu0 }
 0x122   : > { %747 = vst.msk [vmem:[%s1236_s25 + $0x28] sm:$0xff] %vm741_vm0, %v738_v56  ;;  %v662_v63 = vadd.f32 %v930_v57, %v324_v50  ;;  %v933_v0 = vadd.f32 %v932_v62, %v931_v59  ;;  %v972_v1 = vpop.f32.mrb[15].mxu1 }
 0x123   : > { %v973_v3 = vadd.f32 %v972_v1, %v971_v61 }
 0x124   : > { %v727_v4 = vadd.f32 %v970_v60, %v662_v63  ;;  %v665_v5 = vadd.f32 %v933_v0, %v329_v2 }
 0x126   : > { %v739_v6 = vmax.f32 %v727_v4, 0.0  ;;  %v730_v7 = vadd.f32 %v973_v3, %v665_v5 }
 0x128   : > { %748 = vst.msk [vmem:[%s1236_s25 + $0x30] sm:$0xff] %vm741_vm0, %v739_v6  ;;  %v740_v8 = vmax.f32 %v730_v7, 0.0 }
 0x12a   : > { %749 = vst.msk [vmem:[%s1236_s25 + $0x38] sm:$0xff] %vm741_vm0, %v740_v8 }
 0x12b PF: > { %s13_s14 = sadd.s32 1, %s1079_s14   ;;  %s1267_s12 = smov %s1075_s13 }
 0x12c   : > { %p10_p5 = scmp.ge.s32.totalorder %s13_s14, 4   ;;  %s1268_s13 = smov %s1270_s15 }
 0x12e   :  { %12 = sbr.rel (!%p10_p5) target bundleno = 2 (0x2), region = 62 }

// kernel: dcp_forward.59
= control target key start
LH: loop header
LB: loop body
LE: loop exit
PB: predicated region body
PF: predicated region fallthrough
CT: control target
= control target key end

     0   :  { %s2475_s12 = smov 0   ;;  %s2477_s13 = smov 0   ;;  %s3140_s0 = inlined_call_operand.vmem [shape: bf16[256,128], index: 0, kind: input, shape index: {}]   ;;  %s3141_s1 = inlined_call_operand.vmem [shape: bf16[2,4,128,16], index: 1, kind: input, shape index: {}]   ;;  %s3142_s2 = inlined_call_operand.vmem [shape: f32[256,1], index: 2, kind: input, shape index: {}]   ;;  %s3143_s3 = inlined_call_operand.vmem [shape: bf16[2,256,16], index: 3, kind: output, shape index: {}]  }
   0x1   :  { %s2479_s14 = smov 0  }
   0x2 LB: > { %s25_s15 = sadd.s32 1, %s2448_s13  ;;  %p1898_p0 = scmp.ge.s32.totalorder %s2452_s14, 1  ;;  %s2452_s14 = sphi %s2479_s14, %s13_s14   ;;  %s2448_s13 = sphi %s2477_s13, %s3197_s13   ;;  %s2444_s12 = sphi %s2475_s12, %s3196_s12  }
   0x3   : > { %p27_p1 = scmp.ge.s32.totalorder %s25_s15, 2  ;;  %p156_p2 = scmp.lt.s32.totalorder %s2452_s14, 3 }
   0x5   : > { %s3199_s15 = smov (%p27_p1, %s25_s15), 0  ;;  %p157_p3 = pnand %p1898_p0, %p156_p2 }
   0x7   : > { %160 = sbr.rel (%p157_p3) target bundleno = 399 (0x18f), region = 32 }
   0xe   : > { %p186_p4 = scmp.lt.s32.totalorder %s2444_s12, 1  ;;  %v2496_v0 = vld [vmem:[%s3140_s0] sm:$0xff]   ;;  %v2454_v1 = vmov 0   ;;  %v2529_v20 = vld [vmem:[%s3140_s0 + $0x8] sm:$0xff]   ;;  %v2534_v21 = vld [vmem:[%s3140_s0 + $0x10] sm:$0xff]   ;;  %vm1778_vm0 = vcmask 125952  }
   0xf   : > { %2179 = vmatprep.mubr.bf16.mxu0 %v2496_v0  ;;  %2227 = vmatprep.mubr.bf16.mxu1 %v2496_v0  ;;  %v2547_v26 = vld [vmem:[%s3140_s0 + $0x18] sm:$0xff]   ;;  %v2552_v27 = vld [vmem:[%s3140_s0 + $0x20] sm:$0xff]   ;;  %v237_v31 = vld [vmem:[%s3142_s2 + $0x10] sm:$0xff] }
  0x10   : > { %s3201_s12 = smov (!%p186_p4, %s2444_s12), 1  ;;  %2380 = vset.pattern.permute.xlu0 %v2454_v1  ;;  %2381 = vset.pattern.permute.xlu1 %v2454_v1  ;;  %v235_v30 = vld [vmem:[%s3142_s2] sm:$0xff]  ;;  %v2570_v33 = vld [vmem:[%s3140_s0 + $0x28] sm:$0xff]   ;;  %v2576_v35 = vld [vmem:[%s3140_s0 + $0x30] sm:$0xff]  }
  0x11   : > { %s2033_s18 = sshll.u32 %s3201_s12, 8  ;;  %285 = vperm.xlu0 %2380, %v235_v30   ;;  %295 = vperm.xlu1 %2381, %v237_v31   ;;  %v236_v38 = vld [vmem:[%s3142_s2 + $0x8] sm:$0xff]  ;;  %v238_v39 = vld [vmem:[%s3142_s2 + $0x18] sm:$0xff]  ;;  %v2600_v43 = vld [vmem:[%s3140_s0 + $0x40] sm:$0xff]   ;;  %s2034_s25 = sshll.u32 %s3201_s12, 7 }
  0x12   : > { %s2506_s21 = scalar_lea.vmem %s3141_s1, %s2033_s18  ;;  %v2594_v41 = vld [vmem:[%s3140_s0 + $0x38] sm:$0xff]   ;;  %v239_v46 = vld [vmem:[%s3142_s2 + $0x20] sm:$0xff]  ;;  %v240_v47 = vld [vmem:[%s3142_s2 + $0x28] sm:$0xff]  ;;  %s2980_s28 = scalar_lea.vmem %s3143_s3, %s2034_s25 }
  0x13   : > { %v2382_v2 = vld [vmem:[%s2506_s21] sm:$0xff]   ;;  %v2384_v4 = vld [vmem:[%s2506_s21 + $0x8] sm:$0xff]   ;;  %v2386_v6 = vld [vmem:[%s2506_s21 + $0x10] sm:$0xff]  }
  0x14   : > { %v2383_v3 = vld [vmem:[%s2506_s21 + $0x40] sm:$0xff]   ;;  %2163 = vmatprep.subr.bf16.mxu0 %v2382_v2  ;;  %v2385_v5 = vld [vmem:[%s2506_s21 + $0x48] sm:$0xff]   ;;  %v2387_v7 = vld [vmem:[%s2506_s21 + $0x50] sm:$0xff]  }
  0x15   : > { %2211 = vmatprep.subr.bf16.mxu1 %v2383_v3  ;;  %2164 = vmatpush3.bf16.msra.mxu0 %v2382_v2  ;;  %v2388_v8 = vld [vmem:[%s2506_s21 + $0x18] sm:$0xff]   ;;  %v2390_v10 = vld [vmem:[%s2506_s21 + $0x20] sm:$0xff]   ;;  %v2392_v12 = vld [vmem:[%s2506_s21 + $0x28] sm:$0xff]  }
  0x16   : > { %2212 = vmatpush3.bf16.msra.mxu1 %v2383_v3  ;;  %2165 = vmatprep.subr.bf16.mxu0 %v2384_v4  ;;  %v2389_v9 = vld [vmem:[%s2506_s21 + $0x58] sm:$0xff]   ;;  %v2391_v11 = vld [vmem:[%s2506_s21 + $0x60] sm:$0xff]   ;;  %v2393_v13 = vld [vmem:[%s2506_s21 + $0x68] sm:$0xff]  }
  0x17   : > { %2213 = vmatprep.subr.bf16.mxu1 %v2385_v5  ;;  %v2394_v14 = vld [vmem:[%s2506_s21 + $0x30] sm:$0xff]   ;;  %v2396_v16 = vld [vmem:[%s2506_s21 + $0x38] sm:$0xff]   ;;  %v2400_v18 = vld [vmem:[%s2506_s21 + $0x80] sm:$0xff]   ;;  %290 = vperm.xlu0 %2380, %v236_v38  }
  0x18   : > { %v2395_v15 = vld [vmem:[%s2506_s21 + $0x70] sm:$0xff]   ;;  %v2397_v17 = vld [vmem:[%s2506_s21 + $0x78] sm:$0xff]   ;;  %v2401_v19 = vld [vmem:[%s2506_s21 + $0xc0] sm:$0xff]   ;;  %300 = vperm.xlu1 %2381, %v238_v39  }
  0x19   : > { %2166 = vmatpush3.bf16.msra.mxu0 %v2384_v4  ;;  %v2404_v22 = vld [vmem:[%s2506_s21 + $0x88] sm:$0xff]   ;;  %v2408_v24 = vld [vmem:[%s2506_s21 + $0x90] sm:$0xff]   ;;  %v2412_v28 = vld [vmem:[%s2506_s21 + $0x98] sm:$0xff]  }
  0x1a   : > { %2214 = vmatpush3.bf16.msra.mxu1 %v2385_v5  ;;  %2167 = vmatprep.subr.bf16.mxu0 %v2386_v6  ;;  %v2405_v23 = vld [vmem:[%s2506_s21 + $0xc8] sm:$0xff]   ;;  %v2409_v25 = vld [vmem:[%s2506_s21 + $0xd0] sm:$0xff]   ;;  %v2413_v29 = vld [vmem:[%s2506_s21 + $0xd8] sm:$0xff]  }
  0x1b   : > { %2215 = vmatprep.subr.bf16.mxu1 %v2387_v7  ;;  %v2416_v32 = vld [vmem:[%s2506_s21 + $0xa0] sm:$0xff]   ;;  %v2420_v36 = vld [vmem:[%s2506_s21 + $0xa8] sm:$0xff]   ;;  %v2424_v40 = vld [vmem:[%s2506_s21 + $0xb0] sm:$0xff]   ;;  %305 = vperm.xlu0 %2380, %v239_v46  }
  0x1c   : > { %v2417_v34 = vld [vmem:[%s2506_s21 + $0xe0] sm:$0xff]   ;;  %v2421_v37 = vld [vmem:[%s2506_s21 + $0xe8] sm:$0xff]   ;;  %v2425_v42 = vld [vmem:[%s2506_s21 + $0xf0] sm:$0xff]   ;;  %310 = vperm.xlu1 %2381, %v240_v47  }
  0x1d   : > { %2168 = vmatpush3.bf16.msra.mxu0 %v2386_v6  ;;  %v2428_v44 = vld [vmem:[%s2506_s21 + $0xb8] sm:$0xff]   ;;  %v2617_v48 = vld [vmem:[%s3140_s0 + $0x48] sm:$0xff]   ;;  %v2622_v49 = vld [vmem:[%s3140_s0 + $0x50] sm:$0xff]  }
  0x1e   : > { %2216 = vmatpush3.bf16.msra.mxu1 %v2387_v7  ;;  %2169 = vmatprep.subr.bf16.mxu0 %v2388_v8  ;;  %v2429_v45 = vld [vmem:[%s2506_s21 + $0xf8] sm:$0xff]   ;;  %v241_v50 = vld [vmem:[%s3142_s2 + $0x30] sm:$0xff]  ;;  %v243_v52 = vld [vmem:[%s3142_s2 + $0x40] sm:$0xff] }
  0x1f   : > { %2217 = vmatprep.subr.bf16.mxu1 %v2389_v9  ;;  %v242_v51 = vld [vmem:[%s3142_s2 + $0x38] sm:$0xff]  ;;  %315 = vperm.xlu0 %2380, %v241_v50   ;;  %v244_v53 = vld [vmem:[%s3142_s2 + $0x48] sm:$0xff]  ;;  %v2648_v55 = vld [vmem:[%s3140_s0 + $0x60] sm:$0xff]  }
  0x20   : > { %320 = vperm.xlu1 %2381, %v242_v51   ;;  %v2643_v54 = vld [vmem:[%s3140_s0 + $0x58] sm:$0xff]   ;;  %v245_v56 = vld [vmem:[%s3142_s2 + $0x50] sm:$0xff]  ;;  %v247_v58 = vld [vmem:[%s3142_s2 + $0x60] sm:$0xff] }
  0x21   : > { %2170 = vmatpush3.bf16.msra.mxu0 %v2388_v8  ;;  %v246_v57 = vld [vmem:[%s3142_s2 + $0x58] sm:$0xff]  ;;  %v248_v59 = vld [vmem:[%s3142_s2 + $0x68] sm:$0xff]  ;;  %v2674_v61 = vld [vmem:[%s3140_s0 + $0x70] sm:$0xff]  }
  0x22   : > { %2218 = vmatpush3.bf16.msra.mxu1 %v2389_v9  ;;  %2171 = vmatprep.subr.bf16.mxu0 %v2390_v10  ;;  %v2669_v60 = vld [vmem:[%s3140_s0 + $0x68] sm:$0xff]   ;;  %v249_v62 = vld [vmem:[%s3142_s2 + $0x70] sm:$0xff]  ;;  %v250_v63 = vld [vmem:[%s3142_s2 + $0x78] sm:$0xff] }
  0x23   : > { %2219 = vmatprep.subr.bf16.mxu1 %v2391_v11  ;;  %325 = vperm.xlu0 %2380, %v243_v52   ;;  %v251_v1 = vld [vmem:[%s3142_s2 + $0x80] sm:$0xff]  ;;  %v252_v2 = vld [vmem:[%s3142_s2 + $0x88] sm:$0xff]  ;;  %v2695_v3 = vld [vmem:[%s3140_s0 + $0x78] sm:$0xff]  }
  0x24   : > { %330 = vperm.xlu1 %2381, %v244_v53   ;;  %v253_v4 = vld [vmem:[%s3142_s2 + $0x90] sm:$0xff]  ;;  %v254_v5 = vld [vmem:[%s3142_s2 + $0x98] sm:$0xff]  ;;  %v255_v6 = vld [vmem:[%s3142_s2 + $0xa0] sm:$0xff] }
  0x25   : > { %2172 = vmatpush3.bf16.msra.mxu0 %v2390_v10  ;;  %v256_v7 = vld [vmem:[%s3142_s2 + $0xa8] sm:$0xff]  ;;  %v257_v8 = vld [vmem:[%s3142_s2 + $0xb0] sm:$0xff]  ;;  %v258_v9 = vld [vmem:[%s3142_s2 + $0xb8] sm:$0xff] }
  0x26   : > { %2220 = vmatpush3.bf16.msra.mxu1 %v2391_v11  ;;  %2173 = vmatprep.subr.bf16.mxu0 %v2392_v12  ;;  %v260_v10 = vld [vmem:[%s3142_s2 + $0xc8] sm:$0xff]  ;;  %v261_v11 = vld [vmem:[%s3142_s2 + $0xd0] sm:$0xff] }
  0x27   : > { %2221 = vmatprep.subr.bf16.mxu1 %v2393_v13  ;;  %335 = vperm.xlu0 %2380, %v245_v56  }
  0x28   : > { %340 = vperm.xlu1 %2381, %v246_v57  }
  0x29   : > { %2174 = vmatpush3.bf16.msra.mxu0 %v2392_v12  ;;  %v262_v12 = vld [vmem:[%s3142_s2 + $0xd8] sm:$0xff] }
  0x2a   : > { %2222 = vmatpush3.bf16.msra.mxu1 %v2393_v13  ;;  %2175 = vmatprep.subr.bf16.mxu0 %v2394_v14  ;;  %v263_v13 = vld [vmem:[%s3142_s2 + $0xe0] sm:$0xff] }
  0x2b   : > { %2223 = vmatprep.subr.bf16.mxu1 %v2395_v15  ;;  %345 = vperm.xlu0 %2380, %v247_v58  }
  0x2c   : > { %350 = vperm.xlu1 %2381, %v248_v59  }
  0x2d   : > { %2176 = vmatpush3.bf16.msra.mxu0 %v2394_v14  ;;  %v264_v14 = vld [vmem:[%s3142_s2 + $0xe8] sm:$0xff] }
  0x2e   : > { %2224 = vmatpush3.bf16.msra.mxu1 %v2395_v15  ;;  %2177 = vmatprep.subr.bf16.mxu0 %v2396_v16  ;;  %v265_v15 = vld [vmem:[%s3142_s2 + $0xf0] sm:$0xff] }
  0x2f   : > { %2225 = vmatprep.subr.bf16.mxu1 %v2397_v17  ;;  %355 = vperm.xlu0 %2380, %v249_v62  }
  0x30   : > { %360 = vperm.xlu1 %2381, %v250_v63  }
  0x31   : > { %2178 = vmatpush3.bf16.msra.mxu0 %v2396_v16  ;;  %v266_v16 = vld [vmem:[%s3142_s2 + $0xf8] sm:$0xff] }
  0x32   : > { %2226 = vmatpush3.bf16.msra.mxu1 %v2397_v17  ;;  %2259 = vmatprep.subr.bf16.mxu0 %v2400_v18 }
  0x33   : > { %2307 = vmatprep.subr.bf16.mxu1 %v2401_v19  ;;  %365 = vperm.xlu0 %2380, %v251_v1  }
  0x34   : > { %2180 = vmatmul.mubr.bf16.vlgmr.msra.gmra.mrb[0].mxu0 %v2529_v20  ;;  %370 = vperm.xlu1 %2381, %v252_v2  }
  0x35   : > { %2228 = vmatmul.mubr.bf16.vlgmr.msra.gmra.mrb[0].mxu1 %v2529_v20  ;;  %2260 = vmatpush3.bf16.msra.mxu0 %v2400_v18 }
  0x36   : > { %2308 = vmatpush3.bf16.msra.mxu1 %v2401_v19  ;;  %2183 = vmatprep.mubr.bf16.mxu0 %v2534_v21 }
  0x37   : > { %2231 = vmatprep.mubr.bf16.mxu1 %v2534_v21  ;;  %2261 = vmatprep.subr.bf16.mxu0 %v2404_v22 }
  0x38   : > { %2309 = vmatprep.subr.bf16.mxu1 %v2405_v23  ;;  %375 = vperm.xlu0 %2380, %v253_v4  }
  0x39   : > { %2262 = vmatpush3.bf16.msra.mxu0 %v2404_v22  ;;  %380 = vperm.xlu1 %2381, %v254_v5  }
  0x3a   : > { %2310 = vmatpush3.bf16.msra.mxu1 %v2405_v23  ;;  %2263 = vmatprep.subr.bf16.mxu0 %v2408_v24 }
  0x3b   : > { %2311 = vmatprep.subr.bf16.mxu1 %v2409_v25 }
  0x3c   : > { %2184 = vmatmul.mubr.bf16.gmra.mrb[4].mxu0 %v2547_v26  ;;  %385 = vperm.xlu0 %2380, %v255_v6  }
  0x3d   : > { %2232 = vmatmul.mubr.bf16.gmra.mrb[4].mxu1 %v2547_v26  ;;  %2187 = vmatprep.mubr.bf16.mxu0 %v2552_v27 }
  0x3e   : > { %2235 = vmatprep.mubr.bf16.mxu1 %v2552_v27  ;;  %2264 = vmatpush3.bf16.msra.mxu0 %v2408_v24 }
  0x3f   : > { %2312 = vmatpush3.bf16.msra.mxu1 %v2409_v25  ;;  %2265 = vmatprep.subr.bf16.mxu0 %v2412_v28 }
  0x40   : > { %2313 = vmatprep.subr.bf16.mxu1 %v2413_v29  ;;  %390 = vperm.xlu1 %2381, %v256_v7  }
  0x41   : > { %395 = vperm.xlu0 %2380, %v257_v8  }
  0x42   : > { %2266 = vmatpush3.bf16.msra.mxu0 %v2412_v28 }
  0x43   : > { %2314 = vmatpush3.bf16.msra.mxu1 %v2413_v29  ;;  %2267 = vmatprep.subr.bf16.mxu0 %v2416_v32 }
  0x44   : > { %2188 = vmatmul.mubr.bf16.gmra.mrb[8].mxu0 %v2570_v33  ;;  %2315 = vmatprep.subr.bf16.mxu1 %v2417_v34 }
  0x45   : > { %2236 = vmatmul.mubr.bf16.gmra.mrb[8].mxu1 %v2570_v33  ;;  %2191 = vmatprep.mubr.bf16.mxu0 %v2576_v35 }
  0x46   : > { %2239 = vmatprep.mubr.bf16.mxu1 %v2576_v35  ;;  %2268 = vmatpush3.bf16.msra.mxu0 %v2416_v32 }
  0x47   : > { %2316 = vmatpush3.bf16.msra.mxu1 %v2417_v34  ;;  %2269 = vmatprep.subr.bf16.mxu0 %v2420_v36 }
  0x48   : > { %2317 = vmatprep.subr.bf16.mxu1 %v2421_v37  ;;  %400 = vperm.xlu1 %2381, %v258_v9  }
  0x4a   : > { %2270 = vmatpush3.bf16.msra.mxu0 %v2420_v36 }
  0x4b   : > { %2318 = vmatpush3.bf16.msra.mxu1 %v2421_v37  ;;  %2271 = vmatprep.subr.bf16.mxu0 %v2424_v40 }
  0x4c   : > { %2192 = vmatmul.mubr.bf16.gmra.mrb[12].mxu0 %v2594_v41  ;;  %2319 = vmatprep.subr.bf16.mxu1 %v2425_v42 }
  0x4d   : > { %2240 = vmatmul.mubr.bf16.gmra.mrb[12].mxu1 %v2594_v41  ;;  %2195 = vmatprep.mubr.bf16.mxu0 %v2600_v43 }
  0x4e   : > { %2243 = vmatprep.mubr.bf16.mxu1 %v2600_v43  ;;  %2272 = vmatpush3.bf16.msra.mxu0 %v2424_v40 }
  0x4f   : > { %2320 = vmatpush3.bf16.msra.mxu1 %v2425_v42  ;;  %2273 = vmatprep.subr.bf16.mxu0 %v2428_v44 }
  0x50   : > { %2321 = vmatprep.subr.bf16.mxu1 %v2429_v45  ;;  %410 = vperm.xlu1 %2381, %v260_v10  }
  0x52   : > { %2274 = vmatpush3.bf16.msra.mxu0 %v2428_v44 }
  0x53   : > { %2322 = vmatpush3.bf16.msra.mxu1 %v2429_v45 }
  0x54   : > { %2196 = vmatmul.mubr.bf16.gmra.mrb[16].mxu0 %v2617_v48  ;;  %420 = vperm.xlu1 %2381, %v262_v12  }
  0x55   : > { %2244 = vmatmul.mubr.bf16.gmra.mrb[16].mxu1 %v2617_v48  ;;  %2199 = vmatprep.mubr.bf16.mxu0 %v2622_v49 }
  0x56   : > { %2247 = vmatprep.mubr.bf16.mxu1 %v2622_v49 }
  0x58   : > { %430 = vperm.xlu1 %2381, %v264_v14  }
  0x5c   : > { %2200 = vmatmul.mubr.bf16.gmra.mrb[20].mxu0 %v2643_v54  ;;  %440 = vperm.xlu1 %2381, %v266_v16  }
  0x5d   : > { %2248 = vmatmul.mubr.bf16.gmra.mrb[20].mxu1 %v2643_v54  ;;  %2203 = vmatprep.mubr.bf16.mxu0 %v2648_v55 }
  0x5e   : > { %2251 = vmatprep.mubr.bf16.mxu1 %v2648_v55 }
  0x64   : > { %2204 = vmatmul.mubr.bf16.gmra.mrb[24].mxu0 %v2669_v60 }
  0x65   : > { %2252 = vmatmul.mubr.bf16.gmra.mrb[24].mxu1 %v2669_v60  ;;  %2207 = vmatprep.mubr.bf16.mxu0 %v2674_v61 }
  0x66   : > { %2255 = vmatprep.mubr.bf16.mxu1 %v2674_v61 }
  0x6c   : > { %2208 = vmatmul.mubr.bf16.gmra.mrb[28].mxu0 %v2695_v3 }
  0x6d   : > { %2256 = vmatmul.mubr.bf16.gmra.mrb[28].mxu1 %v2695_v3  ;;  %2275 = vmatprep.mubr.bf16.mxu0 %v2496_v0 }
  0x6e   : > { %2323 = vmatprep.mubr.bf16.mxu1 %v2496_v0  ;;  %v259_v0 = vld [vmem:[%s3142_s2 + $0xc0] sm:$0xff] }
  0x6f   : > { %405 = vperm.xlu0 %2380, %v259_v0  }
  0x73   : > { %415 = vperm.xlu0 %2380, %v261_v11  }
  0x74   : > { %2276 = vmatmul.mubr.bf16.vlgmr.msra.gmra.mrb[32].mxu0 %v2529_v20 }
  0x75   : > { %2324 = vmatmul.mubr.bf16.vlgmr.msra.gmra.mrb[32].mxu1 %v2529_v20  ;;  %2279 = vmatprep.mubr.bf16.mxu0 %v2534_v21 }
  0x76   : > { %2327 = vmatprep.mubr.bf16.mxu1 %v2534_v21 }
  0x77   : > { %425 = vperm.xlu0 %2380, %v263_v13  }
  0x7b   : > { %435 = vperm.xlu0 %2380, %v265_v15  }
  0x7c   : > { %2280 = vmatmul.mubr.bf16.gmra.mrb[36].mxu0 %v2547_v26 }
  0x7d   : > { %2328 = vmatmul.mubr.bf16.gmra.mrb[36].mxu1 %v2547_v26  ;;  %2283 = vmatprep.mubr.bf16.mxu0 %v2552_v27 }
  0x7e   : > { %2331 = vmatprep.mubr.bf16.mxu1 %v2552_v27 }
  0x84   : > { %2284 = vmatmul.mubr.bf16.gmra.mrb[40].mxu0 %v2570_v33 }
  0x85   : > { %2332 = vmatmul.mubr.bf16.gmra.mrb[40].mxu1 %v2570_v33  ;;  %2287 = vmatprep.mubr.bf16.mxu0 %v2576_v35 }
  0x86   : > { %2335 = vmatprep.mubr.bf16.mxu1 %v2576_v35 }
  0x8c   : > { %2288 = vmatmul.mubr.bf16.gmra.mrb[44].mxu0 %v2594_v41 }
  0x8d   : > { %2336 = vmatmul.mubr.bf16.gmra.mrb[44].mxu1 %v2594_v41  ;;  %2291 = vmatprep.mubr.bf16.mxu0 %v2600_v43 }
  0x8e   : > { %2339 = vmatprep.mubr.bf16.mxu1 %v2600_v43 }
  0x90   : > { %v2773_v17 = vpop.permute.xlu0 %285  ;;  %v2775_v18 = vpop.permute.xlu1 %295 }
  0x94   : > { %2292 = vmatmul.mubr.bf16.gmra.mrb[48].mxu0 %v2617_v48 }
  0x95   : > { %2340 = vmatmul.mubr.bf16.gmra.mrb[48].mxu1 %v2617_v48  ;;  %2295 = vmatprep.mubr.bf16.mxu0 %v2622_v49 }
  0x96   : > { %2343 = vmatprep.mubr.bf16.mxu1 %v2622_v49  ;;  %v2777_v19 = vpop.permute.xlu0 %290 }
  0x97   : > { %v2779_v20 = vpop.permute.xlu1 %300 }
  0x9a   : > { %v2781_v21 = vpop.permute.xlu0 %305 }
  0x9b   : > { %v2783_v22 = vpop.permute.xlu1 %310 }
  0x9c   : > { %2296 = vmatmul.mubr.bf16.gmra.mrb[52].mxu0 %v2643_v54 }
  0x9d   : > { %2344 = vmatmul.mubr.bf16.gmra.mrb[52].mxu1 %v2643_v54  ;;  %2299 = vmatprep.mubr.bf16.mxu0 %v2648_v55 }
  0x9e   : > { %2347 = vmatprep.mubr.bf16.mxu1 %v2648_v55  ;;  %v2785_v23 = vpop.permute.xlu0 %315 }
  0x9f   : > { %v2787_v24 = vpop.permute.xlu1 %320 }
  0xa2   : > { %v2789_v25 = vpop.permute.xlu0 %325 }
  0xa3   : > { %v2791_v26 = vpop.permute.xlu1 %330 }
  0xa4   : > { %2300 = vmatmul.mubr.bf16.gmra.mrb[56].mxu0 %v2669_v60 }
  0xa5   : > { %2348 = vmatmul.mubr.bf16.gmra.mrb[56].mxu1 %v2669_v60  ;;  %2303 = vmatprep.mubr.bf16.mxu0 %v2674_v61 }
  0xa6   : > { %2351 = vmatprep.mubr.bf16.mxu1 %v2674_v61  ;;  %v2793_v27 = vpop.permute.xlu0 %335 }
  0xa7   : > { %v2795_v28 = vpop.permute.xlu1 %340 }
  0xaa   : > { %v2797_v29 = vpop.permute.xlu0 %345 }
  0xab   : > { %v2799_v30 = vpop.permute.xlu1 %350 }
  0xac   : > { %2304 = vmatmul.mubr.bf16.gmra.mrb[60].mxu0 %v2695_v3 }
  0xad   : > { %2352 = vmatmul.mubr.bf16.gmra.mrb[60].mxu1 %v2695_v3 }
  0xae   : > { %v2801_v31 = vpop.permute.xlu0 %355 }
  0xaf   : > { %v2803_v32 = vpop.permute.xlu1 %360 }
  0xb2   : > { %v2805_v33 = vpop.permute.xlu0 %365 }
  0xb3   : > { %v2807_v35 = vpop.permute.xlu1 %370 }
  0xb7   : > { %v2821_v61 = vpop.permute.xlu0 %375 }
  0xb8   : > { %v2825_v1 = vpop.permute.xlu1 %380 }
 0x107   : > { %v2181_v34 = vpop.f32.mrb[0].mxu0 }
 0x108   : > { %v630_v36 = vadd.f32 %v2181_v34, %v2775_v18  ;;  %v2229_v37 = vpop.f32.mrb[0].mxu1  ;;  %v621_v38 = vpop.f32.mrb[1].mxu0 }
 0x109   : > { %v888_v39 = vadd.f32 %v2229_v37, %v2775_v18  ;;  %v622_v40 = vadd.f32 %v621_v38, %v2773_v17  ;;  %v879_v41 = vpop.f32.mrb[1].mxu1  ;;  %v2182_v42 = vpop.f32.mrb[2].mxu0 }
 0x10a   : > { %v750_v43 = vmax.f32 %v630_v36, 0.0  ;;  %v880_v44 = vadd.f32 %v879_v41, %v2773_v17  ;;  %v633_v45 = vadd.f32 %v2182_v42, %v2779_v20  ;;  %v2230_v46 = vpop.f32.mrb[2].mxu1  ;;  %v624_v47 = vpop.f32.mrb[3].mxu0 }
 0x10b   : > { %v1008_v48 = vmax.f32 %v888_v39, 0.0  ;;  %v748_v49 = vmax.f32 %v622_v40, 0.0  ;;  %v891_v50 = vadd.f32 %v2230_v46, %v2779_v20  ;;  %v625_v51 = vadd.f32 %v624_v47, %v2777_v19  ;;  %v882_v52 = vpop.f32.mrb[3].mxu1 }
 0x10c   : > { %v1006_v53 = vmax.f32 %v880_v44, 0.0  ;;  %v751_v54 = vmax.f32 %v633_v45, 0.0  ;;  %v883_v55 = vadd.f32 %v882_v52, %v2777_v19  ;;  %v2841_v45 = vpop.permute.xlu0 %385 }
 0x10d   : > { %v2817_v56 = vmax.f32 %v750_v43, %v1008_v48  ;;  %v1009_v57 = vmax.f32 %v891_v50, 0.0  ;;  %v749_v58 = vmax.f32 %v625_v51, 0.0  ;;  %3160 = vst [vmem:[#allocation2_spill] sm:$0xff] %v2841_v45  ;;  %v2845_v48 = vpop.permute.xlu1 %390 }
 0x10e   : > { %v2819_v59 = vmax.f32 %v748_v49, %v1006_v53  ;;  %v1007_v60 = vmax.f32 %v883_v55, 0.0  ;;  %3161 = vst [vmem:[#allocation3_spill] sm:$0xff] %v2845_v48 }
 0x10f   : > { %v2823_v62 = vmax.f32 %v751_v54, %v1009_v57  ;;  %v2185_v63 = vpop.f32.mrb[4].mxu0 }
 0x110   : > { %v2827_v2 = vmax.f32 %v749_v58, %v1007_v60  ;;  %v2233_v3 = vpop.f32.mrb[4].mxu1  ;;  %v646_v4 = vadd.f32 %v2185_v63, %v2785_v23  ;;  %v637_v5 = vpop.f32.mrb[5].mxu0 }
 0x111   : > { %v904_v6 = vadd.f32 %v2233_v3, %v2785_v23  ;;  %v638_v7 = vadd.f32 %v637_v5, %v2781_v21  ;;  %v895_v8 = vpop.f32.mrb[5].mxu1  ;;  %v2186_v9 = vpop.f32.mrb[6].mxu0 }
 0x112   : > { %v754_v0 = vmax.f32 %v646_v4, 0.0  ;;  %v896_v10 = vadd.f32 %v895_v8, %v2781_v21  ;;  %v649_v11 = vadd.f32 %v2186_v9, %v2787_v24  ;;  %v2234_v12 = vpop.f32.mrb[6].mxu1  ;;  %v640_v13 = vpop.f32.mrb[7].mxu0 }
 0x113   : > { %v1012_v14 = vmax.f32 %v904_v6, 0.0  ;;  %v752_v15 = vmax.f32 %v638_v7, 0.0  ;;  %v907_v16 = vadd.f32 %v2234_v12, %v2787_v24  ;;  %v641_v34 = vadd.f32 %v640_v13, %v2783_v22  ;;  %v898_v36 = vpop.f32.mrb[7].mxu1 }
 0x114   : > { %v1010_v37 = vmax.f32 %v896_v10, 0.0  ;;  %v755_v38 = vmax.f32 %v649_v11, 0.0  ;;  %v899_v39 = vadd.f32 %v898_v36, %v2783_v22 }
 0x115   : > { %v1013_v40 = vmax.f32 %v907_v16, 0.0  ;;  %v753_v41 = vmax.f32 %v641_v34, 0.0  ;;  %v2837_v42 = vmax.f32 %v754_v0, %v1012_v14  ;;  %v2861_v34 = vpop.permute.xlu0 %395 }
 0x116   : > { %v2839_v43 = vmax.f32 %v752_v15, %v1010_v37  ;;  %v1011_v44 = vmax.f32 %v899_v39, 0.0  ;;  %3162 = vst [vmem:[#allocation4_spill] sm:$0xff] %v2861_v34 }
 0x117   : > { %v2843_v46 = vmax.f32 %v755_v38, %v1013_v40  ;;  %v2189_v47 = vpop.f32.mrb[8].mxu0  ;;  %v2865_v38 = vpop.permute.xlu1 %400 }
 0x118   : > { %v2847_v49 = vmax.f32 %v753_v41, %v1011_v44  ;;  %v2237_v50 = vpop.f32.mrb[8].mxu1  ;;  %v662_v51 = vadd.f32 %v2189_v47, %v2793_v27  ;;  %v653_v52 = vpop.f32.mrb[9].mxu0 }
 0x119   : > { %v920_v53 = vadd.f32 %v2237_v50, %v2793_v27  ;;  %v654_v54 = vadd.f32 %v653_v52, %v2789_v25  ;;  %v911_v55 = vpop.f32.mrb[9].mxu1  ;;  %v2190_v57 = vpop.f32.mrb[10].mxu0 }
 0x11a   : > { %v758_v58 = vmax.f32 %v662_v51, 0.0  ;;  %v912_v60 = vadd.f32 %v911_v55, %v2789_v25  ;;  %v665_v63 = vadd.f32 %v2190_v57, %v2795_v28  ;;  %v2238_v3 = vpop.f32.mrb[10].mxu1  ;;  %v656_v4 = vpop.f32.mrb[11].mxu0 }
 0x11b   : > { %v1016_v5 = vmax.f32 %v920_v53, 0.0  ;;  %v756_v6 = vmax.f32 %v654_v54, 0.0  ;;  %v923_v7 = vadd.f32 %v2238_v3, %v2795_v28  ;;  %v657_v8 = vadd.f32 %v656_v4, %v2791_v26  ;;  %v914_v9 = vpop.f32.mrb[11].mxu1 }
 0x11c   : > { %v1014_v0 = vmax.f32 %v912_v60, 0.0  ;;  %v759_v10 = vmax.f32 %v665_v63, 0.0  ;;  %v915_v11 = vadd.f32 %v914_v9, %v2791_v26 }
 0x11d   : > { %v1017_v12 = vmax.f32 %v923_v7, 0.0  ;;  %v757_v13 = vmax.f32 %v657_v8, 0.0  ;;  %v2857_v14 = vmax.f32 %v758_v58, %v1016_v5 }
 0x11e   : > { %v2859_v15 = vmax.f32 %v756_v6, %v1014_v0  ;;  %v1015_v16 = vmax.f32 %v915_v11, 0.0 }
 0x11f   : > { %v2863_v36 = vmax.f32 %v759_v10, %v1017_v12  ;;  %v2193_v37 = vpop.f32.mrb[12].mxu0 }
 0x120   : > { %v2867_v39 = vmax.f32 %v757_v13, %v1015_v16  ;;  %v2241_v40 = vpop.f32.mrb[12].mxu1  ;;  %v678_v41 = vadd.f32 %v2193_v37, %v2801_v31  ;;  %v669_v44 = vpop.f32.mrb[13].mxu0 }
 0x121   : > { %v936_v47 = vadd.f32 %v2241_v40, %v2801_v31  ;;  %v670_v50 = vadd.f32 %v669_v44, %v2797_v29  ;;  %v927_v51 = vpop.f32.mrb[13].mxu1  ;;  %v2194_v52 = vpop.f32.mrb[14].mxu0 }
 0x122   : > { %v762_v53 = vmax.f32 %v678_v41, 0.0  ;;  %v928_v54 = vadd.f32 %v927_v51, %v2797_v29  ;;  %v681_v55 = vadd.f32 %v2194_v52, %v2803_v32  ;;  %v2242_v57 = vpop.f32.mrb[14].mxu1  ;;  %v672_v58 = vpop.f32.mrb[15].mxu0 }
 0x123   : > { %v1020_v60 = vmax.f32 %v936_v47, 0.0  ;;  %v760_v63 = vmax.f32 %v670_v50, 0.0  ;;  %v939_v3 = vadd.f32 %v2242_v57, %v2803_v32  ;;  %v673_v4 = vadd.f32 %v672_v58, %v2799_v30  ;;  %v930_v5 = vpop.f32.mrb[15].mxu1  ;;  %v2881_v13 = vpop.permute.xlu0 %405 }
 0x124   : > { %v1018_v6 = vmax.f32 %v928_v54, 0.0  ;;  %v763_v7 = vmax.f32 %v681_v55, 0.0  ;;  %v931_v8 = vadd.f32 %v930_v5, %v2799_v30  ;;  %3163 = vst [vmem:[#allocation5_spill] sm:$0xff] %v2881_v13  ;;  %v2885_v40 = vpop.permute.xlu1 %410 }
 0x125   : > { %v1021_v9 = vmax.f32 %v939_v3, 0.0  ;;  %v761_v0 = vmax.f32 %v673_v4, 0.0  ;;  %v2877_v10 = vmax.f32 %v762_v53, %v1020_v60  ;;  %3164 = vst [vmem:[#allocation6_spill] sm:$0xff] %v2885_v40 }
 0x126   : > { %v2879_v11 = vmax.f32 %v760_v63, %v1018_v6  ;;  %v1019_v12 = vmax.f32 %v931_v8, 0.0 }
 0x127   : > { %v2883_v16 = vmax.f32 %v763_v7, %v1021_v9  ;;  %v2197_v37 = vpop.f32.mrb[16].mxu0 }
 0x128   : > { %v2887_v41 = vmax.f32 %v761_v0, %v1019_v12  ;;  %v2245_v44 = vpop.f32.mrb[16].mxu1  ;;  %v694_v47 = vadd.f32 %v2197_v37, %v2821_v61  ;;  %v685_v50 = vpop.f32.mrb[17].mxu0 }
 0x129   : > { %v952_v51 = vadd.f32 %v2245_v44, %v2821_v61  ;;  %v686_v52 = vadd.f32 %v685_v50, %v2805_v33  ;;  %v943_v53 = vpop.f32.mrb[17].mxu1  ;;  %v2198_v54 = vpop.f32.mrb[18].mxu0 }
 0x12a   : > { %v766_v55 = vmax.f32 %v694_v47, 0.0  ;;  %v944_v57 = vadd.f32 %v943_v53, %v2805_v33  ;;  %v697_v58 = vadd.f32 %v2198_v54, %v2825_v1  ;;  %v2246_v60 = vpop.f32.mrb[18].mxu1  ;;  %v688_v63 = vpop.f32.mrb[19].mxu0 }
 0x12b   : > { %v1024_v3 = vmax.f32 %v952_v51, 0.0  ;;  %v764_v4 = vmax.f32 %v686_v52, 0.0  ;;  %v955_v5 = vadd.f32 %v2246_v60, %v2825_v1  ;;  %v689_v6 = vadd.f32 %v688_v63, %v2807_v35  ;;  %v946_v7 = vpop.f32.mrb[19].mxu1  ;;  %v2901_v53 = vpop.permute.xlu0 %415 }
 0x12c   : > { %v1022_v8 = vmax.f32 %v944_v57, 0.0  ;;  %v767_v9 = vmax.f32 %v697_v58, 0.0  ;;  %v947_v0 = vadd.f32 %v946_v7, %v2807_v35  ;;  %3166 = vst [vmem:[#allocation8_spill] sm:$0xff] %v2901_v53  ;;  %v2905_v54 = vpop.permute.xlu1 %420 }
 0x12d   : > { %v1025_v12 = vmax.f32 %v955_v5, 0.0  ;;  %v765_v37 = vmax.f32 %v689_v6, 0.0  ;;  %v2897_v44 = vmax.f32 %v766_v55, %v1024_v3 }
 0x12e   : > { %v2899_v47 = vmax.f32 %v764_v4, %v1022_v8  ;;  %v1023_v50 = vmax.f32 %v947_v0, 0.0 }
 0x12f   : > { %v2903_v51 = vmax.f32 %v767_v9, %v1025_v12  ;;  %v2201_v52 = vpop.f32.mrb[20].mxu0 }
 0x130   : > { %3165 = vst [vmem:[#allocation7_spill] sm:$0xff] %v2899_v47  ;;  %v2907_v60 = vmax.f32 %v765_v37, %v1023_v50  ;;  %v2249_v57 = vpop.f32.mrb[20].mxu1  ;;  %v710_v58 = vadd.f32 %v2201_v52, %v2861_v34  ;;  %v701_v63 = vpop.f32.mrb[21].mxu0 }
 0x131   : > { %3167 = vst [vmem:[#allocation9_spill] sm:$0xff] %v2903_v51  ;;  %v968_v5 = vadd.f32 %v2249_v57, %v2861_v34  ;;  %v702_v55 = vadd.f32 %v701_v63, %v2841_v45  ;;  %v959_v3 = vpop.f32.mrb[21].mxu1  ;;  %v2202_v4 = vpop.f32.mrb[22].mxu0 }
 0x132   : > { %3168 = vst [vmem:[#allocation10_spill] sm:$0xff] %v2907_v60  ;;  %v770_v6 = vmax.f32 %v710_v58, 0.0  ;;  %v960_v7 = vadd.f32 %v959_v3, %v2841_v45  ;;  %v713_v8 = vadd.f32 %v2202_v4, %v2865_v38  ;;  %v2250_v9 = vpop.f32.mrb[22].mxu1  ;;  %v704_v0 = vpop.f32.mrb[23].mxu0 }
 0x133   : > { %v1028_v12 = vmax.f32 %v968_v5, 0.0  ;;  %v768_v37 = vmax.f32 %v702_v55, 0.0  ;;  %v971_v50 = vadd.f32 %v2250_v9, %v2865_v38  ;;  %v705_v52 = vadd.f32 %v704_v0, %v2845_v48  ;;  %v962_v60 = vpop.f32.mrb[23].mxu1  ;;  %v2921_v45 = vpop.permute.xlu0 %425 }
 0x134   : > { %v1026_v51 = vmax.f32 %v960_v7, 0.0  ;;  %v771_v57 = vmax.f32 %v713_v8, 0.0  ;;  %v963_v63 = vadd.f32 %v962_v60, %v2845_v48  ;;  %3170 = vst [vmem:[#allocation12_spill] sm:$0xff] %v2921_v45  ;;  %v2925_v9 = vpop.permute.xlu1 %430 }
 0x135   : > { %v1029_v34 = vmax.f32 %v971_v50, 0.0  ;;  %v769_v47 = vmax.f32 %v705_v52, 0.0  ;;  %v2917_v58 = vmax.f32 %v770_v6, %v1028_v12 }
 0x136   : > { %v2919_v3 = vmax.f32 %v768_v37, %v1026_v51  ;;  %v1027_v4 = vmax.f32 %v963_v63, 0.0 }
 0x137   : > { %v2923_v5 = vmax.f32 %v771_v57, %v1029_v34  ;;  %v2205_v55 = vpop.f32.mrb[24].mxu0 }
 0x138   : > { %3169 = vst [vmem:[#allocation11_spill] sm:$0xff] %v2919_v3  ;;  %v2927_v0 = vmax.f32 %v769_v47, %v1027_v4  ;;  %v2253_v7 = vpop.f32.mrb[24].mxu1  ;;  %v726_v8 = vadd.f32 %v2205_v55, %v2901_v53  ;;  %v717_v60 = vpop.f32.mrb[25].mxu0 }
 0x139   : > { %3171 = vst [vmem:[#allocation13_spill] sm:$0xff] %v2923_v5  ;;  %v984_v50 = vadd.f32 %v2253_v7, %v2901_v53  ;;  %v718_v6 = vadd.f32 %v717_v60, %v2881_v13  ;;  %v975_v51 = vpop.f32.mrb[25].mxu1  ;;  %v2206_v12 = vpop.f32.mrb[26].mxu0 }
 0x13a   : > { %3172 = vst [vmem:[#allocation14_spill] sm:$0xff] %v2927_v0  ;;  %v774_v37 = vmax.f32 %v726_v8, 0.0  ;;  %v976_v52 = vadd.f32 %v975_v51, %v2881_v13  ;;  %v729_v34 = vadd.f32 %v2206_v12, %v2905_v54  ;;  %v2254_v57 = vpop.f32.mrb[26].mxu1  ;;  %v720_v63 = vpop.f32.mrb[27].mxu0 }
 0x13b   : > { %v1032_v5 = vmax.f32 %v984_v50, 0.0  ;;  %v772_v47 = vmax.f32 %v718_v6, 0.0  ;;  %v987_v4 = vadd.f32 %v2254_v57, %v2905_v54  ;;  %v721_v55 = vadd.f32 %v720_v63, %v2885_v40  ;;  %v978_v0 = vpop.f32.mrb[27].mxu1  ;;  %v2937_v8 = vpop.permute.xlu0 %435 }
 0x13c   : > { %v1030_v3 = vmax.f32 %v976_v52, 0.0  ;;  %v775_v7 = vmax.f32 %v729_v34, 0.0  ;;  %v979_v60 = vadd.f32 %v978_v0, %v2885_v40  ;;  %3173 = vst [vmem:[#allocation15_spill] sm:$0xff] %v2937_v8  ;;  %v2945_v57 = vpop.permute.xlu1 %440 }
 0x13d   : > { %v1033_v53 = vmax.f32 %v987_v4, 0.0  ;;  %v773_v48 = vmax.f32 %v721_v55, 0.0  ;;  %v2939_v51 = vmax.f32 %v774_v37, %v1032_v5 }
 0x13e   : > { %v2941_v12 = vmax.f32 %v772_v47, %v1030_v3  ;;  %v1031_v13 = vmax.f32 %v979_v60, 0.0 }
 0x13f   : > { %v2943_v50 = vmax.f32 %v775_v7, %v1033_v53  ;;  %v2209_v6 = vpop.f32.mrb[28].mxu0 }
 0x140   : > { %3174 = vst [vmem:[#allocation16_spill] sm:$0xff] %v2941_v12  ;;  %v2947_v63 = vmax.f32 %v773_v48, %v1031_v13  ;;  %v2257_v52 = vpop.f32.mrb[28].mxu1  ;;  %v742_v34 = vadd.f32 %v2209_v6, %v2937_v8  ;;  %v733_v0 = vpop.f32.mrb[29].mxu0 }
 0x141   : > { %3175 = vst [vmem:[#allocation17_spill] sm:$0xff] %v2943_v50  ;;  %v1000_v4 = vadd.f32 %v2257_v52, %v2937_v8  ;;  %v734_v55 = vadd.f32 %v733_v0, %v2921_v45  ;;  %v991_v5 = vpop.f32.mrb[29].mxu1  ;;  %v2210_v37 = vpop.f32.mrb[30].mxu0 }
 0x142   : > { %3176 = vst [vmem:[#allocation18_spill] sm:$0xff] %v2947_v63  ;;  %v778_v3 = vmax.f32 %v742_v34, 0.0  ;;  %v992_v47 = vadd.f32 %v991_v5, %v2921_v45  ;;  %v745_v53 = vadd.f32 %v2210_v37, %v2945_v57  ;;  %v2258_v7 = vpop.f32.mrb[30].mxu1  ;;  %v736_v60 = vpop.f32.mrb[31].mxu0 }
 0x143   : > { %v1036_v50 = vmax.f32 %v1000_v4, 0.0  ;;  %v776_v48 = vmax.f32 %v734_v55, 0.0  ;;  %v1003_v13 = vadd.f32 %v2258_v7, %v2945_v57  ;;  %v737_v6 = vadd.f32 %v736_v60, %v2925_v9  ;;  %v994_v63 = vpop.f32.mrb[31].mxu1 }
 0x144   : > { %v1034_v40 = vmax.f32 %v992_v47, 0.0  ;;  %v779_v52 = vmax.f32 %v745_v53, 0.0  ;;  %v995_v0 = vadd.f32 %v994_v63, %v2925_v9 }
 0x145   : > { %v1037_v8 = vmax.f32 %v1003_v13, 0.0  ;;  %v777_v12 = vmax.f32 %v737_v6, 0.0  ;;  %v2957_v34 = vmax.f32 %v778_v3, %v1036_v50 }
 0x146   : > { %v2959_v5 = vmax.f32 %v776_v48, %v1034_v40  ;;  %v1035_v37 = vmax.f32 %v995_v0, 0.0 }
 0x147   : > { %v2961_v45 = vmax.f32 %v779_v52, %v1037_v8  ;;  %v2277_v4 = vpop.f32.mrb[32].mxu0 }
 0x148   : > { %v2963_v55 = vmax.f32 %v777_v12, %v1035_v37  ;;  %v1178_v7 = vadd.f32 %v2277_v4, %v2775_v18  ;;  %v2325_v60 = vpop.f32.mrb[32].mxu1  ;;  %v1169_v47 = vpop.f32.mrb[33].mxu0 }
 0x149   : > { %v1468_v53 = vadd.f32 %v2325_v60, %v2775_v18  ;;  %v1170_v63 = vadd.f32 %v1169_v47, %v2773_v17  ;;  %v1459_v13 = vpop.f32.mrb[33].mxu1  ;;  %v2278_v50 = vpop.f32.mrb[34].mxu0 }
 0x14a   : > { %3177 = vst [vmem:[#allocation19_spill] sm:$0xff] %v2963_v55  ;;  %v1298_v3 = vmax.f32 %v1178_v7, 0.0  ;;  %v1460_v40 = vadd.f32 %v1459_v13, %v2773_v17  ;;  %v1181_v8 = vadd.f32 %v2278_v50, %v2779_v20  ;;  %v2326_v48 = vpop.f32.mrb[34].mxu1  ;;  %v1172_v6 = vpop.f32.mrb[35].mxu0 }
 0x14b   : > { %v1296_v12 = vmax.f32 %v1170_v63, 0.0  ;;  %v1471_v52 = vadd.f32 %v2326_v48, %v2779_v20  ;;  %v1173_v0 = vadd.f32 %v1172_v6, %v2777_v19  ;;  %v1462_v37 = vpop.f32.mrb[35].mxu1  ;;  %v1588_v18 = vmax.f32 %v1468_v53, 0.0 }
 0x14c   : > { %v1330_v4 = vmax.f32 %v2817_v56, %v1298_v3  ;;  %v1299_v60 = vmax.f32 %v1181_v8, 0.0  ;;  %v1463_v47 = vadd.f32 %v1462_v37, %v2777_v19  ;;  %v1586_v17 = vmax.f32 %v1460_v40, 0.0 }
 0x14d   : > { %v1328_v7 = vmax.f32 %v2819_v59, %v1296_v12  ;;  %v1297_v13 = vmax.f32 %v1173_v0, 0.0  ;;  %v1589_v63 = vmax.f32 %v1471_v52, 0.0 }
 0x14e   : > { %v1620_v50 = vmax.f32 %v1330_v4, %v1588_v18  ;;  %v1331_v55 = vmax.f32 %v2823_v62, %v1299_v60  ;;  %v1587_v53 = vmax.f32 %v1463_v47, 0.0 }
 0x14f   : > { %v1618_v20 = vmax.f32 %v1328_v7, %v1586_v17  ;;  %v1329_v56 = vmax.f32 %v2827_v2, %v1297_v13  ;;  %v2281_v19 = vpop.f32.mrb[36].mxu0 }
 0x150   : > { %v2037_v3 = vpack.c.bf16 %v1620_v50, %v1620_v50  ;;  %v1621_v59 = vmax.f32 %v1331_v55, %v1589_v63  ;;  %v1194_v40 = vadd.f32 %v2281_v19, %v2785_v23  ;;  %v2329_v8 = vpop.f32.mrb[36].mxu1  ;;  %v1185_v62 = vpop.f32.mrb[37].mxu0 }
 0x151   : > { %v2035_v48 = vpack.c.bf16 %v1618_v20, %v1618_v20  ;;  %v1619_v6 = vmax.f32 %v1329_v56, %v1587_v53  ;;  %v1484_v12 = vadd.f32 %v2329_v8, %v2785_v23  ;;  %v1186_v52 = vadd.f32 %v1185_v62, %v2781_v21  ;;  %v1475_v0 = vpop.f32.mrb[37].mxu1  ;;  %v2282_v37 = vpop.f32.mrb[38].mxu0 }
 0x152   : > { %1781 = vst.msk [vmem:[%s2980_s28 + $0x8] sm:$0xf] %vm1778_vm0, %v2037_v3  ;;  %v2038_v2 = vpack.c.bf16 %v1621_v59, %v1621_v59  ;;  %v1302_v4 = vmax.f32 %v1194_v40, 0.0  ;;  %v1476_v55 = vadd.f32 %v1475_v0, %v2781_v21  ;;  %v1197_v18 = vadd.f32 %v2282_v37, %v2787_v24  ;;  %v2330_v60 = vpop.f32.mrb[38].mxu1  ;;  %v1188_v47 = vpop.f32.mrb[39].mxu0 }
 0x153   : > { %1779 = vst.msk [vmem:[%s2980_s28] sm:$0xf] %vm1778_vm0, %v2035_v48  ;;  %v2036_v7 = vpack.c.bf16 %v1619_v6, %v1619_v6  ;;  %v1300_v23 = vmax.f32 %v1186_v52, 0.0  ;;  %v1487_v17 = vadd.f32 %v2330_v60, %v2787_v24  ;;  %v1478_v13 = vpop.f32.mrb[39].mxu1  ;;  %v1592_v63 = vmax.f32 %v1484_v12, 0.0 }
 0x154   : > { %1782 = vst.msk [vmem:[%s2980_s28 + $0xc] sm:$0xf] %vm1778_vm0, %v2038_v2  ;;  %v1334_v50 = vmax.f32 %v2837_v42, %v1302_v4  ;;  %v1303_v20 = vmax.f32 %v1197_v18, 0.0  ;;  %v1189_v56 = vadd.f32 %v1188_v47, %v2783_v22  ;;  %v1590_v53 = vmax.f32 %v1476_v55, 0.0 }
 0x155   : > { %1780 = vst.msk [vmem:[%s2980_s28 + $0x4] sm:$0xf] %vm1778_vm0, %v2036_v7  ;;  %v1332_v21 = vmax.f32 %v2839_v43, %v1300_v23  ;;  %v1479_v19 = vadd.f32 %v1478_v13, %v2783_v22  ;;  %v1593_v24 = vmax.f32 %v1487_v17, 0.0 }
 0x156   : > { %v1624_v3 = vmax.f32 %v1334_v50, %v1592_v63  ;;  %v1335_v59 = vmax.f32 %v2843_v46, %v1303_v20  ;;  %v1301_v40 = vmax.f32 %v1189_v56, 0.0 }
 0x157   : > { %v1622_v8 = vmax.f32 %v1332_v21, %v1590_v53  ;;  %v1591_v62 = vmax.f32 %v1479_v19, 0.0  ;;  %v2285_v42 = vpop.f32.mrb[40].mxu0 }
 0x158   : > { %v2041_v48 = vpack.c.bf16 %v1624_v3, %v1624_v3  ;;  %v1625_v6 = vmax.f32 %v1335_v59, %v1593_v24  ;;  %v1333_v12 = vmax.f32 %v2847_v49, %v1301_v40  ;;  %v1210_v52 = vadd.f32 %v2285_v42, %v2793_v27  ;;  %v2333_v43 = vpop.f32.mrb[40].mxu1  ;;  %v1201_v0 = vpop.f32.mrb[41].mxu0 }
 0x159   : > { %v2039_v37 = vpack.c.bf16 %v1622_v8, %v1622_v8  ;;  %v1500_v22 = vadd.f32 %v2333_v43, %v2793_v27  ;;  %v1202_v46 = vadd.f32 %v1201_v0, %v2789_v25  ;;  %v1491_v2 = vpop.f32.mrb[41].mxu1  ;;  %v2286_v4 = vpop.f32.mrb[42].mxu0 }
 0x15a   : > { %1785 = vst.msk [vmem:[%s2980_s28 + $0x18] sm:$0xf] %vm1778_vm0, %v2041_v48  ;;  %v2042_v55 = vpack.c.bf16 %v1625_v6, %v1625_v6  ;;  %v1623_v18 = vmax.f32 %v1333_v12, %v1591_v62  ;;  %v1306_v60 = vmax.f32 %v1210_v52, 0.0  ;;  %v1492_v49 = vadd.f32 %v1491_v2, %v2789_v25  ;;  %v2334_v47 = vpop.f32.mrb[42].mxu1  ;;  %v1204_v7 = vpop.f32.mrb[43].mxu0 }
 0x15b   : > { %1783 = vst.msk [vmem:[%s2980_s28 + $0x10] sm:$0xf] %vm1778_vm0, %v2039_v37  ;;  %v1304_v23 = vmax.f32 %v1202_v46, 0.0  ;;  %v1213_v27 = vadd.f32 %v2286_v4, %v2795_v28  ;;  %v1503_v17 = vadd.f32 %v2334_v47, %v2795_v28  ;;  %v1494_v13 = vpop.f32.mrb[43].mxu1  ;;  %v1596_v20 = vmax.f32 %v1500_v22, 0.0 }
 0x15c   : > { %1786 = vst.msk [vmem:[%s2980_s28 + $0x1c] sm:$0xf] %vm1778_vm0, %v2042_v55  ;;  %v2040_v50 = vpack.c.bf16 %v1623_v18, %v1623_v18  ;;  %v1338_v63 = vmax.f32 %v2857_v14, %v1306_v60  ;;  %v1205_v56 = vadd.f32 %v1204_v7, %v2791_v26  ;;  %v1594_v21 = vmax.f32 %v1492_v49, 0.0 }
 0x15d   : > { %v1336_v25 = vmax.f32 %v2859_v15, %v1304_v23  ;;  %v1307_v53 = vmax.f32 %v1213_v27, 0.0  ;;  %v1495_v19 = vadd.f32 %v1494_v13, %v2791_v26  ;;  %v1597_v40 = vmax.f32 %v1503_v17, 0.0 }
 0x15e   : > { %1784 = vst.msk [vmem:[%s2980_s28 + $0x14] sm:$0xf] %vm1778_vm0, %v2040_v50  ;;  %v1628_v3 = vmax.f32 %v1338_v63, %v1596_v20  ;;  %v1305_v59 = vmax.f32 %v1205_v56, 0.0 }
 0x15f   : > { %v1626_v28 = vmax.f32 %v1336_v25, %v1594_v21  ;;  %v1339_v24 = vmax.f32 %v2863_v36, %v1307_v53  ;;  %v2289_v8 = vpop.f32.mrb[44].mxu0  ;;  %v1595_v42 = vmax.f32 %v1495_v19, 0.0 }
 0x160   : > { %v2045_v14 = vpack.c.bf16 %v1628_v3, %v1628_v3  ;;  %v1337_v62 = vmax.f32 %v2867_v39, %v1305_v59  ;;  %v1226_v15 = vadd.f32 %v2289_v8, %v2801_v31  ;;  %v2337_v48 = vpop.f32.mrb[44].mxu1  ;;  %v1217_v6 = vpop.f32.mrb[45].mxu0 }
 0x161   : > { %v2043_v26 = vpack.c.bf16 %v1626_v28, %v1626_v28  ;;  %v1629_v12 = vmax.f32 %v1339_v24, %v1597_v40  ;;  %v1516_v52 = vadd.f32 %v2337_v48, %v2801_v31  ;;  %v1218_v43 = vadd.f32 %v1217_v6, %v2797_v29  ;;  %v1507_v0 = vpop.f32.mrb[45].mxu1  ;;  %v2290_v37 = vpop.f32.mrb[46].mxu0 }
 0x162   : > { %1789 = vst.msk [vmem:[%s2980_s28 + $0x28] sm:$0xf] %vm1778_vm0, %v2045_v14  ;;  %v1627_v36 = vmax.f32 %v1337_v62, %v1595_v42  ;;  %v1310_v22 = vmax.f32 %v1226_v15, 0.0  ;;  %v1508_v39 = vadd.f32 %v1507_v0, %v2797_v29  ;;  %v1229_v46 = vadd.f32 %v2290_v37, %v2803_v32  ;;  %v2338_v2 = vpop.f32.mrb[46].mxu1  ;;  %v1220_v4 = vpop.f32.mrb[47].mxu0  ;;  %v3178_v37 = vld [vmem:[#allocation7_spill] sm:$0xff] }
 0x163   : > { %1787 = vst.msk [vmem:[%s2980_s28 + $0x20] sm:$0xf] %vm1778_vm0, %v2043_v26  ;;  %v2046_v55 = vpack.c.bf16 %v1629_v12, %v1629_v12  ;;  %v1308_v31 = vmax.f32 %v1218_v43, 0.0  ;;  %v1519_v18 = vadd.f32 %v2338_v2, %v2803_v32  ;;  %v1510_v60 = vpop.f32.mrb[47].mxu1  ;;  %v1600_v7 = vmax.f32 %v1516_v52, 0.0  ;;  %v3179_v2 = vld [vmem:[#allocation9_spill] sm:$0xff] }
 0x164   : > { %v2044_v49 = vpack.c.bf16 %v1627_v36, %v1627_v36  ;;  %v1342_v47 = vmax.f32 %v2877_v10, %v1310_v22  ;;  %v1311_v23 = vmax.f32 %v1229_v46, 0.0  ;;  %v1598_v27 = vmax.f32 %v1508_v39, 0.0 }
 0x165   : > { %1790 = vst.msk [vmem:[%s2980_s28 + $0x2c] sm:$0xf] %vm1778_vm0, %v2046_v55  ;;  %v1340_v29 = vmax.f32 %v2879_v11, %v1308_v31  ;;  %v1221_v17 = vadd.f32 %v1220_v4, %v2799_v30  ;;  %v1511_v13 = vadd.f32 %v1510_v60, %v2799_v30  ;;  %v1601_v63 = vmax.f32 %v1519_v18, 0.0 }
 0x166   : > { %1788 = vst.msk [vmem:[%s2980_s28 + $0x24] sm:$0xf] %vm1778_vm0, %v2044_v49  ;;  %v1632_v50 = vmax.f32 %v1342_v47, %v1600_v7  ;;  %v1343_v32 = vmax.f32 %v2883_v16, %v1311_v23  ;;  %v3180_v47 = vld [vmem:[#allocation10_spill] sm:$0xff]  ;;  %v3181_v23 = vld [vmem:[#allocation4_spill] sm:$0xff] }
 0x167   : > { %v1630_v20 = vmax.f32 %v1340_v29, %v1598_v27  ;;  %v1309_v10 = vmax.f32 %v1221_v17, 0.0  ;;  %v2293_v56 = vpop.f32.mrb[48].mxu0  ;;  %v1599_v53 = vmax.f32 %v1511_v13, 0.0 }
 0x168   : > { %v2049_v25 = vpack.c.bf16 %v1632_v50, %v1632_v50  ;;  %v1633_v21 = vmax.f32 %v1343_v32, %v1601_v63  ;;  %v1242_v11 = vadd.f32 %v2293_v56, %v2821_v61  ;;  %v2341_v19 = vpop.f32.mrb[48].mxu1  ;;  %v1233_v3 = vpop.f32.mrb[49].mxu0  ;;  %v3182_v50 = vld [vmem:[#allocation2_spill] sm:$0xff] }
 0x169   : > { %v2047_v59 = vpack.c.bf16 %v1630_v20, %v1630_v20  ;;  %v1341_v30 = vmax.f32 %v2887_v41, %v1309_v10  ;;  %v1532_v28 = vadd.f32 %v2341_v19, %v2821_v61  ;;  %v1234_v16 = vadd.f32 %v1233_v3, %v2805_v33  ;;  %v1523_v24 = vpop.f32.mrb[49].mxu1  ;;  %v2294_v40 = vpop.f32.mrb[50].mxu0 }
 0x16a   : > { %1793 = vst.msk [vmem:[%s2980_s28 + $0x38] sm:$0xf] %vm1778_vm0, %v2049_v25  ;;  %v2050_v8 = vpack.c.bf16 %v1633_v21, %v1633_v21  ;;  %v1314_v14 = vmax.f32 %v1242_v11, 0.0  ;;  %v1524_v62 = vadd.f32 %v1523_v24, %v2805_v33  ;;  %v1245_v42 = vadd.f32 %v2294_v40, %v2825_v1  ;;  %v2342_v15 = vpop.f32.mrb[50].mxu1  ;;  %v1236_v48 = vpop.f32.mrb[51].mxu0  ;;  %v3183_v40 = vld [vmem:[#allocation3_spill] sm:$0xff] }
 0x16b   : > { %1791 = vst.msk [vmem:[%s2980_s28 + $0x30] sm:$0xf] %vm1778_vm0, %v2047_v59  ;;  %v1631_v41 = vmax.f32 %v1341_v30, %v1599_v53  ;;  %v1312_v6 = vmax.f32 %v1234_v16, 0.0  ;;  %v1535_v61 = vadd.f32 %v2342_v15, %v2825_v1  ;;  %v1526_v26 = vpop.f32.mrb[51].mxu1  ;;  %v1604_v52 = vmax.f32 %v1532_v28, 0.0 }
 0x16c   : > { %1794 = vst.msk [vmem:[%s2980_s28 + $0x3c] sm:$0xf] %vm1778_vm0, %v2050_v8  ;;  %v1346_v12 = vmax.f32 %v2897_v44, %v1314_v14  ;;  %v1315_v43 = vmax.f32 %v1245_v42, 0.0  ;;  %v1237_v33 = vadd.f32 %v1236_v48, %v2807_v35  ;;  %v1602_v22 = vmax.f32 %v1524_v62, 0.0  ;;  %v3184_v14 = vld [vmem:[#allocation11_spill] sm:$0xff] }
 0x16d   : > { %v2048_v0 = vpack.c.bf16 %v1631_v41, %v1631_v41  ;;  %v1344_v36 = vmax.f32 %v3178_v37, %v1312_v6  ;;  %v1527_v39 = vadd.f32 %v1526_v26, %v2807_v35  ;;  %v1605_v55 = vmax.f32 %v1535_v61, 0.0  ;;  %v3185_v61 = vld [vmem:[#allocation13_spill] sm:$0xff]  ;;  %v3187_v37 = vld [vmem:[#allocation8_spill] sm:$0xff] }
 0x16e   : > { %v1636_v46 = vmax.f32 %v1346_v12, %v1604_v52  ;;  %v1347_v4 = vmax.f32 %v3179_v2, %v1315_v43  ;;  %v1313_v1 = vmax.f32 %v1237_v33, 0.0  ;;  %v3186_v43 = vld [vmem:[#allocation14_spill] sm:$0xff] }
 0x16f   : > { %1792 = vst.msk [vmem:[%s2980_s28 + $0x34] sm:$0xf] %vm1778_vm0, %v2048_v0  ;;  %v1634_v31 = vmax.f32 %v1344_v36, %v1602_v22  ;;  %v1603_v44 = vmax.f32 %v1527_v39, 0.0  ;;  %v2297_v18 = vpop.f32.mrb[52].mxu0 }
 0x170   : > { %v2053_v60 = vpack.c.bf16 %v1636_v46, %v1636_v46  ;;  %v1637_v49 = vmax.f32 %v1347_v4, %v1605_v55  ;;  %v1345_v7 = vmax.f32 %v3180_v47, %v1313_v1  ;;  %v1258_v29 = vadd.f32 %v2297_v18, %v3181_v23  ;;  %v2345_v27 = vpop.f32.mrb[52].mxu1  ;;  %v1249_v35 = vpop.f32.mrb[53].mxu0  ;;  %v3188_v55 = vld [vmem:[#allocation5_spill] sm:$0xff] }
 0x171   : > { %v2051_v17 = vpack.c.bf16 %v1634_v31, %v1634_v31  ;;  %v1548_v13 = vadd.f32 %v2345_v27, %v3181_v23  ;;  %v1250_v32 = vadd.f32 %v1249_v35, %v3182_v50  ;;  %v1539_v63 = vpop.f32.mrb[53].mxu1  ;;  %v2298_v20 = vpop.f32.mrb[54].mxu0 }
 0x172   : > { %1797 = vst.msk [vmem:[%s2980_s28 + $0x48] sm:$0xf] %vm1778_vm0, %v2053_v60  ;;  %v2054_v10 = vpack.c.bf16 %v1637_v49, %v1637_v49  ;;  %v1635_v56 = vmax.f32 %v1345_v7, %v1603_v44  ;;  %v1318_v25 = vmax.f32 %v1258_v29, 0.0  ;;  %v1540_v21 = vadd.f32 %v1539_v63, %v3182_v50  ;;  %v2346_v53 = vpop.f32.mrb[54].mxu1  ;;  %v1252_v11 = vpop.f32.mrb[55].mxu0 }
 0x173   : > { %1795 = vst.msk [vmem:[%s2980_s28 + $0x40] sm:$0xf] %vm1778_vm0, %v2051_v17  ;;  %v1316_v19 = vmax.f32 %v1250_v32, 0.0  ;;  %v1261_v3 = vadd.f32 %v2298_v20, %v2865_v38  ;;  %v1551_v59 = vadd.f32 %v2346_v53, %v2865_v38  ;;  %v1542_v30 = vpop.f32.mrb[55].mxu1  ;;  %v1608_v24 = vmax.f32 %v1548_v13, 0.0  ;;  %v3189_v20 = vld [vmem:[#allocation16_spill] sm:$0xff] }
 0x174   : > { %1798 = vst.msk [vmem:[%s2980_s28 + $0x4c] sm:$0xf] %vm1778_vm0, %v2054_v10  ;;  %v2052_v28 = vpack.c.bf16 %v1635_v56, %v1635_v56  ;;  %v1350_v16 = vmax.f32 %v2917_v58, %v1318_v25  ;;  %v1253_v8 = vadd.f32 %v1252_v11, %v3183_v40  ;;  %v1606_v42 = vmax.f32 %v1540_v21, 0.0  ;;  %v3190_v25 = vld [vmem:[#allocation6_spill] sm:$0xff] }
 0x175   : > { %v1348_v62 = vmax.f32 %v3184_v14, %v1316_v19  ;;  %v1319_v15 = vmax.f32 %v1261_v3, 0.0  ;;  %v1543_v48 = vadd.f32 %v1542_v30, %v3183_v40  ;;  %v1609_v12 = vmax.f32 %v1551_v59, 0.0  ;;  %v3191_v19 = vld [vmem:[#allocation17_spill] sm:$0xff]  ;;  %v3192_v40 = vld [vmem:[#allocation15_spill] sm:$0xff] }
 0x176   : > { %1796 = vst.msk [vmem:[%s2980_s28 + $0x44] sm:$0xf] %vm1778_vm0, %v2052_v28  ;;  %v1640_v41 = vmax.f32 %v1350_v16, %v1608_v24  ;;  %v1317_v6 = vmax.f32 %v1253_v8, 0.0 }
 0x177   : > { %v1638_v38 = vmax.f32 %v1348_v62, %v1606_v42  ;;  %v1351_v26 = vmax.f32 %v3185_v61, %v1319_v15  ;;  %v2301_v52 = vpop.f32.mrb[56].mxu0  ;;  %v1607_v0 = vmax.f32 %v1543_v48, 0.0  ;;  %v3193_v15 = vld [vmem:[#allocation18_spill] sm:$0xff] }
 0x178   : > { %v2057_v58 = vpack.c.bf16 %v1640_v41, %v1640_v41  ;;  %v1349_v33 = vmax.f32 %v3186_v43, %v1317_v6  ;;  %v1274_v36 = vadd.f32 %v2301_v52, %v3187_v37  ;;  %v2349_v22 = vpop.f32.mrb[56].mxu1  ;;  %v1265_v39 = vpop.f32.mrb[57].mxu0  ;;  %v3194_v6 = vld [vmem:[#allocation12_spill] sm:$0xff] }
 0x179   : > { %v2055_v46 = vpack.c.bf16 %v1638_v38, %v1638_v38  ;;  %v1641_v2 = vmax.f32 %v1351_v26, %v1609_v12  ;;  %v1564_v4 = vadd.f32 %v2349_v22, %v3187_v37  ;;  %v1266_v1 = vadd.f32 %v1265_v39, %v3188_v55  ;;  %v1555_v31 = vpop.f32.mrb[57].mxu1  ;;  %v2302_v44 = vpop.f32.mrb[58].mxu0 }
 0x17a   : > { %1801 = vst.msk [vmem:[%s2980_s28 + $0x58] sm:$0xf] %vm1778_vm0, %v2057_v58  ;;  %v1639_v18 = vmax.f32 %v1349_v33, %v1607_v0  ;;  %v1322_v60 = vmax.f32 %v1274_v36, 0.0  ;;  %v1556_v49 = vadd.f32 %v1555_v31, %v3188_v55  ;;  %v1277_v47 = vadd.f32 %v2302_v44, %v2905_v54  ;;  %v2350_v7 = vpop.f32.mrb[58].mxu1  ;;  %v1268_v23 = vpop.f32.mrb[59].mxu0 }
 0x17b   : > { %1799 = vst.msk [vmem:[%s2980_s28 + $0x50] sm:$0xf] %vm1778_vm0, %v2055_v46  ;;  %v2058_v29 = vpack.c.bf16 %v1641_v2, %v1641_v2  ;;  %v1320_v27 = vmax.f32 %v1266_v1, 0.0  ;;  %v1567_v35 = vadd.f32 %v2350_v7, %v2905_v54  ;;  %v1558_v17 = vpop.f32.mrb[59].mxu1  ;;  %v1612_v32 = vmax.f32 %v1564_v4, 0.0 }
 0x17c   : > { %v2056_v13 = vpack.c.bf16 %v1639_v18, %v1639_v18  ;;  %v1354_v50 = vmax.f32 %v2939_v51, %v1322_v60  ;;  %v1323_v63 = vmax.f32 %v1277_v47, 0.0  ;;  %v1610_v56 = vmax.f32 %v1556_v49, 0.0 }
 0x17d   : > { %1802 = vst.msk [vmem:[%s2980_s28 + $0x5c] sm:$0xf] %vm1778_vm0, %v2058_v29  ;;  %v1352_v10 = vmax.f32 %v3189_v20, %v1320_v27  ;;  %v1269_v21 = vadd.f32 %v1268_v23, %v3190_v25  ;;  %v1559_v53 = vadd.f32 %v1558_v17, %v3190_v25  ;;  %v1613_v3 = vmax.f32 %v1567_v35, 0.0  ;;  %v3195_v29 = vld [vmem:[#allocation19_spill] sm:$0xff] }
 0x17e   : > { %1800 = vst.msk [vmem:[%s2980_s28 + $0x54] sm:$0xf] %vm1778_vm0, %v2056_v13  ;;  %v1644_v11 = vmax.f32 %v1354_v50, %v1612_v32  ;;  %v1355_v54 = vmax.f32 %v3191_v19, %v1323_v63 }
 0x17f   : > { %v1642_v59 = vmax.f32 %v1352_v10, %v1610_v56  ;;  %v1321_v51 = vmax.f32 %v1269_v21, 0.0  ;;  %v2305_v30 = vpop.f32.mrb[60].mxu0  ;;  %v1611_v24 = vmax.f32 %v1559_v53, 0.0 }
 0x180   : > { %v2061_v28 = vpack.c.bf16 %v1644_v11, %v1644_v11  ;;  %v1645_v16 = vmax.f32 %v1355_v54, %v1613_v3  ;;  %v1290_v8 = vadd.f32 %v2305_v30, %v3192_v40  ;;  %v2353_v14 = vpop.f32.mrb[60].mxu1  ;;  %v1281_v62 = vpop.f32.mrb[61].mxu0 }
 0x181   : > { %v2059_v42 = vpack.c.bf16 %v1642_v59, %v1642_v59  ;;  %v1353_v48 = vmax.f32 %v3193_v15, %v1321_v51  ;;  %v1580_v41 = vadd.f32 %v2353_v14, %v3192_v40  ;;  %v1282_v38 = vadd.f32 %v1281_v62, %v3194_v6  ;;  %v1571_v61 = vpop.f32.mrb[61].mxu1  ;;  %v2306_v26 = vpop.f32.mrb[62].mxu0 }
 0x182   : > { %1805 = vst.msk [vmem:[%s2980_s28 + $0x68] sm:$0xf] %vm1778_vm0, %v2061_v28  ;;  %v2062_v12 = vpack.c.bf16 %v1645_v16, %v1645_v16  ;;  %v1326_v52 = vmax.f32 %v1290_v8, 0.0  ;;  %v1572_v58 = vadd.f32 %v1571_v61, %v3194_v6  ;;  %v1293_v43 = vadd.f32 %v2306_v26, %v2945_v57  ;;  %v2354_v33 = vpop.f32.mrb[62].mxu1  ;;  %v1284_v0 = vpop.f32.mrb[63].mxu0 }
 0x183   : > { %1803 = vst.msk [vmem:[%s2980_s28 + $0x60] sm:$0xf] %vm1778_vm0, %v2059_v42  ;;  %v1643_v37 = vmax.f32 %v1353_v48, %v1611_v24  ;;  %v1324_v36 = vmax.f32 %v1282_v38, 0.0  ;;  %v1583_v22 = vadd.f32 %v2354_v33, %v2945_v57  ;;  %v1574_v39 = vpop.f32.mrb[63].mxu1  ;;  %v1616_v2 = vmax.f32 %v1580_v41, 0.0 }
 0x184   : > { %1806 = vst.msk [vmem:[%s2980_s28 + $0x6c] sm:$0xf] %vm1778_vm0, %v2062_v12  ;;  %v1358_v46 = vmax.f32 %v2957_v34, %v1326_v52  ;;  %v1327_v4 = vmax.f32 %v1293_v43, 0.0  ;;  %v1285_v55 = vadd.f32 %v1284_v0, %v2925_v9  ;;  %v1614_v44 = vmax.f32 %v1572_v58, 0.0 }
 0x185   : > { %v2060_v1 = vpack.c.bf16 %v1643_v37, %v1643_v37  ;;  %v1356_v31 = vmax.f32 %v2959_v5, %v1324_v36  ;;  %v1575_v18 = vadd.f32 %v1574_v39, %v2925_v9  ;;  %v1617_v49 = vmax.f32 %v1583_v22, 0.0 }
 0x186   : > { %v1648_v60 = vmax.f32 %v1358_v46, %v1616_v2  ;;  %v1359_v57 = vmax.f32 %v2961_v45, %v1327_v4  ;;  %v1325_v47 = vmax.f32 %v1285_v55, 0.0 }
 0x187   : > { %1804 = vst.msk [vmem:[%s2980_s28 + $0x64] sm:$0xf] %vm1778_vm0, %v2060_v1  ;;  %v1646_v34 = vmax.f32 %v1356_v31, %v1614_v44  ;;  %v1615_v35 = vmax.f32 %v1575_v18, 0.0 }
 0x188   : > { %v2065_v7 = vpack.c.bf16 %v1648_v60, %v1648_v60  ;;  %v1649_v23 = vmax.f32 %v1359_v57, %v1617_v49  ;;  %v1357_v27 = vmax.f32 %v3195_v29, %v1325_v47 }
 0x189   : > { %v2063_v5 = vpack.c.bf16 %v1646_v34, %v1646_v34 }
 0x18a   : > { %1809 = vst.msk [vmem:[%s2980_s28 + $0x78] sm:$0xf] %vm1778_vm0, %v2065_v7  ;;  %v2066_v17 = vpack.c.bf16 %v1649_v23, %v1649_v23  ;;  %v1647_v9 = vmax.f32 %v1357_v27, %v1615_v35 }
 0x18b   : > { %1807 = vst.msk [vmem:[%s2980_s28 + $0x70] sm:$0xf] %vm1778_vm0, %v2063_v5 }
 0x18c   : > { %1810 = vst.msk [vmem:[%s2980_s28 + $0x7c] sm:$0xf] %vm1778_vm0, %v2066_v17  ;;  %v2064_v45 = vpack.c.bf16 %v1647_v9, %v1647_v9 }
 0x18e   : > { %1808 = vst.msk [vmem:[%s2980_s28 + $0x74] sm:$0xf] %vm1778_vm0, %v2064_v45 }
 0x18f PF: > { %s13_s14 = sadd.s32 1, %s2452_s14   ;;  %s3196_s12 = smov %s2448_s13 }
 0x190   : > { %p10_p5 = scmp.ge.s32.totalorder %s13_s14, 4   ;;  %s3197_s13 = smov %s3199_s15 }
 0x192   :  { %12 = sbr.rel (!%p10_p5) target bundleno = 2 (0x2), region = 65 }

// kernel: dcp_forward.97
= control target key start
LH: loop header
LB: loop body
LE: loop exit
PB: predicated region body
PF: predicated region fallthrough
CT: control target
= control target key end

     0   :  { %v184_v1 = vmov 0   ;;  %vm81_vm0 = vcmask 523264   ;;  %v31_v15 = vlaneseq  ;;  %s274_s1 = inlined_call_operand.vmem [shape: bf16[64,192], index: 1, kind: input, shape index: {}]   ;;  %s275_s0 = inlined_call_operand.vmem [shape: f32[32,64], index: 0, kind: input, shape index: {}]   ;;  %s276_s2 = inlined_call_operand.vmem [shape: f32[1,192], index: 2, kind: input, shape index: {}]   ;;  %s277_s3 = inlined_call_operand.vmem [shape: f32[32,192], index: 3, kind: output, shape index: {}]  }
   0x1   :  { %v172_v0 = vld [vmem:[%s274_s1 + $0x4] ss:$8 sps:$4 sm:$0xff]   ;;  %120 = vmatprep.mubr.bf16.mxu0 %v184_v1  ;;  %130 = vmatprep.mubr.bf16.mxu1 %v184_v1  ;;  %v174_v2 = vld [vmem:[%s274_s1] ss:$8 sps:$4 sm:$0xff]   ;;  %v175_v3 = vld [vmem:[%s274_s1 + $0x14] ss:$8 sps:$4 sm:$0xff]  }
   0x2   :  { %88 = vmatprep.subr.bf16.mxu0 %v172_v0  ;;  %163 = vmatprep.subr.bf16.mxu1 %v172_v0  ;;  %v177_v4 = vld [vmem:[%s274_s1 + $0x10] ss:$8 sps:$4 sm:$0xff]   ;;  %v178_v5 = vld [vmem:[%s274_s1 + $0x24] ss:$8 sps:$4 sm:$0xff]   ;;  %v180_v6 = vld [vmem:[%s274_s1 + $0x20] ss:$8 sps:$4 sm:$0xff]  }
   0x3   :  { %89 = vmatpush1.bf16.msra.mxu0 %v174_v2  ;;  %167 = vmatpush1.bf16.msra.mxu1 %v174_v2  ;;  %v181_v7 = vld [vmem:[%s274_s1 + $0x34] ss:$8 sps:$4 sm:$0xff]   ;;  %v183_v8 = vld [vmem:[%s274_s1 + $0x30] ss:$8 sps:$4 sm:$0xff]   ;;  %v15_v9 = vld [vmem:[%s275_s0] sm:$0xff]  ;;  %v32_v16 = vshrl.u32 %v31_v15, 7 }
   0x4   :  { %90 = vmatprep.subr.bf16.mxu0 %v175_v3  ;;  %164 = vmatprep.subr.bf16.mxu1 %v175_v3  ;;  %v16_v10 = vld [vmem:[%s275_s0 + $0x8] sm:$0xff]  ;;  %v17_v11 = vld [vmem:[%s275_s0 + $0x10] sm:$0xff]  ;;  %v18_v12 = vld [vmem:[%s275_s0 + $0x18] sm:$0xff] }
   0x5   :  { %v19_v13 = vpack.c.bf16 %v16_v10, %v15_v9  ;;  %v20_v14 = vpack.c.bf16 %v18_v12, %v17_v11  ;;  %v33_v17 = vsub.s32 0, %v32_v16  ;;  %v29_v18 = vld [vmem:[%s276_s2] sm:$0x3]  ;;  %v37_v19 = vsub.s32 1, %v32_v16 }
   0x7   :  { %91 = vmatpush1.bf16.msra.mxu0 %v177_v4  ;;  %168 = vmatpush1.bf16.msra.mxu1 %v177_v4  ;;  %v34_v20 = vrot.slane %v29_v18, %v33_v17  ;;  %v38_v21 = vrot.slane %v29_v18, %v37_v19 }
   0x8   :  { %92 = vmatprep.subr.bf16.mxu0 %v178_v5  ;;  %165 = vmatprep.subr.bf16.mxu1 %v178_v5 }
   0xb   :  { %93 = vmatpush1.bf16.msra.mxu0 %v180_v6  ;;  %169 = vmatpush1.bf16.msra.mxu1 %v180_v6 }
   0xc   :  { %94 = vmatprep.subr.bf16.mxu0 %v181_v7  ;;  %166 = vmatprep.subr.bf16.mxu1 %v181_v7 }
   0xf   :  { %95 = vmatpush1.bf16.msra.mxu0 %v183_v8  ;;  %170 = vmatpush1.bf16.msra.mxu1 %v183_v8 }
  0x12   :  { %161 = vmatmul.mubr.msk.bf16.vlgmr.msra.gmra.mrb[0].mxu0 %vm81_vm0, %v19_v13  ;;  %162 = vmatmul.mubr.msk.bf16.vlgmr.msra.gmra.mrb[0].mxu1 %vm81_vm0, %v20_v14 }
  0xe5   :  { %v122_v22 = vpop.f32.mrb[0].mxu0  ;;  %v132_v23 = vpop.f32.mrb[0].mxu1 }
  0xe6   :  { %v123_v24 = vadd.f32 %v122_v22, %v34_v20  ;;  %v133_v25 = vadd.f32 %v132_v23, %v34_v20  ;;  %v124_v26 = vpop.f32.mrb[1].mxu0  ;;  %v134_v27 = vpop.f32.mrb[1].mxu1 }
  0xe7   :  { %v125_v28 = vadd.f32 %v124_v26, %v38_v21  ;;  %v135_v29 = vadd.f32 %v134_v27, %v38_v21  ;;  %v126_v30 = vpop.f32.mrb[2].mxu0  ;;  %v136_v31 = vpop.f32.mrb[2].mxu1 }
  0xe8   :  { %141 = vst [vmem:[%s277_s3] sm:$0xff] %v123_v24  ;;  %145 = vst [vmem:[%s277_s3 + $0x20] sm:$0xff] %v133_v25  ;;  %v127_v32 = vadd.f32 %v126_v30, %v34_v20  ;;  %v137_v33 = vadd.f32 %v136_v31, %v34_v20  ;;  %v128_v34 = vpop.f32.mrb[3].mxu0  ;;  %v138_v35 = vpop.f32.mrb[3].mxu1 }
  0xe9   :  { %142 = vst.msk [vmem:[%s277_s3 + $0x8] sm:$0xff] %vm81_vm0, %v125_v28  ;;  %146 = vst.msk [vmem:[%s277_s3 + $0x28] sm:$0xff] %vm81_vm0, %v135_v29  ;;  %v129_v36 = vadd.f32 %v128_v34, %v38_v21  ;;  %v139_v37 = vadd.f32 %v138_v35, %v38_v21 }
  0xea   :  { %143 = vst [vmem:[%s277_s3 + $0x10] sm:$0xff] %v127_v32  ;;  %147 = vst [vmem:[%s277_s3 + $0x30] sm:$0xff] %v137_v33 }
  0xeb   :  { %144 = vst.msk [vmem:[%s277_s3 + $0x18] sm:$0xff] %vm81_vm0, %v129_v36  ;;  %148 = vst.msk [vmem:[%s277_s3 + $0x38] sm:$0xff] %vm81_vm0, %v139_v37 }

// kernel: dcp_forward.99
= control target key start
LH: loop header
LB: loop body
LE: loop exit
PB: predicated region body
PF: predicated region fallthrough
CT: control target
= control target key end

     0   :  { %vm63_vm0 = vcmask 523264   ;;  %s246_s2 = inlined_call_operand.vmem [shape: bf16[64,64], index: 2, kind: input, shape index: {}]   ;;  %s247_s0 = inlined_call_operand.vmem [shape: f32[32,64], index: 0, kind: input, shape index: {}]   ;;  %s248_s3 = inlined_call_operand.vmem [shape: f32[1,64], index: 3, kind: input, shape index: {}]   ;;  %s249_s1 = inlined_call_operand.vmem [shape: f32[32,64], index: 1, kind: input, shape index: {}]   ;;  %s250_s4 = inlined_call_operand.vmem [shape: f32[32,64], index: 4, kind: output, shape index: {}]  }
   0x1   :  { %v160_v0 = vld [vmem:[%s246_s2] sm:$0xff]   ;;  %v161_v1 = vld [vmem:[%s246_s2 + $0x8] sm:$0xff]   ;;  %v162_v2 = vld [vmem:[%s246_s2 + $0x10] sm:$0xff]  }
   0x2   :  { %148 = vmatprep.subr.bf16.mxu0 %v160_v0  ;;  %v18_v3 = vld [vmem:[%s247_s0] sm:$0xff]  ;;  %v19_v4 = vld [vmem:[%s247_s0 + $0x8] sm:$0xff]  ;;  %v163_v6 = vld [vmem:[%s246_s2 + $0x18] sm:$0xff]  }
   0x3   :  { %149 = vmatpush3.bf16.msra.mxu0 %v160_v0  ;;  %v22_v5 = vpack.c.bf16 %v19_v4, %v18_v3  ;;  %v20_v7 = vld [vmem:[%s247_s0 + $0x10] sm:$0xff]  ;;  %v21_v8 = vld [vmem:[%s247_s0 + $0x18] sm:$0xff]  ;;  %v135_v10 = vld [vmem:[%s248_s3] ss:$0 sm:$0xff] }
   0x4   :  { %150 = vmatprep.subr.bf16.mxu0 %v161_v1  ;;  %v23_v9 = vpack.c.bf16 %v21_v8, %v20_v7  ;;  %v121_v12 = vld [vmem:[%s249_s1 + $0x10] sm:$0xff]  ;;  %v119_v15 = vld [vmem:[%s249_s1] sm:$0xff]  ;;  %v122_v18 = vld [vmem:[%s249_s1 + $0x18] sm:$0xff] }
   0x5   :  { %156 = vmatprep.mubr.msk.bf16.mxu0 %vm63_vm0, %v22_v5  ;;  %v120_v22 = vld [vmem:[%s249_s1 + $0x8] sm:$0xff] }
   0x7   :  { %151 = vmatpush3.bf16.msra.mxu0 %v161_v1 }
   0x8   :  { %152 = vmatprep.subr.bf16.mxu0 %v162_v2 }
   0xb   :  { %153 = vmatpush3.bf16.msra.mxu0 %v162_v2 }
   0xc   :  { %154 = vmatprep.subr.bf16.mxu0 %v163_v6 }
   0xf   :  { %155 = vmatpush3.bf16.msra.mxu0 %v163_v6 }
  0x12   :  { %157 = vmatmul.mubr.msk.bf16.vlgmr.msra.gmra.mrb[0].mxu0 %vm63_vm0, %v23_v9 }
  0xe5   :  { %v158_v11 = vpop.f32.mrb[0].mxu0 }
  0xe6   :  { %v113_v13 = vadd.f32 %v158_v11, %v135_v10  ;;  %v104_v14 = vpop.f32.mrb[1].mxu0 }
  0xe7   :  { %v105_v16 = vadd.f32 %v135_v10, %v104_v14  ;;  %v159_v17 = vpop.f32.mrb[2].mxu0 }
  0xe8   :  { %v125_v19 = vadd.f32 %v121_v12, %v113_v13  ;;  %v116_v20 = vadd.f32 %v159_v17, %v135_v10  ;;  %v107_v21 = vpop.f32.mrb[3].mxu0 }
  0xe9   :  { %v123_v23 = vadd.f32 %v119_v15, %v105_v16  ;;  %v108_v24 = vadd.f32 %v135_v10, %v107_v21 }
  0xea   :  { %129 = vst.msk [vmem:[%s250_s4 + $0x10] sm:$0xff] %vm63_vm0, %v125_v19  ;;  %v126_v25 = vadd.f32 %v122_v18, %v116_v20 }
  0xeb   :  { %127 = vst.msk [vmem:[%s250_s4] sm:$0xff] %vm63_vm0, %v123_v23  ;;  %v124_v26 = vadd.f32 %v120_v22, %v108_v24 }
  0xec   :  { %130 = vst.msk [vmem:[%s250_s4 + $0x18] sm:$0xff] %vm63_vm0, %v126_v25 }
  0xed   :  { %128 = vst.msk [vmem:[%s250_s4 + $0x8] sm:$0xff] %vm63_vm0, %v124_v26 }

// kernel: dcp_forward.98
= control target key start
LH: loop header
LB: loop body
LE: loop exit
PB: predicated region body
PF: predicated region fallthrough
CT: control target
= control target key end

     0   :  { %s504_s12 = smov 0   ;;  %s542_s0 = inlined_call_operand.vmem [shape: f32[8,16,16], index: 0, kind: input, shape index: {}]   ;;  %s543_s1 = inlined_call_operand.vmem [shape: f32[8,16,16], index: 1, kind: input, shape index: {}]   ;;  %s544_s2 = inlined_call_operand.vmem [shape: f32[8,16,16], index: 2, kind: input, shape index: {}]   ;;  %s545_s3 = inlined_call_operand.vmem [shape: f32[8,16,16], index: 3, kind: output, shape index: {}]  }
   0x1 LB: > { %s419_s13 = sadd.s32 4294967295, %s480_s12   ;;  %p423_p0 = scmp.ge.s32.totalorder %s480_s12, 1  ;;  %s480_s12 = sphi %s504_s12, %s13_s12  }
   0x2   : > { %p157_p1 = scmp.lt.s32.totalorder %s480_s12, 9 }
   0x4   : > { %p158_p2 = pnand %p423_p0, %p157_p1 }
   0x5   : > { %p191_p3 = scmp.lt.s32.totalorder (!%p158_p2), %s419_s13, 7  ;;  %v482_v0 = vmov (!%p158_p2), 0.0   ;;  %vm483_vm0 = vmmov (!%p158_p2), 0   ;;  %vm218_vm1 = vcmask (!%p158_p2), 130048  }
   0x6   : > { %161 = sbr.rel (%p158_p2) target bundleno = 776 (0x308), region = 32  ;;  %444 = vmatprep.subr.bf16.mxu0 (!%p158_p2), %v482_v0  ;;  %446 = vmatprep.mubr.msk.bf16.mxu0 (!%p158_p2), %vm483_vm0, %v482_v0 }
   0x7   : > { %450 = vmatprep.subr.bf16.mxu1 (!%p158_p2), %v482_v0  ;;  %452 = vmatprep.mubr.msk.bf16.mxu1 (!%p158_p2), %vm483_vm0, %v482_v0 }
   0xd   : > { %s547_s13 = smov (!%p191_p3, %s419_s13), 7 }
   0xe   : > { %s512_s14 = sshll.u32 %s547_s13, 4 }
   0xf   : > { %s200_s17 = scalar_lea.vmem %s543_s1, %s512_s14  ;;  %s195_s20 = scalar_lea.vmem %s542_s0, %s512_s14 }
  0x10   : > { %v215_v1 = vld [vmem:[%s200_s17] sm:$0xff]  ;;  %v216_v2 = vld [vmem:[%s200_s17 + $0x8] sm:$0xff]  ;;  %s205_s23 = scalar_lea.vmem %s544_s2, %s512_s14  ;;  %s210_s26 = scalar_lea.vmem %s545_s3, %s512_s14 }
  0x11   : > { %v217_v3 = vpack.c.bf16 %v216_v2, %v215_v1  ;;  %v212_v5 = vld [vmem:[%s195_s20] sm:$0xff]  ;;  %v213_v6 = vld [vmem:[%s195_s20 + $0x8] sm:$0xff] }
  0x12   : > { %v214_v7 = vpack.c.bf16 %v213_v6, %v212_v5  ;;  %v291_v26 = vld [vmem:[%s205_s23] sm:$0xff]  ;;  %v292_v27 = vld [vmem:[%s205_s23 + $0x8] sm:$0xff] }
  0x13   : > { %v223_v4 = vsel %vm218_vm1, %v217_v3, 0  ;;  %v293_v28 = vpack.c.bf16 %v292_v27, %v291_v26 }
  0x14   : > { %445 = vmatpush3.bf16.xpose.msra.mxu0 %v223_v4 }
  0x15   : > { %451 = vmatpush3.bf16.msra.mxu1 %v293_v28 }
  0x1b   : > { %447 = vmatmul.mubr.msk.bf16.vlgmr.msra.gmra.mrb[0].mxu0 %vm218_vm1, %v214_v7 }
  0xee   : > { %v259_v8 = vpop.f32.mrb[0].mxu0 }
  0xef   : > { %v266_v9 = vmul.f32 0.25, %v259_v8  ;;  %v448_v10 = vpop.f32.mrb[1].mxu0 }
  0xf0   : > { %v262_v11 = vpop.f32.mrb[2].mxu0 }
  0xf1   : > { %v267_v12 = vmul.f32 0.25, %v262_v11  ;;  %v449_v13 = vpop.f32.mrb[3].mxu0  ;;  %v268_v14 = vsel %vm218_vm1, %v266_v9, -inf }
  0xf2   : > { %269 = vmax.xlane.f32.xlu0 %v268_v14 }
  0xf3   : > { %v271_v15 = vsel %vm218_vm1, %v267_v12, -inf }
  0xf6   : > { %272 = vmax.xlane.f32.xlu0 %v271_v15 }
 0x17f   : > { %v270_v16 = vpop.xlane.xlu0 %269 }
 0x180   : > { %v274_v17 = vsub.f32 %v266_v9, %v270_v16 }
 0x182   : > { %v276_v18 = vmul.f32 1.442695, %v274_v17 }
 0x183   : > { %v273_v19 = vpop.xlane.xlu0 %272 }
 0x184   : > { %466 = vpow2.f32 %v276_v18  ;;  %v275_v20 = vsub.f32 %v267_v12, %v273_v19 }
 0x186   : > { %v278_v21 = vmul.f32 1.442695, %v275_v20 }
 0x188   : > { %468 = vpow2.f32 %v278_v21 }
 0x18e   : > { %v467_v22 = vpop.eup %466 }
 0x18f   : > { %v280_v23 = vsel %vm218_vm1, %v467_v22, 0.0 }
 0x190   : > { %281 = vadd.xlane.f32.xlu1 %v280_v23 }
 0x192   : > { %v469_v24 = vpop.eup %468 }
 0x193   : > { %v283_v25 = vsel %vm218_vm1, %v469_v24, 0.0 }
 0x194   : > { %284 = vadd.xlane.f32.xlu1 %v283_v25 }
 0x21d   : > { %v282_v29 = vpop.xlane.xlu1 %281 }
 0x21e   : > { %470 = vrcp.f32 %v282_v29 }
 0x221   : > { %v285_v30 = vpop.xlane.xlu1 %284 }
 0x222   : > { %472 = vrcp.f32 %v285_v30 }
 0x228   : > { %v471_v31 = vpop.eup %470 }
 0x229   : > { %v288_v33 = vmul.f32 %v471_v31, %v467_v22 }
 0x22c   : > { %v473_v32 = vpop.eup %472 }
 0x22d   : > { %v289_v34 = vmul.f32 %v473_v32, %v469_v24 }
 0x22f   : > { %v290_v35 = vpack.c.bf16 %v289_v34, %v288_v33 }
 0x231   : > { %453 = vmatmul.mubr.msk.bf16.vlgmr.msra.gmra.mrb[0].mxu1 %vm218_vm1, %v290_v35 }
 0x304   : > { %v331_v36 = vpop.f32.mrb[0].mxu1 }
 0x305   : > { %338 = vst.msk [vmem:[%s210_s26] sm:$0xff] %vm218_vm1, %v331_v36  ;;  %v454_v37 = vpop.f32.mrb[1].mxu1 }
 0x306   : > { %v334_v38 = vpop.f32.mrb[2].mxu1 }
 0x307   : > { %339 = vst.msk [vmem:[%s210_s26 + $0x8] sm:$0xff] %vm218_vm1, %v334_v38  ;;  %v455_v39 = vpop.f32.mrb[3].mxu1 }
 0x308 PF: > { %s13_s12 = sadd.s32 1, %s480_s12  }
 0x309   : > { %p10_p4 = scmp.ge.s32.totalorder %s13_s12, 10  }
 0x30b   :  { %12 = sbr.rel (!%p10_p4) target bundleno = 1 (0x1), region = 68 }

// kernel: dcp_forward.101
= control target key start
LH: loop header
LB: loop body
LE: loop exit
PB: predicated region body
PF: predicated region fallthrough
CT: control target
= control target key end

     0   :  { %vm60_vm0 = vcmask 523264   ;;  %s218_s1 = inlined_call_operand.vmem [shape: bf16[64,64], index: 1, kind: input, shape index: {}]   ;;  %s219_s0 = inlined_call_operand.vmem [shape: f32[32,64], index: 0, kind: input, shape index: {}]   ;;  %s220_s2 = inlined_call_operand.vmem [shape: f32[1,64], index: 2, kind: input, shape index: {}]   ;;  %s221_s3 = inlined_call_operand.vmem [shape: f32[32,64], index: 3, kind: output, shape index: {}]  }
   0x1   :  { %v149_v0 = vld [vmem:[%s218_s1] sm:$0xff]   ;;  %v150_v1 = vld [vmem:[%s218_s1 + $0x8] sm:$0xff]   ;;  %v151_v2 = vld [vmem:[%s218_s1 + $0x10] sm:$0xff]  }
   0x2   :  { %137 = vmatprep.subr.bf16.mxu0 %v149_v0  ;;  %v15_v3 = vld [vmem:[%s219_s0] sm:$0xff]  ;;  %v16_v4 = vld [vmem:[%s219_s0 + $0x8] sm:$0xff]  ;;  %v152_v6 = vld [vmem:[%s218_s1 + $0x18] sm:$0xff]  }
   0x3   :  { %138 = vmatpush3.bf16.msra.mxu0 %v149_v0  ;;  %v19_v5 = vpack.c.bf16 %v16_v4, %v15_v3  ;;  %v17_v7 = vld [vmem:[%s219_s0 + $0x10] sm:$0xff]  ;;  %v18_v8 = vld [vmem:[%s219_s0 + $0x18] sm:$0xff]  ;;  %v124_v10 = vld [vmem:[%s220_s2] ss:$0 sm:$0xff] }
   0x4   :  { %139 = vmatprep.subr.bf16.mxu0 %v150_v1  ;;  %v20_v9 = vpack.c.bf16 %v18_v8, %v17_v7 }
   0x5   :  { %145 = vmatprep.mubr.msk.bf16.mxu0 %vm60_vm0, %v19_v5 }
   0x7   :  { %140 = vmatpush3.bf16.msra.mxu0 %v150_v1 }
   0x8   :  { %141 = vmatprep.subr.bf16.mxu0 %v151_v2 }
   0xb   :  { %142 = vmatpush3.bf16.msra.mxu0 %v151_v2 }
   0xc   :  { %143 = vmatprep.subr.bf16.mxu0 %v152_v6 }
   0xf   :  { %144 = vmatpush3.bf16.msra.mxu0 %v152_v6 }
  0x12   :  { %146 = vmatmul.mubr.msk.bf16.vlgmr.msra.gmra.mrb[0].mxu0 %vm60_vm0, %v20_v9 }
  0xe5   :  { %v147_v11 = vpop.f32.mrb[0].mxu0 }
  0xe6   :  { %v110_v12 = vadd.f32 %v147_v11, %v124_v10  ;;  %v101_v13 = vpop.f32.mrb[1].mxu0 }
  0xe7   :  { %v102_v14 = vadd.f32 %v124_v10, %v101_v13  ;;  %v148_v15 = vpop.f32.mrb[2].mxu0 }
  0xe8   :  { %118 = vst.msk [vmem:[%s221_s3 + $0x10] sm:$0xff] %vm60_vm0, %v110_v12  ;;  %v113_v16 = vadd.f32 %v148_v15, %v124_v10  ;;  %v104_v17 = vpop.f32.mrb[3].mxu0 }
  0xe9   :  { %116 = vst.msk [vmem:[%s221_s3] sm:$0xff] %vm60_vm0, %v102_v14  ;;  %v105_v18 = vadd.f32 %v124_v10, %v104_v17 }
  0xea   :  { %119 = vst.msk [vmem:[%s221_s3 + $0x18] sm:$0xff] %vm60_vm0, %v113_v16 }
  0xeb   :  { %117 = vst.msk [vmem:[%s221_s3 + $0x8] sm:$0xff] %vm60_vm0, %v105_v18 }

// kernel: dcp_forward.93
= control target key start
LH: loop header
LB: loop body
LE: loop exit
PB: predicated region body
PF: predicated region fallthrough
CT: control target
= control target key end

     0   :  { %vm60_vm0 = vcmask 523264   ;;  %s216_s1 = inlined_call_operand.vmem [shape: bf16[64,128], index: 1, kind: input, shape index: {}]   ;;  %s217_s0 = inlined_call_operand.vmem [shape: f32[32,64], index: 0, kind: input, shape index: {}]   ;;  %s218_s2 = inlined_call_operand.vmem [shape: f32[1,128], index: 2, kind: input, shape index: {}]   ;;  %s219_s3 = inlined_call_operand.vmem [shape: f32[32,128], index: 3, kind: output, shape index: {}]  }
   0x1   :  { %v153_v0 = vld [vmem:[%s216_s1] sm:$0xff]   ;;  %v154_v1 = vld [vmem:[%s216_s1 + $0x8] sm:$0xff]   ;;  %v155_v2 = vld [vmem:[%s216_s1 + $0x10] sm:$0xff]  }
   0x2   :  { %141 = vmatprep.subr.bf16.mxu0 %v153_v0  ;;  %v15_v3 = vld [vmem:[%s217_s0] sm:$0xff]  ;;  %v16_v4 = vld [vmem:[%s217_s0 + $0x8] sm:$0xff]  ;;  %v156_v6 = vld [vmem:[%s216_s1 + $0x18] sm:$0xff]  }
   0x3   :  { %142 = vmatpush3.bf16.msra.mxu0 %v153_v0  ;;  %v19_v5 = vpack.c.bf16 %v16_v4, %v15_v3  ;;  %v17_v7 = vld [vmem:[%s217_s0 + $0x10] sm:$0xff]  ;;  %v18_v8 = vld [vmem:[%s217_s0 + $0x18] sm:$0xff]  ;;  %v128_v10 = vld [vmem:[%s218_s2] ss:$0 sm:$0xff] }
   0x4   :  { %143 = vmatprep.subr.bf16.mxu0 %v154_v1  ;;  %v20_v9 = vpack.c.bf16 %v18_v8, %v17_v7 }
   0x5   :  { %149 = vmatprep.mubr.msk.bf16.mxu0 %vm60_vm0, %v19_v5 }
   0x7   :  { %144 = vmatpush3.bf16.msra.mxu0 %v154_v1 }
   0x8   :  { %145 = vmatprep.subr.bf16.mxu0 %v155_v2 }
   0xb   :  { %146 = vmatpush3.bf16.msra.mxu0 %v155_v2 }
   0xc   :  { %147 = vmatprep.subr.bf16.mxu0 %v156_v6 }
   0xf   :  { %148 = vmatpush3.bf16.msra.mxu0 %v156_v6 }
  0x12   :  { %150 = vmatmul.mubr.msk.bf16.vlgmr.msra.gmra.mrb[0].mxu0 %vm60_vm0, %v20_v9 }
  0xe5   :  { %v151_v11 = vpop.f32.mrb[0].mxu0 }
  0xe6   :  { %v110_v12 = vadd.f32 %v151_v11, %v128_v10  ;;  %v101_v13 = vpop.f32.mrb[1].mxu0 }
  0xe7   :  { %v102_v14 = vadd.f32 %v128_v10, %v101_v13  ;;  %v152_v15 = vpop.f32.mrb[2].mxu0 }
  0xe8   :  { %v118_v16 = vmax.f32 %v110_v12, 0.0  ;;  %v113_v17 = vadd.f32 %v152_v15, %v128_v10  ;;  %v104_v18 = vpop.f32.mrb[3].mxu0 }
  0xe9   :  { %v116_v19 = vmax.f32 %v102_v14, 0.0  ;;  %v105_v20 = vadd.f32 %v128_v10, %v104_v18 }
  0xea   :  { %122 = vst [vmem:[%s219_s3 + $0x10] sm:$0xff] %v118_v16  ;;  %v119_v21 = vmax.f32 %v113_v17, 0.0 }
  0xeb   :  { %120 = vst [vmem:[%s219_s3] sm:$0xff] %v116_v19  ;;  %v117_v22 = vmax.f32 %v105_v20, 0.0 }
  0xec   :  { %123 = vst [vmem:[%s219_s3 + $0x18] sm:$0xff] %v119_v21 }
  0xed   :  { %121 = vst [vmem:[%s219_s3 + $0x8] sm:$0xff] %v117_v22 }

// kernel: dcp_forward.94
= control target key start
LH: loop header
LB: loop body
LE: loop exit
PB: predicated region body
PF: predicated region fallthrough
CT: control target
= control target key end

     0   :  { %vm152_vm0 = vcmask 523264   ;;  %s296_s2 = inlined_call_operand.vmem [shape: bf16[128,64], index: 2, kind: input, shape index: {}]   ;;  %s297_s0 = inlined_call_operand.vmem [shape: f32[32,128], index: 0, kind: input, shape index: {}]   ;;  %s298_s3 = inlined_call_operand.vmem [shape: f32[1,64], index: 3, kind: input, shape index: {}]   ;;  %s299_s1 = inlined_call_operand.vmem [shape: f32[32,64], index: 1, kind: input, shape index: {}]   ;;  %s300_s4 = inlined_call_operand.vmem [shape: f32[32,64], index: 4, kind: output, shape index: {}]  }
   0x1   :  { %v200_v0 = vld [vmem:[%s296_s2] sm:$0xff]   ;;  %v201_v1 = vld [vmem:[%s296_s2 + $0x8] sm:$0xff]   ;;  %v202_v2 = vld [vmem:[%s296_s2 + $0x10] sm:$0xff]  }
   0x2   :  { %180 = vmatprep.subr.bf16.mxu0 %v200_v0  ;;  %v203_v3 = vld [vmem:[%s296_s2 + $0x18] sm:$0xff]   ;;  %v18_v4 = vld [vmem:[%s297_s0] sm:$0xff]  ;;  %v19_v5 = vld [vmem:[%s297_s0 + $0x8] sm:$0xff] }
   0x3   :  { %181 = vmatpush3.bf16.msra.mxu0 %v200_v0  ;;  %v22_v6 = vpack.c.bf16 %v19_v5, %v18_v4  ;;  %v204_v7 = vld [vmem:[%s296_s2 + $0x20] sm:$0xff]   ;;  %v205_v8 = vld [vmem:[%s296_s2 + $0x28] sm:$0xff]   ;;  %v206_v9 = vld [vmem:[%s296_s2 + $0x30] sm:$0xff]  }
   0x4   :  { %182 = vmatprep.subr.bf16.mxu0 %v201_v1  ;;  %v207_v10 = vld [vmem:[%s296_s2 + $0x38] sm:$0xff]   ;;  %v20_v11 = vld [vmem:[%s297_s0 + $0x10] sm:$0xff]  ;;  %v161_v14 = vld [vmem:[%s298_s3] ss:$0 sm:$0xff] }
   0x5   :  { %196 = vmatprep.mubr.bf16.mxu0 %v22_v6  ;;  %v21_v12 = vld [vmem:[%s297_s0 + $0x18] sm:$0xff]  ;;  %v146_v16 = vld [vmem:[%s299_s1 + $0x10] sm:$0xff]  ;;  %v144_v19 = vld [vmem:[%s299_s1] sm:$0xff] }
   0x6   :  { %v23_v13 = vpack.c.bf16 %v21_v12, %v20_v11  ;;  %v147_v22 = vld [vmem:[%s299_s1 + $0x18] sm:$0xff]  ;;  %v145_v26 = vld [vmem:[%s299_s1 + $0x8] sm:$0xff] }
   0x7   :  { %183 = vmatpush3.bf16.msra.mxu0 %v201_v1 }
   0x8   :  { %184 = vmatprep.subr.bf16.mxu0 %v202_v2 }
   0xb   :  { %185 = vmatpush3.bf16.msra.mxu0 %v202_v2 }
   0xc   :  { %186 = vmatprep.subr.bf16.mxu0 %v203_v3 }
   0xf   :  { %187 = vmatpush3.bf16.msra.mxu0 %v203_v3 }
  0x10   :  { %188 = vmatprep.subr.bf16.mxu0 %v204_v7 }
  0x13   :  { %189 = vmatpush3.bf16.msra.mxu0 %v204_v7 }
  0x14   :  { %190 = vmatprep.subr.bf16.mxu0 %v205_v8 }
  0x17   :  { %191 = vmatpush3.bf16.msra.mxu0 %v205_v8 }
  0x18   :  { %192 = vmatprep.subr.bf16.mxu0 %v206_v9 }
  0x1b   :  { %193 = vmatpush3.bf16.msra.mxu0 %v206_v9 }
  0x1c   :  { %194 = vmatprep.subr.bf16.mxu0 %v207_v10 }
  0x1f   :  { %195 = vmatpush3.bf16.msra.mxu0 %v207_v10 }
  0x22   :  { %197 = vmatmul.mubr.bf16.vlgmr.msra.gmra.mrb[0].mxu0 %v23_v13 }
  0xf5   :  { %v198_v15 = vpop.f32.mrb[0].mxu0 }
  0xf6   :  { %v138_v17 = vadd.f32 %v198_v15, %v161_v14  ;;  %v129_v18 = vpop.f32.mrb[1].mxu0 }
  0xf7   :  { %v130_v20 = vadd.f32 %v161_v14, %v129_v18  ;;  %v199_v21 = vpop.f32.mrb[2].mxu0 }
  0xf8   :  { %v150_v23 = vadd.f32 %v146_v16, %v138_v17  ;;  %v141_v24 = vadd.f32 %v199_v21, %v161_v14  ;;  %v132_v25 = vpop.f32.mrb[3].mxu0 }
  0xf9   :  { %v148_v27 = vadd.f32 %v144_v19, %v130_v20  ;;  %v133_v28 = vadd.f32 %v161_v14, %v132_v25 }
  0xfa   :  { %155 = vst.msk [vmem:[%s300_s4 + $0x10] sm:$0xff] %vm152_vm0, %v150_v23  ;;  %v151_v29 = vadd.f32 %v147_v22, %v141_v24 }
  0xfb   :  { %153 = vst.msk [vmem:[%s300_s4] sm:$0xff] %vm152_vm0, %v148_v27  ;;  %v149_v30 = vadd.f32 %v145_v26, %v133_v28 }
  0xfc   :  { %156 = vst.msk [vmem:[%s300_s4 + $0x18] sm:$0xff] %vm152_vm0, %v151_v29 }
  0xfd   :  { %154 = vst.msk [vmem:[%s300_s4 + $0x8] sm:$0xff] %vm152_vm0, %v149_v30 }

// kernel: dcp_forward.102
= control target key start
LH: loop header
LB: loop body
LE: loop exit
PB: predicated region body
PF: predicated region fallthrough
CT: control target
= control target key end

     0   :  { %vm60_vm0 = vcmask 523264   ;;  %s212_s1 = inlined_call_operand.vmem [shape: bf16[64,128], index: 1, kind: input, shape index: {}]   ;;  %s213_s0 = inlined_call_operand.vmem [shape: f32[32,64], index: 0, kind: input, shape index: {}]   ;;  %s214_s2 = inlined_call_operand.vmem [shape: f32[1,128], index: 2, kind: input, shape index: {}]   ;;  %s215_s3 = inlined_call_operand.vmem [shape: f32[32,128], index: 3, kind: output, shape index: {}]  }
   0x1   :  { %v149_v0 = vld [vmem:[%s212_s1] sm:$0xff]   ;;  %v150_v1 = vld [vmem:[%s212_s1 + $0x8] sm:$0xff]   ;;  %v151_v2 = vld [vmem:[%s212_s1 + $0x10] sm:$0xff]  }
   0x2   :  { %137 = vmatprep.subr.bf16.mxu0 %v149_v0  ;;  %v15_v3 = vld [vmem:[%s213_s0] sm:$0xff]  ;;  %v16_v4 = vld [vmem:[%s213_s0 + $0x8] sm:$0xff]  ;;  %v152_v6 = vld [vmem:[%s212_s1 + $0x18] sm:$0xff]  }
   0x3   :  { %138 = vmatpush3.bf16.msra.mxu0 %v149_v0  ;;  %v19_v5 = vpack.c.bf16 %v16_v4, %v15_v3  ;;  %v17_v7 = vld [vmem:[%s213_s0 + $0x10] sm:$0xff]  ;;  %v18_v8 = vld [vmem:[%s213_s0 + $0x18] sm:$0xff]  ;;  %v124_v10 = vld [vmem:[%s214_s2] ss:$0 sm:$0xff] }
   0x4   :  { %139 = vmatprep.subr.bf16.mxu0 %v150_v1  ;;  %v20_v9 = vpack.c.bf16 %v18_v8, %v17_v7 }
   0x5   :  { %145 = vmatprep.mubr.msk.bf16.mxu0 %vm60_vm0, %v19_v5 }
   0x7   :  { %140 = vmatpush3.bf16.msra.mxu0 %v150_v1 }
   0x8   :  { %141 = vmatprep.subr.bf16.mxu0 %v151_v2 }
   0xb   :  { %142 = vmatpush3.bf16.msra.mxu0 %v151_v2 }
   0xc   :  { %143 = vmatprep.subr.bf16.mxu0 %v152_v6 }
   0xf   :  { %144 = vmatpush3.bf16.msra.mxu0 %v152_v6 }
  0x12   :  { %146 = vmatmul.mubr.msk.bf16.vlgmr.msra.gmra.mrb[0].mxu0 %vm60_vm0, %v20_v9 }
  0xe5   :  { %v147_v11 = vpop.f32.mrb[0].mxu0 }
  0xe6   :  { %v110_v12 = vadd.f32 %v147_v11, %v124_v10  ;;  %v101_v13 = vpop.f32.mrb[1].mxu0 }
  0xe7   :  { %v102_v14 = vadd.f32 %v124_v10, %v101_v13  ;;  %v148_v15 = vpop.f32.mrb[2].mxu0 }
  0xe8   :  { %118 = vst [vmem:[%s215_s3 + $0x10] sm:$0xff] %v110_v12  ;;  %v113_v16 = vadd.f32 %v148_v15, %v124_v10  ;;  %v104_v17 = vpop.f32.mrb[3].mxu0 }
  0xe9   :  { %116 = vst [vmem:[%s215_s3] sm:$0xff] %v102_v14  ;;  %v105_v18 = vadd.f32 %v124_v10, %v104_v17 }
  0xea   :  { %119 = vst [vmem:[%s215_s3 + $0x18] sm:$0xff] %v113_v16 }
  0xeb   :  { %117 = vst [vmem:[%s215_s3 + $0x8] sm:$0xff] %v105_v18 }

// kernel: custom-call.61
= control target key start
LH: loop header
LB: loop body
LE: loop exit
PB: predicated region body
PF: predicated region fallthrough
CT: control target
= control target key end

     0   :  { %s645_s9 = smov 0   ;;  %s647_s10 = smov 0   ;;  %s795_s0 = inlined_call_operand.vmem [shape: f32[2,6,3], index: 0, kind: input, shape index: {}]   ;;  %s796_s1 = inlined_call_operand.vmem [shape: f32[2,6,3], index: 1, kind: output, shape index: {0}]   ;;  %s797_s2 = inlined_call_operand.vmem [shape: f32[2,3], index: 2, kind: output, shape index: {1}]  }
   0x1   :  { %s649_s11 = smov 0   ;;  %s651_s12 = smov 0  }
   0x2   :  { %s653_s13 = smov 0  }
   0x3 LB: > { %s28_s14 = sadd.s32 1, %s618_s12  ;;  %s500_s15 = sadd.s32 4294967295, %s622_s13   ;;  %s622_s13 = sphi %s653_s13, %s9_s13   ;;  %s618_s12 = sphi %s651_s12, %s804_s12   ;;  %s614_s11 = sphi %s649_s11, %s803_s11   ;;  %s610_s10 = sphi %s647_s10, %s802_s10   ;;  %s606_s9 = sphi %s645_s9, %s801_s9  }
   0x4   : > { %p30_p0 = scmp.ge.s32.totalorder %s28_s14, 2  ;;  %s33_s16 = ssub.s32 0, %s618_s12 }
   0x5   : > { %s502_s17 = smin.u32 %s618_s12, %s33_s16  ;;  %p57_p1 = scmp.ne.s32.totalorder %s610_s10, %s606_s9 }
   0x6   : > { %s806_s14 = smov (%p30_p0, %s28_s14), 0  ;;  %s35_s18 = sshrl.u32 %s502_s17, 3 }
   0x7   : > { %s39_s19 = ssub.s32 0, %s806_s14  ;;  %p58_p2 = scmp.eq.s32.totalorder %s500_s15, 1 }
   0x8   : > { %s503_s20 = smin.u32 %s39_s19, %s806_s14  ;;  %s47_s24 = sadd.s32 1, %s610_s10 }
   0x9   : > { %s41_s21 = sshrl.u32 %s503_s20, 3  ;;  %p680_p3 = por %p58_p2, %p57_p1 }
   0xa   : > { %s44_s23 = ssub.s32 %s35_s18, %s41_s21  ;;  %p505_p5 = scmp.ge.s32.totalorder %s622_s13, 2 }
   0xb   : > { %p45_p4 = scmp.eq.s32.totalorder %s44_s23, 0  ;;  %s82_s26 = sand.u32 (!%p505_p5), 1, %s622_s13  }
   0xc   : > { %80 = sbr.rel (%p505_p5) target bundleno = 19 (0x13), region = 16  ;;  %s507_s27 = sshll.u32 (!%p505_p5), %s618_s12, 3 }
   0xd   : > { %s686_s25 = scalar_select %p45_p4, %s610_s10, %s47_s24  }
   0xe   : > { %s506_s28 = sshll.u32 (!%p505_p5), %s82_s26, 3  ;;  %s88_s3 = scalar_lea.vmem (!%p505_p5), %s795_s0, %s507_s27 }
   0xf   : > { %v116_v0 = vld [vmem:[%s88_s3] sm:$0xff] (!%p505_p5)  ;;  %s84_s4 = scalar_lea.vmem (!%p505_p5), [#allocation0], %s506_s28 }
  0x10   : > { %117 = vst [vmem:[%s84_s4] sm:$0xff] (!%p505_p5), %v116_v0 }
  0x13 PF: > { %p508_p6 = scmp.ge.s32.totalorder %s622_s13, 1  ;;  %p122_p7 = scmp.lt.s32.totalorder %s622_s13, 3 }
  0x15   : > { %p123_p8 = pnand %p508_p6, %p122_p7 }
  0x17   : > { %126 = sbr.rel (%p123_p8) target bundleno = 330 (0x14a), region = 54 }
  0x1e   : > { %s129_s5 = sand.u32 1, %s500_s15   ;;  %s143_s6 = sand.u32 1, %s606_s9   ;;  %v628_v2 = vmov 0.0  }
  0x1f   : > { %s509_s7 = sshll.u32 %s129_s5, 3  ;;  %s697_s8 = sshll.u32 %s143_s6, 1 }
  0x20   : > { %s152_s16 = sand.u32 7, %s614_s11   ;;  %s131_s17 = scalar_lea.vmem [#allocation0], %s509_s7 }
  0x21   : > { %v154_v1 = vld [vmem:[%s131_s17] sm:$0xff]  ;;  %s700_s18 = scalar_lea.vmem [#allocation1], %s509_s7  ;;  %s703_s19 = scalar_lea.vmem [#allocation2], %s152_s16 }
  0x22   : > { %155 = vst [vmem:[%s700_s18] sm:$0xff] %v154_v1  ;;  %156 = vst [vmem:[%s703_s19] sm:$0x1] %v628_v2  ;;  %s145_s15 = scalar_lea.vmem [#allocation3], %s697_s8  ;;  %s707_s20 = smov 0  }
  0x23 LB: >> { %v164_v3 = vlaneseq  ;;  %v716_v5 = vstv %s626_s20  ;;  %s191_s9 = scalar_lea.vmem %s700_s18, %s626_s20 [#allocation1]  ;;  %s249_s21 = scalar_lea.vmem [#allocation4], %s626_s20  ;;  %v629_v59 = vmov 1.0   ;;  %s626_s20 = sphi %s707_s20, %s162_s20  }
  0x24   : >> { %s266_s23 = smov [#allocation4] }
  0x25   : >> { %v713_v4 = vshrl.u32 %v164_v3, 7  ;;  %v243_v48 = vand.u32 127, %v164_v3 }
  0x27   : >> { %vm168_vm0 = vcmp.gt.s32.totalorder %v713_v4, %v716_v5  ;;  %vm169_vm1 = vcmp.lt.s32.totalorder %v713_v4, 6  ;;  %v230_v4 = vmov %v713_v4  ;;  %vm734_vm12 = vcmp.eq.s32.totalorder %v243_v48, %v716_v5 }
  0x28   : >> { %vm170_vm2 = vmand %vm168_vm0, %vm169_vm1  ;;  %vm234_vm9 = vcmp.gt.s32.totalorder %v230_v4, %v716_v5  ;;  %vm235_vm10 = vcmp.lt.s32.totalorder %v230_v4, 6  ;;  %v269_v4 = vmov %v713_v4  ;;  %vm295_vm15 = vcmp.gt.s32.totalorder %v243_v48, %v716_v5 }
  0x29   : >> { %v163_v6 = vld [vmem:[%s700_s18] sm:$0xff]  ;;  %v192_v15 = vld [vmem:[%s191_s9] ss:$0 sm:$0xff]  ;;  %s227_s18 = smov %s700_s18  ;;  %vm236_vm11 = vmand %vm234_vm9, %vm235_vm10  ;;  %vm274_vm13 = vcmp.lt.s32.totalorder %v269_v4, 6  ;;  %v286_v4 = vmov %v713_v4 }
  0x2a   : >> { %v171_v7 = vsel %vm170_vm2, %v163_v6, 0.0  ;;  %v193_v16 = vand.u32 2147483647, %v192_v15  ;;  %vm218_vm8 = vcmp.lt.f32.partialorder %v192_v15, 0.0  ;;  %v231_v45 = vld [vmem:[%s227_s18] sm:$0xff]  ;;  %s265_s18 = smov %s700_s18  ;;  %vm303_vm14 = vcmp.ge.s32.totalorder %v286_v4, %v716_v5 }
  0x2b   : >> { %v172_v8 = vmul.f32 %v171_v7, %v171_v7  ;;  %v237_v49 = vsel %vm236_vm11, %v231_v45, 0.0  ;;  %v262_v60 = vld [vmem:[%s703_s19] ss:$0 sm:$0xff]  ;;  %vm304_vm0 = vmand %vm734_vm12, %vm303_vm14 }
  0x2c   : >> { %v194_v21 = vmax.f32 %v193_v16, 0.0  ;;  %v272_v63 = vld [vmem:[%s265_s18] sm:$0xff]  ;;  %s282_s18 = smov %s265_s18 }
  0x2d   : >> { %v173_v9 = vrot.slane %v172_v8, 4  ;;  %s307_s24 = scalar_lea.vmem %s282_s18, %s626_s20  ;;  %s162_s20 = sadd.s32 1, %s626_s20  }
  0x2e   : >> { %p159_p9 = scmp.ge.s32.totalorder %s162_s20, 3  }
  0x2f   : >> { %v174_v10 = vadd.f32 %v173_v9, %v172_v8  ;;  %s515_s26 = sshll.u32 (%p159_p9), %s614_s11, 3 }
  0x30   : > { %s332_s29 = scalar_lea.vmem (%p159_p9), %s796_s1, %s515_s26 }
  0x31   : >> { %v175_v11 = vrot.slane %v174_v10, 2 }
  0x33   : >> { %v176_v12 = vadd.f32 %v175_v11, %v174_v10 }
  0x35   : >> { %v177_v13 = vrot.slane %v176_v12, 1 }
  0x37   : >> { %v178_v14 = vadd.f32 %v177_v13, %v176_v12  ;;  %v293_v13 = vld [vmem:[%s282_s18] sm:$0xff] }
  0x39   : >> { %570 = vrsqrt.f32 %v178_v14  ;;  %vm181_vm3 = vcmp.eq.f32.partialorder %v178_v14, inf  ;;  %v184_v18 = vand.u32 2147483648, %v178_v14  ;;  %vm183_vm4 = vcmp.eq.f32.partialorder %v178_v14, 0.0 }
  0x43   : >> { %v571_v17 = vpop.eup %570 }
  0x44   : >> { %v180_v19 = vmul.f32 %v571_v17, %v178_v14 }
  0x46   : >> { %v182_v20 = vsel %vm181_vm3, %v178_v14, %v180_v19 }
  0x47   : >> { %v185_v22 = vsel %vm183_vm4, %v184_v18, %v182_v20 }
  0x48   : >> { %v195_v23 = vand.u32 2147483647, %v185_v22 }
  0x4a   : >> { %v196_v24 = vmax.f32 %v194_v21, %v195_v23 }
  0x4c   : >> { %572 = vrcp.f32 %v196_v24  ;;  %vm208_vm7 = vcmp.eq.f32.partialorder %v196_v24, 0.0 }
  0x56   : >> { %v573_v25 = vpop.eup %572 }
  0x57   : >> { %v198_v26 = vmul.f32 %v573_v25, %v193_v16  ;;  %v201_v27 = vmul.f32 0.0, %v573_v25  ;;  %v205_v28 = vmul.f32 %v573_v25, %v195_v23 }
  0x59   : >> { %v199_v29 = vmul.f32 %v198_v26, %v198_v26  ;;  %v202_v30 = vmul.f32 %v201_v27, %v201_v27  ;;  %v206_v31 = vmul.f32 %v205_v28, %v205_v28 }
  0x5b   : >> { %v203_v32 = vadd.f32 %v202_v30, %v199_v29 }
  0x5d   : >> { %v207_v33 = vadd.f32 %v206_v31, %v203_v32 }
  0x5f   : >> { %574 = vrsqrt.f32 %v207_v33  ;;  %vm211_vm5 = vcmp.eq.f32.partialorder %v207_v33, inf  ;;  %v214_v35 = vand.u32 2147483648, %v207_v33  ;;  %vm213_vm6 = vcmp.eq.f32.partialorder %v207_v33, 0.0 }
  0x69   : >> { %v575_v34 = vpop.eup %574 }
  0x6a   : >> { %v210_v36 = vmul.f32 %v575_v34, %v207_v33 }
  0x6c   : >> { %v212_v37 = vsel %vm211_vm5, %v207_v33, %v210_v36 }
  0x6d   : >> { %v215_v38 = vsel %vm213_vm6, %v214_v35, %v212_v37 }
  0x6e   : >> { %v216_v39 = vmul.f32 %v215_v38, %v196_v24 }
  0x70   : >> { %v217_v40 = vsel %vm208_vm7, 0.0, %v216_v39 }
  0x71   : >> { %v219_v41 = vxor.u32 2147483648, %v217_v40 }
  0x73   : >> { %v220_v42 = vsel %vm218_vm8, %v217_v40, %v219_v41 }
  0x74   : >> { %v726_v43 = vsel %vm183_vm4, %v192_v15, %v220_v42  ;;  %576 = vrcp.f32 %v220_v42  ;;  %v221_v46 = vsub.f32 %v220_v42, %v192_v15 }
  0x75   : >> { %v226_v44 = vsub.f32 %v192_v15, %v726_v43 }
  0x77   : >> { %578 = vrcp.f32 %v226_v44 }
  0x7e   : >> { %v577_v47 = vpop.eup %576 }
  0x7f   : >> { %v223_v50 = vmul.f32 %v577_v47, %v221_v46 }
  0x81   : >> { %v579_v51 = vpop.eup %578  ;;  %v225_v55 = vsel %vm183_vm4, 0.0, %v223_v50 }
  0x82   : >> { %v239_v52 = vmul.f32 %v579_v51, %v237_v49  ;;  %v255_v57 = vsel %vm734_vm12, %v225_v55, 0.0 }
  0x84   : >> { %v240_v54 = vsel %vm183_vm4, 0.0, %v239_v52 }
  0x85   : >> { %v245_v56 = vsel %vm734_vm12, %v240_v54, 0.0 }
  0x86   : >> { %246 = vadd.xlane.f32.xlu0 %v245_v56 }
  0x8a   : >> { %256 = vadd.xlane.f32.xlu0 %v255_v57 }
 0x113   : >> { %v247_v58 = vpop.xlane.xlu0 %246 }
 0x114   : >> { %248 = vst [vmem:[#allocation4] sm:$0xff] %v247_v58 }
 0x115   : >> { %250 = vst [vmem:[%s249_s21] sm:$0x1] %v629_v59 }
 0x117   : >> { %v257_v61 = vpop.xlane.xlu0 %256 }
 0x118   : >> { %v263_v62 = vsel %vm734_vm12, %v257_v61, %v262_v60 }
 0x119   : >> { %264 = vst [vmem:[%s703_s19] sm:$0x1] %v263_v62 }
 0x11c   : >> { %v271_v0 = vld [vmem:[%s266_s23] sm:$0xff]  ;;  %s283_s23 = smov %s266_s23 }
 0x11d   : >> { %v273_v1 = vmul.f32 %v272_v63, %v271_v0  ;;  %v291_v12 = vld [vmem:[%s283_s23] sm:$0xff] }
 0x11f   : >> { %v275_v2 = vsel %vm274_vm13, %v273_v1, 0.0 }
 0x120   : >> { %v276_v3 = vrot.slane %v275_v2, 4  ;;  %v318_v4 = vld [vmem:[#allocation2] sm:$0x3] (%p159_p9) }
 0x121   : > { %320 = vst [vmem:[%s145_s15] sm:$0x3] (%p159_p9), %v318_v4 }
 0x122   : >> { %v277_v6 = vadd.f32 %v276_v3, %v275_v2 }
 0x124   : >> { %v278_v7 = vrot.slane %v277_v6, 2 }
 0x126   : >> { %v279_v8 = vadd.f32 %v278_v7, %v277_v6 }
 0x128   : >> { %v280_v9 = vrot.slane %v279_v8, 1 }
 0x12a   : >> { %v281_v10 = vadd.f32 %v280_v9, %v279_v8 }
 0x12c   : >> { %v287_v11 = vmul.f32 %v281_v10, %v257_v61 }
 0x12e   : >> { %v292_v14 = vmul.f32 %v291_v12, %v287_v11 }
 0x130   : >> { %v296_v15 = vsub.f32 %v293_v13, %v292_v14 }
 0x132   : >> { %v297_v16 = vsel %vm295_vm15, %v296_v15, %v293_v13 }
 0x133   : >> { %v305_v17 = vsel %vm304_vm0, %v291_v12, %v297_v16 }
 0x134   : >> { %306 = vst [vmem:[%s282_s18] sm:$0xff] %v305_v17 }
 0x137   : > { %161 = sbr.rel (!%p159_p9) target bundleno = 35 (0x23), region = 175 }
 0x13b   : >> { %v308_v18 = vld [vmem:[%s307_s24] ss:$0 sm:$0xff] }
 0x13c   : >> { %v313_v19 = vsel %vm734_vm12, %v726_v43, %v308_v18 }
 0x13d   : >> { %314 = vst [vmem:[%s307_s24] sm:$0x1] %v313_v19 }
 0x13e   : > { %p368_p10 = scmp.lt.s32.totalorder (%p680_p3), %s614_s11, 0  ;;  %s369_s30 = ssub.s32 (%p680_p3), 0, %s614_s11  ;;  %v391_v20 = vld [vmem:[%s145_s15] sm:$0x3] (%p680_p3) }
 0x13f   : > { %367 = sbr.rel (!%p680_p3) target bundleno = 330 (0x14a), region = 99  ;;  %s516_s3 = smin.u32 (%p680_p3), %s614_s11, %s369_s30 }
 0x140   : > { %s371_s4 = sshrl.u32 (%p680_p3), %s516_s3, 3 }
 0x141   : > { %s372_s5 = ssub.s32 (%p680_p3), 0, %s371_s4 }
 0x144   : > { %v360_v5 = vld [vmem:[%s700_s18] sm:$0xff] }
 0x145   : > { %361 = vst [vmem:[%s332_s29] sm:$0xff] %v360_v5 }
 0x146   : > { %s808_s5 = smov (!%p368_p10, %s372_s5), %s371_s4 }
 0x147   : > { %s517_s6 = sshll.u32 %s808_s5, 1 }
 0x148   : > { %s375_s17 = scalar_lea.vmem %s797_s2, %s517_s6 }
 0x149   : > { %392 = vst [vmem:[%s375_s17] sm:$0x3] %v391_v20 }
 0x14a PF: > { %s9_s13 = sadd.s32 1, %s622_s13   ;;  %s801_s9 = smov %s610_s10 }
 0x14b   : > { %p6_p11 = scmp.ge.s32.totalorder %s9_s13, 4   ;;  %s802_s10 = smov %s686_s25 }
 0x14c   : > { %s803_s11 = smov %s618_s12  ;;  %s804_s12 = smov %s806_s14 }
 0x14d   :  { %8 = sbr.rel (!%p6_p11) target bundleno = 3 (0x3), region = 186 }

// kernel: dcp_forward.109
= control target key start
LH: loop header
LB: loop body
LE: loop exit
PB: predicated region body
PF: predicated region fallthrough
CT: control target
= control target key end

     0   :  { %s577_s12 = smov 0   ;;  %s611_s0 = inlined_call_operand.vmem [shape: f32[2,64,16], index: 0, kind: input, shape index: {}]   ;;  %s612_s1 = inlined_call_operand.vmem [shape: f32[2,64,16], index: 1, kind: input, shape index: {}]   ;;  %s613_s2 = inlined_call_operand.vmem [shape: f32[2,3,16], index: 2, kind: input, shape index: {}]   ;;  %s614_s3 = inlined_call_operand.vmem [shape: f32[2,3,16], index: 3, kind: output, shape index: {}]  }
   0x1 LB: > { %s476_s13 = sadd.s32 4294967295, %s552_s12   ;;  %p480_p0 = scmp.ge.s32.totalorder %s552_s12, 1  ;;  %s552_s12 = sphi %s577_s12, %s13_s12  }
   0x2   : > { %p156_p1 = scmp.lt.s32.totalorder %s552_s12, 3 }
   0x4   : > { %p157_p2 = pnand %p480_p0, %p156_p1 }
   0x5   : > { %p188_p3 = scmp.lt.s32.totalorder (!%p157_p2), %s476_s13, 1  ;;  %v554_v0 = vmov (!%p157_p2), 0.0   ;;  %vm555_vm0 = vmmov (!%p157_p2), 0   ;;  %vm247_vm1 = vcmask (!%p157_p2), 523264   ;;  %vm294_vm2 = vcmask (!%p157_p2), 130048  }
   0x6   : > { %160 = sbr.rel (%p157_p2) target bundleno = 876 (0x36c), region = 32  ;;  %503 = vmatprep.subr.bf16.mxu0 (!%p157_p2), %v554_v0  ;;  %511 = vmatprep.mubr.msk.bf16.mxu0 (!%p157_p2), %vm555_vm0, %v554_v0  ;;  %v556_v44 = vmov (!%p157_p2), 0.0|0.0   ;;  %vm524_vm3 = vmpackc.low (!%p157_p2), %vm294_vm2, %vm294_vm2  ;;  %vm397_vm4 = vcmask (!%p157_p2), 124928  }
   0x7   : > { %519 = vmatprep.mubr.msk.f32.mxu1 (!%p157_p2), %vm555_vm0, %v554_v0  ;;  %522 = vmatprep.subr.bf16.mxu1 (!%p157_p2), %v556_v44 }
   0xd   : > { %s616_s13 = smov (!%p188_p3, %s476_s13), 1 }
   0xe   : > { %s493_s14 = sshll.u32 %s616_s13, 6  ;;  %s485_s21 = sshll.u32 %s616_s13, 2 }
   0xf   : > { %s192_s17 = scalar_lea.vmem %s611_s0, %s493_s14  ;;  %s197_s20 = scalar_lea.vmem %s612_s1, %s493_s14 }
  0x10   : > { %v207_v1 = vld [vmem:[%s192_s17] sm:$0xff]  ;;  %v208_v2 = vld [vmem:[%s192_s17 + $0x8] sm:$0xff]  ;;  %v209_v3 = vld [vmem:[%s192_s17 + $0x10] sm:$0xff]  ;;  %s201_s24 = scalar_lea.vmem %s613_s2, %s485_s21  ;;  %s205_s27 = scalar_lea.vmem %s614_s3, %s485_s21 }
  0x11   : > { %v215_v4 = vpack.c.bf16 %v208_v2, %v207_v1  ;;  %v210_v5 = vld [vmem:[%s192_s17 + $0x18] sm:$0xff]  ;;  %v219_v6 = vld [vmem:[%s197_s20] sm:$0xff]  ;;  %v220_v8 = vld [vmem:[%s197_s20 + $0x8] sm:$0xff] }
  0x12   : > { %v216_v7 = vpack.c.bf16 %v210_v5, %v209_v3  ;;  %v221_v9 = vld [vmem:[%s197_s20 + $0x10] sm:$0xff]  ;;  %v222_v10 = vld [vmem:[%s197_s20 + $0x18] sm:$0xff]  ;;  %v211_v11 = vld [vmem:[%s192_s17 + $0x20] sm:$0xff]  ;;  %v227_v13 = vpack.c.bf16 %v220_v8, %v219_v6 }
  0x13   : > { %231 = vxpose.xlu0.c.b16.start [1/4] (short) (narrow) %v215_v4, 16  ;;  %v212_v12 = vld [vmem:[%s192_s17 + $0x28] sm:$0xff]  ;;  %v228_v14 = vpack.c.bf16 %v222_v10, %v221_v9  ;;  %v223_v16 = vld [vmem:[%s197_s20 + $0x20] sm:$0xff]  ;;  %v213_v18 = vld [vmem:[%s192_s17 + $0x30] sm:$0xff] }
  0x14   : > { %504 = vmatpush3.bf16.msra.mxu0 %v227_v13  ;;  %v217_v15 = vpack.c.bf16 %v212_v12, %v211_v11  ;;  %v224_v17 = vld [vmem:[%s197_s20 + $0x28] sm:$0xff]  ;;  %v214_v19 = vld [vmem:[%s192_s17 + $0x38] sm:$0xff]  ;;  %v225_v22 = vld [vmem:[%s197_s20 + $0x30] sm:$0xff] }
  0x15   : > { %505 = vmatprep.subr.bf16.mxu0 %v554_v0  ;;  %v229_v20 = vpack.c.bf16 %v224_v17, %v223_v16  ;;  %v218_v21 = vpack.c.bf16 %v214_v19, %v213_v18  ;;  %v226_v23 = vld [vmem:[%s197_s20 + $0x38] sm:$0xff]  ;;  %v317_v52 = vld [vmem:[%s201_s24] sm:$0x7] }
  0x16   : > { %v230_v24 = vpack.c.bf16 %v226_v23, %v225_v22 }
  0x17   : > { %232 = vxpose.xlu0.c.b16.cont [2/4] (short) (narrow) %v216_v7, 16 }
  0x18   : > { %506 = vmatpush3.bf16.msra.mxu0 %v228_v14 }
  0x19   : > { %507 = vmatprep.subr.bf16.mxu0 %v554_v0 }
  0x1b   : > { %233 = vxpose.xlu0.c.b16.cont [3/4] (short) (narrow) %v217_v15, 16 }
  0x1c   : > { %508 = vmatpush3.bf16.msra.mxu0 %v229_v20 }
  0x1d   : > { %509 = vmatprep.subr.bf16.mxu0 %v554_v0 }
  0x1f   : > { %234 = vxpose.xlu0.c.b16.end [4/4] (short) (narrow) %v218_v21, 16 }
  0x20   : > { %510 = vmatpush3.bf16.msra.mxu0 %v230_v24 }
  0x79   : > { %v239_v25 = vpop.trf.xlu0 }
  0x7a   : > { %512 = vmatmul.mubr.msk.bf16.vlgmr.msra.gmra.mrb[0].mxu0 %vm247_vm1, %v239_v25 }
 0x14d   : > { %v285_v26 = vpop.f32.mrb[0].mxu0 }
 0x14e   : > { %v292_v27 = vmul.f32 0.125, %v285_v26  ;;  %v513_v28 = vpop.f32.mrb[1].mxu0 }
 0x14f   : > { %v288_v29 = vpop.f32.mrb[2].mxu0 }
 0x150   : > { %v293_v30 = vmul.f32 0.125, %v288_v29  ;;  %v514_v31 = vpop.f32.mrb[3].mxu0  ;;  %v295_v32 = vsel %vm294_vm2, %v292_v27, -inf }
 0x151   : > { %296 = vmax.xlane.f32.xlu1 %v295_v32 }
 0x152   : > { %v298_v33 = vsel %vm294_vm2, %v293_v30, -inf }
 0x155   : > { %299 = vmax.xlane.f32.xlu1 %v298_v33 }
 0x1de   : > { %v297_v34 = vpop.xlane.xlu1 %296 }
 0x1df   : > { %v301_v35 = vsub.f32 %v292_v27, %v297_v34 }
 0x1e1   : > { %v303_v36 = vmul.f32 1.442695, %v301_v35 }
 0x1e2   : > { %v300_v37 = vpop.xlane.xlu1 %299 }
 0x1e3   : > { %538 = vpow2.f32 %v303_v36  ;;  %v302_v38 = vsub.f32 %v293_v30, %v300_v37 }
 0x1e5   : > { %v305_v39 = vmul.f32 1.442695, %v302_v38 }
 0x1e7   : > { %540 = vpow2.f32 %v305_v39 }
 0x1ed   : > { %v539_v40 = vpop.eup %538 }
 0x1ee   : > { %v307_v41 = vsel %vm294_vm2, %v539_v40, 0.0 }
 0x1ef   : > { %308 = vadd.xlane.f32.xlu1 %v307_v41 }
 0x1f1   : > { %v541_v42 = vpop.eup %540 }
 0x1f2   : > { %v310_v43 = vsel %vm294_vm2, %v541_v42, 0.0 }
 0x1f3   : > { %311 = vadd.xlane.f32.xlu1 %v310_v43 }
 0x27c   : > { %v309_v45 = vpop.xlane.xlu1 %308 }
 0x27d   : > { %542 = vrcp.f32 %v309_v45 }
 0x280   : > { %v312_v46 = vpop.xlane.xlu1 %311 }
 0x281   : > { %544 = vrcp.f32 %v312_v46 }
 0x287   : > { %v543_v47 = vpop.eup %542 }
 0x288   : > { %v315_v49 = vmul.f32 %v543_v47, %v539_v40 }
 0x28b   : > { %v545_v48 = vpop.eup %544 }
 0x28c   : > { %v316_v50 = vmul.f32 %v545_v48, %v541_v42 }
 0x28e   : > { %v523_v51 = vpack.c.bf16 %v316_v50, %v315_v49 }
 0x290   : > { %525 = vmatpush3.bf16.xpose.msk.msra.mxu1 %vm524_vm3, %v523_v51 }
 0x297   : > { %520 = vmatmul.mubr.msk.f32.vlgmr.msra.gmra.mrb[0].mxu1 %vm294_vm2, %v317_v52 }
 0x36a   : > { %v393_v53 = vpop.f32.mrb[0].mxu1 }
 0x36b   : > { %398 = vst.msk [vmem:[%s205_s27] sm:$0x7] %vm397_vm4, %v393_v53  ;;  %v521_v54 = vpop.f32.mrb[1].mxu1 }
 0x36c PF: > { %s13_s12 = sadd.s32 1, %s552_s12  }
 0x36d   : > { %p10_p4 = scmp.ge.s32.totalorder %s13_s12, 4  }
 0x36f   :  { %12 = sbr.rel (!%p10_p4) target bundleno = 1 (0x1), region = 68 }

// kernel: custom-call.62
= control target key start
LH: loop header
LB: loop body
LE: loop exit
PB: predicated region body
PF: predicated region fallthrough
CT: control target
= control target key end

     0   :  { %s236_s6 = smov 0   ;;  %s263_s0 = inlined_call_operand.vmem [shape: f32[2,3,3], index: 0, kind: input, shape index: {}]   ;;  %s264_s1 = inlined_call_operand.vmem [shape: f32[2,3,3], index: 1, kind: output, shape index: {}]  }
   0x1 LB: > { %s198_s7 = sadd.s32 4294967295, %s224_s6   ;;  %p200_p0 = scmp.ge.s32.totalorder %s224_s6, 2  ;;  %s224_s6 = sphi %s236_s6, %s7_s6  }
   0x2   : > { %s23_s8 = sand.u32 (!%p200_p0), 1, %s224_s6   ;;  %s202_s9 = sshll.u32 (!%p200_p0), %s224_s6, 2 }
   0x3   : > { %21 = sbr.rel (%p200_p0) target bundleno = 10 (0xa), region = 16  ;;  %s201_s10 = sshll.u32 (!%p200_p0), %s23_s8, 2 }
   0x4   : > { %s27_s13 = scalar_lea.vmem (!%p200_p0), %s263_s0, %s202_s9  ;;  %s25_s14 = scalar_lea.vmem (!%p200_p0), [#allocation1], %s201_s10 }
   0x5   : > { %v43_v0 = vld [vmem:[%s27_s13] sm:$0xf] (!%p200_p0) }
   0x6   : > { %44 = vst [vmem:[%s25_s14] sm:$0xf] (!%p200_p0), %v43_v0 }
   0xa PF: > { %p203_p1 = scmp.ge.s32.totalorder %s224_s6, 1  ;;  %p60_p2 = scmp.lt.s32.totalorder %s224_s6, 3 }
   0xc   : > { %p61_p3 = pnand %p203_p1, %p60_p2 }
   0xd   : > { %s252_s15 = sand.u32 (!%p61_p3), 1, %s198_s7   ;;  %v82_v1 = vlaneseq (!%p61_p3)  ;;  %vm96_vm1 = vcmask (!%p61_p3), 23552   ;;  %s207_s19 = sshll.u32 (!%p61_p3), %s198_s7, 2 }
   0xe   : > { %64 = sbr.rel (%p61_p3) target bundleno = 334 (0x14e), region = 50  ;;  %s204_s16 = sshll.u32 (!%p61_p3), %s252_s15, 2 }
   0xf   : > { %s73_s17 = scalar_lea.vmem (!%p61_p3), [#allocation1], %s204_s16  ;;  %v83_v3 = vand.u32 (!%p61_p3), 127, %v82_v1  ;;  %v85_v4 = vshrl.u32 (!%p61_p3), %v82_v1, 7  ;;  %s77_s18 = scalar_lea.vmem (!%p61_p3), [#allocation3], %s204_s16 }
  0x10   : > { %v80_v2 = vld [vmem:[%s73_s17] sm:$0xf] (!%p61_p3)  ;;  %s128_s22 = scalar_lea.vmem (!%p61_p3), %s264_s1, %s207_s19 }
  0x11   : > { %81 = vst [vmem:[#allocation0] sm:$0xf] (!%p61_p3), %v80_v2  ;;  %vm91_vm0 = vcmp.eq.s32.totalorder (!%p61_p3), %v83_v3, 0  ;;  %vm87_vm2 = vcmp.eq.s32.totalorder (!%p61_p3), %v83_v3, %v85_v4  ;;  %vm100_vm3 = vcmp.eq.s32.totalorder (!%p61_p3), %v83_v3, 1  ;;  %vm111_vm4 = vcmp.eq.s32.totalorder (!%p61_p3), %v83_v3, 2 }
  0x18   : > { %v88_v5 = vld [vmem:[#allocation0] sm:$0xff] }
  0x19   : > { %v95_v6 = vld [vmem:[#allocation0 + $0x1] ss:$0 sm:$0xff]  ;;  %v92_v7 = vsel %vm91_vm0, %v88_v5, 1.0  ;;  %v106_v11 = vld [vmem:[#allocation0 + $0x2] ss:$0 sm:$0xff] }
  0x1a   : > { %v97_v8 = vsel %vm96_vm1, %v95_v6, 0.0  ;;  %v93_v9 = vsel %vm87_vm2, %v92_v7, 0.0  ;;  %v108_v12 = vsel %vm96_vm1, %v106_v11, 0.0 }
  0x1b   : > { %v101_v10 = vmul.f32 %v97_v8, %v93_v9 }
  0x1d   : > { %102 = vadd.xlane.f32.xlu0 %v101_v10 }
  0xaa   : > { %v103_v13 = vpop.xlane.xlu0 %102 }
  0xab   : > { %v104_v14 = vsel %vm100_vm3, %v103_v13, %v93_v9 }
  0xac   : > { %v112_v15 = vmul.f32 %v108_v12, %v104_v14 }
  0xae   : > { %113 = vadd.xlane.f32.xlu0 %v112_v15 }
 0x13b   : > { %v114_v16 = vpop.xlane.xlu0 %113 }
 0x13c   : > { %v115_v17 = vsel %vm111_vm4, %v114_v16, %v104_v14 }
 0x13d   : > { %116 = vst [vmem:[#allocation2] sm:$0xff] %v115_v17 }
 0x144   : > { %v120_v18 = vld [vmem:[#allocation2] sm:$0xf] }
 0x145   : > { %122 = vst [vmem:[%s77_s18] sm:$0xf] %v120_v18 }
 0x14c   : > { %v144_v19 = vld [vmem:[%s77_s18] sm:$0xf] }
 0x14d   : > { %145 = vst [vmem:[%s128_s22] sm:$0xf] %v144_v19 }
 0x14e PF: > { %s7_s6 = sadd.s32 1, %s224_s6  }
 0x14f   : > { %p4_p4 = scmp.ge.s32.totalorder %s7_s6, 4  }
 0x151   :  { %6 = sbr.rel (!%p4_p4) target bundleno = 1 (0x1), region = 112 }

// kernel: custom-call.54
= control target key start
LH: loop header
LB: loop body
LE: loop exit
PB: predicated region body
PF: predicated region fallthrough
CT: control target
= control target key end

     0   :  { %s6_s0 = inlined_call_operand.hbm [shape: pred[2], index: 0, kind: output, shape index: {}]  }

// kernel: custom-call.59
= control target key start
LH: loop header
LB: loop body
LE: loop exit
PB: predicated region body
PF: predicated region fallthrough
CT: control target
= control target key end

     0   :  { %s343_s6 = smov 0   ;;  %s345_s7 = smov 0   ;;  %s390_s0 = inlined_call_operand.vmem [shape: f32[2,3,3], index: 0, kind: input, shape index: {}]   ;;  %s391_s1 = inlined_call_operand.vmem [shape: f32[2,3,3], index: 1, kind: output, shape index: {}]  }
   0x1   :  { %s347_s8 = smov 0  }
   0x2 LB: > { %s265_s9 = sadd.s32 4294967295, %s330_s8   ;;  %s26_s10 = sadd.s32 1, %s326_s7  ;;  %s330_s8 = sphi %s347_s8, %s7_s8   ;;  %s326_s7 = sphi %s345_s7, %s393_s7   ;;  %s322_s6 = sphi %s343_s6, %s392_s6  }
   0x3   : > { %p28_p0 = scmp.ge.s32.totalorder %s26_s10, 2  ;;  %p267_p1 = scmp.ge.s32.totalorder %s330_s8, 2 }
   0x4   : > { %s42_s11 = sand.u32 (!%p267_p1), 1, %s330_s8   ;;  %s269_s12 = sshll.u32 (!%p267_p1), %s326_s7, 2 }
   0x5   : > { %s395_s10 = smov (%p28_p0, %s26_s10), 0  ;;  %40 = sbr.rel (%p267_p1) target bundleno = 12 (0xc), region = 16 }
   0x6   : > { %s268_s13 = sshll.u32 (!%p267_p1), %s42_s11, 2  ;;  %s48_s16 = scalar_lea.vmem (!%p267_p1), %s390_s0, %s269_s12 }
   0x7   : > { %v64_v0 = vld [vmem:[%s48_s16] sm:$0xf] (!%p267_p1)  ;;  %s44_s17 = scalar_lea.vmem (!%p267_p1), [#allocation1], %s268_s13 }
   0x8   : > { %65 = vst [vmem:[%s44_s17] sm:$0xf] (!%p267_p1), %v64_v0 }
   0xc PF: > { %p270_p2 = scmp.ge.s32.totalorder %s330_s8, 1  ;;  %p81_p3 = scmp.lt.s32.totalorder %s330_s8, 3 }
   0xe   : > { %p82_p4 = pnand %p270_p2, %p81_p3 }
   0xf   : > { %v332_v1 = vmov (!%p82_p4), 0.0   ;;  %s370_s18 = sand.u32 (!%p82_p4), 1, %s265_s9   ;;  %vm104_vm0 = vcmask (!%p82_p4), 7168   ;;  %vm122_vm1 = vcmask (!%p82_p4), 15368   ;;  %vm139_vm2 = vcmask (!%p82_p4), 1047553   ;;  %s274_s22 = sshll.u32 (!%p82_p4), %s322_s6, 2 }
  0x10   : > { %85 = sbr.rel (%p82_p4) target bundleno = 541 (0x21d), region = 50  ;;  %103 = vst [vmem:[#allocation2] sm:$0xff] (!%p82_p4), %v332_v1  ;;  %s271_s19 = sshll.u32 (!%p82_p4), %s370_s18, 2  ;;  %vm140_vm3 = vmand (!%p82_p4), %vm122_vm1, %vm139_vm2  ;;  %vm144_vm4 = vcmask (!%p82_p4), 23568   ;;  %vm161_vm5 = vcmask (!%p82_p4), 1047554  }
  0x11   : > { %s94_s20 = scalar_lea.vmem (!%p82_p4), [#allocation1], %s271_s19  ;;  %vm162_vm6 = vmand (!%p82_p4), %vm144_vm4, %vm161_vm5  ;;  %s98_s21 = scalar_lea.vmem (!%p82_p4), [#allocation3], %s271_s19 }
  0x12   : > { %v101_v5 = vld [vmem:[%s94_s20] sm:$0xf] (!%p82_p4)  ;;  %s179_s25 = scalar_lea.vmem (!%p82_p4), %s391_s1, %s274_s22 }
  0x13   : > { %102 = vst [vmem:[#allocation0] sm:$0xf] (!%p82_p4), %v101_v5 }
  0x17   : > { %v105_v2 = vld [vmem:[#allocation2] ss:$0 sm:$0xff] }
  0x18   : > { %v107_v3 = vmul.f32 %v105_v2, %v105_v2  ;;  %v114_v4 = vmul.f32 0.0, %v105_v2 }
  0x1a   : > { %108 = vadd.xlane.f32.xlu0 %v107_v3  ;;  %v106_v6 = vld [vmem:[#allocation0] ss:$0 sm:$0xff]  ;;  %v126_v18 = vld [vmem:[#allocation0 + $0x1] ss:$0 sm:$0xff]  ;;  %v148_v30 = vld [vmem:[#allocation0 + $0x2] ss:$0 sm:$0xff] }
  0x1b   : > { %v112_v10 = vld [vmem:[#allocation0] sm:$0xff] }
  0x1e   : > { %115 = vadd.xlane.f32.xlu0 %v114_v4 }
  0xa7   : > { %v109_v7 = vpop.xlane.xlu0 %108 }
  0xa8   : > { %v110_v8 = vsub.f32 %v106_v6, %v109_v7 }
  0xaa   : > { %302 = vrsqrt.f32 %v110_v8 }
  0xab   : > { %v116_v9 = vpop.xlane.xlu0 %115 }
  0xac   : > { %v117_v11 = vsub.f32 %v112_v10, %v116_v9 }
  0xb4   : > { %v303_v12 = vpop.eup %302 }
  0xb5   : > { %v118_v13 = vmul.f32 %v303_v12, %v117_v11 }
  0xb7   : > { %v119_v14 = vsel %vm104_vm0, %v118_v13, 0.0 }
  0xb8   : > { %121 = vst [vmem:[#allocation2] sm:$0xff] %v119_v14 }
  0xbf   : > { %v124_v15 = vld [vmem:[#allocation2 + $0x1] ss:$0 sm:$0xff] }
  0xc0   : > { %v127_v16 = vmul.f32 %v124_v15, %v124_v15  ;;  %v134_v17 = vmul.f32 %v124_v15, %v119_v14 }
  0xc2   : > { %128 = vadd.xlane.f32.xlu1 %v127_v16 }
  0xc6   : > { %135 = vadd.xlane.f32.xlu1 %v134_v17 }
 0x14f   : > { %v129_v19 = vpop.xlane.xlu1 %128 }
 0x150   : > { %v130_v20 = vsub.f32 %v126_v18, %v129_v19 }
 0x152   : > { %304 = vrsqrt.f32 %v130_v20 }
 0x153   : > { %v136_v21 = vpop.xlane.xlu1 %135 }
 0x154   : > { %v137_v22 = vsub.f32 %v112_v10, %v136_v21 }
 0x15c   : > { %v305_v23 = vpop.eup %304 }
 0x15d   : > { %v138_v24 = vmul.f32 %v305_v23, %v137_v22 }
 0x15f   : > { %v141_v25 = vsel %vm140_vm3, %v138_v24, 0.0 }
 0x160   : > { %v142_v26 = vadd.f32 %v141_v25, %v119_v14 }
 0x162   : > { %143 = vst [vmem:[#allocation2] sm:$0xff] %v142_v26 }
 0x169   : > { %v146_v27 = vld [vmem:[#allocation2 + $0x2] ss:$0 sm:$0xff] }
 0x16a   : > { %v156_v28 = vmul.f32 %v146_v27, %v142_v26  ;;  %v149_v29 = vmul.f32 %v146_v27, %v146_v27 }
 0x16c   : > { %157 = vadd.xlane.f32.xlu1 %v156_v28  ;;  %150 = vadd.xlane.f32.xlu0 %v149_v29 }
 0x1f9   : > { %v151_v31 = vpop.xlane.xlu0 %150  ;;  %v158_v33 = vpop.xlane.xlu1 %157 }
 0x1fa   : > { %v152_v32 = vsub.f32 %v148_v30, %v151_v31  ;;  %v159_v34 = vsub.f32 %v112_v10, %v158_v33 }
 0x1fc   : > { %306 = vrsqrt.f32 %v152_v32 }
 0x206   : > { %v307_v35 = vpop.eup %306 }
 0x207   : > { %v160_v36 = vmul.f32 %v307_v35, %v159_v34 }
 0x209   : > { %v163_v37 = vsel %vm162_vm6, %v160_v36, 0.0 }
 0x20a   : > { %v164_v38 = vadd.f32 %v163_v37, %v142_v26 }
 0x20c   : > { %165 = vst [vmem:[#allocation2] sm:$0xff] %v164_v38 }
 0x213   : > { %v169_v39 = vld [vmem:[#allocation2] sm:$0xf] }
 0x214   : > { %171 = vst [vmem:[%s98_s21] sm:$0xf] %v169_v39 }
 0x21b   : > { %v195_v40 = vld [vmem:[%s98_s21] sm:$0xf] }
 0x21c   : > { %196 = vst [vmem:[%s179_s25] sm:$0xf] %v195_v40 }
 0x21d PF: > { %s7_s8 = sadd.s32 1, %s330_s8   ;;  %s392_s6 = smov %s326_s7 }
 0x21e   : > { %p4_p5 = scmp.ge.s32.totalorder %s7_s8, 4   ;;  %s393_s7 = smov %s395_s10 }
 0x220   :  { %6 = sbr.rel (!%p4_p5) target bundleno = 2 (0x2), region = 114 }

// kernel: custom-call.60
= control target key start
LH: loop header
LB: loop body
LE: loop exit
PB: predicated region body
PF: predicated region fallthrough
CT: control target
= control target key end

     0   :  { %s343_s6 = smov 0   ;;  %s345_s7 = smov 0   ;;  %s390_s0 = inlined_call_operand.vmem [shape: f32[2,1,3,3], index: 0, kind: input, shape index: {}]   ;;  %s391_s1 = inlined_call_operand.vmem [shape: f32[2,1,3,3], index: 1, kind: output, shape index: {}]  }
   0x1   :  { %s347_s8 = smov 0  }
   0x2 LB: > { %s269_s9 = sadd.s32 4294967295, %s330_s8   ;;  %s33_s10 = sadd.s32 1, %s326_s7  ;;  %s330_s8 = sphi %s347_s8, %s7_s8   ;;  %s326_s7 = sphi %s345_s7, %s393_s7   ;;  %s322_s6 = sphi %s343_s6, %s392_s6  }
   0x3   : > { %p35_p0 = scmp.ge.s32.totalorder %s33_s10, 2  ;;  %p271_p1 = scmp.ge.s32.totalorder %s330_s8, 2 }
   0x4   : > { %s49_s11 = sand.u32 (!%p271_p1), 1, %s330_s8   ;;  %s273_s12 = sshll.u32 (!%p271_p1), %s326_s7, 2 }
   0x5   : > { %s395_s10 = smov (%p35_p0, %s33_s10), 0  ;;  %47 = sbr.rel (%p271_p1) target bundleno = 12 (0xc), region = 16 }
   0x6   : > { %s272_s13 = sshll.u32 (!%p271_p1), %s49_s11, 2  ;;  %s56_s16 = scalar_lea.vmem (!%p271_p1), %s390_s0, %s273_s12 }
   0x7   : > { %v72_v0 = vld [vmem:[%s56_s16] sm:$0xf] (!%p271_p1)  ;;  %s51_s17 = scalar_lea.vmem (!%p271_p1), [#allocation1], %s272_s13 }
   0x8   : > { %73 = vst [vmem:[%s51_s17] sm:$0xf] (!%p271_p1), %v72_v0 }
   0xc PF: > { %p274_p2 = scmp.ge.s32.totalorder %s330_s8, 1  ;;  %p89_p3 = scmp.lt.s32.totalorder %s330_s8, 3 }
   0xe   : > { %p90_p4 = pnand %p274_p2, %p89_p3 }
  0x10   : > { %93 = sbr.rel (%p90_p4) target bundleno = 511 (0x1ff), region = 50 }
  0x17   : > { %s370_s18 = sand.u32 1, %s269_s9   ;;  %v111_v1 = vlaneseq  ;;  %v332_v11 = vmov -1.0   ;;  %s278_s22 = sshll.u32 %s322_s6, 2 }
  0x18   : > { %s275_s19 = sshll.u32 %s370_s18, 2  ;;  %s178_s25 = scalar_lea.vmem %s391_s1, %s278_s22 }
  0x19   : > { %s102_s20 = scalar_lea.vmem [#allocation1], %s275_s19  ;;  %v112_v3 = vand.u32 127, %v111_v1  ;;  %v115_v4 = vshrl.u32 %v111_v1, 7  ;;  %s106_s21 = scalar_lea.vmem [#allocation3], %s275_s19 }
  0x1a   : > { %v109_v2 = vld [vmem:[%s102_s20] sm:$0xf] }
  0x1b   : > { %110 = vst [vmem:[#allocation0] sm:$0xf] %v109_v2  ;;  %vm113_vm0 = vcmp.lt.s32.totalorder %v112_v3, 3  ;;  %vm122_vm1 = vcmp.ge.s32.totalorder %v115_v4, %v112_v3  ;;  %vm117_vm2 = vcmp.eq.s32.totalorder %v115_v4, %v112_v3  ;;  %vm136_vm4 = vcmp.eq.s32.totalorder %v112_v3, 0 }
  0x1c   : > { %vm123_vm3 = vmand %vm122_vm1, %vm113_vm0  ;;  %vm133_vm5 = vcmp.eq.s32.totalorder %v112_v3, %v115_v4  ;;  %v137_v12 = vsel %vm136_vm4, 1.0, %v332_v11  ;;  %vm144_vm6 = vcmp.eq.s32.totalorder %v112_v3, 1  ;;  %vm154_vm7 = vcmp.eq.s32.totalorder %v112_v3, 2 }
  0x1d   : > { %v138_v13 = vsel %vm133_vm5, %v137_v12, 0.0 }
  0x22   : > { %v118_v5 = vld [vmem:[#allocation0] sm:$0xff] }
  0x23   : > { %v119_v6 = vsel %vm117_vm2, %v118_v5, 0.0  ;;  %v124_v7 = vsel %vm123_vm3, %v118_v5, 0.0 }
  0x24   : > { %120 = vadd.xlane.f32.xlu0 %v119_v6 }
  0xb1   : > { %v121_v8 = vpop.xlane.xlu0 %120 }
  0xb2   : > { %306 = vrcp.f32 %v121_v8  ;;  %vm161_vm8 = vweird.f32 %v121_v8 }
  0xbc   : > { %v307_v9 = vpop.eup %306 }
  0xbd   : > { %v126_v10 = vmul.f32 %v307_v9, %v124_v7 }
  0xbf   : > { %127 = vst [vmem:[#allocation4] sm:$0xff] %v126_v10 }
  0xc6   : > { %v140_v14 = vld [vmem:[#allocation4 + $0x1] ss:$0 sm:$0xff]  ;;  %v150_v17 = vld [vmem:[#allocation4 + $0x2] ss:$0 sm:$0xff] }
  0xc7   : > { %v141_v15 = vxor.u32 2147483648, %v140_v14  ;;  %v151_v19 = vxor.u32 2147483648, %v150_v17 }
  0xc9   : > { %v145_v16 = vmul.f32 %v141_v15, %v138_v13 }
  0xcb   : > { %146 = vadd.xlane.f32.xlu0 %v145_v16 }
 0x158   : > { %v147_v18 = vpop.xlane.xlu0 %146 }
 0x159   : > { %v148_v20 = vsel %vm144_vm6, %v147_v18, %v138_v13 }
 0x15a   : > { %v155_v21 = vmul.f32 %v151_v19, %v148_v20 }
 0x15c   : > { %156 = vadd.xlane.f32.xlu1 %v155_v21 }
 0x1e9   : > { %v157_v22 = vpop.xlane.xlu1 %156 }
 0x1ea   : > { %v158_v23 = vsel %vm154_vm7, %v157_v22, %v148_v20 }
 0x1eb   : > { %v160_v24 = vmul.f32 %v307_v9, %v158_v23 }
 0x1ed   : > { %v162_v25 = vsel %vm161_vm8, %v158_v23, %v160_v24 }
 0x1ee   : > { %163 = vst [vmem:[#allocation2] sm:$0xff] %v162_v25 }
 0x1f5   : > { %v167_v26 = vld [vmem:[#allocation2] sm:$0xf] }
 0x1f6   : > { %169 = vst [vmem:[%s106_s21] sm:$0xf] %v167_v26 }
 0x1fd   : > { %v194_v27 = vld [vmem:[%s106_s21] sm:$0xf] }
 0x1fe   : > { %195 = vst [vmem:[%s178_s25] sm:$0xf] %v194_v27 }
 0x1ff PF: > { %s7_s8 = sadd.s32 1, %s330_s8   ;;  %s392_s6 = smov %s326_s7 }
 0x200   : > { %p4_p5 = scmp.ge.s32.totalorder %s7_s8, 4   ;;  %s393_s7 = smov %s395_s10 }
 0x202   :  { %6 = sbr.rel (!%p4_p5) target bundleno = 2 (0x2), region = 112 }

// kernel: custom-call.22
= control target key start
LH: loop header
LB: loop body
LE: loop exit
PB: predicated region body
PF: predicated region fallthrough
CT: control target
= control target key end

     0   :  { %s1704_s30 = smov 0   ;;  %s1706_s10 = smov 0   ;;  %s2030_s0 = inlined_call_operand.vmem [shape: f32[2,2,2], index: 0, kind: input, shape index: {}]   ;;  %s2031_s1 = inlined_call_operand.vmem [shape: f32[2,2,2], index: 1, kind: input, shape index: {}]   ;;  %s2032_s2 = inlined_call_operand.vmem [shape: f32[2,2,2], index: 2, kind: input, shape index: {}]   ;;  %s2033_s3 = inlined_call_operand.vmem [shape: f32[2,2,2], index: 3, kind: input, shape index: {}]   ;;  %s2034_s4 = inlined_call_operand.vmem [shape: f32[2,2], index: 4, kind: output, shape index: {0}]   ;;  %s2035_s5 = inlined_call_operand.vmem [shape: f32[2,2], index: 5, kind: output, shape index: {1}]   ;;  %s2036_s6 = inlined_call_operand.vmem [shape: f32[2,2,2], index: 6, kind: output, shape index: {2}]   ;;  %s2037_s7 = inlined_call_operand.vmem [shape: f32[2,2,2], index: 7, kind: output, shape index: {3}]   ;;  %s2038_s8 = inlined_call_operand.vmem [shape: f32[2,2,2], index: 8, kind: output, shape index: {4}]   ;;  %s2039_s9 = inlined_call_operand.vmem [shape: f32[2,2,2], index: 9, kind: output, shape index: {5}]  }
   0x1   :  { %s1708_s11 = smov 0  }
   0x2 LB: > { %s1720_s12 = sadd.s32 4294967295, %s1641_s11   ;;  %s1723_s13 = sadd.s32 1, %s1641_s11   ;;  %s1641_s11 = sphi %s1708_s11, %s2058_s11   ;;  %s1637_s10 = sphi %s1706_s10, %s2057_s10   ;;  %s1633_s30 = sphi %s1704_s30, %s2056_s30  }
   0x3   : > { %s20_s14 = sshrl.u32 %s1641_s11, 3  ;;  %s21_s15 = sshrl.u32 %s1723_s13, 3 }
   0x4   : > { %s22_s16 = ssub.s32 %s20_s14, %s21_s15  ;;  %s25_s17 = sadd.s32 1, %s1637_s10 }
   0x5   : > { %p23_p0 = scmp.eq.s32.totalorder %s22_s16, 0  ;;  %p35_p1 = scmp.ne.s32.totalorder %s1637_s10, %s1633_s30 }
   0x6   : > { %p36_p2 = scmp.eq.s32.totalorder %s1720_s12, 1  ;;  %p1502_p4 = scmp.ge.s32.totalorder %s1641_s11, 2 }
   0x7   : > { %s1732_s18 = scalar_select %p23_p0, %s1637_s10, %s25_s17  }
   0x8   : > { %p1734_p3 = por %p36_p2, %p35_p1  ;;  %86 = sbr.rel (%p1502_p4) target bundleno = 17 (0x11), region = 16 }
   0x9   : > { %2040 = sst [smem:[#allocation33_spill]] %s1732_s18  ;;  %s88_s20 = sand.u32 (!%p1502_p4), 1, %s1641_s11  }
   0xa   : > { %s1504_s21 = sshll.u32 (!%p1502_p4), %s1641_s11, 1  ;;  %s1503_s22 = sshll.u32 (!%p1502_p4), %s88_s20, 1 }
   0xb   : > { %s92_s25 = scalar_lea.vmem (!%p1502_p4), %s2030_s0, %s1504_s21  ;;  %s90_s26 = scalar_lea.vmem (!%p1502_p4), [#allocation1], %s1503_s22 }
   0xc   : > { %v108_v0 = vld [vmem:[%s92_s25] sm:$0x3] (!%p1502_p4)  ;;  %s129_s29 = scalar_lea.vmem (!%p1502_p4), %s2031_s1, %s1504_s21  ;;  %s166_s16 = scalar_lea.vmem (!%p1502_p4), %s2032_s2, %s1504_s21 }
   0xd   : > { %109 = vst [vmem:[%s90_s26] sm:$0x3] (!%p1502_p4), %v108_v0  ;;  %v145_v1 = vld [vmem:[%s129_s29] sm:$0x3] (!%p1502_p4)  ;;  %s127_s17 = scalar_lea.vmem (!%p1502_p4), [#allocation3], %s1503_s22  ;;  %s203_s23 = scalar_lea.vmem (!%p1502_p4), %s2033_s3, %s1504_s21 }
   0xe   : > { %146 = vst [vmem:[%s127_s17] sm:$0x3] (!%p1502_p4), %v145_v1  ;;  %v182_v2 = vld [vmem:[%s166_s16] sm:$0x3] (!%p1502_p4)  ;;  %s164_s24 = scalar_lea.vmem (!%p1502_p4), [#allocation5], %s1503_s22  ;;  %s201_s25 = scalar_lea.vmem (!%p1502_p4), [#allocation7], %s1503_s22 }
   0xf   : > { %183 = vst [vmem:[%s164_s24] sm:$0x3] %v182_v2  ;;  %v219_v3 = vld [vmem:[%s203_s23] sm:$0x3] }
  0x10   : > { %220 = vst [vmem:[%s201_s25] sm:$0x3] %v219_v3 }
  0x11 PF: > { %p1511_p5 = scmp.ge.s32.totalorder %s1641_s11, 1  ;;  %p236_p6 = scmp.lt.s32.totalorder %s1641_s11, 3 }
  0x13   : > { %p237_p7 = pnand %p1511_p5, %p236_p6 }
  0x15   : > { %240 = sbr.rel (%p237_p7) target bundleno = 999 (0x3e7), region = 140 }
  0x1c   : > { %s259_s26 = sand.u32 1, %s1720_s12   ;;  %s277_s27 = sand.u32 1, %s1633_s30   ;;  %v337_v4 = vlaneseq  ;;  %v1651_v5 = vmov 0.0  }
  0x1d   : > { %s1757_s28 = sshll.u32 %s259_s26, 1  ;;  %s1759_s18 = sshll.u32 %s277_s27, 1  ;;  %332 = vst [vmem:[#allocation12] sm:$0xff] %v1651_v5  ;;  %333 = vst [vmem:[#allocation14] sm:$0xff] %v1651_v5 }
  0x1e   : > { %334 = vst [vmem:[#allocation16] sm:$0xff] %v1651_v5  ;;  %335 = vst [vmem:[#allocation18] sm:$0xff] %v1651_v5  ;;  %v1761_v6 = vand.u32 127, %v337_v4  ;;  %v1763_v7 = vshrl.u32 %v337_v4, 7  ;;  %s261_s11 = scalar_lea.vmem [#allocation1], %s1757_s28  ;;  %s265_s30 = scalar_lea.vmem [#allocation3], %s1757_s28 }
  0x1f   : > { %v304_v8 = vld [vmem:[%s261_s11] sm:$0x3]  ;;  %v308_v9 = vld [vmem:[%s265_s30] sm:$0x3]  ;;  %s269_s21 = scalar_lea.vmem [#allocation5], %s1757_s28  ;;  %s273_s22 = scalar_lea.vmem [#allocation7], %s1757_s28 }
  0x20   : > { %305 = vst [vmem:[#allocation0] sm:$0x3] %v304_v8  ;;  %309 = vst [vmem:[#allocation2] sm:$0x3] %v308_v9  ;;  %v312_v10 = vld [vmem:[%s269_s21] sm:$0x3]  ;;  %v339_v6 = vmov %v1761_v6  ;;  %v342_v7 = vmov %v1763_v7 }
  0x21   : > { %v316_v11 = vld [vmem:[%s273_s22] sm:$0x3]  ;;  %313 = vst [vmem:[#allocation4] sm:$0x3] %v312_v10  ;;  %v352_v6 = vmov %v1761_v6  ;;  %v355_v7 = vmov %v1763_v7  ;;  %s320_s29 = smov [#allocation20]  ;;  %s323_s14 = smov [#allocation21]  ;;  %vm346_vm0 = vcmp.eq.s32.totalorder %v342_v7, %v339_v6 }
  0x22   : > { %317 = vst [vmem:[#allocation6] sm:$0x3] %v316_v11  ;;  %vm359_vm1 = vcmp.eq.s32.totalorder %v355_v7, %v352_v6  ;;  %s336_s15 = smov [#allocation12]  ;;  %s349_s16 = smov [#allocation18]  ;;  %vm1391_vm2 = vcmp.lt.s32.totalorder %v1761_v6, 2  ;;  %v1383_v6 = vmov %v1761_v6  ;;  %v1386_v7 = vmov %v1763_v7 }
  0x23   : > { %s326_s17 = smov [#allocation22]  ;;  %s329_s20 = smov [#allocation23]  ;;  %vm1396_vm3 = vcmp.eq.s32.totalorder %v1386_v7, %v1383_v6  ;;  %v1434_v6 = vmov %v1761_v6  ;;  %v1403_v7 = vmov %v1763_v7 }
  0x24   : > { %v343_v12 = vld [vmem:[%s336_s15] sm:$0x3]  ;;  %s1387_s30 = smov [#allocation20]  ;;  %s1404_s21 = smov [#allocation21]  ;;  %v1400_v6 = vmov %v1761_v6  ;;  %v1437_v7 = vmov %v1763_v7 }
  0x25   : > { %v356_v13 = vld [vmem:[%s349_s16] sm:$0x3]  ;;  %v347_v16 = vsel %vm346_vm0, 1.0, %v343_v12  ;;  %s1421_s22 = smov [#allocation22]  ;;  %v1417_v6 = vmov %v1761_v6  ;;  %v1420_v7 = vmov %v1763_v7  ;;  %vm1447_vm4 = vcmp.eq.s32.totalorder %v1437_v7, %v1434_v6 }
  0x26   : > { %v360_v17 = vsel %vm359_vm1, 1.0, %v356_v13  ;;  %348 = vst [vmem:[%s336_s15] sm:$0x3] %v347_v16 }
  0x27   : > { %v321_v14 = vld [vmem:[#allocation0] sm:$0xff]  ;;  %v324_v15 = vld [vmem:[#allocation2] sm:$0xff]  ;;  %361 = vst [vmem:[%s349_s16] sm:$0x3] %v360_v17 }
  0x28   : > { %322 = vst [vmem:[%s320_s29] sm:$0xff] %v321_v14  ;;  %325 = vst [vmem:[%s323_s14] sm:$0xff] %v324_v15  ;;  %v327_v18 = vld [vmem:[#allocation4] sm:$0xff]  ;;  %s1438_s29 = smov [#allocation23] }
  0x29   : > { %v330_v19 = vld [vmem:[#allocation6] sm:$0xff]  ;;  %328 = vst [vmem:[%s326_s17] sm:$0xff] %v327_v18 }
  0x2a   : > { %331 = vst [vmem:[%s329_s20] sm:$0xff] %v330_v19 }
  0x2f   : > { %v1393_v20 = vld [vmem:[%s1387_s30] sm:$0x3] }
  0x30   : > { %v1410_v21 = vld [vmem:[%s1404_s21] sm:$0x3]  ;;  %v1394_v22 = vsel %vm1391_vm2, %v1393_v20, 0.0 }
  0x31   : > { %v1411_v23 = vsel %vm1391_vm2, %v1410_v21, 0.0  ;;  %v1427_v24 = vld [vmem:[%s1421_s22] sm:$0x3]  ;;  %v1395_v26 = vmul.f32 %v1394_v22, %v1394_v22 }
  0x32   : > { %v1444_v25 = vld [vmem:[%s1438_s29] sm:$0x3]  ;;  %v1412_v27 = vmul.f32 %v1411_v23, %v1411_v23  ;;  %v1428_v28 = vsel %vm1391_vm2, %v1427_v24, 0.0 }
  0x33   : > { %v1445_v29 = vsel %vm1391_vm2, %v1444_v25, 0.0  ;;  %v1429_v30 = vmul.f32 %v1428_v28, %v1428_v28  ;;  %v1397_v33 = vsel %vm1396_vm3, 0.0, %v1395_v26 }
  0x34   : > { %v1414_v31 = vadd.f32 %v1412_v27, %v1395_v26  ;;  %v1446_v32 = vmul.f32 %v1445_v29, %v1445_v29  ;;  %v1413_v34 = vadd.f32 %v1412_v27, %v1397_v33 }
  0x36   : > { %v1431_v35 = vadd.f32 %v1429_v30, %v1414_v31  ;;  %v1430_v36 = vadd.f32 %v1429_v30, %v1413_v34  ;;  %v1448_v37 = vsel %vm1447_vm4, 0.0, %v1446_v32 }
  0x38   : > { %v1450_v38 = vadd.f32 %v1446_v32, %v1431_v35  ;;  %v1449_v39 = vadd.f32 %v1448_v37, %v1430_v36 }
  0x3a   : > { %1451 = vadd.xlane.f32.xlu0 %v1450_v38 }
  0x3e   : > { %1459 = vadd.xlane.f32.xlu0 %v1449_v39 }
  0xc7   : > { %v1452_v40 = vpop.xlane.xlu0 %1451 }
  0xc8   : > { %v1453_v41 = vrot.slane %v1452_v40, 4 }
  0xca   : > { %v1454_v42 = vadd.f32 %v1453_v41, %v1452_v40 }
  0xcb   : > { %v1460_v43 = vpop.xlane.xlu0 %1459 }
  0xcc   : > { %v1455_v44 = vrot.slane %v1454_v42, 2  ;;  %v1461_v45 = vrot.slane %v1460_v43, 4 }
  0xce   : > { %v1462_v46 = vadd.f32 %v1461_v45, %v1460_v43  ;;  %v1456_v47 = vadd.f32 %v1455_v44, %v1454_v42 }
  0xd0   : > { %v1463_v48 = vrot.slane %v1462_v46, 2  ;;  %v1457_v50 = vrot.slane %v1456_v47, 1 }
  0xd2   : > { %v1464_v49 = vadd.f32 %v1463_v48, %v1462_v46  ;;  %v1458_v53 = vadd.f32 %v1457_v50, %v1456_v47 }
  0xd4   : > { %v1465_v51 = vrot.slane %v1464_v49, 1 }
  0xd6   : > { %v1466_v52 = vadd.f32 %v1465_v51, %v1464_v49 }
  0xd8   : > { %1552 = vpush %v1466_v52 }
  0xd9   : > { %1554 = vpush %v1458_v53 }
 0x109   : > { %s1553_s14 = spop %1552 }
 0x10a   : > { %s1555_s15 = spop %1554 }
 0x10b   : > { %s1469_s16 = smul.f32 1e-10, %s1555_s15 }
 0x10d   : > { %p1470_p8 = scmp.le.f32.partialorder %s1553_s14, %s1469_s16 }
 0x10e   : > { %s1797_s17 = smov (!%p1470_p8), 0  }
 0x10f   : > { %1473 = sbr.rel (%p1470_p8) target bundleno = 953 (0x3b9), region = 467 }
 0x116 LB: >> { %s1802_s20 = smov 0   ;;  %s1645_s17 = sphi %s1797_s17, %s2042_s17  }
 0x117 LB: >>> { %s466_s30 = smov [#allocation20]  ;;  %v470_v6 = vmov %v1761_v6  ;;  %v473_v7 = vmov %v1763_v7  ;;  %s486_s21 = smov [#allocation21]  ;;  %vm789_vm14 = vcmp.eq.s32.totalorder %v1763_v7, 0  ;;  %vm801_vm15 = vcmp.eq.s32.totalorder %v1763_v7, 1  ;;  %s1649_s20 = sphi %s1802_s20, %s465_s20  }
 0x118   : >>> { %v490_v6 = vmov %v1761_v6  ;;  %v493_v7 = vmov %v1763_v7  ;;  %v474_v54 = vld [vmem:[%s466_s30] sm:$0x3]  ;;  %vm477_vm5 = vcmp.eq.s32.totalorder %v473_v7, %v470_v6  ;;  %s506_s22 = smov [#allocation23]  ;;  %s467_s29 = smov [#allocation24] }
 0x119   : >>> { %vm497_vm6 = vcmp.eq.s32.totalorder %v493_v7, %v490_v6  ;;  %v510_v6 = vmov %v1761_v6  ;;  %v513_v7 = vmov %v1763_v7  ;;  %v478_v55 = vsel %vm477_vm5, %v474_v54, 0.0  ;;  %v494_v56 = vld [vmem:[%s486_s21] sm:$0x3]  ;;  %s487_s14 = smov [#allocation25]  ;;  %s507_s15 = smov [#allocation26] }
 0x11a   : >>> { %vm517_vm7 = vcmp.eq.s32.totalorder %v513_v7, %v510_v6  ;;  %v479_v57 = vrot.slane %v478_v55, 4  ;;  %v498_v58 = vsel %vm497_vm6, %v494_v56, 0.0  ;;  %v514_v59 = vld [vmem:[%s506_s22] sm:$0x3]  ;;  %s530_s16 = smov [#allocation25]  ;;  %s528_s30 = smov [#allocation24]  ;;  %v579_v6 = vmov %v1761_v6 }
 0x11b   : >>> { %v499_v60 = vrot.slane %v498_v58, 4  ;;  %v518_v61 = vsel %vm517_vm7, %v514_v59, 0.0  ;;  %s532_s21 = smov [#allocation26]  ;;  %s567_s22 = smov [#allocation27]  ;;  %v582_v7 = vmov %v1763_v7  ;;  %v594_v6 = vmov %v1761_v6 }
 0x11c   : >>> { %v480_v62 = vadd.f32 %v479_v57, %v478_v55  ;;  %v519_v63 = vrot.slane %v518_v61, 4  ;;  %v597_v7 = vmov %v1763_v7  ;;  %vm584_vm12 = vcmp.eq.s32.totalorder %v582_v7, %v579_v6  ;;  %s1821_s24 = smov [#allocation22]  ;;  %s1827_s23 = smov [#allocation14] }
 0x11d   : >>> { %v500_v0 = vadd.f32 %v499_v60, %v498_v58  ;;  %vm599_vm13 = vcmp.eq.s32.totalorder %v597_v7, %v594_v6  ;;  %s829_s11 = smov [#allocation31]  ;;  %s1833_s27 = smov [#allocation18]  ;;  %v615_v55 = vld [vmem:[%s1821_s24] sm:$0x3]  ;;  %v692_v6 = vmov %v1761_v6  ;;  %v695_v7 = vmov %v1763_v7 }
 0x11e   : >>> { %v481_v1 = vrot.slane %v480_v62, 2  ;;  %v520_v2 = vadd.f32 %v519_v63, %v518_v61  ;;  %v838_v58 = vld [vmem:[%s1827_s23] sm:$0x3]  ;;  %s607_s26 = smov [#allocation32]  ;;  %s831_s25 = smov [#allocation32]  ;;  %v706_v6 = vmov %v1761_v6  ;;  %v709_v7 = vmov %v1763_v7 }
 0x11f   : >>> { %v501_v3 = vrot.slane %v500_v0, 2  ;;  %v840_v61 = vld [vmem:[%s1833_s27] sm:$0x3]  ;;  %vm699_vm0 = vcmp.eq.s32.totalorder %v695_v7, %v692_v6  ;;  %v665_v6 = vmov %v1761_v6  ;;  %v668_v7 = vmov %v1763_v7  ;;  %s465_s20 = sadd.s32 1, %s1649_s20  }
 0x120   : >>> { %v482_v4 = vadd.f32 %v481_v1, %v480_v62  ;;  %v521_v5 = vrot.slane %v520_v2, 2  ;;  %v679_v6 = vmov %v1761_v6  ;;  %v682_v7 = vmov %v1763_v7  ;;  %p462_p9 = scmp.ge.s32.totalorder %s465_s20, 3  }
 0x121   : >>> { %v502_v8 = vadd.f32 %v501_v3, %v500_v0  ;;  %vm714_vm1 = vcmp.eq.s32.totalorder %v709_v7, %v706_v6  ;;  %vm673_vm3 = vcmp.eq.s32.totalorder %v668_v7, %v665_v6  ;;  %vm686_vm4 = vcmp.eq.s32.totalorder %v682_v7, %v679_v6 }
 0x122   : >>> { %v483_v9 = vrot.slane %v482_v4, 1  ;;  %v522_v10 = vadd.f32 %v521_v5, %v520_v2  ;;  %vm728_vm5 = vcmp.eq.s32.totalorder %v1761_v6, 0  ;;  %vm732_vm6 = vcmp.eq.s32.totalorder %v1761_v6, 1 }
 0x123   : >>> { %v503_v11 = vrot.slane %v502_v8, 1  ;;  %v366_v6 = vmov (%p462_p9), %v1761_v6  ;;  %v369_v7 = vmov (%p462_p9), %v1763_v7 }
 0x124   : >>> { %v484_v12 = vadd.f32 %v483_v9, %v482_v4  ;;  %v523_v13 = vrot.slane %v522_v10, 1  ;;  %v419_v6 = vmov (%p462_p9), %v1761_v6  ;;  %vm381_vm7 = vcmp.eq.s32.totalorder (%p462_p9), %v369_v7, %v366_v6 }
 0x125   : >>> { %v504_v14 = vadd.f32 %v503_v11, %v502_v8  ;;  %v422_v7 = vmov (%p462_p9), %v1763_v7  ;;  %v385_v6 = vmov (%p462_p9), %v1761_v6 }
 0x126   : >>> { %485 = vst [vmem:[%s467_s29] sm:$0x1] %v484_v12  ;;  %v524_v15 = vadd.f32 %v523_v13, %v522_v10  ;;  %s569_s29 = smov [#allocation28]  ;;  %v388_v7 = vmov (%p462_p9), %v1763_v7  ;;  %v402_v6 = vmov (%p462_p9), %v1761_v6 }
 0x127   : >>> { %505 = vst [vmem:[%s487_s14] sm:$0x1] %v504_v14  ;;  %s526_s14 = smov [#allocation29]  ;;  %v405_v7 = vmov (%p462_p9), %v1763_v7 }
 0x128   : >>> { %525 = vst [vmem:[%s507_s15] sm:$0x1] %v524_v15  ;;  %s527_s15 = smov [#allocation30]  ;;  %s571_s14 = smov %s526_s14 }
 0x129   : >>> { %s573_s15 = smov %s527_s15 }
 0x12d   : >>> { %v529_v18 = vld [vmem:[%s528_s30] sm:$0xff]  ;;  %s590_s30 = smov [#allocation30] }
 0x12e   : >>> { %v531_v16 = vld [vmem:[%s530_s16] sm:$0xff]  ;;  %v552_v31 = vand.u32 2147483647, %v529_v18  ;;  %s575_s16 = smov [#allocation29] }
 0x12f   : >>> { %v535_v17 = vmul.f32 2.0, %v531_v16  ;;  %v533_v19 = vld [vmem:[%s532_s21] sm:$0xff]  ;;  %v553_v36 = vand.u32 2147483647, %v531_v16  ;;  %s588_s21 = smov [#allocation31] }
 0x130   : >>> { %v534_v20 = vsub.f32 %v533_v19, %v529_v18  ;;  %v554_v32 = vand.u32 2147483647, %v533_v19 }
 0x131   : >>> { %1603 = vrcp.f32 %v535_v17 }
 0x132   : >>> { %v555_v35 = vmin.f32 %v552_v31, %v554_v32 }
 0x134   : >>> { %v556_v37 = vmul.f32 1.1920929e-08, %v555_v35 }
 0x136   : >>> { %vm557_vm11 = vcmp.le.f32.partialorder %v553_v36, %v556_v37 }
 0x13b   : >>> { %v1604_v21 = vpop.eup %1603 }
 0x13c   : >>> { %v537_v22 = vmul.f32 %v1604_v21, %v534_v20 }
 0x13e   : >>> { %v539_v23 = vmul.f32 %v537_v22, %v537_v22  ;;  %vm538_vm10 = vcmp.ge.f32.partialorder %v537_v22, 0.0 }
 0x140   : >>> { %v540_v24 = vadd.f32 1.0, %v539_v23 }
 0x142   : >>> { %1605 = vrsqrt.f32 %v540_v24  ;;  %vm543_vm8 = vcmp.eq.f32.partialorder %v540_v24, inf  ;;  %v546_v26 = vand.u32 2147483648, %v540_v24  ;;  %vm545_vm9 = vcmp.eq.f32.partialorder %v540_v24, 0.0 }
 0x14c   : >>> { %v1606_v25 = vpop.eup %1605 }
 0x14d   : >>> { %v542_v27 = vmul.f32 %v1606_v25, %v540_v24 }
 0x14f   : >>> { %v544_v28 = vsel %vm543_vm8, %v540_v24, %v542_v27  ;;  %vm434_vm8 = vcmp.eq.s32.totalorder (%p462_p9), %v422_v7, %v419_v6 }
 0x150   : >>> { %v547_v29 = vsel %vm545_vm9, %v546_v26, %v544_v28 }
 0x151   : >>> { %v548_v30 = vxor.u32 2147483648, %v547_v29 }
 0x153   : >>> { %v549_v33 = vsel %vm538_vm10, %v547_v29, %v548_v30 }
 0x154   : >>> { %v550_v34 = vadd.f32 %v549_v33, %v537_v22 }
 0x156   : >>> { %1607 = vrcp.f32 %v550_v34 }
 0x160   : >>> { %v1608_v38 = vpop.eup %1607 }
 0x161   : >>> { %v558_v39 = vsel %vm557_vm11, 0.0, %v1608_v38 }
 0x162   : >>> { %v559_v40 = vmul.f32 %v558_v39, %v558_v39  ;;  %v563_v41 = vmul.f32 %v558_v39, %v531_v16 }
 0x164   : >>> { %v560_v42 = vadd.f32 1.0, %v559_v40  ;;  %v564_v43 = vsub.f32 %v529_v18, %v563_v41  ;;  %v566_v44 = vadd.f32 %v563_v41, %v533_v19 }
 0x166   : >>> { %1609 = vrsqrt.f32 %v560_v42  ;;  %568 = vst [vmem:[%s567_s22] sm:$0xff] %v564_v43  ;;  %570 = vst [vmem:[%s569_s29] sm:$0xff] %v566_v44  ;;  %s605_s22 = smov [#allocation31]  ;;  %s1817_s29 = smov [#allocation20] }
 0x167   : >>> { %v613_v53 = vld [vmem:[%s1817_s29] sm:$0x3] }
 0x170   : >>> { %v1610_v45 = vpop.eup %1609 }
 0x171   : >>> { %572 = vst [vmem:[%s571_s14] sm:$0xff] %v1610_v45  ;;  %v562_v46 = vmul.f32 %v1610_v45, %v558_v39  ;;  %s603_s14 = smov [#allocation32] }
 0x173   : >>> { %574 = vst [vmem:[%s573_s15] sm:$0xff] %v562_v46  ;;  %s1819_s15 = smov [#allocation21] }
 0x174   : >>> { %v614_v54 = vld [vmem:[%s1819_s15] sm:$0x3] }
 0x178   : >>> { %v576_v47 = vld [vmem:[%s575_s16] ss:$0 sm:$0xff]  ;;  %s1823_s16 = smov [#allocation23] }
 0x179   : >>> { %v585_v48 = vsel %vm584_vm12, %v576_v47, 0.0  ;;  %v616_v56 = vld [vmem:[%s1823_s16] sm:$0x3] }
 0x17a   : >>> { %586 = vadd.xlane.f32.xlu0 %v585_v48  ;;  %v591_v49 = vld [vmem:[%s590_s30] ss:$0 sm:$0xff]  ;;  %s1825_s30 = smov [#allocation12] }
 0x17b   : >>> { %v600_v50 = vsel %vm599_vm13, %v591_v49, 0.0  ;;  %v837_v57 = vld [vmem:[%s1825_s30] sm:$0x3] }
 0x17e   : >>> { %601 = vadd.xlane.f32.xlu0 %v600_v50 }
 0x207   : >>> { %v587_v51 = vpop.xlane.xlu0 %586 }
 0x208   : >>> { %589 = vst [vmem:[%s588_s21] sm:$0xff] %v587_v51  ;;  %s1829_s21 = smov [#allocation16] }
 0x209   : >>> { %v839_v59 = vld [vmem:[%s1829_s21] sm:$0x3] }
 0x20b   : >>> { %v602_v52 = vpop.xlane.xlu0 %601 }
 0x20c   : >>> { %604 = vst [vmem:[%s603_s14] sm:$0xff] %v602_v52  ;;  %s1853_s14 = smov [#allocation23] }
 0x20f   : >>> { %v606_v60 = vld [vmem:[%s605_s22] sm:$0xff]  ;;  %s1851_s22 = smov [#allocation22] }
 0x210   : >>> { %v830_v62 = vld [vmem:[%s829_s11] sm:$0xff]  ;;  %v617_v63 = vmul.f32 %v613_v53, %v606_v60  ;;  %v620_v0 = vmul.f32 %v614_v54, %v606_v60  ;;  %v624_v1 = vmul.f32 %v615_v55, %v606_v60  ;;  %v627_v2 = vmul.f32 %v616_v56, %v606_v60  ;;  %s1849_s11 = smov [#allocation12] }
 0x211   : >>> { %v841_v3 = vmul.f32 %v837_v57, %v830_v62  ;;  %v844_v4 = vmul.f32 %v838_v58, %v830_v62  ;;  %v848_v5 = vmul.f32 %v839_v59, %v830_v62  ;;  %v851_v8 = vmul.f32 %v840_v61, %v830_v62 }
 0x213   : >>> { %v608_v9 = vld [vmem:[%s607_s26] sm:$0xff]  ;;  %s635_s26 = smov [#allocation30] }
 0x214   : >>> { %v832_v10 = vld [vmem:[%s831_s25] sm:$0xff]  ;;  %v618_v11 = vmul.f32 %v615_v55, %v608_v9  ;;  %v621_v12 = vmul.f32 %v616_v56, %v608_v9  ;;  %v623_v13 = vmul.f32 %v613_v53, %v608_v9  ;;  %v626_v14 = vmul.f32 %v614_v54, %v608_v9  ;;  %s633_s25 = smov [#allocation29] }
 0x215   : >>> { %v842_v15 = vmul.f32 %v839_v59, %v832_v10  ;;  %v845_v16 = vmul.f32 %v840_v61, %v832_v10  ;;  %v847_v17 = vmul.f32 %v837_v57, %v832_v10  ;;  %v850_v18 = vmul.f32 %v838_v58, %v832_v10  ;;  %v634_v27 = vld [vmem:[%s633_s25] ss:$0 sm:$0xff]  ;;  %s662_s25 = smov [#allocation27] }
 0x216   : >>> { %v619_v19 = vsub.f32 %v617_v63, %v618_v11  ;;  %v622_v20 = vsub.f32 %v620_v0, %v621_v12  ;;  %v625_v21 = vadd.f32 %v624_v1, %v623_v13  ;;  %v628_v22 = vadd.f32 %v627_v2, %v626_v14  ;;  %v636_v28 = vld [vmem:[%s635_s26] ss:$0 sm:$0xff]  ;;  %s661_s26 = smov [#allocation20] }
 0x217   : >>> { %v843_v23 = vsub.f32 %v841_v3, %v842_v15  ;;  %v846_v24 = vsub.f32 %v844_v4, %v845_v16  ;;  %v849_v25 = vadd.f32 %v848_v5, %v847_v17  ;;  %v852_v26 = vadd.f32 %v851_v8, %v850_v18  ;;  %v669_v63 = vld [vmem:[%s662_s25] ss:$0 sm:$0xff]  ;;  %s905_s25 = sadd.s32 (%p462_p9), 1, %s1645_s17  }
 0x218   : >>> { %630 = vst [vmem:[%s1819_s15] sm:$0x3] %v622_v20  ;;  %632 = vst [vmem:[%s1823_s16] sm:$0x3] %v628_v22  ;;  %s1855_s15 = smov [#allocation20]  ;;  %s703_s16 = smov [#allocation28] }
 0x219   : >>> { %629 = vst [vmem:[%s1817_s29] sm:$0x3] %v619_v19  ;;  %631 = vst [vmem:[%s1821_s24] sm:$0x3] %v625_v21  ;;  %s1857_s24 = smov [#allocation16]  ;;  %s1865_s29 = smov [#allocation21]  ;;  %v710_v59 = vld [vmem:[%s703_s16] ss:$0 sm:$0xff] }
 0x21a   : >>> { %853 = vst [vmem:[%s1825_s30] sm:$0x3] %v843_v23  ;;  %854 = vst [vmem:[%s1827_s23] sm:$0x3] %v846_v24  ;;  %s1859_s23 = smov [#allocation14]  ;;  %s689_s30 = smov [#allocation22] }
 0x21b   : >>> { %855 = vst [vmem:[%s1829_s21] sm:$0x3] %v849_v25  ;;  %856 = vst [vmem:[%s1833_s27] sm:$0x3] %v852_v26  ;;  %s1863_s27 = smov [#allocation18]  ;;  %s702_s21 = smov [#allocation23] }
 0x21c   : >>> { %s805_s16 = smov [#allocation21]  ;;  %p458_p10 = scmp.ge.s32.totalorder (%p462_p9), %s905_s25, 15 }
 0x21d   : >> { %s2042_s17 = smov (%p462_p9), %s905_s25 }
 0x21f   : >>> { %v644_v30 = vld [vmem:[%s1853_s14] sm:$0x3] }
 0x220   : >>> { %v643_v29 = vld [vmem:[%s1851_s22] sm:$0x3]  ;;  %v652_v36 = vmul.f32 %v644_v30, %v636_v28  ;;  %v655_v42 = vmul.f32 %v644_v30, %v634_v27 }
 0x221   : >>> { %v641_v31 = vld [vmem:[%s1855_s15] sm:$0x3]  ;;  %v651_v35 = vmul.f32 %v643_v29, %v634_v27  ;;  %v654_v37 = vmul.f32 %v643_v29, %v636_v28 }
 0x222   : >>> { %v859_v32 = vld [vmem:[%s1849_s11] ss:$0 sm:$0xff]  ;;  %v1531_v34 = vld [vmem:[%s1849_s11 + $0x1] ss:$0 sm:$0xff]  ;;  %v645_v48 = vmul.f32 %v641_v31, %v634_v27  ;;  %v648_v49 = vmul.f32 %v641_v31, %v636_v28 }
 0x223   : >>> { %v1530_v33 = vld [vmem:[%s1849_s11 - $0x1] sm:$0x2]  ;;  %v1533_v40 = vld [vmem:[%s1857_s24 + $0x1] sm:$0x1]  ;;  %v653_v47 = vsub.f32 %v651_v35, %v652_v36  ;;  %v656_v53 = vadd.f32 %v655_v42, %v654_v37 }
 0x224   : >>> { %v866_v38 = vsel %vm789_vm14, %v859_v32, %v1530_v33  ;;  %v870_v39 = vld [vmem:[%s1857_s24] ss:$0 sm:$0xff]  ;;  %v878_v43 = vsel %vm801_vm15, %v1531_v34, %v1533_v40  ;;  %v1535_v45 = vld [vmem:[%s1859_s23 + $0x1] ss:$0 sm:$0xff] }
 0x225   : >>> { %v883_v41 = vld [vmem:[%s1859_s23] ss:$0 sm:$0xff]  ;;  %869 = vst [vmem:[%s1849_s11] sm:$0x3] %v866_v38  ;;  %880 = vst [vmem:[%s1857_s24] sm:$0x3] %v878_v43  ;;  %v1537_v51 = vld [vmem:[%s1863_s27 + $0x1] sm:$0x1] }
 0x226   : >>> { %v1534_v44 = vld [vmem:[%s1859_s23 - $0x1] sm:$0x2]  ;;  %1532 = vst [vmem:[%s1849_s11 + $0x1] sm:$0x1] %v870_v39  ;;  %v902_v54 = vsel %vm801_vm15, %v1535_v45, %v1537_v51  ;;  %659 = vst [vmem:[%s1851_s22] sm:$0x3] %v653_v47  ;;  %s676_s11 = smov [#allocation21] }
 0x227   : >>> { %v894_v46 = vld [vmem:[%s1863_s27] ss:$0 sm:$0xff]  ;;  %v890_v50 = vsel %vm789_vm14, %v883_v41, %v1534_v44  ;;  %660 = vst [vmem:[%s1853_s14] sm:$0x3] %v656_v53  ;;  %s1907_s22 = smov [#allocation22]  ;;  %s1652_s14 = smov 1  }
 0x228   : >>> { %v642_v52 = vld [vmem:[%s1865_s29] sm:$0x3]  ;;  %893 = vst [vmem:[%s1859_s23] sm:$0x3] %v890_v50  ;;  %904 = vst [vmem:[%s1863_s27] sm:$0x3] %v902_v54  ;;  %s718_s24 = smov [#allocation21]  ;;  %s1910_s27 = smov [#allocation23] }
 0x229   : >>> { %v646_v55 = vmul.f32 %v642_v52, %v636_v28  ;;  %v649_v56 = vmul.f32 %v642_v52, %v634_v27  ;;  %1536 = vst [vmem:[%s1859_s23 + $0x1] sm:$0x1] %v894_v46  ;;  %s1653_s23 = smov 127  }
 0x22b   : >>> { %v647_v57 = vsub.f32 %v645_v48, %v646_v55  ;;  %v650_v58 = vadd.f32 %v649_v56, %v648_v49 }
 0x22d   : >>> { %657 = vst [vmem:[%s1855_s15] sm:$0x3] %v647_v57  ;;  %658 = vst [vmem:[%s1865_s29] sm:$0x3] %v650_v58  ;;  %v696_v60 = vld [vmem:[%s689_s30] sm:$0x3]  ;;  %s717_s15 = smov [#allocation20]  ;;  %s781_s29 = smov [#allocation20] }
 0x22e   : >>> { %v700_v61 = vsel %vm699_vm0, 0.0, %v696_v60  ;;  %v711_v62 = vld [vmem:[%s702_s21] sm:$0x3] }
 0x22f   : >>> { %701 = vst [vmem:[%s689_s30] sm:$0x3] %v700_v61  ;;  %v715_v0 = vsel %vm714_vm1, %v710_v59, %v711_v62  ;;  %s782_s30 = smov [#allocation22] }
 0x230   : >>> { %716 = vst [vmem:[%s702_s21] sm:$0x3] %v715_v0  ;;  %s806_s21 = smov [#allocation23] }
 0x234   : >>> { %v670_v1 = vld [vmem:[%s661_s26] sm:$0x3] }
 0x235   : >>> { %v683_v2 = vld [vmem:[%s676_s11] sm:$0x3]  ;;  %v674_v3 = vsel %vm673_vm3, %v669_v63, %v670_v1 }
 0x236   : >>> { %v687_v4 = vsel %vm686_vm4, 0.0, %v683_v2  ;;  %675 = vst [vmem:[%s661_s26] sm:$0x3] %v674_v3  ;;  %v755_v5 = vld [vmem:[%s1907_s22] sm:$0x3]  ;;  %s370_s26 = smov (%p462_p9), [#allocation20] }
 0x237   : >>> { %688 = vst [vmem:[%s676_s11] sm:$0x3] %v687_v4  ;;  %756 = vrot.lane.b32.xlu0 %v755_v5, %s1652_s14  ;;  %v751_v11 = vld [vmem:[%s1910_s27] sm:$0x3]  ;;  %s389_s11 = smov (%p462_p9), [#allocation21] }
 0x238   : >>> { %v772_v12 = vld [vmem:[%s1910_s27] sm:$0x3] }
 0x239   : >>> { %v754_v30 = vld [vmem:[%s1907_s22] sm:$0x3] }
 0x23d   : >>> { %v723_v8 = vld [vmem:[%s717_s15] sm:$0x3] }
 0x23e   : >>> { %724 = vrot.lane.b32.xlu1 %v723_v8, %s1652_s14  ;;  %v719_v9 = vld [vmem:[%s718_s24] sm:$0x3] }
 0x23f   : >>> { %v740_v10 = vld [vmem:[%s718_s24] sm:$0x3] }
 0x240   : >>> { %v722_v18 = vld [vmem:[%s717_s15] sm:$0x3] }
 0x242   : >>> { %720 = vrot.lane.b32.xlu1 %v719_v9, %s1652_s14 }
 0x246   : >>> { %741 = vrot.lane.b32.xlu1 %v740_v10, %s1653_s23 }
 0x24a   : >>> { %752 = vrot.lane.b32.xlu1 %v751_v11, %s1652_s14  ;;  %s423_s14 = smov (%p462_p9), [#allocation23] }
 0x24e   : >>> { %773 = vrot.lane.b32.xlu1 %v772_v12, %s1653_s23 }
 0x2a9   : >>> { %v757_v20 = vpop.permute.xlu0 %756 }
 0x2aa   : >>> { %v761_v22 = vsel %vm728_vm5, %v755_v5, %v757_v20 }
 0x2b0   : >>> { %v725_v13 = vpop.permute.xlu1 %724 }
 0x2b1   : >>> { %v729_v14 = vsel %vm728_vm5, %v723_v8, %v725_v13 }
 0x2b4   : >>> { %v721_v15 = vpop.permute.xlu1 %720 }
 0x2b5   : >>> { %v733_v16 = vsel %vm732_vm6, %v721_v15, %v729_v14 }
 0x2b6   : >>> { %v739_v17 = vsel %vm1391_vm2, %v733_v16, 0.0 }
 0x2b7   : >>> { %747 = vst [vmem:[%s717_s15] sm:$0x3] %v739_v17 }
 0x2b8   : >>> { %v742_v19 = vpop.permute.xlu1 %741 }
 0x2b9   : >>> { %v746_v21 = vsel %vm732_vm6, %v722_v18, %v742_v19 }
 0x2ba   : >>> { %748 = vst [vmem:[%s718_s24] sm:$0x3] %v746_v21 }
 0x2bc   : >>> { %v753_v23 = vpop.permute.xlu1 %752 }
 0x2bd   : >>> { %v765_v24 = vsel %vm732_vm6, %v753_v23, %v761_v22 }
 0x2be   : >>> { %v783_v25 = vld [vmem:[%s781_s29] ss:$0 sm:$0xff]  ;;  %v1523_v27 = vld [vmem:[%s781_s29 + $0x1] ss:$0 sm:$0xff]  ;;  %v771_v29 = vsel %vm1391_vm2, %v765_v24, 0.0 }
 0x2bf   : >>> { %v1522_v26 = vld [vmem:[%s781_s29 - $0x1] sm:$0x2]  ;;  %779 = vst [vmem:[%s1907_s22] sm:$0x3] %v771_v29  ;;  %s406_s22 = smov (%p462_p9), [#allocation22] }
 0x2c0   : >>> { %v790_v28 = vsel %vm789_vm14, %v783_v25, %v1522_v26  ;;  %v774_v31 = vpop.permute.xlu1 %773 }
 0x2c1   : >>> { %793 = vst [vmem:[%s781_s29] sm:$0x3] %v790_v28  ;;  %v807_v32 = vld [vmem:[%s805_s16] ss:$0 sm:$0xff]  ;;  %v1527_v34 = vld [vmem:[%s805_s16 + $0x1] ss:$0 sm:$0xff]  ;;  %v778_v35 = vsel %vm732_vm6, %v754_v30, %v774_v31 }
 0x2c2   : >>> { %v1526_v33 = vld [vmem:[%s805_s16 - $0x1] sm:$0x2]  ;;  %780 = vst [vmem:[%s1910_s27] sm:$0x3] %v778_v35 }
 0x2c3   : >>> { %v814_v36 = vsel %vm789_vm14, %v807_v32, %v1526_v33 }
 0x2c4   : >>> { %817 = vst [vmem:[%s805_s16] sm:$0x3] %v814_v36 }
 0x2c6   : >>> { %v794_v37 = vld [vmem:[%s782_s30] ss:$0 sm:$0xff]  ;;  %v1525_v38 = vld [vmem:[%s782_s30 + $0x1] sm:$0x1] }
 0x2c7   : >>> { %1524 = vst [vmem:[%s781_s29 + $0x1] sm:$0x1] %v794_v37  ;;  %v802_v39 = vsel %vm801_vm15, %v1523_v27, %v1525_v38  ;;  %464 = sbr.rel (!%p462_p9) target bundleno = 279 (0x117), region = 462 }
 0x2c8   : >>> { %804 = vst [vmem:[%s782_s30] sm:$0x3] %v802_v39 }
 0x2c9   : >>> { %v818_v40 = vld [vmem:[%s806_s21] ss:$0 sm:$0xff]  ;;  %v1529_v41 = vld [vmem:[%s806_s21 + $0x1] sm:$0x1] }
 0x2ca   : >>> { %1528 = vst [vmem:[%s805_s16 + $0x1] sm:$0x1] %v818_v40  ;;  %v826_v42 = vsel %vm801_vm15, %v1527_v34, %v1529_v41 }
 0x2cb   : >>> { %828 = vst [vmem:[%s806_s21] sm:$0x3] %v826_v42 }
 0x2ce   : >> { %v376_v43 = vld [vmem:[%s370_s26] sm:$0x3] }
 0x2cf   : >> { %v377_v45 = vsel %vm1391_vm2, %v376_v43, 0.0  ;;  %v412_v47 = vld [vmem:[%s406_s22] sm:$0x3] }
 0x2d0   : >> { %v378_v49 = vmul.f32 %v377_v45, %v377_v45  ;;  %v413_v51 = vsel %vm1391_vm2, %v412_v47, 0.0 }
 0x2d1   : >> { %v395_v44 = vld [vmem:[%s389_s11] sm:$0x3]  ;;  %v414_v53 = vmul.f32 %v413_v51, %v413_v51 }
 0x2d2   : >> { %v396_v46 = vsel %vm1391_vm2, %v395_v44, 0.0  ;;  %v429_v48 = vld [vmem:[%s423_s14] sm:$0x3]  ;;  %v382_v56 = vsel %vm381_vm7, 0.0, %v378_v49 }
 0x2d3   : >> { %v397_v50 = vmul.f32 %v396_v46, %v396_v46  ;;  %v430_v52 = vsel %vm1391_vm2, %v429_v48, 0.0 }
 0x2d4   : >> { %v431_v55 = vmul.f32 %v430_v52, %v430_v52 }
 0x2d5   : >> { %v399_v54 = vadd.f32 %v397_v50, %v378_v49  ;;  %v398_v57 = vadd.f32 %v397_v50, %v382_v56 }
 0x2d6   : >> { %v435_v60 = vsel %vm434_vm8, 0.0, %v431_v55 }
 0x2d7   : >> { %v416_v58 = vadd.f32 %v414_v53, %v399_v54  ;;  %v415_v59 = vadd.f32 %v414_v53, %v398_v57 }
 0x2d9   : >> { %v437_v61 = vadd.f32 %v431_v55, %v416_v58  ;;  %v436_v62 = vadd.f32 %v435_v60, %v415_v59 }
 0x2db   : >> { %438 = vadd.xlane.f32.xlu0 %v437_v61 }
 0x2df   : >> { %446 = vadd.xlane.f32.xlu0 %v436_v62 }
 0x368   : >> { %v439_v63 = vpop.xlane.xlu0 %438 }
 0x369   : >> { %v440_v0 = vrot.slane %v439_v63, 4 }
 0x36b   : >> { %v441_v1 = vadd.f32 %v440_v0, %v439_v63 }
 0x36c   : >> { %v447_v2 = vpop.xlane.xlu0 %446 }
 0x36d   : >> { %v442_v3 = vrot.slane %v441_v1, 2  ;;  %v448_v4 = vrot.slane %v447_v2, 4 }
 0x36f   : >> { %v449_v5 = vadd.f32 %v448_v4, %v447_v2  ;;  %v443_v8 = vadd.f32 %v442_v3, %v441_v1 }
 0x371   : >> { %v450_v9 = vrot.slane %v449_v5, 2  ;;  %v444_v11 = vrot.slane %v443_v8, 1 }
 0x373   : >> { %v451_v10 = vadd.f32 %v450_v9, %v449_v5  ;;  %v445_v14 = vadd.f32 %v444_v11, %v443_v8 }
 0x375   : >> { %v452_v12 = vrot.slane %v451_v10, 1 }
 0x377   : >> { %v453_v13 = vadd.f32 %v452_v12, %v451_v10 }
 0x379   : >> { %1556 = vpush %v453_v13 }
 0x37a   : >> { %1558 = vpush %v445_v14 }
 0x3aa   : >> { %s1557_s20 = spop %1556 }
 0x3ab   : >> { %s1559_s15 = spop %1558 }
 0x3ac   : >> { %s456_s24 = smul.f32 1e-10, %s1559_s15 }
 0x3ae   : >> { %p457_p11 = scmp.le.f32.partialorder %s1557_s20, %s456_s24 }
 0x3b0   : >> { %p459_p12 = por %p458_p10, %p457_p11 }
 0x3b2   : > { %907 = sbr.rel (!%p459_p12) target bundleno = 278 (0x116), region = 473 }
 0x3b9 PF: > { %s912_s23 = smov [#allocation20]  ;;  %v916_v6 = vmov %v1761_v6  ;;  %v919_v7 = vmov %v1763_v7  ;;  %v967_v15 = vld [vmem:[#allocation12] sm:$0x3]  ;;  %v973_v16 = vld [vmem:[#allocation14] sm:$0x3]  ;;  %s2043_s17 = scalar_lea.vmem [#allocation13], %s1757_s28 }
 0x3ba   : > { %v936_v6 = vmov %v1761_v6  ;;  %v939_v7 = vmov %v1763_v7  ;;  %v920_v17 = vld [vmem:[%s912_s23] sm:$0x3]  ;;  %vm923_vm9 = vcmp.eq.s32.totalorder %v919_v7, %v916_v6  ;;  %969 = vst [vmem:[%s2043_s17] sm:$0x3] %v967_v15  ;;  %s2044_s27 = scalar_lea.vmem [#allocation15], %s1757_s28  ;;  %s932_s29 = smov [#allocation23] }
 0x3bb   : > { %vm943_vm10 = vcmp.eq.s32.totalorder %v939_v7, %v936_v6  ;;  %975 = vst [vmem:[%s2044_s27] sm:$0x3] %v973_v16  ;;  %v979_v18 = vld [vmem:[#allocation16] sm:$0x3]  ;;  %v924_v19 = vsel %vm923_vm9, %v920_v17, 0.0  ;;  %s2045_s16 = scalar_lea.vmem [#allocation17], %s1757_s28  ;;  %s2046_s30 = scalar_lea.vmem [#allocation19], %s1757_s28 }
 0x3bc   : > { %981 = vst [vmem:[%s2045_s16] sm:$0x3] %v979_v18  ;;  %v985_v20 = vld [vmem:[#allocation18] sm:$0x3]  ;;  %v925_v21 = vrot.slane %v924_v19, 4  ;;  %v940_v22 = vld [vmem:[%s932_s29] sm:$0x3] }
 0x3bd   : > { %987 = vst [vmem:[%s2046_s30] sm:$0x3] %v985_v20  ;;  %v944_v23 = vsel %vm943_vm10, %v940_v22, 0.0  ;;  %s908_s21 = sand.u32 7, %s1720_s12   ;;  %s2047_s11 = scalar_lea.vmem [#allocation9], %s1759_s18 }
 0x3be   : > { %v926_v24 = vadd.f32 %v925_v21, %v924_v19  ;;  %v945_v25 = vrot.slane %v944_v23, 4  ;;  %s909_s25 = scalar_lea.vmem [#allocation8], %s908_s21  ;;  %s911_s26 = scalar_lea.vmem [#allocation10], %s908_s21 }
 0x3bf   : > { %s913_s25 = smov %s909_s25  ;;  %s933_s26 = smov %s911_s26 }
 0x3c0   : > { %v927_v26 = vrot.slane %v926_v24, 2  ;;  %v946_v6 = vadd.f32 %v945_v25, %v944_v23  ;;  %s2048_s22 = scalar_lea.vmem [#allocation11], %s1759_s18  ;;  %s1015_s14 = sshrl.u32 (%p1734_p3), %s1720_s12, 3 }
 0x3c1   : > { %s2049_s20 = scalar_lea.vmem (%p1734_p3), [#allocation9], %s1759_s18  ;;  %s1544_s15 = sshll.u32 (%p1734_p3), %s1015_s14, 1 }
 0x3c2   : > { %v928_v7 = vadd.f32 %v927_v26, %v926_v24  ;;  %v947_v27 = vrot.slane %v946_v6, 2  ;;  %s1017_s17 = scalar_lea.vmem (%p1734_p3), %s2034_s4, %s1544_s15 }
 0x3c4   : > { %v929_v28 = vrot.slane %v928_v7, 1  ;;  %v948_v29 = vadd.f32 %v947_v27, %v946_v6 }
 0x3c6   : > { %v930_v30 = vadd.f32 %v929_v28, %v928_v7  ;;  %v949_v31 = vrot.slane %v948_v29, 1 }
 0x3c8   : > { %931 = vst [vmem:[%s913_s25] sm:$0x1] %v930_v30  ;;  %v950_v32 = vadd.f32 %v949_v31, %v948_v29 }
 0x3ca   : > { %951 = vst [vmem:[%s933_s26] sm:$0x1] %v950_v32 }
 0x3cc   : > { %1014 = sbr.rel (!%p1734_p3) target bundleno = 985 (0x3d9), region = 158 }
 0x3cf   : > { %v955_v33 = vld [vmem:[#allocation8] sm:$0x3] }
 0x3d0   : > { %957 = vst [vmem:[%s2047_s11] sm:$0x3] %v955_v33 }
 0x3d1   : > { %v961_v34 = vld [vmem:[#allocation10] sm:$0x3] }
 0x3d2   : > { %963 = vst [vmem:[%s2048_s22] sm:$0x3] %v961_v34 }
 0x3d7   : > { %v1033_v35 = vld [vmem:[%s2049_s20] sm:$0x3] }
 0x3d8   : > { %1034 = vst [vmem:[%s1017_s17] sm:$0x3] %v1033_v35 }
 0x3d9 PF: > { %1051 = sbr.rel (!%p1734_p3) target bundleno = 993 (0x3e1), region = 192  ;;  %s1052_s27 = sshrl.u32 (%p1734_p3), %s1720_s12, 3 }
 0x3da   : > { %s2050_s29 = scalar_lea.vmem (%p1734_p3), [#allocation11], %s1759_s18  ;;  %s1545_s16 = sshll.u32 (%p1734_p3), %s1052_s27, 1 }
 0x3db   : > { %s1054_s25 = scalar_lea.vmem (%p1734_p3), %s2035_s5, %s1545_s16 }
 0x3df   : > { %v1070_v36 = vld [vmem:[%s2050_s29] sm:$0x3] (%p1734_p3) }
 0x3e0   : > { %1071 = vst [vmem:[%s1054_s25] sm:$0x3] %v1070_v36 }
 0x3e1 PF: > { %s1546_s26 = sshll.u32 %s1720_s12, 1  ;;  %s2051_s19 = scalar_lea.vmem [#allocation13], %s1757_s28 }
 0x3e2   : > { %v1103_v37 = vld [vmem:[%s2051_s19] sm:$0x3]  ;;  %s2052_s11 = scalar_lea.vmem [#allocation15], %s1757_s28  ;;  %s1087_s14 = scalar_lea.vmem %s2036_s6, %s1546_s26 }
 0x3e3   : > { %v1136_v38 = vld [vmem:[%s2052_s11] sm:$0x3]  ;;  %s1120_s24 = scalar_lea.vmem %s2037_s7, %s1546_s26  ;;  %s2053_s23 = scalar_lea.vmem [#allocation17], %s1757_s28  ;;  %1104 = vst [vmem:[%s1087_s14] sm:$0x3] %v1103_v37 }
 0x3e4   : > { %v1169_v39 = vld [vmem:[%s2053_s23] sm:$0x3]  ;;  %s2054_s17 = scalar_lea.vmem [#allocation19], %s1757_s28  ;;  %1137 = vst [vmem:[%s1120_s24] sm:$0x3] %v1136_v38  ;;  %s1153_s29 = scalar_lea.vmem %s2038_s8, %s1546_s26 }
 0x3e5   : > { %v1202_v40 = vld [vmem:[%s2054_s17] sm:$0x3]  ;;  %s1186_s21 = scalar_lea.vmem %s2039_s9, %s1546_s26  ;;  %1170 = vst [vmem:[%s1153_s29] sm:$0x3] %v1169_v39 }
 0x3e6   : > { %1203 = vst [vmem:[%s1186_s21] sm:$0x3] %v1202_v40 }
 0x3e7 PF: > { %s2055_s25 = sld [smem:[#allocation33_spill]]  ;;  %p13_p13 = scmp.ge.s32.totalorder %s1723_s13, 4  }
 0x3e8   : > { %s2056_s30 = smov %s1637_s10  ;;  %s2058_s11 = smov %s1723_s13 }
 0x3e9   :  { %15 = sbr.rel (!%p13_p13) target bundleno = 2 (0x2), region = 484 }
 0x3ed   : > { %s2057_s10 = smov %s2055_s25 }

// kernel: reverse
= control target key start
LH: loop header
LB: loop body
LE: loop exit
PB: predicated region body
PF: predicated region fallthrough
CT: control target
= control target key end

     0   :  { %v2_v0 = vlaneseq  ;;  %s105_s0 = inlined_call_operand.vmem [shape: f32[2,3], index: 0, kind: input, shape index: {}]   ;;  %s106_s1 = inlined_call_operand.vmem [shape: f32[2,3], index: 1, kind: output, shape index: {}]  }
   0x2   :  { %v3_v1 = vsub.s32 2, %v2_v0 }
   0x4   :  { %4 = vset.pattern.permute.xlu0 %v3_v1 }
   0x5   :  { %v20_v2 = vld [vmem:[%s105_s0] sm:$0x3] }
   0x6   :  { %21 = vst [vmem:[#allocation1] sm:$0x3] %v20_v2 }
   0xd   :  { %v38_v3 = vld [vmem:[#allocation1] sm:$0x3] }
   0xe   :  { %39 = vst [vmem:[#allocation0] sm:$0x3] %v38_v3 }
  0x15   :  { %v40_v4 = vld [vmem:[#allocation0] sm:$0xff] }
  0x16   :  { %41 = vperm.xlu0 %4, %v40_v4  }
  0x95   :  { %v42_v5 = vpop.permute.xlu0 %41 }
  0x96   :  { %43 = vst [vmem:[#allocation2] sm:$0xff] %v42_v5 }
  0x9d   :  { %v47_v6 = vld [vmem:[#allocation2] sm:$0x3] }
  0x9e   :  { %49 = vst [vmem:[#allocation3] sm:$0x3] %v47_v6 }
  0xa5   :  { %v65_v7 = vld [vmem:[#allocation3] sm:$0x3] }
  0xa6   :  { %66 = vst [vmem:[%s106_s1] sm:$0x3] %v65_v7 }

// kernel: custom-call.16
= control target key start
LH: loop header
LB: loop body
LE: loop exit
PB: predicated region body
PF: predicated region fallthrough
CT: control target
= control target key end

     0   :  { %s653_s9 = smov 0   ;;  %s655_s10 = smov 0   ;;  %s799_s0 = inlined_call_operand.vmem [shape: f32[2,3,3], index: 0, kind: input, shape index: {}]   ;;  %s800_s1 = inlined_call_operand.vmem [shape: f32[2,3,3], index: 1, kind: output, shape index: {0}]   ;;  %s801_s2 = inlined_call_operand.vmem [shape: f32[2,3], index: 2, kind: output, shape index: {1}]  }
   0x1   :  { %s657_s11 = smov 0   ;;  %s659_s12 = smov 0  }
   0x2   :  { %s661_s13 = smov 0  }
   0x3 LB: > { %s28_s14 = sadd.s32 1, %s626_s12  ;;  %s508_s15 = sadd.s32 4294967295, %s630_s13   ;;  %s630_s13 = sphi %s661_s13, %s9_s13   ;;  %s626_s12 = sphi %s659_s12, %s808_s12   ;;  %s622_s11 = sphi %s657_s11, %s807_s11   ;;  %s618_s10 = sphi %s655_s10, %s806_s10   ;;  %s614_s9 = sphi %s653_s9, %s805_s9  }
   0x4   : > { %p30_p0 = scmp.ge.s32.totalorder %s28_s14, 2  ;;  %s33_s16 = ssub.s32 0, %s626_s12 }
   0x5   : > { %s510_s17 = smin.u32 %s626_s12, %s33_s16  ;;  %p57_p1 = scmp.ne.s32.totalorder %s618_s10, %s614_s9 }
   0x6   : > { %s810_s14 = smov (%p30_p0, %s28_s14), 0  ;;  %s35_s18 = sshrl.u32 %s510_s17, 3 }
   0x7   : > { %s39_s19 = ssub.s32 0, %s810_s14  ;;  %p58_p2 = scmp.eq.s32.totalorder %s508_s15, 1 }
   0x8   : > { %s511_s20 = smin.u32 %s39_s19, %s810_s14  ;;  %s47_s24 = sadd.s32 1, %s618_s10 }
   0x9   : > { %s41_s21 = sshrl.u32 %s511_s20, 3  ;;  %p688_p3 = por %p58_p2, %p57_p1 }
   0xa   : > { %s44_s23 = ssub.s32 %s35_s18, %s41_s21  ;;  %p513_p5 = scmp.ge.s32.totalorder %s630_s13, 2 }
   0xb   : > { %p45_p4 = scmp.eq.s32.totalorder %s44_s23, 0  ;;  %s82_s26 = sand.u32 (!%p513_p5), 1, %s630_s13  }
   0xc   : > { %80 = sbr.rel (%p513_p5) target bundleno = 19 (0x13), region = 16  ;;  %s515_s27 = sshll.u32 (!%p513_p5), %s626_s12, 2 }
   0xd   : > { %s694_s25 = scalar_select %p45_p4, %s618_s10, %s47_s24  }
   0xe   : > { %s514_s28 = sshll.u32 (!%p513_p5), %s82_s26, 2  ;;  %s88_s3 = scalar_lea.vmem (!%p513_p5), %s799_s0, %s515_s27 }
   0xf   : > { %v104_v0 = vld [vmem:[%s88_s3] sm:$0xf] (!%p513_p5)  ;;  %s84_s4 = scalar_lea.vmem (!%p513_p5), [#allocation1], %s514_s28 }
  0x10   : > { %105 = vst [vmem:[%s84_s4] sm:$0xf] (!%p513_p5), %v104_v0 }
  0x13 PF: > { %p516_p6 = scmp.ge.s32.totalorder %s630_s13, 1  ;;  %p121_p7 = scmp.lt.s32.totalorder %s630_s13, 3 }
  0x15   : > { %p122_p8 = pnand %p516_p6, %p121_p7 }
  0x17   : > { %125 = sbr.rel (%p122_p8) target bundleno = 346 (0x15a), region = 50 }
  0x1e   : > { %s132_s5 = sand.u32 1, %s508_s15   ;;  %s142_s6 = sand.u32 1, %s614_s9   ;;  %v636_v2 = vmov 0.0  }
  0x1f   : > { %s517_s7 = sshll.u32 %s132_s5, 2  ;;  %s705_s8 = sshll.u32 %s142_s6, 1 }
  0x20   : > { %s134_s16 = scalar_lea.vmem [#allocation1], %s517_s7  ;;  %s155_s17 = sand.u32 7, %s622_s11  }
  0x21   : > { %v147_v1 = vld [vmem:[%s134_s16] sm:$0xf]  ;;  %s708_s18 = scalar_lea.vmem [#allocation4], %s155_s17  ;;  %s711_s19 = scalar_lea.vmem [#allocation3], %s517_s7 }
  0x22   : > { %148 = vst [vmem:[#allocation0] sm:$0xf] %v147_v1  ;;  %159 = vst [vmem:[%s708_s18] sm:$0x1] %v636_v2  ;;  %s144_s15 = scalar_lea.vmem [#allocation5], %s705_s8  ;;  %s714_s20 = smov 0  }
  0x29   : > { %v157_v3 = vld [vmem:[#allocation0] sm:$0xff] }
  0x2a   : > { %158 = vst [vmem:[#allocation2] sm:$0xff] %v157_v3 }
  0x2b LB: >> { %v167_v4 = vlaneseq  ;;  %v723_v6 = vstv %s634_s20  ;;  %s194_s9 = scalar_lea.vmem [#allocation2], %s634_s20  ;;  %s230_s21 = smov [#allocation2]  ;;  %v637_v60 = vmov 1.0   ;;  %v265_v61 = vld [vmem:[%s708_s18] ss:$0 sm:$0xff]  ;;  %s634_s20 = sphi %s714_s20, %s165_s20  }
  0x2c   : >> { %s252_s23 = scalar_lea.vmem [#allocation6], %s634_s20  ;;  %s268_s24 = smov [#allocation2] }
  0x2d   : >> { %v720_v5 = vshrl.u32 %v167_v4, 7  ;;  %v246_v49 = vand.u32 127, %v167_v4  ;;  %s269_s26 = smov [#allocation6] }
  0x2f   : >> { %vm171_vm0 = vcmp.gt.s32.totalorder %v720_v5, %v723_v6  ;;  %vm172_vm1 = vcmp.lt.s32.totalorder %v720_v5, 3  ;;  %v233_v5 = vmov %v720_v5  ;;  %vm738_vm12 = vcmp.eq.s32.totalorder %v246_v49, %v723_v6 }
  0x30   : >> { %vm173_vm2 = vmand %vm171_vm0, %vm172_vm1  ;;  %vm237_vm9 = vcmp.gt.s32.totalorder %v233_v5, %v723_v6  ;;  %vm238_vm10 = vcmp.lt.s32.totalorder %v233_v5, 3  ;;  %v272_v5 = vmov %v720_v5  ;;  %vm298_vm15 = vcmp.gt.s32.totalorder %v246_v49, %v723_v6 }
  0x31   : >> { %v166_v7 = vld [vmem:[#allocation2] sm:$0xff]  ;;  %v195_v16 = vld [vmem:[%s194_s9] ss:$0 sm:$0xff]  ;;  %vm239_vm11 = vmand %vm237_vm9, %vm238_vm10  ;;  %vm277_vm13 = vcmp.lt.s32.totalorder %v272_v5, 3  ;;  %v289_v5 = vmov %v720_v5 }
  0x32   : >> { %v174_v8 = vsel %vm173_vm2, %v166_v7, 0.0  ;;  %v196_v17 = vand.u32 2147483647, %v195_v16  ;;  %vm221_vm8 = vcmp.lt.f32.partialorder %v195_v16, 0.0  ;;  %v234_v46 = vld [vmem:[%s230_s21] sm:$0xff]  ;;  %vm306_vm14 = vcmp.ge.s32.totalorder %v289_v5, %v723_v6 }
  0x33   : >> { %v175_v9 = vmul.f32 %v174_v8, %v174_v8  ;;  %v240_v50 = vsel %vm239_vm11, %v234_v46, 0.0  ;;  %v275_v0 = vld [vmem:[%s268_s24] sm:$0xff]  ;;  %s285_s24 = smov %s268_s24  ;;  %vm307_vm0 = vmand %vm738_vm12, %vm306_vm14 }
  0x34   : >> { %v197_v22 = vmax.f32 %v196_v17, 0.0  ;;  %s310_s27 = scalar_lea.vmem %s285_s24, %s634_s20  ;;  %s165_s20 = sadd.s32 1, %s634_s20  }
  0x35   : >> { %v176_v10 = vrot.slane %v175_v9, 4  ;;  %p162_p9 = scmp.ge.s32.totalorder %s165_s20, 3  }
  0x36   : > { %s523_s28 = sshll.u32 (%p162_p9), %s622_s11, 2 }
  0x37   : >> { %v177_v11 = vadd.f32 %v176_v10, %v175_v9  ;;  %s341_s3 = scalar_lea.vmem (%p162_p9), %s800_s1, %s523_s28 }
  0x39   : >> { %v178_v12 = vrot.slane %v177_v11, 2 }
  0x3b   : >> { %v179_v13 = vadd.f32 %v178_v12, %v177_v11 }
  0x3d   : >> { %v180_v14 = vrot.slane %v179_v13, 1 }
  0x3f   : >> { %v181_v15 = vadd.f32 %v180_v14, %v179_v13  ;;  %v296_v14 = vld [vmem:[%s285_s24] sm:$0xff] }
  0x41   : >> { %578 = vrsqrt.f32 %v181_v15  ;;  %vm184_vm3 = vcmp.eq.f32.partialorder %v181_v15, inf  ;;  %v187_v19 = vand.u32 2147483648, %v181_v15  ;;  %vm186_vm4 = vcmp.eq.f32.partialorder %v181_v15, 0.0 }
  0x4b   : >> { %v579_v18 = vpop.eup %578 }
  0x4c   : >> { %v183_v20 = vmul.f32 %v579_v18, %v181_v15 }
  0x4e   : >> { %v185_v21 = vsel %vm184_vm3, %v181_v15, %v183_v20 }
  0x4f   : >> { %v188_v23 = vsel %vm186_vm4, %v187_v19, %v185_v21 }
  0x50   : >> { %v198_v24 = vand.u32 2147483647, %v188_v23 }
  0x52   : >> { %v199_v25 = vmax.f32 %v197_v22, %v198_v24 }
  0x54   : >> { %580 = vrcp.f32 %v199_v25  ;;  %vm211_vm7 = vcmp.eq.f32.partialorder %v199_v25, 0.0 }
  0x5e   : >> { %v581_v26 = vpop.eup %580 }
  0x5f   : >> { %v201_v27 = vmul.f32 %v581_v26, %v196_v17  ;;  %v204_v28 = vmul.f32 0.0, %v581_v26  ;;  %v208_v29 = vmul.f32 %v581_v26, %v198_v24 }
  0x61   : >> { %v202_v30 = vmul.f32 %v201_v27, %v201_v27  ;;  %v205_v31 = vmul.f32 %v204_v28, %v204_v28  ;;  %v209_v32 = vmul.f32 %v208_v29, %v208_v29 }
  0x63   : >> { %v206_v33 = vadd.f32 %v205_v31, %v202_v30 }
  0x65   : >> { %v210_v34 = vadd.f32 %v209_v32, %v206_v33 }
  0x67   : >> { %582 = vrsqrt.f32 %v210_v34  ;;  %vm214_vm5 = vcmp.eq.f32.partialorder %v210_v34, inf  ;;  %v217_v36 = vand.u32 2147483648, %v210_v34  ;;  %vm216_vm6 = vcmp.eq.f32.partialorder %v210_v34, 0.0 }
  0x71   : >> { %v583_v35 = vpop.eup %582 }
  0x72   : >> { %v213_v37 = vmul.f32 %v583_v35, %v210_v34 }
  0x74   : >> { %v215_v38 = vsel %vm214_vm5, %v210_v34, %v213_v37 }
  0x75   : >> { %v218_v39 = vsel %vm216_vm6, %v217_v36, %v215_v38 }
  0x76   : >> { %v219_v40 = vmul.f32 %v218_v39, %v199_v25 }
  0x78   : >> { %v220_v41 = vsel %vm211_vm7, 0.0, %v219_v40 }
  0x79   : >> { %v222_v42 = vxor.u32 2147483648, %v220_v41 }
  0x7b   : >> { %v223_v43 = vsel %vm221_vm8, %v220_v41, %v222_v42 }
  0x7c   : >> { %v731_v44 = vsel %vm186_vm4, %v195_v16, %v223_v43  ;;  %584 = vrcp.f32 %v223_v43  ;;  %v224_v47 = vsub.f32 %v223_v43, %v195_v16 }
  0x7d   : >> { %v229_v45 = vsub.f32 %v195_v16, %v731_v44 }
  0x7f   : >> { %586 = vrcp.f32 %v229_v45 }
  0x86   : >> { %v585_v48 = vpop.eup %584 }
  0x87   : >> { %v226_v51 = vmul.f32 %v585_v48, %v224_v47 }
  0x89   : >> { %v587_v52 = vpop.eup %586  ;;  %v228_v56 = vsel %vm186_vm4, 0.0, %v226_v51 }
  0x8a   : >> { %v242_v53 = vmul.f32 %v587_v52, %v240_v50  ;;  %v258_v58 = vsel %vm738_vm12, %v228_v56, 0.0 }
  0x8c   : >> { %v243_v55 = vsel %vm186_vm4, 0.0, %v242_v53 }
  0x8d   : >> { %v248_v57 = vsel %vm738_vm12, %v243_v55, 0.0 }
  0x8e   : >> { %249 = vadd.xlane.f32.xlu0 %v248_v57 }
  0x92   : >> { %259 = vadd.xlane.f32.xlu0 %v258_v58 }
 0x11b   : >> { %v250_v59 = vpop.xlane.xlu0 %249 }
 0x11c   : >> { %251 = vst [vmem:[#allocation6] sm:$0xff] %v250_v59 }
 0x11d   : >> { %253 = vst [vmem:[%s252_s23] sm:$0x1] %v637_v60 }
 0x11f   : >> { %v260_v62 = vpop.xlane.xlu0 %259 }
 0x120   : >> { %v266_v63 = vsel %vm738_vm12, %v260_v62, %v265_v61 }
 0x121   : >> { %267 = vst [vmem:[%s708_s18] sm:$0x1] %v266_v63 }
 0x124   : >> { %v274_v1 = vld [vmem:[%s269_s26] sm:$0xff]  ;;  %s286_s26 = smov %s269_s26 }
 0x125   : >> { %v276_v2 = vmul.f32 %v275_v0, %v274_v1  ;;  %v294_v13 = vld [vmem:[%s286_s26] sm:$0xff] }
 0x127   : >> { %v278_v3 = vsel %vm277_vm13, %v276_v2, 0.0 }
 0x128   : >> { %v279_v4 = vrot.slane %v278_v3, 4  ;;  %v327_v6 = vld [vmem:[#allocation4] sm:$0x3] (%p162_p9) }
 0x129   : > { %329 = vst [vmem:[%s144_s15] sm:$0x3] (%p162_p9), %v327_v6 }
 0x12a   : >> { %v280_v7 = vadd.f32 %v279_v4, %v278_v3 }
 0x12c   : >> { %v281_v8 = vrot.slane %v280_v7, 2 }
 0x12e   : >> { %v282_v9 = vadd.f32 %v281_v8, %v280_v7 }
 0x130   : >> { %v283_v10 = vrot.slane %v282_v9, 1 }
 0x132   : >> { %v284_v11 = vadd.f32 %v283_v10, %v282_v9 }
 0x134   : >> { %v290_v12 = vmul.f32 %v284_v11, %v260_v62 }
 0x136   : >> { %v295_v15 = vmul.f32 %v294_v13, %v290_v12 }
 0x138   : >> { %v299_v16 = vsub.f32 %v296_v14, %v295_v15 }
 0x13a   : >> { %v300_v17 = vsel %vm298_vm15, %v299_v16, %v296_v14 }
 0x13b   : >> { %v308_v18 = vsel %vm307_vm0, %v294_v13, %v300_v17 }
 0x13c   : >> { %309 = vst [vmem:[%s285_s24] sm:$0xff] %v308_v18 }
 0x13f   : > { %164 = sbr.rel (!%p162_p9) target bundleno = 43 (0x2b), region = 167 }
 0x143   : >> { %v311_v19 = vld [vmem:[%s310_s27] ss:$0 sm:$0xff] }
 0x144   : >> { %v316_v20 = vsel %vm738_vm12, %v731_v44, %v311_v19 }
 0x145   : >> { %317 = vst [vmem:[%s310_s27] sm:$0x1] %v316_v20 }
 0x146   : > { %p376_p10 = scmp.lt.s32.totalorder (%p688_p3), %s622_s11, 0  ;;  %s377_s4 = ssub.s32 (%p688_p3), 0, %s622_s11  ;;  %v399_v22 = vld [vmem:[%s144_s15] sm:$0x3] (%p688_p3) }
 0x147   : > { %s524_s5 = smin.u32 (%p688_p3), %s622_s11, %s377_s4 }
 0x148   : > { %s379_s6 = sshrl.u32 (%p688_p3), %s524_s5, 3 }
 0x149   : > { %s380_s7 = ssub.s32 (%p688_p3), 0, %s379_s6 }
 0x14c   : > { %v321_v5 = vld [vmem:[#allocation2] sm:$0xf] }
 0x14d   : > { %323 = vst [vmem:[%s711_s19] sm:$0xf] %v321_v5 }
 0x14f   : > { %375 = sbr.rel (!%p688_p3) target bundleno = 346 (0x15a), region = 91 }
 0x154   : > { %v357_v21 = vld [vmem:[%s711_s19] sm:$0xf] }
 0x155   : > { %358 = vst [vmem:[%s341_s3] sm:$0xf] %v357_v21 }
 0x156   : > { %s812_s7 = smov (!%p376_p10, %s380_s7), %s379_s6 }
 0x157   : > { %s525_s16 = sshll.u32 %s812_s7, 1 }
 0x158   : > { %s383_s19 = scalar_lea.vmem %s801_s2, %s525_s16 }
 0x159   : > { %400 = vst [vmem:[%s383_s19] sm:$0x3] %v399_v22 }
 0x15a PF: > { %s9_s13 = sadd.s32 1, %s630_s13   ;;  %s805_s9 = smov %s618_s10 }
 0x15b   : > { %p6_p11 = scmp.ge.s32.totalorder %s9_s13, 4   ;;  %s806_s10 = smov %s694_s25 }
 0x15c   : > { %s807_s11 = smov %s626_s12  ;;  %s808_s12 = smov %s810_s14 }
 0x15d   :  { %8 = sbr.rel (!%p6_p11) target bundleno = 3 (0x3), region = 178 }

// kernel: neg.3
= control target key start
LH: loop header
LB: loop body
LE: loop exit
PB: predicated region body
PF: predicated region fallthrough
CT: control target
= control target key end

     0   :  { %2 = vsyncpa [#allocation1], 0  ;;  %s70_s0 = inlined_call_operand.vmem [shape: f32[2,3], index: 0, kind: input, shape index: {}]   ;;  %s71_s1 = inlined_call_operand.hbm [shape: f32[2,3], index: 1, kind: output, shape index: {}]  }
   0x1   :  { %v3_v0 = vld [vmem:[%s70_s0] sm:$0x3]  ;;  %s44_s0 = smov [#allocation0]  }
   0x2   :  { %v6_v1 = vxor.u32 2147483648, %v3_v0  ;;  %s13_s8 = sshll.u32 %s44_s0, 4  ;;  %s14_s8 = int_to_ptr.vmem [resolvable:$true] %s13_s8 }
   0x3   :  { %s20_s9 = scalar_lea.vmem %s14_s8, 32  ;;  %p25_p1 = scmp.lt.s32.totalorder %s14_s8, %s14_s8 }
   0x4   :  { %8 = vst [vmem:[#allocation0] sm:$0x3] %v6_v1  ;;  %p21_p0 = scmp.ne.s32.totalorder %s14_s8, %s20_s9  ;;  %p26_p2 = scmp.lt.s32.totalorder %s20_s9, %s20_s9 }
   0x6   :  { %p27_p3 = por %p26_p2, %p25_p1 }
   0x8   :  { %p28_p4 = pnand %p27_p3, %p21_p0 }
   0xa   :  { %31 = shalt.err (!%p28_p4)
}
   0xb   :  { %s32_s12 = scalar_lea.hbm %s71_s1, 32 }
   0xc   :  { %p33_p5 = scmp.ne.s32.totalorder %s71_s1, %s32_s12  ;;  %p36_p6 = scmp.lt.u32.totalorder %s32_s12, %s71_s1 }
   0xe   :  { %p38_p7 = pnand %p36_p6, %p33_p5 }
  0x10   :  { %41 = shalt.err (!%p38_p7)
}
  0x11   :  { %16 = dma.vmem_to_hbm [thread:$0]  %s14_s8, 32, %s71_s1, [#allocation1]  }
  0x12   :  { %42 = dma.done.wait [#allocation1], 32  }
  0x13   :  { %43 = vsyncadd [#allocation1], 4294967264 }
  0x14   :  { %18 = vsyncpa [#allocation1], 1 }

</bundles_post_ra>
